<compile_context>
chip_gen: v6e
topology: v6e:2x2x1
jax: 0.10.0
libtpu: 0.0.40
codegen_flags: <defaults>
</compile_context>

<pallas_src>
import functools

import jax
import jax.numpy as jnp
from jax import lax
from jax.experimental import pallas as pl
from jax.experimental.pallas import tpu as pltpu

LANE = 128   # lane width; channels are padded to a multiple of this
LP = 8       # left pad (in W) of the halo scratch -> sublane-aligned interior


def _basic_block_kernel(x_ref, w1_ref, w2_ref, s1_ref, b1_ref, s2_ref, b2_ref,
                        o_ref, pad_ref, col_ref, *, H, W, C):
    """One batch image per grid step.

    x_ref  : (1, H, W, C)  bf16   unpadded NHWC input block (C lane-padded)
    w*_ref : (9*C, C)      bf16   im2col-flattened 3x3 weights (tap-major)
    s*/b*  : (1, C)        f32    folded eval-mode batchnorm scale / shift
    o_ref  : (1, H, W, C)  f32
    pad_ref: (H+2, W+2*LP, C) bf16  halo scratch shared by conv1 and conv2
    col_ref: (H*W, 9*C)    bf16   im2col patch matrix
    """
    Wp = W + 2 * LP

    # Re-zero only the thin halo border the taps read (the interior is fully
    # overwritten before every use).  Done every step so correctness does not
    # depend on which TensorCore ran step 0 when the batch axis is split.
    zrow = jnp.zeros((1, Wp, C), pad_ref.dtype)
    pad_ref[0:1, :, :] = zrow
    pad_ref[H + 1:H + 2, :, :] = zrow
    zcol = jnp.zeros((H + 2, 1, C), pad_ref.dtype)
    pad_ref[:, LP - 1:LP, :] = zcol
    pad_ref[:, LP + W:LP + W + 1, :] = zcol

    def conv3x3(w_ref):
        # pad_ref interior [1:H+1, LP:LP+W, :] holds the conv input, halo is 0.
        # Build the (H*W, 9*C) im2col matrix once, then a single MXU matmul.
        for dh in range(3):
            for dw in range(3):
                t = dh * 3 + dw
                c0 = LP - 1 + dw
                patch = pad_ref[dh:dh + H, c0:c0 + W, :].reshape(H * W, C)
                col_ref[:, t * C:(t + 1) * C] = patch
        return jnp.dot(col_ref[...], w_ref[...],
                       preferred_element_type=jnp.float32)          # (H*W, C) f32

    # ---- conv1 + bn1 + relu1 ----
    pad_ref[1:H + 1, LP:LP + W, :] = x_ref[0]          # aligned interior write
    y1 = jnp.maximum(conv3x3(w1_ref) * s1_ref[...] + b1_ref[...], 0.0)

    # ---- conv2 + bn2 ----
    pad_ref[1:H + 1, LP:LP + W, :] = y1.reshape(H, W, C).astype(pad_ref.dtype)
    y2 = conv3x3(w2_ref) * s2_ref[...] + b2_ref[...]

    # ---- residual add + relu2 ----
    res = x_ref[0].astype(jnp.float32).reshape(H * W, C)
    o_ref[...] = jnp.maximum(res + y2, 0.0).reshape(1, H, W, C)


def basic_block(x_nchw, w1_hwio, w2_hwio, bn1, bn2, eps=1e-5):
    """x_nchw: (N, C, H, W) f32. Weights HWIO (3,3,C,C). bn* = (gamma, beta, mean, var)."""
    N, C, H, W = x_nchw.shape
    assert w1_hwio.shape == (3, 3, C, C) and w2_hwio.shape == (3, 3, C, C)
    Cp = ((C + LANE - 1) // LANE) * LANE                      # lane-dense channels

    # layout glue: NCHW -> NHWC, lane-pad channels, bf16 activations
    x = jnp.transpose(x_nchw, (0, 2, 3, 1))
    x = jnp.pad(x, ((0, 0), (0, 0), (0, 0), (0, Cp - C))).astype(jnp.bfloat16)

    def prep_w(w):
        w = jnp.pad(w, ((0, 0), (0, 0), (0, Cp - C), (0, Cp - C)))
        return w.reshape(9 * Cp, Cp).astype(jnp.bfloat16)     # (kh,kw,cin)-major

    def fold(bn):
        gamma, beta, mean, var = (a.astype(jnp.float32) for a in bn)
        s = gamma / jnp.sqrt(var + eps)
        b = beta - mean * s
        return (jnp.pad(s, (0, Cp - C)).reshape(1, Cp),
                jnp.pad(b, (0, Cp - C)).reshape(1, Cp))        # padded ch -> 0

    w1f, w2f = prep_w(w1_hwio), prep_w(w2_hwio)
    s1, b1 = fold(bn1)
    s2, b2 = fold(bn2)

    kernel = functools.partial(_basic_block_kernel, H=H, W=W, C=Cp)
    out = pl.pallas_call(
        kernel,
        out_shape=jax.ShapeDtypeStruct((N, H, W, Cp), jnp.float32),
        grid_spec=pltpu.PrefetchScalarGridSpec(
            num_scalar_prefetch=0,
            grid=(N,),
            in_specs=[
                pl.BlockSpec((1, H, W, Cp), lambda n: (n, 0, 0, 0)),   # x
                pl.BlockSpec((9 * Cp, Cp), lambda n: (0, 0)),          # w1 (flat)
                pl.BlockSpec((9 * Cp, Cp), lambda n: (0, 0)),          # w2 (flat)
                pl.BlockSpec((1, Cp), lambda n: (0, 0)),               # bn1 scale
                pl.BlockSpec((1, Cp), lambda n: (0, 0)),               # bn1 shift
                pl.BlockSpec((1, Cp), lambda n: (0, 0)),               # bn2 scale
                pl.BlockSpec((1, Cp), lambda n: (0, 0)),               # bn2 shift
            ],
            out_specs=pl.BlockSpec((1, H, W, Cp), lambda n: (n, 0, 0, 0)),
            scratch_shapes=[
                pltpu.VMEM((H + 2, W + 2 * LP, Cp), jnp.bfloat16),     # halo buf
                pltpu.VMEM((H * W, 9 * Cp), jnp.bfloat16),             # im2col
            ],
        ),
        compiler_params=pltpu.CompilerParams(
            dimension_semantics=("parallel",)),
    )(x, w1f, w2f, s1, b1, s2, b2)

    out = out[..., :C]                                     # drop channel padding
    return jnp.transpose(out, (0, 3, 1, 2))                # back to NCHW


# ---------------- pure-JAX reference (for correctness check) ----------------
def _ref_conv(x_nchw, w_hwio):
    return lax.conv_general_dilated(
        x_nchw, w_hwio, window_strides=(1, 1), padding=((1, 1), (1, 1)),
        dimension_numbers=("NCHW", "HWIO", "NCHW"))


def _ref_bn(x_nchw, bn, eps=1e-5):
    gamma, beta, mean, var = bn
    s = gamma / jnp.sqrt(var + eps)
    return x_nchw * s[None, :, None, None] + (beta - mean * s)[None, :, None, None]


def _reference(x, w1, w2, bn1, bn2):
    # Matches the kernel's quantization points: bf16 conv inputs/weights with
    # f32 accumulation; bn / relu / residual in f32.
    q = lambda a: a.astype(jnp.bfloat16).astype(jnp.float32)
    xq = q(x)
    y = jnp.maximum(_ref_bn(_ref_conv(xq, q(w1)), bn1), 0.0)
    y = _ref_bn(_ref_conv(q(y), q(w2)), bn2)
    return jnp.maximum(xq + y, 0.0)


if __name__ == "__main__":
    N, C, H, W = 2, 8, 16, 16                  # in_type == out_type, stride=1
    key = jax.random.PRNGKey(0)
    kx, kw1, kw2, kg1, kb1, km1, kv1, kg2, kb2, km2, kv2 = jax.random.split(key, 11)

    x = jax.random.normal(kx, (N, C, H, W), jnp.float32)
    w1 = jax.random.normal(kw1, (3, 3, C, C), jnp.float32) * 0.1
    w2 = jax.random.normal(kw2, (3, 3, C, C), jnp.float32) * 0.1

    bn1 = (jax.random.uniform(kg1, (C,), jnp.float32, 0.5, 1.5),
           jax.random.normal(kb1, (C,), jnp.float32) * 0.1,
           jax.random.normal(km1, (C,), jnp.float32) * 0.1,
           jax.random.uniform(kv1, (C,), jnp.float32, 0.5, 1.5))
    bn2 = (jax.random.uniform(kg2, (C,), jnp.float32, 0.5, 1.5),
           jax.random.normal(kb2, (C,), jnp.float32) * 0.1,
           jax.random.normal(km2, (C,), jnp.float32) * 0.1,
           jax.random.uniform(kv2, (C,), jnp.float32, 0.5, 1.5))

    out = jax.block_until_ready(basic_block(x, w1, w2, bn1, bn2))
    ref = _reference(x, w1, w2, bn1, bn2)

    assert out.shape == (N, C, H, W)
    max_err = float(jnp.max(jnp.abs(out - ref)))
    assert jnp.allclose(out, ref, atol=2e-3, rtol=2e-3), \
        f"mismatch vs JAX reference (max abs err {max_err})"

    print("KERNEL_OK")
</pallas_src>

<mosaic_0001>
module attributes {stable_mosaic.version = 11 : i64} {
  func.func @_basic_block_kernel(%arg0: i32, %arg1: memref<1x16x16x128xbf16, #tpu.memory_space<vmem>>, %arg2: memref<1152x128xbf16, #tpu.memory_space<vmem>>, %arg3: memref<1152x128xbf16, #tpu.memory_space<vmem>>, %arg4: memref<1x128xf32, #tpu.memory_space<vmem>>, %arg5: memref<1x128xf32, #tpu.memory_space<vmem>>, %arg6: memref<1x128xf32, #tpu.memory_space<vmem>>, %arg7: memref<1x128xf32, #tpu.memory_space<vmem>>, %arg8: memref<1x16x16x128xf32, #tpu.memory_space<vmem>>, %arg9: memref<18x32x128xbf16, #tpu.memory_space<vmem>>, %arg10: memref<256x1152xbf16, #tpu.memory_space<vmem>>) attributes {dimension_semantics = [#tpu.dimension_semantics<parallel>], iteration_bounds = array<i64: 2>, scalar_prefetch = 0 : i64, scratch_operands = 2 : i64, tpu.core_type = #tpu.core_type<tc>, window_params = [{transform_indices = @transform_0, window_bounds = array<i64: 1, 16, 16, 128>}, {pipeline_mode = #tpu.pipeline_mode<synchronous>, transform_indices = @transform_1, window_bounds = array<i64: 1152, 128>}, {pipeline_mode = #tpu.pipeline_mode<synchronous>, transform_indices = @transform_2, window_bounds = array<i64: 1152, 128>}, {pipeline_mode = #tpu.pipeline_mode<synchronous>, transform_indices = @transform_3, window_bounds = array<i64: 1, 128>}, {pipeline_mode = #tpu.pipeline_mode<synchronous>, transform_indices = @transform_4, window_bounds = array<i64: 1, 128>}, {pipeline_mode = #tpu.pipeline_mode<synchronous>, transform_indices = @transform_5, window_bounds = array<i64: 1, 128>}, {pipeline_mode = #tpu.pipeline_mode<synchronous>, transform_indices = @transform_6, window_bounds = array<i64: 1, 128>}, {transform_indices = @transform_7, window_bounds = array<i64: 1, 16, 16, 128>}]} {
    %cst = arith.constant 0.000000e+00 : bf16
    %0 = vector.broadcast %cst : bf16 to vector<1x32x128xbf16>
    %c0 = arith.constant 0 : index
    %c0_0 = arith.constant 0 : index
    %c0_1 = arith.constant 0 : index
    %1 = vector.load %arg9[%c0, %c0_0, %c0_1] : memref<18x32x128xbf16, #tpu.memory_space<vmem>>, vector<1x32x128xbf16>
    tpu.vector_store %arg9[%c0, %c0_0, %c0_1], %0 {strides = array<i32>} : memref<18x32x128xbf16, #tpu.memory_space<vmem>>, vector<1x32x128xbf16>,
    %c17 = arith.constant 17 : index
    %c0_2 = arith.constant 0 : index
    %c0_3 = arith.constant 0 : index
    %2 = vector.load %arg9[%c17, %c0_2, %c0_3] : memref<18x32x128xbf16, #tpu.memory_space<vmem>>, vector<1x32x128xbf16>
    tpu.vector_store %arg9[%c17, %c0_2, %c0_3], %0 {strides = array<i32>} : memref<18x32x128xbf16, #tpu.memory_space<vmem>>, vector<1x32x128xbf16>,
    %cst_4 = arith.constant 0.000000e+00 : bf16
    %3 = vector.broadcast %cst_4 : bf16 to vector<18x1x128xbf16>
    %c0_5 = arith.constant 0 : index
    %c7 = arith.constant 7 : index
    %c0_6 = arith.constant 0 : index
    %4 = vector.load %arg9[%c0_5, %c7, %c0_6] : memref<18x32x128xbf16, #tpu.memory_space<vmem>>, vector<18x1x128xbf16>
    tpu.vector_store %arg9[%c0_5, %c7, %c0_6], %3 {strides = array<i32>} : memref<18x32x128xbf16, #tpu.memory_space<vmem>>, vector<18x1x128xbf16>,
    %c0_7 = arith.constant 0 : index
    %c24 = arith.constant 24 : index
    %c0_8 = arith.constant 0 : index
    %5 = vector.load %arg9[%c0_7, %c24, %c0_8] : memref<18x32x128xbf16, #tpu.memory_space<vmem>>, vector<18x1x128xbf16>
    tpu.vector_store %arg9[%c0_7, %c24, %c0_8], %3 {strides = array<i32>} : memref<18x32x128xbf16, #tpu.memory_space<vmem>>, vector<18x1x128xbf16>,
    %c0_9 = arith.constant 0 : index
    %c0_10 = arith.constant 0 : index
    %c0_11 = arith.constant 0 : index
    %c0_12 = arith.constant 0 : index
    %6 = vector.load %arg1[%c0_9, %c0_10, %c0_11, %c0_12] : memref<1x16x16x128xbf16, #tpu.memory_space<vmem>>, vector<1x16x16x128xbf16>
    %7 = vector.shape_cast %6 : vector<1x16x16x128xbf16> to vector<16x16x128xbf16>
    %c1 = arith.constant 1 : index
    %c8 = arith.constant 8 : index
    %c0_13 = arith.constant 0 : index
    %8 = vector.load %arg9[%c1, %c8, %c0_13] : memref<18x32x128xbf16, #tpu.memory_space<vmem>>, vector<16x16x128xbf16>
    tpu.vector_store %arg9[%c1, %c8, %c0_13], %7 {strides = array<i32>} : memref<18x32x128xbf16, #tpu.memory_space<vmem>>, vector<16x16x128xbf16>,
    %c0_14 = arith.constant 0 : index
    %c7_15 = arith.constant 7 : index
    %c0_16 = arith.constant 0 : index
    %9 = vector.load %arg9[%c0_14, %c7_15, %c0_16] : memref<18x32x128xbf16, #tpu.memory_space<vmem>>, vector<16x16x128xbf16>
    %10 = vector.shape_cast %9 : vector<16x16x128xbf16> to vector<256x128xbf16>
    %c0_17 = arith.constant 0 : index
    %c0_18 = arith.constant 0 : index
    %11 = vector.load %arg10[%c0_17, %c0_18] : memref<256x1152xbf16, #tpu.memory_space<vmem>>, vector<256x128xbf16>
    tpu.vector_store %arg10[%c0_17, %c0_18], %10 {strides = array<i32>} : memref<256x1152xbf16, #tpu.memory_space<vmem>>, vector<256x128xbf16>,
    %c0_19 = arith.constant 0 : index
    %c8_20 = arith.constant 8 : index
    %c0_21 = arith.constant 0 : index
    %12 = vector.load %arg9[%c0_19, %c8_20, %c0_21] : memref<18x32x128xbf16, #tpu.memory_space<vmem>>, vector<16x16x128xbf16>
    %13 = vector.shape_cast %12 : vector<16x16x128xbf16> to vector<256x128xbf16>
    %c0_22 = arith.constant 0 : index
    %c128 = arith.constant 128 : index
    %14 = vector.load %arg10[%c0_22, %c128] : memref<256x1152xbf16, #tpu.memory_space<vmem>>, vector<256x128xbf16>
    tpu.vector_store %arg10[%c0_22, %c128], %13 {strides = array<i32>} : memref<256x1152xbf16, #tpu.memory_space<vmem>>, vector<256x128xbf16>,
    %c0_23 = arith.constant 0 : index
    %c9 = arith.constant 9 : index
    %c0_24 = arith.constant 0 : index
    %15 = vector.load %arg9[%c0_23, %c9, %c0_24] : memref<18x32x128xbf16, #tpu.memory_space<vmem>>, vector<16x16x128xbf16>
    %16 = vector.shape_cast %15 : vector<16x16x128xbf16> to vector<256x128xbf16>
    %c0_25 = arith.constant 0 : index
    %c256 = arith.constant 256 : index
    %17 = vector.load %arg10[%c0_25, %c256] : memref<256x1152xbf16, #tpu.memory_space<vmem>>, vector<256x128xbf16>
    tpu.vector_store %arg10[%c0_25, %c256], %16 {strides = array<i32>} : memref<256x1152xbf16, #tpu.memory_space<vmem>>, vector<256x128xbf16>,
    %c1_26 = arith.constant 1 : index
    %c7_27 = arith.constant 7 : index
    %c0_28 = arith.constant 0 : index
    %18 = vector.load %arg9[%c1_26, %c7_27, %c0_28] : memref<18x32x128xbf16, #tpu.memory_space<vmem>>, vector<16x16x128xbf16>
    %19 = vector.shape_cast %18 : vector<16x16x128xbf16> to vector<256x128xbf16>
    %c0_29 = arith.constant 0 : index
    %c384 = arith.constant 384 : index
    %20 = vector.load %arg10[%c0_29, %c384] : memref<256x1152xbf16, #tpu.memory_space<vmem>>, vector<256x128xbf16>
    tpu.vector_store %arg10[%c0_29, %c384], %19 {strides = array<i32>} : memref<256x1152xbf16, #tpu.memory_space<vmem>>, vector<256x128xbf16>,
    %c1_30 = arith.constant 1 : index
    %c8_31 = arith.constant 8 : index
    %c0_32 = arith.constant 0 : index
    %21 = vector.load %arg9[%c1_30, %c8_31, %c0_32] : memref<18x32x128xbf16, #tpu.memory_space<vmem>>, vector<16x16x128xbf16>
    %22 = vector.shape_cast %21 : vector<16x16x128xbf16> to vector<256x128xbf16>
    %c0_33 = arith.constant 0 : index
    %c512 = arith.constant 512 : index
    %23 = vector.load %arg10[%c0_33, %c512] : memref<256x1152xbf16, #tpu.memory_space<vmem>>, vector<256x128xbf16>
    tpu.vector_store %arg10[%c0_33, %c512], %22 {strides = array<i32>} : memref<256x1152xbf16, #tpu.memory_space<vmem>>, vector<256x128xbf16>,
    %c1_34 = arith.constant 1 : index
    %c9_35 = arith.constant 9 : index
    %c0_36 = arith.constant 0 : index
    %24 = vector.load %arg9[%c1_34, %c9_35, %c0_36] : memref<18x32x128xbf16, #tpu.memory_space<vmem>>, vector<16x16x128xbf16>
    %25 = vector.shape_cast %24 : vector<16x16x128xbf16> to vector<256x128xbf16>
    %c0_37 = arith.constant 0 : index
    %c640 = arith.constant 640 : index
    %26 = vector.load %arg10[%c0_37, %c640] : memref<256x1152xbf16, #tpu.memory_space<vmem>>, vector<256x128xbf16>
    tpu.vector_store %arg10[%c0_37, %c640], %25 {strides = array<i32>} : memref<256x1152xbf16, #tpu.memory_space<vmem>>, vector<256x128xbf16>,
    %c2 = arith.constant 2 : index
    %c7_38 = arith.constant 7 : index
    %c0_39 = arith.constant 0 : index
    %27 = vector.load %arg9[%c2, %c7_38, %c0_39] : memref<18x32x128xbf16, #tpu.memory_space<vmem>>, vector<16x16x128xbf16>
    %28 = vector.shape_cast %27 : vector<16x16x128xbf16> to vector<256x128xbf16>
    %c0_40 = arith.constant 0 : index
    %c768 = arith.constant 768 : index
    %29 = vector.load %arg10[%c0_40, %c768] : memref<256x1152xbf16, #tpu.memory_space<vmem>>, vector<256x128xbf16>
    tpu.vector_store %arg10[%c0_40, %c768], %28 {strides = array<i32>} : memref<256x1152xbf16, #tpu.memory_space<vmem>>, vector<256x128xbf16>,
    %c2_41 = arith.constant 2 : index
    %c8_42 = arith.constant 8 : index
    %c0_43 = arith.constant 0 : index
    %30 = vector.load %arg9[%c2_41, %c8_42, %c0_43] : memref<18x32x128xbf16, #tpu.memory_space<vmem>>, vector<16x16x128xbf16>
    %31 = vector.shape_cast %30 : vector<16x16x128xbf16> to vector<256x128xbf16>
    %c0_44 = arith.constant 0 : index
    %c896 = arith.constant 896 : index
    %32 = vector.load %arg10[%c0_44, %c896] : memref<256x1152xbf16, #tpu.memory_space<vmem>>, vector<256x128xbf16>
    tpu.vector_store %arg10[%c0_44, %c896], %31 {strides = array<i32>} : memref<256x1152xbf16, #tpu.memory_space<vmem>>, vector<256x128xbf16>,
    %c2_45 = arith.constant 2 : index
    %c9_46 = arith.constant 9 : index
    %c0_47 = arith.constant 0 : index
    %33 = vector.load %arg9[%c2_45, %c9_46, %c0_47] : memref<18x32x128xbf16, #tpu.memory_space<vmem>>, vector<16x16x128xbf16>
    %34 = vector.shape_cast %33 : vector<16x16x128xbf16> to vector<256x128xbf16>
    %c0_48 = arith.constant 0 : index
    %c1024 = arith.constant 1024 : index
    %35 = vector.load %arg10[%c0_48, %c1024] : memref<256x1152xbf16, #tpu.memory_space<vmem>>, vector<256x128xbf16>
    tpu.vector_store %arg10[%c0_48, %c1024], %34 {strides = array<i32>} : memref<256x1152xbf16, #tpu.memory_space<vmem>>, vector<256x128xbf16>,
    %c0_49 = arith.constant 0 : index
    %c0_50 = arith.constant 0 : index
    %36 = vector.load %arg10[%c0_49, %c0_50] : memref<256x1152xbf16, #tpu.memory_space<vmem>>, vector<256x1152xbf16>
    %c0_51 = arith.constant 0 : index
    %c0_52 = arith.constant 0 : index
    %37 = vector.load %arg2[%c0_51, %c0_52] : memref<1152x128xbf16, #tpu.memory_space<vmem>>, vector<1152x128xbf16>
    %cst_53 = arith.constant dense<0.000000e+00> : vector<256x128xf32>
    %38 = tpu.matmul %36, %37, %cst_53 {dimension_numbers = #tpu.dot_dimension_numbers<[1], [0], [0], [1], [0, 0, 1, 1], [], []>} : vector<256x1152xbf16>, vector<1152x128xbf16>, vector<256x128xf32> -> vector<256x128xf32>
    %c0_54 = arith.constant 0 : index
    %c0_55 = arith.constant 0 : index
    %39 = vector.load %arg4[%c0_54, %c0_55] : memref<1x128xf32, #tpu.memory_space<vmem>>, vector<1x128xf32>
    %40 = vector.broadcast %39 : vector<1x128xf32> to vector<256x128xf32>
    %41 = arith.mulf %38, %40 : vector<256x128xf32>
    %c0_56 = arith.constant 0 : index
    %c0_57 = arith.constant 0 : index
    %42 = vector.load %arg5[%c0_56, %c0_57] : memref<1x128xf32, #tpu.memory_space<vmem>>, vector<1x128xf32>
    %43 = vector.broadcast %42 : vector<1x128xf32> to vector<256x128xf32>
    %44 = arith.addf %41, %43 : vector<256x128xf32>
    %cst_58 = arith.constant 0.000000e+00 : f32
    %45 = vector.broadcast %cst_58 : f32 to vector<256x128xf32>
    %46 = arith.maximumf %44, %45 : vector<256x128xf32>
    %47 = vector.shape_cast %46 : vector<256x128xf32> to vector<16x16x128xf32>
    %48 = arith.truncf %47 : vector<16x16x128xf32> to vector<16x16x128xbf16>
    %c1_59 = arith.constant 1 : index
    %c8_60 = arith.constant 8 : index
    %c0_61 = arith.constant 0 : index
    %49 = vector.load %arg9[%c1_59, %c8_60, %c0_61] : memref<18x32x128xbf16, #tpu.memory_space<vmem>>, vector<16x16x128xbf16>
    tpu.vector_store %arg9[%c1_59, %c8_60, %c0_61], %48 {strides = array<i32>} : memref<18x32x128xbf16, #tpu.memory_space<vmem>>, vector<16x16x128xbf16>,
    %c0_62 = arith.constant 0 : index
    %c7_63 = arith.constant 7 : index
    %c0_64 = arith.constant 0 : index
    %50 = vector.load %arg9[%c0_62, %c7_63, %c0_64] : memref<18x32x128xbf16, #tpu.memory_space<vmem>>, vector<16x16x128xbf16>
    %51 = vector.shape_cast %50 : vector<16x16x128xbf16> to vector<256x128xbf16>
    %c0_65 = arith.constant 0 : index
    %c0_66 = arith.constant 0 : index
    %52 = vector.load %arg10[%c0_65, %c0_66] : memref<256x1152xbf16, #tpu.memory_space<vmem>>, vector<256x128xbf16>
    tpu.vector_store %arg10[%c0_65, %c0_66], %51 {strides = array<i32>} : memref<256x1152xbf16, #tpu.memory_space<vmem>>, vector<256x128xbf16>,
    %c0_67 = arith.constant 0 : index
    %c8_68 = arith.constant 8 : index
    %c0_69 = arith.constant 0 : index
    %53 = vector.load %arg9[%c0_67, %c8_68, %c0_69] : memref<18x32x128xbf16, #tpu.memory_space<vmem>>, vector<16x16x128xbf16>
    %54 = vector.shape_cast %53 : vector<16x16x128xbf16> to vector<256x128xbf16>
    %c0_70 = arith.constant 0 : index
    %c128_71 = arith.constant 128 : index
    %55 = vector.load %arg10[%c0_70, %c128_71] : memref<256x1152xbf16, #tpu.memory_space<vmem>>, vector<256x128xbf16>
    tpu.vector_store %arg10[%c0_70, %c128_71], %54 {strides = array<i32>} : memref<256x1152xbf16, #tpu.memory_space<vmem>>, vector<256x128xbf16>,
    %c0_72 = arith.constant 0 : index
    %c9_73 = arith.constant 9 : index
    %c0_74 = arith.constant 0 : index
    %56 = vector.load %arg9[%c0_72, %c9_73, %c0_74] : memref<18x32x128xbf16, #tpu.memory_space<vmem>>, vector<16x16x128xbf16>
    %57 = vector.shape_cast %56 : vector<16x16x128xbf16> to vector<256x128xbf16>
    %c0_75 = arith.constant 0 : index
    %c256_76 = arith.constant 256 : index
    %58 = vector.load %arg10[%c0_75, %c256_76] : memref<256x1152xbf16, #tpu.memory_space<vmem>>, vector<256x128xbf16>
    tpu.vector_store %arg10[%c0_75, %c256_76], %57 {strides = array<i32>} : memref<256x1152xbf16, #tpu.memory_space<vmem>>, vector<256x128xbf16>,
    %c1_77 = arith.constant 1 : index
    %c7_78 = arith.constant 7 : index
    %c0_79 = arith.constant 0 : index
    %59 = vector.load %arg9[%c1_77, %c7_78, %c0_79] : memref<18x32x128xbf16, #tpu.memory_space<vmem>>, vector<16x16x128xbf16>
    %60 = vector.shape_cast %59 : vector<16x16x128xbf16> to vector<256x128xbf16>
    %c0_80 = arith.constant 0 : index
    %c384_81 = arith.constant 384 : index
    %61 = vector.load %arg10[%c0_80, %c384_81] : memref<256x1152xbf16, #tpu.memory_space<vmem>>, vector<256x128xbf16>
    tpu.vector_store %arg10[%c0_80, %c384_81], %60 {strides = array<i32>} : memref<256x1152xbf16, #tpu.memory_space<vmem>>, vector<256x128xbf16>,
    %c1_82 = arith.constant 1 : index
    %c8_83 = arith.constant 8 : index
    %c0_84 = arith.constant 0 : index
    %62 = vector.load %arg9[%c1_82, %c8_83, %c0_84] : memref<18x32x128xbf16, #tpu.memory_space<vmem>>, vector<16x16x128xbf16>
    %63 = vector.shape_cast %62 : vector<16x16x128xbf16> to vector<256x128xbf16>
    %c0_85 = arith.constant 0 : index
    %c512_86 = arith.constant 512 : index
    %64 = vector.load %arg10[%c0_85, %c512_86] : memref<256x1152xbf16, #tpu.memory_space<vmem>>, vector<256x128xbf16>
    tpu.vector_store %arg10[%c0_85, %c512_86], %63 {strides = array<i32>} : memref<256x1152xbf16, #tpu.memory_space<vmem>>, vector<256x128xbf16>,
    %c1_87 = arith.constant 1 : index
    %c9_88 = arith.constant 9 : index
    %c0_89 = arith.constant 0 : index
    %65 = vector.load %arg9[%c1_87, %c9_88, %c0_89] : memref<18x32x128xbf16, #tpu.memory_space<vmem>>, vector<16x16x128xbf16>
    %66 = vector.shape_cast %65 : vector<16x16x128xbf16> to vector<256x128xbf16>
    %c0_90 = arith.constant 0 : index
    %c640_91 = arith.constant 640 : index
    %67 = vector.load %arg10[%c0_90, %c640_91] : memref<256x1152xbf16, #tpu.memory_space<vmem>>, vector<256x128xbf16>
    tpu.vector_store %arg10[%c0_90, %c640_91], %66 {strides = array<i32>} : memref<256x1152xbf16, #tpu.memory_space<vmem>>, vector<256x128xbf16>,
    %c2_92 = arith.constant 2 : index
    %c7_93 = arith.constant 7 : index
    %c0_94 = arith.constant 0 : index
    %68 = vector.load %arg9[%c2_92, %c7_93, %c0_94] : memref<18x32x128xbf16, #tpu.memory_space<vmem>>, vector<16x16x128xbf16>
    %69 = vector.shape_cast %68 : vector<16x16x128xbf16> to vector<256x128xbf16>
    %c0_95 = arith.constant 0 : index
    %c768_96 = arith.constant 768 : index
    %70 = vector.load %arg10[%c0_95, %c768_96] : memref<256x1152xbf16, #tpu.memory_space<vmem>>, vector<256x128xbf16>
    tpu.vector_store %arg10[%c0_95, %c768_96], %69 {strides = array<i32>} : memref<256x1152xbf16, #tpu.memory_space<vmem>>, vector<256x128xbf16>,
    %c2_97 = arith.constant 2 : index
    %c8_98 = arith.constant 8 : index
    %c0_99 = arith.constant 0 : index
    %71 = vector.load %arg9[%c2_97, %c8_98, %c0_99] : memref<18x32x128xbf16, #tpu.memory_space<vmem>>, vector<16x16x128xbf16>
    %72 = vector.shape_cast %71 : vector<16x16x128xbf16> to vector<256x128xbf16>
    %c0_100 = arith.constant 0 : index
    %c896_101 = arith.constant 896 : index
    %73 = vector.load %arg10[%c0_100, %c896_101] : memref<256x1152xbf16, #tpu.memory_space<vmem>>, vector<256x128xbf16>
    tpu.vector_store %arg10[%c0_100, %c896_101], %72 {strides = array<i32>} : memref<256x1152xbf16, #tpu.memory_space<vmem>>, vector<256x128xbf16>,
    %c2_102 = arith.constant 2 : index
    %c9_103 = arith.constant 9 : index
    %c0_104 = arith.constant 0 : index
    %74 = vector.load %arg9[%c2_102, %c9_103, %c0_104] : memref<18x32x128xbf16, #tpu.memory_space<vmem>>, vector<16x16x128xbf16>
    %75 = vector.shape_cast %74 : vector<16x16x128xbf16> to vector<256x128xbf16>
    %c0_105 = arith.constant 0 : index
    %c1024_106 = arith.constant 1024 : index
    %76 = vector.load %arg10[%c0_105, %c1024_106] : memref<256x1152xbf16, #tpu.memory_space<vmem>>, vector<256x128xbf16>
    tpu.vector_store %arg10[%c0_105, %c1024_106], %75 {strides = array<i32>} : memref<256x1152xbf16, #tpu.memory_space<vmem>>, vector<256x128xbf16>,
    %c0_107 = arith.constant 0 : index
    %c0_108 = arith.constant 0 : index
    %77 = vector.load %arg10[%c0_107, %c0_108] : memref<256x1152xbf16, #tpu.memory_space<vmem>>, vector<256x1152xbf16>
    %c0_109 = arith.constant 0 : index
    %c0_110 = arith.constant 0 : index
    %78 = vector.load %arg3[%c0_109, %c0_110] : memref<1152x128xbf16, #tpu.memory_space<vmem>>, vector<1152x128xbf16>
    %cst_111 = arith.constant dense<0.000000e+00> : vector<256x128xf32>
    %79 = tpu.matmul %77, %78, %cst_111 {dimension_numbers = #tpu.dot_dimension_numbers<[1], [0], [0], [1], [0, 0, 1, 1], [], []>} : vector<256x1152xbf16>, vector<1152x128xbf16>, vector<256x128xf32> -> vector<256x128xf32>
    %c0_112 = arith.constant 0 : index
    %c0_113 = arith.constant 0 : index
    %80 = vector.load %arg6[%c0_112, %c0_113] : memref<1x128xf32, #tpu.memory_space<vmem>>, vector<1x128xf32>
    %81 = vector.broadcast %80 : vector<1x128xf32> to vector<256x128xf32>
    %82 = arith.mulf %79, %81 : vector<256x128xf32>
    %c0_114 = arith.constant 0 : index
    %c0_115 = arith.constant 0 : index
    %83 = vector.load %arg7[%c0_114, %c0_115] : memref<1x128xf32, #tpu.memory_space<vmem>>, vector<1x128xf32>
    %84 = vector.broadcast %83 : vector<1x128xf32> to vector<256x128xf32>
    %85 = arith.addf %82, %84 : vector<256x128xf32>
    %c0_116 = arith.constant 0 : index
    %c0_117 = arith.constant 0 : index
    %c0_118 = arith.constant 0 : index
    %c0_119 = arith.constant 0 : index
    %86 = vector.load %arg1[%c0_116, %c0_117, %c0_118, %c0_119] : memref<1x16x16x128xbf16, #tpu.memory_space<vmem>>, vector<1x16x16x128xbf16>
    %87 = vector.shape_cast %86 : vector<1x16x16x128xbf16> to vector<16x16x128xbf16>
    %88 = arith.extf %87 : vector<16x16x128xbf16> to vector<16x16x128xf32>
    %89 = vector.shape_cast %88 : vector<16x16x128xf32> to vector<256x128xf32>
    %90 = arith.addf %89, %85 : vector<256x128xf32>
    %cst_120 = arith.constant 0.000000e+00 : f32
    %91 = vector.broadcast %cst_120 : f32 to vector<256x128xf32>
    %92 = arith.maximumf %90, %91 : vector<256x128xf32>
    %93 = vector.shape_cast %92 : vector<256x128xf32> to vector<1x16x16x128xf32>
    %c0_121 = arith.constant 0 : index
    %c0_122 = arith.constant 0 : index
    %c0_123 = arith.constant 0 : index
    %c0_124 = arith.constant 0 : index
    %94 = vector.load %arg8[%c0_121, %c0_122, %c0_123, %c0_124] : memref<1x16x16x128xf32, #tpu.memory_space<vmem>>, vector<1x16x16x128xf32>
    tpu.vector_store %arg8[%c0_121, %c0_122, %c0_123, %c0_124], %93 {strides = array<i32>} : memref<1x16x16x128xf32, #tpu.memory_space<vmem>>, vector<1x16x16x128xf32>,
    return
  }
  func.func @transform_0(%arg0: i32) -> (i32, i32, i32, i32) {
    %c0_i32 = arith.constant 0 : i32
    %c0_i32_0 = arith.constant 0 : i32
    %c0_i32_1 = arith.constant 0 : i32
    %c0_i32_2 = arith.constant 0 : i32
    return %arg0, %c0_i32, %c0_i32_0, %c0_i32_1 : i32, i32, i32, i32
  }
  func.func @transform_1(%arg0: i32) -> (i32, i32) {
    %c0_i32 = arith.constant 0 : i32
    %c0_i32_0 = arith.constant 0 : i32
    %c0_i32_1 = arith.constant 0 : i32
    return %c0_i32, %c0_i32_0 : i32, i32
  }
  func.func @transform_2(%arg0: i32) -> (i32, i32) {
    %c0_i32 = arith.constant 0 : i32
    %c0_i32_0 = arith.constant 0 : i32
    %c0_i32_1 = arith.constant 0 : i32
    return %c0_i32, %c0_i32_0 : i32, i32
  }
  func.func @transform_3(%arg0: i32) -> (i32, i32) {
    %c0_i32 = arith.constant 0 : i32
    %c0_i32_0 = arith.constant 0 : i32
    %c0_i32_1 = arith.constant 0 : i32
    return %c0_i32, %c0_i32_0 : i32, i32
  }
  func.func @transform_4(%arg0: i32) -> (i32, i32) {
    %c0_i32 = arith.constant 0 : i32
    %c0_i32_0 = arith.constant 0 : i32
    %c0_i32_1 = arith.constant 0 : i32
    return %c0_i32, %c0_i32_0 : i32, i32
  }
  func.func @transform_5(%arg0: i32) -> (i32, i32) {
    %c0_i32 = arith.constant 0 : i32
    %c0_i32_0 = arith.constant 0 : i32
    %c0_i32_1 = arith.constant 0 : i32
    return %c0_i32, %c0_i32_0 : i32, i32
  }
  func.func @transform_6(%arg0: i32) -> (i32, i32) {
    %c0_i32 = arith.constant 0 : i32
    %c0_i32_0 = arith.constant 0 : i32
    %c0_i32_1 = arith.constant 0 : i32
    return %c0_i32, %c0_i32_0 : i32, i32
  }
  func.func @transform_7(%arg0: i32) -> (i32, i32, i32, i32) {
    %c0_i32 = arith.constant 0 : i32
    %c0_i32_0 = arith.constant 0 : i32
    %c0_i32_1 = arith.constant 0 : i32
    %c0_i32_2 = arith.constant 0 : i32
    return %arg0, %c0_i32, %c0_i32_0, %c0_i32_1 : i32, i32, i32, i32
  }
}

</mosaic_0001>

<bundles_post_ra>
// kernel: tpu_custom_call.1
= control target key start
LH: loop header
LB: loop body
LE: loop exit
PB: predicated region body
PF: predicated region fallthrough
CT: control target
= control target key end

     0   :  { %s17247_s0 = inlined_call_operand.hbm [shape: bf16[2,16,16,128], index: 0, kind: input, shape index: {}]   ;;  %s17248_s1 = inlined_call_operand.hbm [shape: bf16[1152,128], index: 1, kind: input, shape index: {}]   ;;  %s17249_s2 = inlined_call_operand.hbm [shape: bf16[1152,128], index: 2, kind: input, shape index: {}]   ;;  %s17250_s3 = inlined_call_operand.vmem [shape: f32[1,128], index: 3, kind: input, shape index: {}]   ;;  %s17251_s4 = inlined_call_operand.vmem [shape: f32[1,128], index: 4, kind: input, shape index: {}]   ;;  %s17252_s5 = inlined_call_operand.vmem [shape: f32[1,128], index: 5, kind: input, shape index: {}]   ;;  %s17253_s6 = inlined_call_operand.vmem [shape: f32[1,128], index: 6, kind: input, shape index: {}]   ;;  %s17254_s7 = inlined_call_operand.hbm [shape: f32[2,16,16,128], index: 7, kind: output, shape index: {}]  }
   0x1   :  { %17265 = sst [smem:[#allocation52_spill]] %s17248_s1 }
   0x2   :  { %12 = vsyncpa [#allocation5], 0 }
   0x3   :  { %14 = vsyncpa [#allocation5 + $0x1], 0 }
   0x4   :  { %15 = vsyncpa [#allocation8], 0 }
   0x5   :  { %16 = vsyncpa [#allocation6], 0 }
   0x6   :  { %18 = vsyncpa [#allocation6 + $0x1], 0  ;;  %s14385_s24 = smov 0   ;;  %s14387_s25 = smov 0  }
   0x7   :  { %s14389_s26 = smov 0   ;;  %s14391_s27 = smov 0  }
   0x8 LB: > { %s14406_s28 = sadd.s32 4294967295, %s14334_s27   ;;  %s11833_s29 = sadd.s32 4294967294, %s14334_s27   ;;  %s14334_s27 = sphi %s14391_s27, %s17463_s27   ;;  %s14330_s26 = sphi %s14389_s26, %s17462_s26   ;;  %s14326_s25 = sphi %s14387_s25, %s17461_s25   ;;  %s14322_s24 = sphi %s14385_s24, %s17460_s24  }
   0x9   : > { %p44_p0 = scmp.ne.s32.totalorder %s14326_s25, %s14322_s24  ;;  %p17256_p1 = scmp.eq.s32.totalorder %s14406_s28, 0 }
   0xa   : > { %p194_p2 = scmp.eq.s32.totalorder %s14406_s28, 1  ;;  %p200_p3 = scmp.eq.s32.totalorder %s11833_s29, 1 }
   0xb   : > { %p14415_p4 = por %p17256_p1, %p44_p0  ;;  %p11834_p5 = scmp.ge.s32.totalorder %s14334_s27, 1 }
   0xc   : > { %p14420_p6 = por %p200_p3, %p44_p0  ;;  %p207_p7 = scmp.lt.s32.totalorder %s14334_s27, 3 }
   0xd   : > { %s17266_s30 = scalar_select %p14415_p4, 1, 0 }
   0xe   : > { %s17267_s8 = scalar_select %p14420_p6, 1, 0 }
   0xf   : > { %p14425_p8 = pnand %p11834_p5, %p207_p7  ;;  %s14336_s10 = smov [#allocation7]  }
  0x10   : > { %s219_s11 = sshll.u32 %s14336_s10, 4  ;;  %s14337_s13 = smov [#allocation9]   ;;  %s220_s11 = int_to_ptr.vmem [resolvable:$true] %s219_s11 }
  0x11   : > { %s17268_s9 = scalar_select %p14425_p8, 1, 0 }
  0x12   : > { %p13580_p9 = pneg %p14425_p8  ;;  %s232_s14 = sshll.u32 %s14337_s13, 4  ;;  %s233_s14 = int_to_ptr.vmem [resolvable:$true] %s232_s14 }
  0x13   : > { %s14197_s15 = scalar_lea.vmem %s220_s11, 9216  ;;  %p14205_p5 = scmp.lt.s32.totalorder %s220_s11, %s220_s11 }
  0x14   : > { %p14434_p11 = pnand %p13580_p9, %p17256_p1  ;;  %p14198_p13 = scmp.ne.s32.totalorder %s220_s11, %s14197_s15 }
  0x15   : > { %p14206_p7 = scmp.lt.s32.totalorder %s14197_s15, %s14197_s15 }
  0x16   : > { %p14188_p12 = pneg %p14434_p11 }
  0x17   : > { %p14207_p10 = por %p14206_p7, %p14205_p5 }
  0x18   : > { %p14200_p0 = pnand %p14198_p13, %p14188_p12 }
  0x1a   : > { %p14201_p3 = pneg %p14200_p0 }
  0x1c   : > { %p14208_p9 = pnand %p14207_p10, %p14201_p3 }
  0x1e   : > { %14211 = shalt.err (!%p14208_p9)
}
  0x1f   : > { %s17255_s16 = smov 64   ;;  %s17257_s17 = smov 4  }
  0x20   : > { %s17270_s1 = sld [smem:[#allocation52_spill]]  ;;  %s14223_s20 = scalar_lea.vmem %s233_s14, 9216 }
  0x21   : > { %p14224_p13 = scmp.ne.s32.totalorder %s233_s14, %s14223_s20  ;;  %p14231_p10 = scmp.lt.s32.totalorder %s233_s14, %s233_s14 }
  0x22   : > { %p14232_p3 = scmp.lt.s32.totalorder %s14223_s20, %s14223_s20 }
  0x23   : > { %p14226_p0 = pnand %p14224_p13, %p14188_p12 }
  0x24   : > { %p14233_p7 = por %p14232_p3, %p14231_p10 }
  0x25   : > { %p14227_p5 = pneg %p14226_p0 }
  0x26   : > { %13583 = dma.hbm_to_vmem [thread:$0]  (!%p14434_p11), %s17270_s1, 9216, %s220_s11, [#allocation8], %s17255_s16, %s17255_s16, %s17257_s17  }
  0x27   : > { %p14234_p9 = pnand %p14233_p7, %p14227_p5 }
  0x29   : > { %14237 = shalt.err (!%p14234_p9)
}
  0x2a   : > { %13586 = dma.hbm_to_vmem [thread:$0]  (!%p14434_p11), %s17249_s2, 9216, %s233_s14, [#allocation8], %s17255_s16, %s17255_s16, %s17257_s17  }
  0x2b   : > { %s14463_s23 = sadd.s32 1, %s14334_s27   ;;  %s31_s29 = sadd.s32 1, %s14330_s26 }
  0x2c   : > { %s28_s10 = ssub.s32 %s14334_s27, %s14463_s23  ;;  %p38_p12 = scmp.ne.s32.totalorder %s14330_s26, %s14326_s25 }
  0x2d   : > { %p29_p13 = scmp.eq.s32.totalorder %s28_s10, 0  ;;  %p39_p0 = scmp.eq.s32.totalorder %s14334_s27, 0 }
  0x2e   : > { %p14473_p5 = por %p194_p2, %p38_p12  ;;  %p13597_p10 = scmp.lt.s32.totalorder %s14334_s27, 2 }
  0x2f   : > { %s14479_s12 = scalar_select %p29_p13, %s14330_s26, %s31_s29  }
  0x30   : > { %s17271_s11 = scalar_select %p14473_p5, 1, 0 }
  0x31   : > { %p40_p3 = por %p39_p0, %p38_p12  ;;  %s258_s13 = sand.u32 1, %s14330_s26  }
  0x32   : > { %s11838_s15 = sshll.u32 %s258_s13, 7  ;;  %s12415_s14 = sshll.u32 %s14334_s27, 11 }
  0x33   : > { %s14486_s20 = scalar_lea.hbm %s17247_s0, %s12415_s14  ;;  %s262_s21 = scalar_lea.vmem [#allocation4], %s11838_s15 }
  0x34   : > { %s269_s22 = sshll.u32 %s262_s21, 4  ;;  %p14490_p2 = pnand %p13597_p10, %p40_p3  ;;  %s14488_s22 = int_to_ptr.vmem [resolvable:$true] %s269_s22 }
  0x35   : > { %s14494_s29 = scalar_lea.sflag [#allocation5], %s258_s13  ;;  %s14238_s16 = scalar_lea.hbm %s14486_s20, 2048 }
  0x36   : > { %p14239_p11 = scmp.ne.s32.totalorder %s14486_s20, %s14238_s16  ;;  %p14240_p7 = pneg %p14490_p2 }
  0x37   : > { %s14243_s15 = scalar_lea.hbm %s17247_s0, 4096  ;;  %p14244_p13 = scmp.lt.s32.totalorder %s14486_s20, %s17247_s0 }
  0x38   : > { %p14241_p9 = pnand %p14240_p7, %p14239_p11  ;;  %p14245_p0 = scmp.lt.s32.totalorder %s14243_s15, %s14238_s16 }
  0x3a   : > { %p14242_p12 = pneg %p14241_p9  ;;  %p14246_p10 = por %p14245_p0, %p14244_p13 }
  0x3c   : > { %p14247_p3 = pnand %p14246_p10, %p14242_p12 }
  0x3e   : > { %14250 = shalt.err (!%p14247_p3)
}
  0x3f   : > { %s14251_s13 = scalar_lea.vmem %s14488_s22, 2048  ;;  %s14340_s17 = smov [#allocation4]  }
  0x40   : > { %p14252_p1 = scmp.ne.s32.totalorder %s14488_s22, %s14251_s13  ;;  %s14256_s1 = sshll.u32 %s14340_s17, 4  ;;  %s14257_s1 = int_to_ptr.vmem [resolvable:$false] %s14256_s1 }
  0x41   : > { %s14258_s14 = scalar_lea.vmem %s14257_s1, 4096  ;;  %p14259_p9 = scmp.lt.s32.totalorder %s14488_s22, %s14257_s1 }
  0x42   : > { %p14254_p6 = pnand %p14252_p1, %p14240_p7  ;;  %p14260_p5 = scmp.lt.s32.totalorder %s14258_s14, %s14251_s13 }
  0x44   : > { %p14255_p11 = pneg %p14254_p6  ;;  %p14261_p4 = por %p14260_p5, %p14259_p9 }
  0x46   : > { %p14262_p8 = pnand %p14261_p4, %p14255_p11 }
  0x48   : > { %14265 = shalt.err (!%p14262_p8)
}
  0x49   : > { %s17273_s16 = smov 4   ;;  %s17274_s18 = smov 64  }
  0x4a   : > { %13590 = dma.hbm_to_vmem [thread:$0]  (!%p14490_p2), %s14486_s20, 2048, %s14488_s22, %s14494_s29, %s17274_s18, %s17274_s18, %s17273_s16  }
  0x4b   : > { %p17275_p1 = scmp.ne.s32.totalorder %s17268_s9, 0 }
  0x4d   : > { %281 = sbr.rel (%p17275_p1) target bundleno = 1461 (0x5b5), region = 48 }
  0x52   : > { %s14521_s17 = sand.u32 1, %s14326_s25   ;;  %p17276_p4 = scmp.ne.s32.totalorder %s17266_s30, 0 }
  0x53   : > { %s11842_s1 = sshll.u32 %s14521_s17, 7  ;;  %s284_s15 = scalar_lea.sflag [#allocation5], %s14521_s17 }
  0x54   : > { %s14525_s19 = scalar_lea.vmem [#allocation4], %s11842_s1 }
  0x55   : > { %14309 = dma.done.wait (%p17276_p4), %s284_s15, 2048  }
  0x56   : > { %14311 = vsyncadd (%p17276_p4), %s284_s15, 4294965248  ;;  %p17277_p6 = scmp.eq.s32.totalorder %s14406_s28, 0 }
  0x58   : > { %14313 = dma.done.wait (%p17277_p6), [#allocation8], 18432   ;;  %p17278_p8 = pmov %p17277_p6 }
  0x59   : > { %v14341_v0 = vmov 0   ;;  %v13640_v1 = vld [vmem:[#allocation7 + $0x78] sm:$0xff]   ;;  %v13644_v5 = vld [vmem:[#allocation7 + $0x70] sm:$0xff]   ;;  %v13648_v9 = vld [vmem:[#allocation7 + $0x68] sm:$0xff]   ;;  %vm337_vm0 = vsmask.f32 7950 }
  0x5a   : > { %14315 = vsyncadd (%p17278_p8), [#allocation8], 4294948864  ;;  %327 = vst [vmem:[#allocation2] sm:$0xf] %v14341_v0  ;;  %v13641_v2 = vld [vmem:[#allocation7 + $0xf8] sm:$0xff]   ;;  %12528 = vmatprep.subr.bf16.mxu0 %v13640_v1  ;;  %v13645_v6 = vld [vmem:[#allocation7 + $0xf0] sm:$0xff]  }
  0x5b   : > { %328 = vst [vmem:[#allocation2 + $0x4] sm:$0xf] %v14341_v0  ;;  %329 = vst [vmem:[#allocation2 + $0x8] sm:$0xf] %v14341_v0  ;;  %v13642_v3 = vld [vmem:[#allocation7 + $0x38] sm:$0xff]   ;;  %12640 = vmatprep.subr.bf16.mxu1 %v13641_v2  ;;  %v13646_v7 = vld [vmem:[#allocation7 + $0x30] sm:$0xff]  }
  0x5c   : > { %330 = vst [vmem:[#allocation2 + $0xc] sm:$0xf] %v14341_v0  ;;  %332 = vst [vmem:[#allocation2 + $0x110] sm:$0xf] %v14341_v0  ;;  %v13643_v4 = vld [vmem:[#allocation7 + $0xb8] sm:$0xff]   ;;  %12529 = vmatpush3.bf16.msra.mxu0 %v13642_v3  ;;  %v13647_v8 = vld [vmem:[#allocation7 + $0xb0] sm:$0xff]  }
  0x5d   : > { %333 = vst [vmem:[#allocation2 + $0x114] sm:$0xf] %v14341_v0  ;;  %334 = vst [vmem:[#allocation2 + $0x118] sm:$0xf] %v14341_v0  ;;  %12641 = vmatpush3.bf16.msra.mxu1 %v13643_v4  ;;  %12530 = vmatprep.subr.bf16.mxu0 %v13644_v5  ;;  %v13649_v10 = vld [vmem:[#allocation7 + $0xe8] sm:$0xff]   ;;  %v13652_v13 = vld [vmem:[#allocation7 + $0x60] sm:$0xff]  }
  0x5e   : > { %335 = vst [vmem:[#allocation2 + $0x11c] sm:$0xf] %v14341_v0  ;;  %12642 = vmatprep.subr.bf16.mxu1 %v13645_v6  ;;  %v13650_v11 = vld [vmem:[#allocation7 + $0x28] sm:$0xff]   ;;  %v13653_v14 = vld [vmem:[#allocation7 + $0xe0] sm:$0xff]   ;;  %v13656_v17 = vld [vmem:[#allocation7 + $0x58] sm:$0xff]   ;;  %vm336_vm1 = vcmask 1043459  }
  0x5f   : > { %v13651_v12 = vld [vmem:[#allocation7 + $0xa8] sm:$0xff]   ;;  %v13654_v15 = vld [vmem:[#allocation7 + $0x20] sm:$0xff]   ;;  %v13657_v18 = vld [vmem:[#allocation7 + $0xd8] sm:$0xff]   ;;  %vm394_vm3 = vsmask.f32 256  ;;  %vm393_vm5 = vcmask 1040384  }
  0x60   : > { %12531 = vmatpush3.bf16.msra.mxu0 %v13646_v7  ;;  %v13655_v16 = vld [vmem:[#allocation7 + $0xa0] sm:$0xff]   ;;  %v13658_v19 = vld [vmem:[#allocation7 + $0x18] sm:$0xff]   ;;  %v13660_v21 = vld [vmem:[#allocation7 + $0x50] sm:$0xff]   ;;  %vm563_vm4 = vsmask.f32 4368  ;;  %v17283_v50 = vmov 0 }
  0x61   : > { %12643 = vmatpush3.bf16.msra.mxu1 %v13647_v8  ;;  %12532 = vmatprep.subr.bf16.mxu0 %v13648_v9  ;;  %v13659_v20 = vld [vmem:[#allocation7 + $0x98] sm:$0xff]   ;;  %v13661_v22 = vld [vmem:[#allocation7 + $0xd0] sm:$0xff]   ;;  %vm14536_vm2 = vmand %vm336_vm1, %vm337_vm0  ;;  %vm1093_vm6 = vsmask.f32 3328  ;;  %vm1094_vm7 = vsmask.f32 7440 }
  0x62   : > { %12644 = vmatprep.subr.bf16.mxu1 %v13649_v10  ;;  %v13662_v23 = vld [vmem:[#allocation7 + $0x10] sm:$0xff]   ;;  %v13664_v26 = vld [vmem:[#allocation7 + $0x48] sm:$0xff]   ;;  %v13668_v30 = vld [vmem:[#allocation7 + $0x40] sm:$0xff]   ;;  %s11845_s15 = sshll.u32 %s14521_s17, 8  ;;  %s11728_s29 = scalar_lea.sflag [#allocation6], %s14521_s17 }
  0x63   : > { %v13663_v25 = vld [vmem:[#allocation7 + $0x90] sm:$0xff]   ;;  %v13665_v27 = vld [vmem:[#allocation7 + $0xc8] sm:$0xff]   ;;  %v13669_v31 = vld [vmem:[#allocation7 + $0xc0] sm:$0xff]   ;;  %s17002_s30 = scalar_lea.vmem [#allocation10], %s11845_s15  ;;  %p17457_p2 = scmp.ne.s32.totalorder %s17271_s11, 0 }
  0x64   : > { %12533 = vmatpush3.bf16.msra.mxu0 %v13650_v11  ;;  %v13666_v28 = vld [vmem:[#allocation7 + $0x8] sm:$0xff]   ;;  %v13670_v32 = vld [vmem:[#allocation7] sm:$0xff]   ;;  %vm14545_vm8 = vmand %vm393_vm5, %vm394_vm3  ;;  %s11741_s9 = sshll.u32 %s17002_s30, 4  ;;  %s14342_s21 = smov [#allocation10]   ;;  %s17202_s9 = int_to_ptr.vmem [resolvable:$true] %s11741_s9 }
  0x65   : > { %12645 = vmatpush3.bf16.msra.mxu1 %v13651_v12  ;;  %12534 = vmatprep.subr.bf16.mxu0 %v13652_v13  ;;  %v13667_v29 = vld [vmem:[#allocation7 + $0x88] sm:$0xff]   ;;  %v13671_v33 = vld [vmem:[#allocation7 + $0x80] sm:$0xff]   ;;  %vm14551_vm9 = vmor %vm394_vm3, %vm563_vm4  ;;  %s14270_s13 = sshll.u32 %s14342_s21, 4  ;;  %s14271_s13 = int_to_ptr.vmem [resolvable:$false] %s14270_s13 }
  0x66   : > { %12646 = vmatprep.subr.bf16.mxu1 %v13653_v14  ;;  %v339_v34 = vld [vmem:[#allocation2] sm:$0x8]  ;;  %v516_v35 = vld [vmem:[#allocation2 + $0x4] sm:$0xf]  ;;  %v517_v36 = vld [vmem:[#allocation2 + $0x8] sm:$0xf]  ;;  %p14273_p13 = scmp.lt.s32.totalorder %s17202_s9, %s14271_s13 }
  0x67   : > { %v340_v37 = vsel %vm14536_vm2, 0, %v339_v34  ;;  %v571_v38 = vshrl.u32 %v516_v35, 16  ;;  %v580_v39 = vshrl.u32 %v517_v36, 16  ;;  %v981_v40 = vld [vmem:[#allocation2 + $0x4] sm:$0xf]  ;;  %v583_v41 = vshll.u32 %v517_v36, 16  ;;  %vm14572_vm10 = vmor %vm1093_vm6, %vm1094_vm7 }
  0x68   : > { %12535 = vmatpush3.bf16.msra.mxu0 %v13654_v15  ;;  %341 = vst [vmem:[#allocation2] sm:$0x8] %v340_v37  ;;  %v982_v42 = vld [vmem:[#allocation2 + $0x8] sm:$0xf]  ;;  %1013 = vst [vmem:[#allocation3 + $0x4] sm:$0xf] %v981_v40 }
  0x69   : > { %12647 = vmatpush3.bf16.msra.mxu1 %v13655_v16  ;;  %12536 = vmatprep.subr.bf16.mxu0 %v13656_v17  ;;  %v6141_v43 = vld [vmem:[#allocation2 + $0x4] sm:$0xf]  ;;  %v573_v45 = vrot.slane %v571_v38, 7  ;;  %v582_v46 = vrot.slane %v580_v39, 7  ;;  %1014 = vst [vmem:[#allocation3 + $0x28] sm:$0xf] %v982_v42 }
  0x6a   : > { %12648 = vmatprep.subr.bf16.mxu1 %v13657_v18  ;;  %v450_v44 = vld [vmem:[%s14525_s19] sm:$0xff]   ;;  %v6142_v47 = vld [vmem:[#allocation2 + $0x8] sm:$0xf]  ;;  %v6194_v48 = vshrl.u32 %v6141_v43, 16  ;;  %v17284_v50 = vsel %vm14551_vm9, 4294967295, %v17283_v50  ;;  %v574_v51 = vshll.u32 %v516_v35, 16 }
  0x6b   : > { %483 = vst [vmem:[#allocation2 + $0x14] sm:$0xff] %v450_v44   ;;  %17285 = vst [vmem:[#allocation14_spill] sm:$0xff] %v17284_v50  ;;  %v6197_v52 = vshll.u32 %v6141_v43, 16  ;;  %v6203_v53 = vshrl.u32 %v6142_v47, 16  ;;  %v6206_v54 = vshll.u32 %v6142_v47, 16  ;;  %v578_v55 = vrot.slane %v573_v45, 4 }
  0x6c   : > { %12537 = vmatpush3.bf16.msra.mxu0 %v13658_v19  ;;  %v585_v56 = vor.u32 %v583_v41, %v582_v46  ;;  %v6196_v57 = vrot.slane %v6194_v48, 7  ;;  %v342_v58 = vld [vmem:[#allocation2 + $0x10] sm:$0x8]  ;;  %v396_v59 = vld [vmem:[#allocation2 + $0xc] sm:$0x1]  ;;  %v13676_v0 = vld [vmem:[#allocation7 + $0x178] sm:$0xff]   ;;  %v576_v10 = vor.u32 %v574_v51, %v573_v45 }
  0x6d   : > { %12649 = vmatpush3.bf16.msra.mxu1 %v13659_v20  ;;  %12538 = vmatprep.subr.bf16.mxu0 %v13660_v21  ;;  %v6205_v60 = vrot.slane %v6203_v53, 7  ;;  %v343_v61 = vsel %vm14536_vm2, 0, %v342_v58  ;;  %v397_v62 = vsel %vm14545_vm8, 0, %v396_v59  ;;  %v1045_v63 = vld [vmem:[#allocation2 + $0x4] sm:$0xf]  ;;  %v452_v20 = vld [vmem:[%s14525_s19 + $0x8] sm:$0xff]  }
  0x6e   : > { %12650 = vmatprep.subr.bf16.mxu1 %v13661_v22  ;;  %v586_v1 = vsel %vm14551_vm9, %v578_v55, %v585_v56  ;;  %344 = vst [vmem:[#allocation2 + $0x10] sm:$0x8] %v343_v61  ;;  %398 = vst [vmem:[#allocation2 + $0xc] sm:$0x1] %v397_v62  ;;  %v1046_v2 = vld [vmem:[#allocation2 + $0x8] sm:$0xf]  ;;  %v14563_v12 = vor.u32 %v6197_v52, %v6196_v57 }
  0x6f   : > { %v1097_v3 = vshrl.u32 %v1045_v63, 16  ;;  %v14561_v4 = vld [vmem:[#allocation2 + $0x4] sm:$0xf]  ;;  %950 = vst [vmem:[#allocation3 + $0x24] sm:$0xf] %v586_v1  ;;  %v6201_v5 = vrot.slane %v6196_v57, 4  ;;  %v6208_v17 = vor.u32 %v6206_v54, %v6205_v60 }
  0x70   : > { %12539 = vmatpush3.bf16.msra.mxu0 %v13662_v23  ;;  %v1100_v6 = vshll.u32 %v1045_v63, 16  ;;  %v1106_v7 = vshll.u32 %v1046_v2, 16  ;;  %v1110_v8 = vshrl.u32 %v1046_v2, 16  ;;  %v515_v9 = vld [vmem:[#allocation2] sm:$0x8]  ;;  %v6717_v14 = vshrl.u32 %v14561_v4, 16 }
  0x71   : > { %12651 = vmatpush3.bf16.msra.mxu1 %v13663_v25  ;;  %12540 = vmatprep.subr.bf16.mxu0 %v13664_v26  ;;  %v6140_v11 = vld [vmem:[#allocation2] sm:$0x8]  ;;  %v1099_v13 = vrot.slane %v1097_v3, 4  ;;  %v566_v15 = vshrl.u32 %v515_v9, 16  ;;  %485 = vst [vmem:[#allocation2 + $0x24] sm:$0xff] %v452_v20   ;;  %v6209_v39 = vsel %vm14551_vm9, %v6201_v5, %v6208_v17  ;;  %v6720_v54 = vshll.u32 %v14561_v4, 16 }
  0x72   : > { %12652 = vmatprep.subr.bf16.mxu1 %v13665_v27  ;;  %v6189_v16 = vshrl.u32 %v6140_v11, 16  ;;  %v1102_v18 = vrot.slane %v1100_v6, 5  ;;  %v1545_v19 = vld [vmem:[#allocation2 + $0x14] sm:$0xf]  ;;  %v1108_v21 = vrot.slane %v1106_v7, 5  ;;  %v1112_v22 = vrot.slane %v1110_v8, 4 }
  0x73   : > { %v1546_v23 = vld [vmem:[#allocation2 + $0x18] sm:$0xf]  ;;  %v1598_v25 = vshrl.u32 %v1545_v19, 16  ;;  %v1601_v26 = vshll.u32 %v1545_v19, 16  ;;  %v11846_v27 = vrot.slane %v566_v15, 11  ;;  %v6719_v37 = vrot.slane %v6717_v14, 4 }
  0x74   : > { %12541 = vmatpush3.bf16.msra.mxu0 %v13666_v28  ;;  %v14567_v28 = vrot.slane %v6189_v16, 11  ;;  %v1113_v34 = vor.u32 %v1112_v22, %v1108_v21  ;;  %v1610_v36 = vshll.u32 %v1546_v23, 16  ;;  %v6604_v61 = vld [vmem:[#allocation2 + $0x4] sm:$0xf]  ;;  %v6605_v62 = vld [vmem:[#allocation2 + $0x8] sm:$0xf] }
  0x75   : > { %12653 = vmatpush3.bf16.msra.mxu1 %v13667_v29  ;;  %12542 = vmatprep.subr.bf16.mxu0 %v13668_v30  ;;  %v1103_v29 = vor.u32 %v1102_v18, %v1099_v13  ;;  %v1607_v30 = vshrl.u32 %v1546_v23, 16  ;;  %v1600_v35 = vrot.slane %v1598_v25, 7  ;;  %v577_v38 = vsel %vm14551_vm9, %v11846_v27, %v576_v10  ;;  %v1047_v40 = vld [vmem:[#allocation2 + $0xc] sm:$0x1]  ;;  %v1544_v42 = vld [vmem:[#allocation2 + $0x10] sm:$0x8] }
  0x76   : > { %12654 = vmatprep.subr.bf16.mxu1 %v13669_v31  ;;  %v6669_v31 = vld [vmem:[#allocation2 + $0x8] sm:$0xf]  ;;  %949 = vst [vmem:[#allocation3] sm:$0xf] %v577_v38  ;;  %v1114_v44 = vrot.slane %v1113_v34, 4  ;;  %v1116_v45 = vshll.u32 %v1047_v40, 16  ;;  %v6200_v60 = vsel %vm14551_vm9, %v14567_v28, %v14563_v12 }
  0x77   : > { %v1104_v41 = vrot.slane %v1103_v29, 4  ;;  %v1609_v43 = vrot.slane %v1607_v30, 7  ;;  %v1593_v46 = vshrl.u32 %v1544_v42, 16  ;;  %v1603_v47 = vor.u32 %v1601_v26, %v1600_v35  ;;  %v6670_v48 = vld [vmem:[#allocation2 + $0xc] sm:$0x1]  ;;  %v3598_v10 = vld [vmem:[#allocation3 + $0x24] sm:$0xff] }
  0x78   : > { %12543 = vmatpush3.bf16.msra.mxu0 %v13670_v32  ;;  %v454_v32 = vld [vmem:[%s14525_s19 + $0x10] sm:$0xff]   ;;  %v1605_v52 = vrot.slane %v1600_v35, 4  ;;  %v1118_v55 = vrot.slane %v1116_v45, 5  ;;  %v6726_v57 = vshll.u32 %v6669_v31, 16  ;;  %v6730_v58 = vshrl.u32 %v6669_v31, 16  ;;  %v13677_v13 = vld [vmem:[#allocation7 + $0x138] sm:$0xff]  }
  0x79   : > { %12655 = vmatpush3.bf16.msra.mxu1 %v13671_v33  ;;  %12752 = vmatprep.subr.bf16.mxu0 %v13676_v0  ;;  %v17286_v33 = vmov 0  ;;  %487 = vst [vmem:[#allocation2 + $0x34] sm:$0xff] %v454_v32   ;;  %v1109_v51 = vsel %vm14572_vm10, %v1104_v41, %v1108_v21  ;;  %v1612_v53 = vor.u32 %v1610_v36, %v1609_v43  ;;  %v11862_v56 = vrot.slane %v1593_v46, 11  ;;  %v518_v59 = vld [vmem:[#allocation2 + $0x10] sm:$0x8]  ;;  %v456_v23 = vld [vmem:[%s14525_s19 + $0x18] sm:$0xff]  }
  0x7a   : > { %v17287_v33 = vsel %vm14572_vm10, 4294967295, %v17286_v33  ;;  %1512 = vst [vmem:[#allocation3 + $0x8] sm:$0xf] %v1109_v51  ;;  %v6722_v0 = vrot.slane %v6720_v54, 5  ;;  %v6736_v1 = vshll.u32 %v6670_v48, 16  ;;  %v1119_v4 = vsel %vm14572_vm10, %v1114_v44, %v1118_v55  ;;  %v13688_v22 = vld [vmem:[#allocation7 + $0x170] sm:$0xff]  }
  0x7b   : > { %17288 = vst [vmem:[#allocation15_spill] sm:$0xff] %v17287_v33  ;;  %v1613_v63 = vsel %vm14551_vm9, %v1605_v52, %v1612_v53  ;;  %v519_v2 = vld [vmem:[#allocation2 + $0x14] sm:$0xf]  ;;  %v520_v3 = vld [vmem:[#allocation2 + $0x18] sm:$0xf]  ;;  %v1604_v5 = vsel %vm14551_vm9, %v11862_v56, %v1603_v47  ;;  %v14593_v6 = vrot.slane %v6726_v57, 5 }
  0x7c   : > { %1977 = vst [vmem:[#allocation3 + $0x30] sm:$0xf] %v1613_v63  ;;  %v6732_v7 = vrot.slane %v6730_v58, 4  ;;  %v983_v8 = vld [vmem:[#allocation2 + $0x14] sm:$0xf]  ;;  %v6723_v11 = vor.u32 %v6722_v0, %v6719_v37  ;;  %v14595_v12 = vrot.slane %v6736_v1, 5 }
  0x7d   : > { %v984_v9 = vld [vmem:[#allocation2 + $0x18] sm:$0xf]  ;;  %1513 = vst [vmem:[#allocation3 + $0x2c] sm:$0xf] %v1119_v4  ;;  %1976 = vst [vmem:[#allocation3 + $0xc] sm:$0xf] %v1604_v5 }
  0x7e   : > { %v588_v14 = vshrl.u32 %v518_v59, 16  ;;  %v593_v15 = vshrl.u32 %v519_v2, 16  ;;  %1015 = vst [vmem:[#allocation3 + $0x4c] sm:$0xf] %v983_v8  ;;  %1016 = vst [vmem:[#allocation3 + $0x70] sm:$0xf] %v984_v9  ;;  %v6733_v17 = vor.u32 %v6732_v7, %v14593_v6 }
  0x7f   : > { %v345_v16 = vld [vmem:[#allocation2 + $0x20] sm:$0x8]  ;;  %v596_v18 = vshll.u32 %v519_v2, 16  ;;  %v602_v19 = vshrl.u32 %v520_v3, 16  ;;  %v605_v20 = vshll.u32 %v520_v3, 16  ;;  %v6724_v27 = vrot.slane %v6723_v11, 4 }
  0x80   : > { %v399_v21 = vld [vmem:[#allocation2 + $0x1c] sm:$0x1]  ;;  %v3593_v25 = vld [vmem:[#allocation3] sm:$0xff]  ;;  %v11847_v28 = vrot.slane %v588_v14, 11  ;;  %v595_v29 = vrot.slane %v593_v15, 7  ;;  %489 = vst [vmem:[#allocation2 + $0x44] sm:$0xff] %v456_v23  }
  0x81   : > { %v13672_v26 = vld [vmem:[#allocation3 + $0x4] ss:$36 sps:$4 sm:$0xff]   ;;  %6572 = vst [vmem:[#allocation3] sm:$0xf] %v6200_v60  ;;  %6573 = vst [vmem:[#allocation3 + $0x24] sm:$0xf] %v6209_v39  ;;  %v11894_v31 = vcombine.low %v3593_v25, %v3598_v10  ;;  %v6729_v37 = vsel %vm14572_vm10, %v6724_v27, %v14593_v6 }
  0x82   : > { %6636 = vst [vmem:[#allocation3 + $0x4] sm:$0xf] %v6604_v61  ;;  %6637 = vst [vmem:[#allocation3 + $0x28] sm:$0xf] %v6605_v62  ;;  %v6734_v30 = vrot.slane %v6733_v17, 4  ;;  %v604_v32 = vrot.slane %v602_v19, 7  ;;  %5097 = vmatprep.mubr.bf16.mxu0 %v13672_v26  ;;  %v598_v38 = vor.u32 %v596_v18, %v595_v29 }
  0x83   : > { %v346_v34 = vsel %vm14536_vm2, 0, %v345_v16  ;;  %v1048_v35 = vld [vmem:[#allocation2 + $0x14] sm:$0xf]  ;;  %v458_v36 = vld [vmem:[%s14525_s19 + $0x20] sm:$0xff]   ;;  %v600_v40 = vrot.slane %v595_v29, 4  ;;  %v400_v39 = vsel %vm14545_vm8, 0, %v399_v21  ;;  %5098 = vmatmul.mubr.bf16.vlgmr.msra.gmra.mxu0 %v11894_v31 }
  0x84   : > { %347 = vst [vmem:[#allocation2 + $0x20] sm:$0x8] %v346_v34  ;;  %v1049_v41 = vld [vmem:[#allocation2 + $0x18] sm:$0xf]  ;;  %v1548_v42 = vld [vmem:[#allocation2 + $0x24] sm:$0xf]  ;;  %v6739_v43 = vsel %vm14572_vm10, %v6734_v30, %v14595_v12  ;;  %v607_v44 = vor.u32 %v605_v20, %v604_v32  ;;  %12753 = vmatpush3.bf16.msra.mxu0 %v13677_v13  ;;  %v599_v51 = vsel %vm14551_vm9, %v11847_v28, %v598_v38 }
  0x85   : > { %491 = vst [vmem:[#allocation2 + $0x54] sm:$0xff] %v458_v36   ;;  %401 = vst [vmem:[#allocation2 + $0x1c] sm:$0x1] %v400_v39  ;;  %v1121_v45 = vshrl.u32 %v1048_v35, 16  ;;  %v1124_v46 = vshll.u32 %v1048_v35, 16  ;;  %v13689_v48 = vld [vmem:[#allocation7 + $0x130] sm:$0xff]   ;;  %12754 = vmatprep.subr.bf16.mxu0 %v13688_v22 }
  0x86   : > { %v1549_v47 = vld [vmem:[#allocation2 + $0x28] sm:$0xf]  ;;  %v1130_v52 = vshll.u32 %v1049_v41, 16  ;;  %v1134_v53 = vshrl.u32 %v1049_v41, 16  ;;  %v1620_v54 = vshrl.u32 %v1548_v42, 16  ;;  %v3599_v58 = vld [vmem:[#allocation3 + $0x2c] sm:$0xff]  ;;  %v608_v60 = vsel %vm14551_vm9, %v600_v40, %v607_v44 }
  0x87   : > { %v522_v55 = vld [vmem:[#allocation2 + $0x24] sm:$0xf]  ;;  %v13700_v56 = vld [vmem:[#allocation7 + $0x168] sm:$0xff]   ;;  %951 = vst [vmem:[#allocation3 + $0x48] sm:$0xf] %v599_v51  ;;  %v1123_v61 = vrot.slane %v1121_v45, 4 }
  0x88   : > { %v3594_v57 = vld [vmem:[#allocation3 + $0x8] sm:$0xff]  ;;  %v1126_v62 = vrot.slane %v1124_v46, 5  ;;  %7133 = vst [vmem:[#allocation3 + $0x2c] sm:$0xf] %v6739_v43  ;;  %952 = vst [vmem:[#allocation3 + $0x6c] sm:$0xf] %v608_v60  ;;  %12755 = vmatpush3.bf16.msra.mxu0 %v13689_v48 }
  0x89   : > { %v13674_v59 = vld [vmem:[#allocation3 + $0xc] ss:$36 sps:$4 sm:$0xff]   ;;  %7132 = vst [vmem:[#allocation3 + $0x8] sm:$0xf] %v6729_v37  ;;  %v11896_v63 = vcombine.low %v3594_v57, %v3599_v58  ;;  %v1132_v0 = vrot.slane %v1130_v52, 5  ;;  %v1136_v1 = vrot.slane %v1134_v53, 4  ;;  %12756 = vmatprep.subr.bf16.mxu0 %v13700_v56 }
  0x8a   : > { %v1622_v2 = vrot.slane %v1620_v54, 7  ;;  %v14614_v3 = vld [vmem:[#allocation2 + $0x28] sm:$0xf]  ;;  %v985_v4 = vld [vmem:[#allocation2 + $0x24] sm:$0xf]  ;;  %5258 = vmatprep.mubr.bf16.mxu1 %v13674_v59  ;;  %v1127_v5 = vor.u32 %v1126_v62, %v1123_v61  ;;  %v1623_v6 = vshll.u32 %v1548_v42, 16 }
  0x8b   : > { %v1629_v7 = vshrl.u32 %v1549_v47, 16  ;;  %v1632_v8 = vshll.u32 %v1549_v47, 16  ;;  %v986_v9 = vld [vmem:[#allocation2 + $0x28] sm:$0xf]  ;;  %1017 = vst [vmem:[#allocation3 + $0x94] sm:$0xf] %v985_v4  ;;  %5259 = vmatmul.mubr.bf16.vlgmr.msra.gmra.mxu1 %v11896_v63  ;;  %v1137_v11 = vor.u32 %v1136_v1, %v1132_v0 }
  0x8c   : > { %v460_v10 = vld [vmem:[%s14525_s19 + $0x28] sm:$0xff]   ;;  %v1627_v12 = vrot.slane %v1622_v2, 4  ;;  %v615_v13 = vshrl.u32 %v522_v55, 16  ;;  %v618_v14 = vshll.u32 %v522_v55, 16  ;;  %1018 = vst [vmem:[#allocation3 + $0xb8] sm:$0xf] %v986_v9  ;;  %v1625_v19 = vor.u32 %v1623_v6, %v1622_v2 }
  0x8d   : > { %v13701_v15 = vld [vmem:[#allocation7 + $0x128] sm:$0xff]   ;;  %493 = vst [vmem:[#allocation2 + $0x64] sm:$0xff] %v460_v10   ;;  %v462_v16 = vld [vmem:[%s14525_s19 + $0x30] sm:$0xff]   ;;  %v1128_v17 = vrot.slane %v1127_v5, 4  ;;  %v1547_v18 = vld [vmem:[#allocation2 + $0x20] sm:$0x8] }
  0x8e   : > { %v1631_v20 = vrot.slane %v1629_v7, 7  ;;  %v521_v21 = vld [vmem:[#allocation2 + $0x20] sm:$0x8]  ;;  %v348_v22 = vld [vmem:[#allocation2 + $0x30] sm:$0x8]  ;;  %495 = vst [vmem:[#allocation2 + $0x74] sm:$0xff] %v462_v16   ;;  %12757 = vmatpush3.bf16.msra.mxu0 %v13701_v15 }
  0x8f   : > { %v1050_v23 = vld [vmem:[#allocation2 + $0x1c] sm:$0x1]  ;;  %v1138_v25 = vrot.slane %v1137_v11, 4  ;;  %v1615_v26 = vshrl.u32 %v1547_v18, 16  ;;  %v610_v27 = vshrl.u32 %v521_v21, 16  ;;  %v617_v28 = vrot.slane %v615_v13, 7 }
  0x90   : > { %v1133_v29 = vsel %vm14572_vm10, %v1128_v17, %v1132_v0  ;;  %v1140_v30 = vshll.u32 %v1050_v23, 16  ;;  %v1634_v31 = vor.u32 %v1632_v8, %v1631_v20  ;;  %v624_v32 = vshrl.u32 %v14614_v3, 16  ;;  %v402_v34 = vld [vmem:[#allocation2 + $0x2c] sm:$0x1]  ;;  %v1051_v35 = vld [vmem:[#allocation2 + $0x24] sm:$0xf] }
  0x91   : > { %v3603_v36 = vld [vmem:[#allocation3 + $0x48] sm:$0xff]  ;;  %1514 = vst [vmem:[#allocation3 + $0x50] sm:$0xf] %v1133_v29  ;;  %v11863_v37 = vrot.slane %v1615_v26, 11  ;;  %v11848_v38 = vrot.slane %v610_v27, 11  ;;  %v620_v40 = vor.u32 %v618_v14, %v617_v28  ;;  %v622_v39 = vrot.slane %v617_v28, 4 }
  0x92   : > { %v1052_v41 = vld [vmem:[#allocation2 + $0x28] sm:$0xf]  ;;  %v3608_v42 = vld [vmem:[#allocation3 + $0x6c] sm:$0xff]  ;;  %v1142_v44 = vrot.slane %v1140_v30, 5  ;;  %v1635_v45 = vsel %vm14551_vm9, %v1627_v12, %v1634_v31  ;;  %v626_v46 = vrot.slane %v624_v32, 7  ;;  %v627_v47 = vshll.u32 %v14614_v3, 16 }
  0x93   : > { %v13678_v43 = vld [vmem:[#allocation3 + $0x4c] ss:$36 sps:$4 sm:$0xff]   ;;  %v1626_v48 = vsel %vm14551_vm9, %v11863_v37, %v1625_v19  ;;  %1979 = vst [vmem:[#allocation3 + $0x78] sm:$0xf] %v1635_v45  ;;  %v11903_v51 = vcombine.low %v3603_v36, %v3608_v42  ;;  %v621_v52 = vsel %vm14551_vm9, %v11848_v38, %v620_v40  ;;  %v349_v53 = vsel %vm14536_vm2, 0, %v348_v22  ;;  %v13712_v56 = vld [vmem:[#allocation7 + $0x160] sm:$0xff]  }
  0x94   : > { %v1551_v54 = vld [vmem:[#allocation2 + $0x34] sm:$0xf]  ;;  %v1552_v55 = vld [vmem:[#allocation2 + $0x38] sm:$0xf]  ;;  %5105 = vmatprep.mubr.bf16.mxu0 %v13678_v43  ;;  %v1143_v57 = vsel %vm14572_vm10, %v1138_v25, %v1142_v44  ;;  %1978 = vst [vmem:[#allocation3 + $0x54] sm:$0xf] %v1626_v48  ;;  %v629_v58 = vor.u32 %v627_v47, %v626_v46  ;;  %12758 = vmatprep.subr.bf16.mxu0 %v13712_v56 }
  0x95   : > { %953 = vst [vmem:[#allocation3 + $0x90] sm:$0xf] %v621_v52  ;;  %350 = vst [vmem:[#allocation2 + $0x30] sm:$0x8] %v349_v53  ;;  %v403_v59 = vsel %vm14545_vm8, 0, %v402_v34  ;;  %v1145_v60 = vshrl.u32 %v1051_v35, 16  ;;  %5106 = vmatmul.mubr.bf16.gmra.mxu0 %v11903_v51 }
  0x96   : > { %1515 = vst [vmem:[#allocation3 + $0x74] sm:$0xf] %v1143_v57  ;;  %404 = vst [vmem:[#allocation2 + $0x2c] sm:$0x1] %v403_v59  ;;  %v1148_v61 = vshll.u32 %v1051_v35, 16  ;;  %v1154_v62 = vshll.u32 %v1052_v41, 16  ;;  %v630_v1 = vsel %vm14551_vm9, %v622_v39, %v629_v58 }
  0x97   : > { %v1158_v63 = vshrl.u32 %v1052_v41, 16  ;;  %v1642_v0 = vshrl.u32 %v1551_v54, 16  ;;  %v1147_v2 = vrot.slane %v1145_v60, 4  ;;  %v1645_v3 = vshll.u32 %v1551_v54, 16  ;;  %v13713_v5 = vld [vmem:[#allocation7 + $0x120] sm:$0xff]   ;;  %v464_v21 = vld [vmem:[%s14525_s19 + $0x38] sm:$0xff]  }
  0x98   : > { %v1651_v4 = vshrl.u32 %v1552_v55, 16  ;;  %954 = vst [vmem:[#allocation3 + $0xb4] sm:$0xf] %v630_v1  ;;  %v1150_v6 = vrot.slane %v1148_v61, 5  ;;  %v1156_v7 = vrot.slane %v1154_v62, 5  ;;  %v1654_v12 = vshll.u32 %v1552_v55, 16  ;;  %12759 = vmatpush3.bf16.msra.mxu0 %v13713_v5 }
  0x99   : > { %v1160_v8 = vrot.slane %v1158_v63, 4  ;;  %v1644_v9 = vrot.slane %v1642_v0, 7  ;;  %v525_v10 = vld [vmem:[#allocation2 + $0x34] sm:$0xf]  ;;  %v526_v13 = vld [vmem:[#allocation2 + $0x38] sm:$0xf] }
  0x9a   : > { %v1653_v11 = vrot.slane %v1651_v4, 7  ;;  %v637_v14 = vshrl.u32 %v525_v10, 16  ;;  %v640_v15 = vshll.u32 %v525_v10, 16  ;;  %v1151_v16 = vor.u32 %v1150_v6, %v1147_v2  ;;  %v987_v19 = vld [vmem:[#allocation2 + $0x34] sm:$0xf]  ;;  %497 = vst [vmem:[#allocation2 + $0x84] sm:$0xff] %v464_v21  }
  0x9b   : > { %v1161_v17 = vor.u32 %v1160_v8, %v1156_v7  ;;  %v1649_v18 = vrot.slane %v1644_v9, 4  ;;  %v988_v20 = vld [vmem:[#allocation2 + $0x38] sm:$0xf]  ;;  %v646_v25 = vshrl.u32 %v526_v13, 16  ;;  %v649_v26 = vshll.u32 %v526_v13, 16  ;;  %v466_v28 = vld [vmem:[%s14525_s19 + $0x40] sm:$0xff]  }
  0x9c   : > { %v1656_v22 = vor.u32 %v1654_v12, %v1653_v11  ;;  %v639_v23 = vrot.slane %v637_v14, 7  ;;  %1019 = vst [vmem:[#allocation3 + $0xdc] sm:$0xf] %v987_v19  ;;  %1020 = vst [vmem:[#allocation3 + $0x100] sm:$0xf] %v988_v20  ;;  %v3613_v29 = vld [vmem:[#allocation3 + $0x90] sm:$0xff]  ;;  %v1647_v37 = vor.u32 %v1645_v3, %v1644_v9 }
  0x9d   : > { %v351_v27 = vld [vmem:[#allocation2 + $0x40] sm:$0x8]  ;;  %v1152_v30 = vrot.slane %v1151_v16, 4  ;;  %v1162_v31 = vrot.slane %v1161_v17, 4  ;;  %v1550_v32 = vld [vmem:[#allocation2 + $0x30] sm:$0x8] }
  0x9e   : > { %499 = vst [vmem:[#allocation2 + $0x94] sm:$0xff] %v466_v28   ;;  %v13680_v34 = vld [vmem:[#allocation3 + $0x54] ss:$36 sps:$4 sm:$0xff]   ;;  %v1637_v36 = vshrl.u32 %v1550_v32, 16  ;;  %v1657_v38 = vsel %vm14551_vm9, %v1649_v18, %v1656_v22  ;;  %v1053_v40 = vld [vmem:[#allocation2 + $0x2c] sm:$0x1]  ;;  %v642_v51 = vor.u32 %v640_v15, %v639_v23 }
  0x9f   : > { %v13682_v35 = vld [vmem:[#allocation3 + $0x50] ss:$36 sps:$4 sm:$0xff]   ;;  %v1157_v39 = vsel %vm14572_vm10, %v1152_v30, %v1156_v7  ;;  %1981 = vst [vmem:[#allocation3 + $0xc0] sm:$0xf] %v1657_v38  ;;  %v644_v42 = vrot.slane %v639_v23, 4  ;;  %v648_v43 = vrot.slane %v646_v25, 7  ;;  %5266 = vmatprep.mubr.bf16.mxu1 %v13680_v34 }
  0xa0   : > { %v524_v41 = vld [vmem:[#allocation2 + $0x30] sm:$0x8]  ;;  %v3618_v44 = vld [vmem:[#allocation3 + $0xb4] sm:$0xff]  ;;  %v1164_v46 = vshll.u32 %v1053_v40, 16  ;;  %1516 = vst [vmem:[#allocation3 + $0x98] sm:$0xf] %v1157_v39  ;;  %5267 = vmatmul.mubr.bf16.gmra.mxu1 %v13682_v35 }
  0xa1   : > { %v13683_v45 = vld [vmem:[#allocation3 + $0x94] ss:$36 sps:$4 sm:$0xff]   ;;  %v11864_v47 = vrot.slane %v1637_v36, 11  ;;  %v632_v48 = vshrl.u32 %v524_v41, 16  ;;  %v11912_v52 = vcombine.low %v3613_v29, %v3618_v44  ;;  %v651_v53 = vor.u32 %v649_v26, %v648_v43  ;;  %v405_v55 = vld [vmem:[#allocation2 + $0x3c] sm:$0x1] }
  0xa2   : > { %v352_v54 = vsel %vm14536_vm2, 0, %v351_v27  ;;  %v1054_v56 = vld [vmem:[#allocation2 + $0x34] sm:$0xf]  ;;  %v13724_v57 = vld [vmem:[#allocation7 + $0x158] sm:$0xff]   ;;  %5113 = vmatprep.mubr.bf16.mxu0 %v13683_v45  ;;  %v1166_v58 = vrot.slane %v1164_v46, 5  ;;  %v406_v61 = vsel %vm14545_vm8, 0, %v405_v55 }
  0xa3   : > { %v1648_v59 = vsel %vm14551_vm9, %v11864_v47, %v1647_v37  ;;  %v11849_v60 = vrot.slane %v632_v48, 11  ;;  %353 = vst [vmem:[#allocation2 + $0x40] sm:$0x8] %v352_v54  ;;  %v1055_v62 = vld [vmem:[#allocation2 + $0x38] sm:$0xf]  ;;  %5114 = vmatmul.mubr.bf16.gmra.mxu0 %v11912_v52  ;;  %v652_v0 = vsel %vm14551_vm9, %v644_v42, %v651_v53  ;;  %v1169_v1 = vshrl.u32 %v1054_v56, 16  ;;  %12760 = vmatprep.subr.bf16.mxu0 %v13724_v57 }
  0xa4   : > { %v13725_v63 = vld [vmem:[#allocation7 + $0x118] sm:$0xff]   ;;  %1980 = vst [vmem:[#allocation3 + $0x9c] sm:$0xf] %v1648_v59  ;;  %407 = vst [vmem:[#allocation2 + $0x3c] sm:$0x1] %v406_v61  ;;  %v1172_v2 = vshll.u32 %v1054_v56, 16  ;;  %v1167_v6 = vsel %vm14572_vm10, %v1162_v31, %v1166_v58 }
  0xa5   : > { %v1178_v3 = vshll.u32 %v1055_v62, 16  ;;  %v1554_v4 = vld [vmem:[#allocation2 + $0x44] sm:$0xf]  ;;  %v468_v5 = vld [vmem:[%s14525_s19 + $0x48] sm:$0xff]   ;;  %v643_v7 = vsel %vm14551_vm9, %v11849_v60, %v642_v51  ;;  %956 = vst [vmem:[#allocation3 + $0xfc] sm:$0xf] %v652_v0  ;;  %12761 = vmatpush3.bf16.msra.mxu0 %v13725_v63 }
  0xa6   : > { %v1182_v8 = vshrl.u32 %v1055_v62, 16  ;;  %v1555_v9 = vld [vmem:[#allocation2 + $0x48] sm:$0xf]  ;;  %v1664_v10 = vshrl.u32 %v1554_v4, 16  ;;  %v528_v11 = vld [vmem:[#allocation2 + $0x44] sm:$0xf] }
  0xa7   : > { %501 = vst [vmem:[#allocation2 + $0xa4] sm:$0xff] %v468_v5   ;;  %1517 = vst [vmem:[#allocation3 + $0xbc] sm:$0xf] %v1167_v6  ;;  %v1171_v12 = vrot.slane %v1169_v1, 4  ;;  %v1174_v13 = vrot.slane %v1172_v2, 5  ;;  %v1180_v14 = vrot.slane %v1178_v3, 5 }
  0xa8   : > { %955 = vst [vmem:[#allocation3 + $0xd8] sm:$0xf] %v643_v7  ;;  %v1667_v15 = vshll.u32 %v1554_v4, 16  ;;  %v14655_v16 = vld [vmem:[#allocation2 + $0x48] sm:$0xf]  ;;  %v1184_v17 = vrot.slane %v1182_v8, 4 }
  0xa9   : > { %v1666_v18 = vrot.slane %v1664_v10, 7  ;;  %v1673_v19 = vshrl.u32 %v1555_v9, 16  ;;  %v1676_v20 = vshll.u32 %v1555_v9, 16  ;;  %v989_v21 = vld [vmem:[#allocation2 + $0x44] sm:$0xf]  ;;  %v1175_v22 = vor.u32 %v1174_v13, %v1171_v12  ;;  %v470_v27 = vld [vmem:[%s14525_s19 + $0x50] sm:$0xff]  }
  0xaa   : > { %v659_v23 = vshrl.u32 %v528_v11, 16  ;;  %v662_v25 = vshll.u32 %v528_v11, 16  ;;  %v990_v26 = vld [vmem:[#allocation2 + $0x48] sm:$0xf]  ;;  %1021 = vst [vmem:[#allocation3 + $0x124] sm:$0xf] %v989_v21  ;;  %v1185_v28 = vor.u32 %v1184_v17, %v1180_v14 }
  0xab   : > { %v1671_v29 = vrot.slane %v1666_v18, 4  ;;  %v1675_v30 = vrot.slane %v1673_v19, 7  ;;  %v668_v31 = vshrl.u32 %v14655_v16, 16  ;;  %1022 = vst [vmem:[#allocation3 + $0x148] sm:$0xf] %v990_v26  ;;  %503 = vst [vmem:[#allocation2 + $0xb4] sm:$0xff] %v470_v27   ;;  %v1669_v35 = vor.u32 %v1667_v15, %v1666_v18 }
  0xac   : > { %v1176_v32 = vrot.slane %v1175_v22, 4  ;;  %v1553_v34 = vld [vmem:[#allocation2 + $0x40] sm:$0x8]  ;;  %v661_v37 = vrot.slane %v659_v23, 7  ;;  %v354_v38 = vld [vmem:[#allocation2 + $0x50] sm:$0x8] }
  0xad   : > { %v527_v36 = vld [vmem:[#allocation2 + $0x40] sm:$0x8]  ;;  %v1056_v40 = vld [vmem:[#allocation2 + $0x3c] sm:$0x1]  ;;  %v1186_v39 = vrot.slane %v1185_v28, 4  ;;  %v1659_v41 = vshrl.u32 %v1553_v34, 16  ;;  %v1678_v42 = vor.u32 %v1676_v20, %v1675_v30 }
  0xae   : > { %v654_v43 = vshrl.u32 %v527_v36, 16  ;;  %v408_v44 = vld [vmem:[#allocation2 + $0x4c] sm:$0x1]  ;;  %v3628_v45 = vld [vmem:[#allocation3 + $0xfc] sm:$0xff]  ;;  %v1181_v46 = vsel %vm14572_vm10, %v1176_v32, %v1180_v14  ;;  %v1188_v47 = vshll.u32 %v1056_v40, 16  ;;  %v664_v48 = vor.u32 %v662_v25, %v661_v37  ;;  %v13736_v53 = vld [vmem:[#allocation7 + $0x150] sm:$0xff]  }
  0xaf   : > { %v666_v51 = vrot.slane %v661_v37, 4  ;;  %v1057_v52 = vld [vmem:[#allocation2 + $0x44] sm:$0xf]  ;;  %v13685_v54 = vld [vmem:[#allocation3 + $0x9c] ss:$36 sps:$4 sm:$0xff]   ;;  %v11865_v56 = vrot.slane %v1659_v41, 11  ;;  %v1679_v57 = vsel %vm14551_vm9, %v1671_v29, %v1678_v42  ;;  %12762 = vmatprep.subr.bf16.mxu0 %v13736_v53 }
  0xb0   : > { %v13687_v55 = vld [vmem:[#allocation3 + $0x98] ss:$36 sps:$4 sm:$0xff]   ;;  %1518 = vst [vmem:[#allocation3 + $0xe0] sm:$0xf] %v1181_v46  ;;  %v1190_v60 = vrot.slane %v1188_v47, 5  ;;  %v11850_v61 = vrot.slane %v654_v43, 11  ;;  %5274 = vmatprep.mubr.bf16.mxu1 %v13685_v54 }
  0xb1   : > { %v3623_v58 = vld [vmem:[#allocation3 + $0xd8] sm:$0xff]  ;;  %1983 = vst [vmem:[#allocation3 + $0x108] sm:$0xf] %v1679_v57  ;;  %v670_v62 = vrot.slane %v668_v31, 7  ;;  %v1670_v63 = vsel %vm14551_vm9, %v11865_v56, %v1669_v35  ;;  %v671_v1 = vshll.u32 %v14655_v16, 16  ;;  %v355_v2 = vsel %vm14536_vm2, 0, %v354_v38  ;;  %5275 = vmatmul.mubr.bf16.gmra.mxu1 %v13687_v55 }
  0xb2   : > { %v13690_v59 = vld [vmem:[#allocation3 + $0xdc] ss:$36 sps:$4 sm:$0xff]   ;;  %v11921_v0 = vcombine.low %v3623_v58, %v3628_v45  ;;  %v1058_v3 = vld [vmem:[#allocation2 + $0x48] sm:$0xf]  ;;  %v1557_v4 = vld [vmem:[#allocation2 + $0x54] sm:$0xf]  ;;  %v1191_v5 = vsel %vm14572_vm10, %v1186_v39, %v1190_v60  ;;  %v665_v6 = vsel %vm14551_vm9, %v11850_v61, %v664_v48 }
  0xb3   : > { %5121 = vmatprep.mubr.bf16.mxu0 %v13690_v59  ;;  %1982 = vst [vmem:[#allocation3 + $0xe4] sm:$0xf] %v1670_v63  ;;  %356 = vst [vmem:[#allocation2 + $0x50] sm:$0x8] %v355_v2  ;;  %v409_v7 = vsel %vm14545_vm8, 0, %v408_v44  ;;  %v1193_v8 = vshrl.u32 %v1057_v52, 16  ;;  %v673_v10 = vor.u32 %v671_v1, %v670_v62 }
  0xb4   : > { %v1558_v9 = vld [vmem:[#allocation2 + $0x58] sm:$0xf]  ;;  %1519 = vst [vmem:[#allocation3 + $0x104] sm:$0xf] %v1191_v5  ;;  %5122 = vmatmul.mubr.bf16.gmra.mxu0 %v11921_v0  ;;  %957 = vst [vmem:[#allocation3 + $0x120] sm:$0xf] %v665_v6 }
  0xb5   : > { %410 = vst [vmem:[#allocation2 + $0x4c] sm:$0x1] %v409_v7  ;;  %v1196_v11 = vshll.u32 %v1057_v52, 16  ;;  %v1202_v12 = vshll.u32 %v1058_v3, 16  ;;  %v1206_v13 = vshrl.u32 %v1058_v3, 16  ;;  %v13737_v14 = vld [vmem:[#allocation7 + $0x110] sm:$0xff]   ;;  %v674_v19 = vsel %vm14551_vm9, %v666_v51, %v673_v10 }
  0xb6   : > { %v1195_v15 = vrot.slane %v1193_v8, 4  ;;  %v1686_v16 = vshrl.u32 %v1557_v4, 16  ;;  %v1689_v17 = vshll.u32 %v1557_v4, 16  ;;  %v1695_v18 = vshrl.u32 %v1558_v9, 16  ;;  %12763 = vmatpush3.bf16.msra.mxu0 %v13737_v14  ;;  %v472_v23 = vld [vmem:[%s14525_s19 + $0x58] sm:$0xff]   ;;  %v474_v29 = vld [vmem:[%s14525_s19 + $0x60] sm:$0xff]  }
  0xb7   : > { %v1198_v20 = vrot.slane %v1196_v11, 5  ;;  %v1204_v21 = vrot.slane %v1202_v12, 5  ;;  %v1208_v22 = vrot.slane %v1206_v13, 4  ;;  %958 = vst [vmem:[#allocation3 + $0x144] sm:$0xf] %v674_v19  ;;  %v1698_v27 = vshll.u32 %v1558_v9, 16 }
  0xb8   : > { %v1688_v25 = vrot.slane %v1686_v16, 7  ;;  %v1697_v26 = vrot.slane %v1695_v18, 7  ;;  %v531_v28 = vld [vmem:[#allocation2 + $0x54] sm:$0xf]  ;;  %505 = vst [vmem:[#allocation2 + $0xc4] sm:$0xff] %v472_v23   ;;  %507 = vst [vmem:[#allocation2 + $0xd4] sm:$0xff] %v474_v29  }
  0xb9   : > { %v1199_v30 = vor.u32 %v1198_v20, %v1195_v15  ;;  %v1209_v31 = vor.u32 %v1208_v22, %v1204_v21  ;;  %v532_v32 = vld [vmem:[#allocation2 + $0x58] sm:$0xf]  ;;  %v681_v34 = vshrl.u32 %v531_v28, 16  ;;  %v684_v35 = vshll.u32 %v531_v28, 16  ;;  %v991_v36 = vld [vmem:[#allocation2 + $0x54] sm:$0xf] }
  0xba   : > { %v1693_v37 = vrot.slane %v1688_v25, 4  ;;  %v1700_v38 = vor.u32 %v1698_v27, %v1697_v26  ;;  %v690_v40 = vshrl.u32 %v532_v32, 16  ;;  %v992_v39 = vld [vmem:[#allocation2 + $0x58] sm:$0xf]  ;;  %1023 = vst [vmem:[#allocation3 + $0x16c] sm:$0xf] %v991_v36  ;;  %v1691_v51 = vor.u32 %v1689_v17, %v1688_v25 }
  0xbb   : > { %v357_v41 = vld [vmem:[#allocation2 + $0x60] sm:$0x8]  ;;  %v1200_v42 = vrot.slane %v1199_v30, 4  ;;  %v1210_v43 = vrot.slane %v1209_v31, 4  ;;  %v1556_v44 = vld [vmem:[#allocation2 + $0x50] sm:$0x8] }
  0xbc   : > { %v683_v45 = vrot.slane %v681_v34, 7  ;;  %1024 = vst [vmem:[#allocation3 + $0x190] sm:$0xf] %v992_v39  ;;  %v13692_v46 = vld [vmem:[#allocation3 + $0xe4] ss:$36 sps:$4 sm:$0xff]   ;;  %v1681_v48 = vshrl.u32 %v1556_v44, 16  ;;  %v1701_v52 = vsel %vm14551_vm9, %v1693_v37, %v1700_v38 }
  0xbd   : > { %v13694_v47 = vld [vmem:[#allocation3 + $0xe0] ss:$36 sps:$4 sm:$0xff]   ;;  %v1059_v54 = vld [vmem:[#allocation2 + $0x4c] sm:$0x1]  ;;  %v1205_v55 = vsel %vm14572_vm10, %v1200_v42, %v1204_v21  ;;  %1985 = vst [vmem:[#allocation3 + $0x150] sm:$0xf] %v1701_v52  ;;  %5282 = vmatprep.mubr.bf16.mxu1 %v13692_v46 }
  0xbe   : > { %v3633_v53 = vld [vmem:[#allocation3 + $0x120] sm:$0xff]  ;;  %v530_v56 = vld [vmem:[#allocation2 + $0x50] sm:$0x8]  ;;  %v686_v57 = vor.u32 %v684_v35, %v683_v45  ;;  %v688_v58 = vrot.slane %v683_v45, 4  ;;  %v1212_v59 = vshll.u32 %v1059_v54, 16  ;;  %v11866_v60 = vrot.slane %v1681_v48, 11  ;;  %5283 = vmatmul.mubr.bf16.gmra.mxu1 %v13694_v47 }
  0xbf   : > { %1520 = vst [vmem:[#allocation3 + $0x128] sm:$0xf] %v1205_v55  ;;  %v676_v61 = vshrl.u32 %v530_v56, 16  ;;  %v692_v62 = vrot.slane %v690_v40, 7  ;;  %v411_v63 = vld [vmem:[#allocation2 + $0x5c] sm:$0x1] }
  0xc0   : > { %v3638_v0 = vld [vmem:[#allocation3 + $0x144] sm:$0xff]  ;;  %v693_v2 = vshll.u32 %v532_v32, 16  ;;  %v358_v3 = vsel %vm14536_vm2, 0, %v357_v41  ;;  %v412_v4 = vsel %vm14545_vm8, 0, %v411_v63  ;;  %v1214_v5 = vrot.slane %v1212_v59, 5  ;;  %v13750_v39 = vld [vmem:[#allocation7 + $0x1f8] sm:$0xff]  }
  0xc1   : > { %v13695_v1 = vld [vmem:[#allocation3 + $0x124] ss:$36 sps:$4 sm:$0xff]   ;;  %v1692_v6 = vsel %vm14551_vm9, %v11866_v60, %v1691_v51  ;;  %v11930_v7 = vcombine.low %v3633_v53, %v3638_v0  ;;  %v11851_v8 = vrot.slane %v676_v61, 11  ;;  %359 = vst [vmem:[#allocation2 + $0x60] sm:$0x8] %v358_v3  ;;  %12864 = vmatprep.subr.bf16.mxu1 %v13750_v39  ;;  %s14272_s14 = scalar_lea.vmem %s14271_s13, 8192 }
  0xc2   : > { %413 = vst [vmem:[#allocation2 + $0x5c] sm:$0x1] %v412_v4  ;;  %v1060_v9 = vld [vmem:[#allocation2 + $0x54] sm:$0xf]  ;;  %v1061_v10 = vld [vmem:[#allocation2 + $0x58] sm:$0xf]  ;;  %5129 = vmatprep.mubr.bf16.mxu0 %v13695_v1  ;;  %v695_v11 = vor.u32 %v693_v2, %v692_v62  ;;  %v1215_v17 = vsel %vm14572_vm10, %v1210_v43, %v1214_v5 }
  0xc3   : > { %1984 = vst [vmem:[#allocation3 + $0x12c] sm:$0xf] %v1692_v6  ;;  %v1217_v12 = vshrl.u32 %v1060_v9, 16  ;;  %v1220_v13 = vshll.u32 %v1060_v9, 16  ;;  %v1226_v14 = vshll.u32 %v1061_v10, 16  ;;  %v13748_v16 = vld [vmem:[#allocation7 + $0x148] sm:$0xff]   ;;  %5130 = vmatmul.mubr.bf16.gmra.mxu0 %v11930_v7  ;;  %v687_v18 = vsel %vm14551_vm9, %v11851_v8, %v686_v57 }
  0xc4   : > { %v1560_v15 = vld [vmem:[#allocation2 + $0x64] sm:$0xf]  ;;  %v1230_v19 = vshrl.u32 %v1061_v10, 16  ;;  %v1561_v20 = vld [vmem:[#allocation2 + $0x68] sm:$0xf]  ;;  %v696_v23 = vsel %vm14551_vm9, %v688_v58, %v695_v11  ;;  %12764 = vmatprep.subr.bf16.mxu0 %v13748_v16 }
  0xc5   : > { %v1708_v21 = vshrl.u32 %v1560_v15, 16  ;;  %v534_v22 = vld [vmem:[#allocation2 + $0x64] sm:$0xf]  ;;  %1521 = vst [vmem:[#allocation3 + $0x14c] sm:$0xf] %v1215_v17  ;;  %v1219_v25 = vrot.slane %v1217_v12, 4 }
  0xc6   : > { %959 = vst [vmem:[#allocation3 + $0x168] sm:$0xf] %v687_v18  ;;  %v1222_v26 = vrot.slane %v1220_v13, 5  ;;  %v1228_v27 = vrot.slane %v1226_v14, 5  ;;  %v13749_v28 = vld [vmem:[#allocation7 + $0x108] sm:$0xff]   ;;  %v1232_v29 = vrot.slane %v1230_v19, 4 }
  0xc7   : > { %960 = vst [vmem:[#allocation3 + $0x18c] sm:$0xf] %v696_v23  ;;  %v1710_v30 = vrot.slane %v1708_v21, 7  ;;  %v1711_v31 = vshll.u32 %v1560_v15, 16  ;;  %v1717_v32 = vshrl.u32 %v1561_v20, 16  ;;  %v1720_v36 = vshll.u32 %v1561_v20, 16  ;;  %12765 = vmatpush3.bf16.msra.mxu0 %v13749_v28 }
  0xc8   : > { %v993_v34 = vld [vmem:[#allocation2 + $0x64] sm:$0xf]  ;;  %v1223_v35 = vor.u32 %v1222_v26, %v1219_v25  ;;  %v703_v37 = vshrl.u32 %v534_v22, 16  ;;  %v706_v38 = vshll.u32 %v534_v22, 16  ;;  %v994_v40 = vld [vmem:[#allocation2 + $0x68] sm:$0xf]  ;;  %v1233_v41 = vor.u32 %v1232_v29, %v1228_v27 }
  0xc9   : > { %1025 = vst [vmem:[#allocation3 + $0x1b4] sm:$0xf] %v993_v34  ;;  %v1715_v42 = vrot.slane %v1710_v30, 4  ;;  %v1719_v43 = vrot.slane %v1717_v32, 7  ;;  %1026 = vst [vmem:[#allocation3 + $0x1d8] sm:$0xf] %v994_v40  ;;  %v1713_v47 = vor.u32 %v1711_v31, %v1710_v30 }
  0xca   : > { %v1062_v44 = vld [vmem:[#allocation2 + $0x5c] sm:$0x1]  ;;  %v1224_v45 = vrot.slane %v1223_v35, 4  ;;  %v1559_v46 = vld [vmem:[#allocation2 + $0x60] sm:$0x8]  ;;  %v14694_v51 = vrot.slane %v703_v37, 7 }
  0xcb   : > { %v535_v48 = vld [vmem:[#allocation2 + $0x68] sm:$0xf]  ;;  %v1234_v52 = vrot.slane %v1233_v41, 4  ;;  %v1236_v53 = vshll.u32 %v1062_v44, 16  ;;  %v1703_v54 = vshrl.u32 %v1559_v46, 16  ;;  %v1722_v55 = vor.u32 %v1720_v36, %v1719_v43  ;;  %v13751_v35 = vld [vmem:[#allocation7 + $0x1b8] sm:$0xff]  }
  0xcc   : > { %v533_v56 = vld [vmem:[#allocation2 + $0x60] sm:$0x8]  ;;  %v360_v57 = vld [vmem:[#allocation2 + $0x70] sm:$0x8]  ;;  %v414_v58 = vld [vmem:[#allocation2 + $0x6c] sm:$0x1]  ;;  %v1229_v59 = vsel %vm14572_vm10, %v1224_v45, %v1228_v27  ;;  %v708_v61 = vor.u32 %v706_v38, %v14694_v51  ;;  %12865 = vmatpush3.bf16.msra.mxu1 %v13751_v35 }
  0xcd   : > { %v698_v60 = vshrl.u32 %v533_v56, 16  ;;  %v710_v62 = vrot.slane %v14694_v51, 4  ;;  %v1063_v63 = vld [vmem:[#allocation2 + $0x64] sm:$0xf]  ;;  %v1064_v0 = vld [vmem:[#allocation2 + $0x68] sm:$0xf]  ;;  %v1723_v4 = vsel %vm14551_vm9, %v1715_v42, %v1722_v55 }
  0xce   : > { %v13697_v1 = vld [vmem:[#allocation3 + $0x12c] ss:$36 sps:$4 sm:$0xff]   ;;  %v1238_v3 = vrot.slane %v1236_v53, 5  ;;  %1522 = vst [vmem:[#allocation3 + $0x170] sm:$0xf] %v1229_v59  ;;  %v11867_v8 = vrot.slane %v1703_v54, 11 }
  0xcf   : > { %v13699_v2 = vld [vmem:[#allocation3 + $0x128] ss:$36 sps:$4 sm:$0xff]   ;;  %1987 = vst [vmem:[#allocation3 + $0x198] sm:$0xf] %v1723_v4  ;;  %v11852_v9 = vrot.slane %v698_v60, 11  ;;  %5290 = vmatprep.mubr.bf16.mxu1 %v13697_v1  ;;  %v712_v12 = vshrl.u32 %v535_v48, 16 }
  0xd0   : > { %v3643_v5 = vld [vmem:[#allocation3 + $0x168] sm:$0xff]  ;;  %v1239_v10 = vsel %vm14572_vm10, %v1234_v52, %v1238_v3  ;;  %v715_v13 = vshll.u32 %v535_v48, 16  ;;  %v14704_v14 = vld [vmem:[#allocation2 + $0x74] sm:$0xf]  ;;  %v1564_v15 = vld [vmem:[#allocation2 + $0x78] sm:$0xf]  ;;  %5291 = vmatmul.mubr.bf16.gmra.mxu1 %v13699_v2  ;;  %v1714_v16 = vsel %vm14551_vm9, %v11867_v8, %v1713_v47 }
  0xd1   : > { %v3648_v6 = vld [vmem:[#allocation3 + $0x18c] sm:$0xff]  ;;  %1523 = vst [vmem:[#allocation3 + $0x194] sm:$0xf] %v1239_v10  ;;  %v709_v17 = vsel %vm14551_vm9, %v11852_v9, %v708_v61  ;;  %v361_v18 = vsel %vm14536_vm2, 0, %v360_v57  ;;  %v415_v19 = vsel %vm14545_vm8, 0, %v414_v58  ;;  %v714_v20 = vrot.slane %v712_v12, 7 }
  0xd2   : > { %v13702_v7 = vld [vmem:[#allocation3 + $0x16c] ss:$36 sps:$4 sm:$0xff]   ;;  %v11939_v11 = vcombine.low %v3643_v5, %v3648_v6  ;;  %1986 = vst [vmem:[#allocation3 + $0x174] sm:$0xf] %v1714_v16  ;;  %961 = vst [vmem:[#allocation3 + $0x1b0] sm:$0xf] %v709_v17 }
  0xd3   : > { %5137 = vmatprep.mubr.bf16.mxu0 %v13702_v7  ;;  %362 = vst [vmem:[#allocation2 + $0x70] sm:$0x8] %v361_v18  ;;  %416 = vst [vmem:[#allocation2 + $0x6c] sm:$0x1] %v415_v19  ;;  %v1241_v21 = vshrl.u32 %v1063_v63, 16  ;;  %v1244_v22 = vshll.u32 %v1063_v63, 16  ;;  %v717_v29 = vor.u32 %v715_v13, %v714_v20 }
  0xd4   : > { %5138 = vmatmul.mubr.bf16.gmra.mxu0 %v11939_v11  ;;  %v1250_v23 = vshll.u32 %v1064_v0, 16  ;;  %v1254_v25 = vshrl.u32 %v1064_v0, 16  ;;  %v1730_v26 = vshrl.u32 %v14704_v14, 16  ;;  %v1733_v27 = vshll.u32 %v14704_v14, 16  ;;  %v537_v34 = vld [vmem:[#allocation2 + $0x74] sm:$0xf] }
  0xd5   : > { %v1739_v28 = vshrl.u32 %v1564_v15, 16  ;;  %v1243_v30 = vrot.slane %v1241_v21, 4  ;;  %v1246_v31 = vrot.slane %v1244_v22, 5  ;;  %v1742_v40 = vshll.u32 %v1564_v15, 16  ;;  %v538_v39 = vld [vmem:[#allocation2 + $0x78] sm:$0xf] }
  0xd6   : > { %v1252_v32 = vrot.slane %v1250_v23, 5  ;;  %v1256_v36 = vrot.slane %v1254_v25, 4  ;;  %v1732_v37 = vrot.slane %v1730_v26, 7  ;;  %v718_v41 = vsel %vm14551_vm9, %v710_v62, %v717_v29  ;;  %v995_v45 = vld [vmem:[#allocation2 + $0x74] sm:$0xf]  ;;  %v476_v59 = vld [vmem:[%s14525_s19 + $0x68] sm:$0xff]  }
  0xd7   : > { %v1741_v38 = vrot.slane %v1739_v28, 7  ;;  %v1247_v42 = vor.u32 %v1246_v31, %v1243_v30  ;;  %v725_v43 = vshrl.u32 %v537_v34, 16  ;;  %v728_v44 = vshll.u32 %v537_v34, 16  ;;  %v996_v46 = vld [vmem:[#allocation2 + $0x78] sm:$0xf]  ;;  %v13752_v54 = vld [vmem:[#allocation7 + $0x1f0] sm:$0xff]  }
  0xd8   : > { %962 = vst [vmem:[#allocation3 + $0x1d4] sm:$0xf] %v718_v41  ;;  %v1257_v47 = vor.u32 %v1256_v36, %v1252_v32  ;;  %v1737_v48 = vrot.slane %v1732_v37, 4  ;;  %1027 = vst [vmem:[#allocation3 + $0x1fc] sm:$0xf] %v995_v45  ;;  %v734_v57 = vshrl.u32 %v538_v39, 16  ;;  %12866 = vmatprep.subr.bf16.mxu1 %v13752_v54  ;;  %v1735_v4 = vor.u32 %v1733_v27, %v1732_v37 }
  0xd9   : > { %v1744_v51 = vor.u32 %v1742_v40, %v1741_v38  ;;  %1028 = vst [vmem:[#allocation3 + $0x220] sm:$0xf] %v996_v46  ;;  %v363_v52 = vld [vmem:[#allocation2 + $0x80] sm:$0x8]  ;;  %v417_v53 = vld [vmem:[#allocation2 + $0x7c] sm:$0x1] }
  0xda   : > { %v1248_v55 = vrot.slane %v1247_v42, 4  ;;  %v727_v56 = vrot.slane %v725_v43, 7  ;;  %v737_v58 = vshll.u32 %v538_v39, 16  ;;  %v13704_v60 = vld [vmem:[#allocation3 + $0x174] ss:$36 sps:$4 sm:$0xff]   ;;  %v1258_v62 = vrot.slane %v1257_v47, 4 }
  0xdb   : > { %v13706_v61 = vld [vmem:[#allocation3 + $0x170] ss:$36 sps:$4 sm:$0xff]   ;;  %v1745_v63 = vsel %vm14551_vm9, %v1737_v48, %v1744_v51  ;;  %509 = vst [vmem:[#allocation2 + $0xe4] sm:$0xff] %v476_v59   ;;  %v1065_v1 = vld [vmem:[#allocation2 + $0x6c] sm:$0x1]  ;;  %5298 = vmatprep.mubr.bf16.mxu1 %v13704_v60  ;;  %v736_v9 = vrot.slane %v734_v57, 7 }
  0xdc   : > { %v3653_v0 = vld [vmem:[#allocation3 + $0x1b0] sm:$0xff]  ;;  %v1253_v2 = vsel %vm14572_vm10, %v1248_v55, %v1252_v32  ;;  %1989 = vst [vmem:[#allocation3 + $0x1e0] sm:$0xf] %v1745_v63  ;;  %v732_v5 = vrot.slane %v727_v56, 4  ;;  %v1260_v6 = vshll.u32 %v1065_v1, 16  ;;  %v364_v10 = vsel %vm14536_vm2, 0, %v363_v52  ;;  %5299 = vmatmul.mubr.bf16.gmra.mxu1 %v13706_v61 }
  0xdd   : > { %v1562_v3 = vld [vmem:[#allocation2 + $0x70] sm:$0x8]  ;;  %1524 = vst [vmem:[#allocation3 + $0x1b8] sm:$0xf] %v1253_v2  ;;  %v730_v12 = vor.u32 %v728_v44, %v727_v56  ;;  %365 = vst [vmem:[#allocation2 + $0x80] sm:$0x8] %v364_v10  ;;  %v739_v18 = vor.u32 %v737_v58, %v736_v9 }
  0xde   : > { %v1725_v7 = vshrl.u32 %v1562_v3, 16  ;;  %v536_v8 = vld [vmem:[#allocation2 + $0x70] sm:$0x8]  ;;  %v418_v13 = vsel %vm14545_vm8, 0, %v417_v53  ;;  %v1066_v14 = vld [vmem:[#allocation2 + $0x74] sm:$0xf] }
  0xdf   : > { %v720_v11 = vshrl.u32 %v536_v8, 16  ;;  %v1067_v15 = vld [vmem:[#allocation2 + $0x78] sm:$0xf]  ;;  %v1262_v16 = vrot.slane %v1260_v6, 5  ;;  %419 = vst [vmem:[#allocation2 + $0x7c] sm:$0x1] %v418_v13  ;;  %v740_v31 = vsel %vm14551_vm9, %v732_v5, %v739_v18 }
  0xe0   : > { %v11868_v17 = vrot.slane %v1725_v7, 11  ;;  %v1265_v19 = vshrl.u32 %v1066_v14, 16  ;;  %v1566_v20 = vld [vmem:[#allocation2 + $0x84] sm:$0xf]  ;;  %v13757_v21 = vld [vmem:[#allocation7 + $0x1b0] sm:$0xff]   ;;  %v1268_v26 = vshll.u32 %v1066_v14, 16 }
  0xe1   : > { %v3658_v22 = vld [vmem:[#allocation3 + $0x1d4] sm:$0xff]  ;;  %v11853_v25 = vrot.slane %v720_v11, 11  ;;  %v1274_v27 = vshll.u32 %v1067_v15, 16  ;;  %v1263_v28 = vsel %vm14572_vm10, %v1258_v62, %v1262_v16  ;;  %v1567_v32 = vld [vmem:[#allocation2 + $0x88] sm:$0xf]  ;;  %12867 = vmatpush3.bf16.msra.mxu1 %v13757_v21  ;;  %v1278_v42 = vshrl.u32 %v1067_v15, 16 }
  0xe2   : > { %v13707_v23 = vld [vmem:[#allocation3 + $0x1b4] ss:$36 sps:$4 sm:$0xff]   ;;  %v1736_v29 = vsel %vm14551_vm9, %v11868_v17, %v1735_v4  ;;  %v11948_v30 = vcombine.low %v3653_v0, %v3658_v22  ;;  %v14733_v34 = vld [vmem:[#allocation2 + $0x84] sm:$0xf]  ;;  %v14735_v35 = vld [vmem:[#allocation2 + $0x88] sm:$0xf] }
  0xe3   : > { %5145 = vmatprep.mubr.bf16.mxu0 %v13707_v23  ;;  %1525 = vst [vmem:[#allocation3 + $0x1dc] sm:$0xf] %v1263_v28  ;;  %1988 = vst [vmem:[#allocation3 + $0x1bc] sm:$0xf] %v1736_v29  ;;  %v731_v36 = vsel %vm14551_vm9, %v11853_v25, %v730_v12  ;;  %v1267_v37 = vrot.slane %v1265_v19, 4  ;;  %v1270_v38 = vrot.slane %v1268_v26, 5 }
  0xe4   : > { %964 = vst [vmem:[#allocation3 + $0x21c] sm:$0xf] %v740_v31  ;;  %v1276_v40 = vrot.slane %v1274_v27, 5  ;;  %v997_v39 = vld [vmem:[#allocation2 + $0x84] sm:$0xf]  ;;  %v13759_v41 = vld [vmem:[#allocation7 + $0x1e8] sm:$0xff]   ;;  %5146 = vmatmul.mubr.bf16.gmra.mxu0 %v11948_v30 }
  0xe5   : > { %963 = vst [vmem:[#allocation3 + $0x1f8] sm:$0xf] %v731_v36  ;;  %v1752_v43 = vshrl.u32 %v1566_v20, 16  ;;  %v1755_v44 = vshll.u32 %v1566_v20, 16  ;;  %v1761_v45 = vshrl.u32 %v1567_v32, 16  ;;  %v1271_v47 = vor.u32 %v1270_v38, %v1267_v37  ;;  %12868 = vmatprep.subr.bf16.mxu1 %v13759_v41  ;;  %v13760_v53 = vld [vmem:[#allocation7 + $0x1a8] sm:$0xff]  }
  0xe6   : > { %v998_v46 = vld [vmem:[#allocation2 + $0x88] sm:$0xf]  ;;  %1029 = vst [vmem:[#allocation3 + $0x244] sm:$0xf] %v997_v39  ;;  %v1764_v48 = vshll.u32 %v1567_v32, 16  ;;  %v747_v51 = vshrl.u32 %v14733_v34, 16  ;;  %12869 = vmatpush3.bf16.msra.mxu1 %v13760_v53 }
  0xe7   : > { %v750_v52 = vshll.u32 %v14733_v34, 16  ;;  %1030 = vst [vmem:[#allocation3 + $0x268] sm:$0xf] %v998_v46  ;;  %v1280_v54 = vrot.slane %v1278_v42, 4  ;;  %v1565_v55 = vld [vmem:[#allocation2 + $0x80] sm:$0x8] }
  0xe8   : > { %v1754_v56 = vrot.slane %v1752_v43, 7  ;;  %v1763_v57 = vrot.slane %v1761_v45, 7  ;;  %v756_v58 = vshrl.u32 %v14735_v35, 16  ;;  %v1068_v59 = vld [vmem:[#allocation2 + $0x7c] sm:$0x1]  ;;  %v1272_v60 = vrot.slane %v1271_v47, 4 }
  0xe9   : > { %v1747_v61 = vshrl.u32 %v1565_v55, 16  ;;  %v539_v62 = vld [vmem:[#allocation2 + $0x80] sm:$0x8]  ;;  %v1281_v63 = vor.u32 %v1280_v54, %v1276_v40  ;;  %v1284_v0 = vshll.u32 %v1068_v59, 16  ;;  %v366_v3 = vld [vmem:[#allocation2 + $0x90] sm:$0x8] }
  0xea   : > { %v1757_v1 = vor.u32 %v1755_v44, %v1754_v56  ;;  %v1759_v2 = vrot.slane %v1754_v56, 4  ;;  %v420_v4 = vld [vmem:[#allocation2 + $0x8c] sm:$0x1]  ;;  %v1277_v5 = vsel %vm14572_vm10, %v1272_v60, %v1276_v40  ;;  %v1766_v7 = vor.u32 %v1764_v48, %v1763_v57  ;;  %v1069_v9 = vld [vmem:[#allocation2 + $0x84] sm:$0xf]  ;;  %v478_v40 = vld [vmem:[%s14525_s19 + $0x70] sm:$0xff]  }
  0xeb   : > { %v11869_v6 = vrot.slane %v1747_v61, 11  ;;  %v742_v8 = vshrl.u32 %v539_v62, 16  ;;  %v1070_v10 = vld [vmem:[#allocation2 + $0x88] sm:$0xf]  ;;  %v13709_v11 = vld [vmem:[#allocation3 + $0x1bc] ss:$36 sps:$4 sm:$0xff]  }
  0xec   : > { %v1282_v12 = vrot.slane %v1281_v63, 4  ;;  %v1286_v13 = vrot.slane %v1284_v0, 5  ;;  %1526 = vst [vmem:[#allocation3 + $0x200] sm:$0xf] %v1277_v5  ;;  %v14744_v14 = vld [vmem:[#allocation2 + $0x94] sm:$0xf]  ;;  %v1767_v19 = vsel %vm14551_vm9, %v1759_v2, %v1766_v7  ;;  %5306 = vmatprep.mubr.bf16.mxu1 %v13709_v11 }
  0xed   : > { %v13711_v15 = vld [vmem:[#allocation3 + $0x1b8] ss:$36 sps:$4 sm:$0xff]   ;;  %v1758_v18 = vsel %vm14551_vm9, %v11869_v6, %v1757_v1  ;;  %v11854_v20 = vrot.slane %v742_v8, 11  ;;  %v749_v21 = vrot.slane %v747_v51, 7  ;;  %1991 = vst [vmem:[#allocation3 + $0x228] sm:$0xf] %v1767_v19 }
  0xee   : > { %v3663_v16 = vld [vmem:[#allocation3 + $0x1f8] sm:$0xff]  ;;  %v1287_v23 = vsel %vm14572_vm10, %v1282_v12, %v1286_v13  ;;  %1990 = vst [vmem:[#allocation3 + $0x204] sm:$0xf] %v1758_v18  ;;  %v758_v26 = vrot.slane %v756_v58, 7  ;;  %v759_v27 = vshll.u32 %v14735_v35, 16  ;;  %5307 = vmatmul.mubr.bf16.gmra.mxu1 %v13711_v15  ;;  %v367_v31 = vsel %vm14536_vm2, 0, %v366_v3 }
  0xef   : > { %v3668_v17 = vld [vmem:[#allocation3 + $0x21c] sm:$0xff]  ;;  %v1570_v28 = vld [vmem:[#allocation2 + $0x98] sm:$0xf]  ;;  %1527 = vst [vmem:[#allocation3 + $0x224] sm:$0xf] %v1287_v23  ;;  %v752_v29 = vor.u32 %v750_v52, %v749_v21  ;;  %v754_v30 = vrot.slane %v749_v21, 4 }
  0xf0   : > { %v13714_v22 = vld [vmem:[#allocation3 + $0x1fc] ss:$36 sps:$4 sm:$0xff]   ;;  %v11957_v25 = vcombine.low %v3663_v16, %v3668_v17  ;;  %v421_v32 = vsel %vm14545_vm8, 0, %v420_v4  ;;  %v761_v36 = vor.u32 %v759_v27, %v758_v26  ;;  %368 = vst [vmem:[#allocation2 + $0x90] sm:$0x8] %v367_v31  ;;  %v1289_v37 = vshrl.u32 %v1069_v9, 16 }
  0xf1   : > { %v13761_v34 = vld [vmem:[#allocation7 + $0x1e0] sm:$0xff]   ;;  %5153 = vmatprep.mubr.bf16.mxu0 %v13714_v22  ;;  %422 = vst [vmem:[#allocation2 + $0x8c] sm:$0x1] %v421_v32  ;;  %v1292_v38 = vshll.u32 %v1069_v9, 16  ;;  %v1298_v35 = vshll.u32 %v1070_v10, 16  ;;  %v753_v39 = vsel %vm14551_vm9, %v11854_v20, %v752_v29  ;;  %v1302_v41 = vshrl.u32 %v1070_v10, 16 }
  0xf2   : > { %5154 = vmatmul.mubr.bf16.gmra.mxu0 %v11957_v25  ;;  %v1774_v42 = vshrl.u32 %v14744_v14, 16  ;;  %v1777_v43 = vshll.u32 %v14744_v14, 16  ;;  %12870 = vmatprep.subr.bf16.mxu1 %v13761_v34  ;;  %511 = vst [vmem:[#allocation2 + $0xf4] sm:$0xff] %v478_v40   ;;  %v13766_v44 = vld [vmem:[#allocation7 + $0x1a0] sm:$0xff]   ;;  %v762_v45 = vsel %vm14551_vm9, %v754_v30, %v761_v36  ;;  %965 = vst [vmem:[#allocation3 + $0x240] sm:$0xf] %v753_v39 }
  0xf3   : > { %v1291_v46 = vrot.slane %v1289_v37, 4  ;;  %v1294_v47 = vrot.slane %v1292_v38, 5  ;;  %v1300_v48 = vrot.slane %v1298_v35, 5  ;;  %v13768_v51 = vld [vmem:[#allocation7 + $0x140] sm:$0xff]   ;;  %966 = vst [vmem:[#allocation3 + $0x264] sm:$0xf] %v762_v45  ;;  %12871 = vmatpush3.bf16.msra.mxu1 %v13766_v44 }
  0xf4   : > { %v1304_v52 = vrot.slane %v1302_v41, 4  ;;  %v1776_v53 = vrot.slane %v1774_v42, 7  ;;  %v1783_v54 = vshrl.u32 %v1570_v28, 16  ;;  %v1786_v55 = vshll.u32 %v1570_v28, 16  ;;  %v543_v56 = vld [vmem:[#allocation2 + $0x94] sm:$0xf]  ;;  %12766 = vmatprep.subr.bf16.mxu0 %v13768_v51 }
  0xf5   : > { %v1295_v57 = vor.u32 %v1294_v47, %v1291_v46  ;;  %v14764_v58 = vld [vmem:[#allocation2 + $0x98] sm:$0xf]  ;;  %v769_v59 = vshrl.u32 %v543_v56, 16  ;;  %v772_v60 = vshll.u32 %v543_v56, 16  ;;  %v999_v61 = vld [vmem:[#allocation2 + $0x94] sm:$0xf] }
  0xf6   : > { %v1305_v62 = vor.u32 %v1304_v52, %v1300_v48  ;;  %v1781_v63 = vrot.slane %v1776_v53, 4  ;;  %v1785_v0 = vrot.slane %v1783_v54, 7  ;;  %v1000_v1 = vld [vmem:[#allocation2 + $0x98] sm:$0xf]  ;;  %1031 = vst [vmem:[#allocation3 + $0x28c] sm:$0xf] %v999_v61  ;;  %v1779_v9 = vor.u32 %v1777_v43, %v1776_v53 }
  0xf7   : > { %v13769_v2 = vld [vmem:[#allocation7 + $0x100] sm:$0xff]   ;;  %v1296_v5 = vrot.slane %v1295_v57, 4  ;;  %1032 = vst [vmem:[#allocation3 + $0x2b0] sm:$0xf] %v1000_v1  ;;  %v1568_v8 = vld [vmem:[#allocation2 + $0x90] sm:$0x8] }
  0xf8   : > { %v13716_v3 = vld [vmem:[#allocation3 + $0x204] ss:$36 sps:$4 sm:$0xff]   ;;  %v1071_v6 = vld [vmem:[#allocation2 + $0x8c] sm:$0x1]  ;;  %v1306_v7 = vrot.slane %v1305_v62, 4  ;;  %v1788_v10 = vor.u32 %v1786_v55, %v1785_v0  ;;  %v771_v11 = vrot.slane %v769_v59, 7  ;;  %12767 = vmatpush3.bf16.msra.mxu0 %v13769_v2 }
  0xf9   : > { %v13718_v4 = vld [vmem:[#allocation3 + $0x200] ss:$36 sps:$4 sm:$0xff]   ;;  %5314 = vmatprep.mubr.bf16.mxu1 %v13716_v3  ;;  %v1301_v12 = vsel %vm14572_vm10, %v1296_v5, %v1300_v48  ;;  %v1308_v13 = vshll.u32 %v1071_v6, 16  ;;  %v1769_v14 = vshrl.u32 %v1568_v8, 16  ;;  %v542_v15 = vld [vmem:[#allocation2 + $0x90] sm:$0x8] }
  0xfa   : > { %v778_v16 = vshrl.u32 %v14764_v58, 16  ;;  %v13770_v17 = vld [vmem:[#allocation7 + $0x1d8] sm:$0xff]   ;;  %5315 = vmatmul.mubr.bf16.gmra.mxu1 %v13718_v4  ;;  %v3673_v18 = vld [vmem:[#allocation3 + $0x240] sm:$0xff]  ;;  %1528 = vst [vmem:[#allocation3 + $0x248] sm:$0xf] %v1301_v12  ;;  %v1789_v19 = vsel %vm14551_vm9, %v1781_v63, %v1788_v10  ;;  %v764_v20 = vshrl.u32 %v542_v15, 16  ;;  %v774_v21 = vor.u32 %v772_v60, %v771_v11 }
  0xfb   : > { %v776_v22 = vrot.slane %v771_v11, 4  ;;  %v369_v23 = vld [vmem:[#allocation2 + $0xa0] sm:$0x8]  ;;  %v13771_v25 = vld [vmem:[#allocation7 + $0x198] sm:$0xff]   ;;  %v3678_v26 = vld [vmem:[#allocation3 + $0x264] sm:$0xff]  ;;  %v1310_v28 = vrot.slane %v1308_v13, 5  ;;  %12872 = vmatprep.subr.bf16.mxu1 %v13770_v17 }
  0xfc   : > { %v13719_v27 = vld [vmem:[#allocation3 + $0x244] ss:$36 sps:$4 sm:$0xff]   ;;  %v11870_v29 = vrot.slane %v1769_v14, 11  ;;  %1993 = vst [vmem:[#allocation3 + $0x270] sm:$0xf] %v1789_v19  ;;  %v780_v30 = vrot.slane %v778_v16, 7  ;;  %v11966_v31 = vcombine.low %v3673_v18, %v3678_v26  ;;  %12873 = vmatpush3.bf16.msra.mxu1 %v13771_v25 }
  0xfd   : > { %v11855_v32 = vrot.slane %v764_v20, 11  ;;  %v781_v34 = vshll.u32 %v14764_v58, 16  ;;  %v370_v36 = vsel %vm14536_vm2, 0, %v369_v23  ;;  %v423_v37 = vld [vmem:[#allocation2 + $0x9c] sm:$0x1]  ;;  %v13772_v38 = vld [vmem:[#allocation7 + $0x1d0] sm:$0xff]   ;;  %5161 = vmatprep.mubr.bf16.mxu0 %v13719_v27  ;;  %v1311_v35 = vsel %vm14572_vm10, %v1306_v7, %v1310_v28 }
  0xfe   : > { %v1780_v40 = vsel %vm14551_vm9, %v11870_v29, %v1779_v9  ;;  %371 = vst [vmem:[#allocation2 + $0xa0] sm:$0x8] %v370_v36  ;;  %v424_v39 = vsel %vm14545_vm8, 0, %v423_v37  ;;  %v1072_v41 = vld [vmem:[#allocation2 + $0x94] sm:$0xf]  ;;  %v480_v43 = vld [vmem:[%s14525_s19 + $0x78] sm:$0xff]   ;;  %5162 = vmatmul.mubr.bf16.gmra.mxu0 %v11966_v31  ;;  %12874 = vmatprep.subr.bf16.mxu1 %v13772_v38 }
  0xff   : > { %v1073_v42 = vld [vmem:[#allocation2 + $0x98] sm:$0xf]  ;;  %1529 = vst [vmem:[#allocation3 + $0x26c] sm:$0xf] %v1311_v35  ;;  %1992 = vst [vmem:[#allocation3 + $0x24c] sm:$0xf] %v1780_v40  ;;  %v775_v44 = vsel %vm14551_vm9, %v11855_v32, %v774_v21  ;;  %v783_v45 = vor.u32 %v781_v34, %v780_v30 }
 0x100   : > { %425 = vst [vmem:[#allocation2 + $0x9c] sm:$0x1] %v424_v39  ;;  %v1313_v46 = vshrl.u32 %v1072_v41, 16  ;;  %v1316_v47 = vshll.u32 %v1072_v41, 16  ;;  %v1572_v48 = vld [vmem:[#allocation2 + $0xa4] sm:$0xf] }
 0x101   : > { %v1573_v51 = vld [vmem:[#allocation2 + $0xa8] sm:$0xf]  ;;  %513 = vst [vmem:[#allocation2 + $0x104] sm:$0xff] %v480_v43   ;;  %967 = vst [vmem:[#allocation3 + $0x288] sm:$0xf] %v775_v44  ;;  %v1322_v52 = vshll.u32 %v1073_v42, 16  ;;  %v784_v57 = vsel %vm14551_vm9, %v776_v22, %v783_v45 }
 0x102   : > { %v1326_v53 = vshrl.u32 %v1073_v42, 16  ;;  %v1796_v54 = vshrl.u32 %v1572_v48, 16  ;;  %v1799_v55 = vshll.u32 %v1572_v48, 16  ;;  %v546_v56 = vld [vmem:[#allocation2 + $0xa4] sm:$0xf]  ;;  %v1315_v58 = vrot.slane %v1313_v46, 4 }
 0x103   : > { %v1318_v59 = vrot.slane %v1316_v47, 5  ;;  %v1805_v60 = vshrl.u32 %v1573_v51, 16  ;;  %v14785_v61 = vld [vmem:[#allocation2 + $0xa8] sm:$0xf]  ;;  %v13777_v62 = vld [vmem:[#allocation7 + $0x190] sm:$0xff]   ;;  %v1324_v63 = vrot.slane %v1322_v52, 5 }
 0x104   : > { %968 = vst [vmem:[#allocation3 + $0x2ac] sm:$0xf] %v784_v57  ;;  %v1328_v0 = vrot.slane %v1326_v53, 4  ;;  %v1798_v1 = vrot.slane %v1796_v54, 7  ;;  %v1808_v2 = vshll.u32 %v1573_v51, 16  ;;  %v791_v6 = vshrl.u32 %v546_v56, 16  ;;  %12875 = vmatpush3.bf16.msra.mxu1 %v13777_v62 }
 0x105   : > { %v1001_v3 = vld [vmem:[#allocation2 + $0xa4] sm:$0xf]  ;;  %v1319_v4 = vor.u32 %v1318_v59, %v1315_v58  ;;  %v1807_v5 = vrot.slane %v1805_v60, 7  ;;  %v794_v7 = vshll.u32 %v546_v56, 16  ;;  %v1002_v8 = vld [vmem:[#allocation2 + $0xa8] sm:$0xf] }
 0x106   : > { %1033 = vst [vmem:[#allocation3 + $0x2d4] sm:$0xf] %v1001_v3  ;;  %v13779_v9 = vld [vmem:[#allocation7 + $0x1c8] sm:$0xff]   ;;  %v1329_v10 = vor.u32 %v1328_v0, %v1324_v63  ;;  %v1803_v11 = vrot.slane %v1798_v1, 4  ;;  %v800_v12 = vshrl.u32 %v14785_v61, 16  ;;  %v793_v18 = vrot.slane %v791_v6, 7 }
 0x107   : > { %1034 = vst [vmem:[#allocation3 + $0x2f8] sm:$0xf] %v1002_v8  ;;  %v372_v13 = vld [vmem:[#allocation2 + $0xb0] sm:$0x8]  ;;  %v1320_v14 = vrot.slane %v1319_v4, 4  ;;  %v1810_v16 = vor.u32 %v1808_v2, %v1807_v5  ;;  %12876 = vmatprep.subr.bf16.mxu1 %v13779_v9  ;;  %v1801_v23 = vor.u32 %v1799_v55, %v1798_v1  ;;  %v803_v41 = vshll.u32 %v14785_v61, 16 }
 0x108   : > { %v1571_v15 = vld [vmem:[#allocation2 + $0xa0] sm:$0x8]  ;;  %v426_v19 = vld [vmem:[#allocation2 + $0xac] sm:$0x1]  ;;  %v1330_v21 = vrot.slane %v1329_v10, 4  ;;  %v796_v31 = vor.u32 %v794_v7, %v793_v18  ;;  %v798_v36 = vrot.slane %v793_v18, 4 }
 0x109   : > { %v545_v17 = vld [vmem:[#allocation2 + $0xa0] sm:$0x8]  ;;  %v13721_v20 = vld [vmem:[#allocation3 + $0x24c] ss:$36 sps:$4 sm:$0xff]   ;;  %v1791_v22 = vshrl.u32 %v1571_v15, 16  ;;  %v1325_v28 = vsel %vm14572_vm10, %v1320_v14, %v1324_v63  ;;  %v1811_v29 = vsel %vm14551_vm9, %v1803_v11, %v1810_v16  ;;  %v802_v37 = vrot.slane %v800_v12, 7 }
 0x10a   : > { %v13723_v25 = vld [vmem:[#allocation3 + $0x248] ss:$36 sps:$4 sm:$0xff]   ;;  %v1074_v27 = vld [vmem:[#allocation2 + $0x9c] sm:$0x1]  ;;  %v786_v30 = vshrl.u32 %v545_v17, 16  ;;  %5322 = vmatprep.mubr.bf16.mxu1 %v13721_v20  ;;  %v373_v42 = vsel %vm14536_vm2, 0, %v372_v13 }
 0x10b   : > { %v3683_v26 = vld [vmem:[#allocation3 + $0x288] sm:$0xff]  ;;  %v1332_v32 = vshll.u32 %v1074_v27, 16  ;;  %1530 = vst [vmem:[#allocation3 + $0x290] sm:$0xf] %v1325_v28  ;;  %v11871_v34 = vrot.slane %v1791_v22, 11  ;;  %5323 = vmatmul.mubr.bf16.gmra.mxu1 %v13723_v25  ;;  %v427_v46 = vsel %vm14545_vm8, 0, %v426_v19  ;;  %v805_v52 = vor.u32 %v803_v41, %v802_v37 }
 0x10c   : > { %1995 = vst [vmem:[#allocation3 + $0x2b8] sm:$0xf] %v1811_v29  ;;  %v1075_v38 = vld [vmem:[#allocation2 + $0xa4] sm:$0xf]  ;;  %v3688_v35 = vld [vmem:[#allocation3 + $0x2ac] sm:$0xff]  ;;  %v11856_v39 = vrot.slane %v786_v30, 11 }
 0x10d   : > { %v13726_v40 = vld [vmem:[#allocation3 + $0x28c] ss:$36 sps:$4 sm:$0xff]   ;;  %v1334_v43 = vrot.slane %v1332_v32, 5  ;;  %v1802_v44 = vsel %vm14551_vm9, %v11871_v34, %v1801_v23  ;;  %v11975_v45 = vcombine.low %v3683_v26, %v3688_v35  ;;  %374 = vst [vmem:[#allocation2 + $0xb0] sm:$0x8] %v373_v42  ;;  %v1337_v53 = vshrl.u32 %v1075_v38, 16 }
 0x10e   : > { %v1076_v47 = vld [vmem:[#allocation2 + $0xa8] sm:$0xf]  ;;  %v1575_v48 = vld [vmem:[#allocation2 + $0xb4] sm:$0xf]  ;;  %5169 = vmatprep.mubr.bf16.mxu0 %v13726_v40  ;;  %1994 = vst [vmem:[#allocation3 + $0x294] sm:$0xf] %v1802_v44  ;;  %v797_v51 = vsel %vm14551_vm9, %v11856_v39, %v796_v31  ;;  %v806_v61 = vsel %vm14551_vm9, %v798_v36, %v805_v52 }
 0x10f   : > { %428 = vst [vmem:[#allocation2 + $0xac] sm:$0x1] %v427_v46  ;;  %v1340_v54 = vshll.u32 %v1075_v38, 16  ;;  %v1576_v55 = vld [vmem:[#allocation2 + $0xb8] sm:$0xf]  ;;  %v1335_v56 = vsel %vm14572_vm10, %v1330_v21, %v1334_v43  ;;  %5170 = vmatmul.mubr.bf16.gmra.mxu0 %v11975_v45  ;;  %v1346_v57 = vshll.u32 %v1076_v47, 16 }
 0x110   : > { %969 = vst [vmem:[#allocation3 + $0x2d0] sm:$0xf] %v797_v51  ;;  %v1350_v58 = vshrl.u32 %v1076_v47, 16  ;;  %v1818_v59 = vshrl.u32 %v1575_v48, 16  ;;  %v13780_v60 = vld [vmem:[#allocation7 + $0x188] sm:$0xff]   ;;  %v1339_v62 = vrot.slane %v1337_v53, 4 }
 0x111   : > { %1531 = vst [vmem:[#allocation3 + $0x2b4] sm:$0xf] %v1335_v56  ;;  %v1342_v63 = vrot.slane %v1340_v54, 5  ;;  %v1821_v0 = vshll.u32 %v1575_v48, 16  ;;  %v13781_v1 = vld [vmem:[#allocation7 + $0x1c0] sm:$0xff]   ;;  %v1348_v2 = vrot.slane %v1346_v57, 5  ;;  %12877 = vmatpush3.bf16.msra.mxu1 %v13780_v60 }
 0x112   : > { %970 = vst [vmem:[#allocation3 + $0x2f4] sm:$0xf] %v806_v61  ;;  %v1352_v3 = vrot.slane %v1350_v58, 4  ;;  %v1820_v4 = vrot.slane %v1818_v59, 7  ;;  %v1827_v5 = vshrl.u32 %v1576_v55, 16  ;;  %v1830_v7 = vshll.u32 %v1576_v55, 16  ;;  %12878 = vmatprep.subr.bf16.mxu1 %v13781_v1 }
 0x113   : > { %v1343_v6 = vor.u32 %v1342_v63, %v1339_v62  ;;  %v549_v8 = vld [vmem:[#allocation2 + $0xb4] sm:$0xf]  ;;  %v13784_v9 = vld [vmem:[#allocation7 + $0x180] sm:$0xff]   ;;  %v1004_v14 = vld [vmem:[#allocation2 + $0xb8] sm:$0xf] }
 0x114   : > { %v1353_v10 = vor.u32 %v1352_v3, %v1348_v2  ;;  %v1825_v11 = vrot.slane %v1820_v4, 4  ;;  %v1829_v12 = vrot.slane %v1827_v5, 7  ;;  %v1003_v13 = vld [vmem:[#allocation2 + $0xb4] sm:$0xf]  ;;  %v1574_v16 = vld [vmem:[#allocation2 + $0xb0] sm:$0x8]  ;;  %v1823_v17 = vor.u32 %v1821_v0, %v1820_v4 }
 0x115   : > { %v1344_v15 = vrot.slane %v1343_v6, 4  ;;  %v548_v18 = vld [vmem:[#allocation2 + $0xb0] sm:$0x8]  ;;  %v550_v19 = vld [vmem:[#allocation2 + $0xb8] sm:$0xf]  ;;  %v813_v20 = vshrl.u32 %v549_v8, 16  ;;  %12879 = vmatpush3.bf16.msra.mxu1 %v13784_v9 }
 0x116   : > { %1035 = vst [vmem:[#allocation3 + $0x31c] sm:$0xf] %v1003_v13  ;;  %1036 = vst [vmem:[#allocation3 + $0x340] sm:$0xf] %v1004_v14  ;;  %v1077_v21 = vld [vmem:[#allocation2 + $0xac] sm:$0x1]  ;;  %v1832_v25 = vor.u32 %v1830_v7, %v1829_v12 }
 0x117   : > { %v1354_v22 = vrot.slane %v1353_v10, 4  ;;  %v1813_v23 = vshrl.u32 %v1574_v16, 16  ;;  %v808_v26 = vshrl.u32 %v548_v18, 16  ;;  %v3693_v27 = vld [vmem:[#allocation3 + $0x2d0] sm:$0xff]  ;;  %v1349_v28 = vsel %vm14572_vm10, %v1344_v15, %v1348_v2  ;;  %v375_v32 = vld [vmem:[#allocation2 + $0xc0] sm:$0x8] }
 0x118   : > { %v1356_v29 = vshll.u32 %v1077_v21, 16  ;;  %v815_v30 = vrot.slane %v813_v20, 7  ;;  %v816_v31 = vshll.u32 %v549_v8, 16  ;;  %v13728_v34 = vld [vmem:[#allocation3 + $0x294] ss:$36 sps:$4 sm:$0xff]   ;;  %v1833_v38 = vsel %vm14551_vm9, %v1825_v11, %v1832_v25 }
 0x119   : > { %v13730_v36 = vld [vmem:[#allocation3 + $0x290] ss:$36 sps:$4 sm:$0xff]   ;;  %1532 = vst [vmem:[#allocation3 + $0x2d8] sm:$0xf] %v1349_v28  ;;  %v11872_v37 = vrot.slane %v1813_v23, 11  ;;  %v11857_v41 = vrot.slane %v808_v26, 11  ;;  %5330 = vmatprep.mubr.bf16.mxu1 %v13728_v34 }
 0x11a   : > { %v3698_v35 = vld [vmem:[#allocation3 + $0x2f4] sm:$0xff]  ;;  %v1358_v39 = vrot.slane %v1356_v29, 5  ;;  %1997 = vst [vmem:[#allocation3 + $0x300] sm:$0xf] %v1833_v38  ;;  %v818_v42 = vor.u32 %v816_v31, %v815_v30  ;;  %v820_v43 = vrot.slane %v815_v30, 4  ;;  %v822_v46 = vshrl.u32 %v550_v19, 16  ;;  %5331 = vmatmul.mubr.bf16.gmra.mxu1 %v13730_v36 }
 0x11b   : > { %v13731_v40 = vld [vmem:[#allocation3 + $0x2d4] ss:$36 sps:$4 sm:$0xff]   ;;  %v1824_v44 = vsel %vm14551_vm9, %v11872_v37, %v1823_v17  ;;  %v11984_v45 = vcombine.low %v3693_v27, %v3698_v35  ;;  %v825_v47 = vshll.u32 %v550_v19, 16  ;;  %v429_v48 = vld [vmem:[#allocation2 + $0xbc] sm:$0x1]  ;;  %v376_v54 = vsel %vm14536_vm2, 0, %v375_v32 }
 0x11c   : > { %v1078_v51 = vld [vmem:[#allocation2 + $0xb4] sm:$0xf]  ;;  %5177 = vmatprep.mubr.bf16.mxu0 %v13731_v40  ;;  %v1359_v52 = vsel %vm14572_vm10, %v1354_v22, %v1358_v39  ;;  %1996 = vst [vmem:[#allocation3 + $0x2dc] sm:$0xf] %v1824_v44  ;;  %v819_v53 = vsel %vm14551_vm9, %v11857_v41, %v818_v42  ;;  %v430_v55 = vsel %vm14545_vm8, 0, %v429_v48  ;;  %v824_v58 = vrot.slane %v822_v46, 7 }
 0x11d   : > { %v1079_v56 = vld [vmem:[#allocation2 + $0xb8] sm:$0xf]  ;;  %v1578_v57 = vld [vmem:[#allocation2 + $0xc4] sm:$0xf]  ;;  %1533 = vst [vmem:[#allocation3 + $0x2fc] sm:$0xf] %v1359_v52  ;;  %5178 = vmatmul.mubr.bf16.gmra.mxu0 %v11984_v45 }
 0x11e   : > { %971 = vst [vmem:[#allocation3 + $0x318] sm:$0xf] %v819_v53  ;;  %377 = vst [vmem:[#allocation2 + $0xc0] sm:$0x8] %v376_v54  ;;  %v1361_v59 = vshrl.u32 %v1078_v51, 16  ;;  %v1364_v60 = vshll.u32 %v1078_v51, 16  ;;  %v827_v4 = vor.u32 %v825_v47, %v824_v58 }
 0x11f   : > { %431 = vst [vmem:[#allocation2 + $0xbc] sm:$0x1] %v430_v55  ;;  %v1370_v61 = vshll.u32 %v1079_v56, 16  ;;  %v1579_v62 = vld [vmem:[#allocation2 + $0xc8] sm:$0xf]  ;;  %v1374_v63 = vshrl.u32 %v1079_v56, 16 }
 0x120   : > { %v1840_v0 = vshrl.u32 %v1578_v57, 16  ;;  %v1843_v1 = vshll.u32 %v1578_v57, 16  ;;  %v1849_v2 = vshrl.u32 %v1579_v62, 16  ;;  %v552_v3 = vld [vmem:[#allocation2 + $0xc4] sm:$0xf]  ;;  %v1363_v5 = vrot.slane %v1361_v59, 4 }
 0x121   : > { %v1366_v6 = vrot.slane %v1364_v60, 5  ;;  %v1372_v7 = vrot.slane %v1370_v61, 5  ;;  %v553_v8 = vld [vmem:[#allocation2 + $0xc8] sm:$0xf]  ;;  %v13786_v9 = vld [vmem:[#allocation7 + $0x238] sm:$0xff]   ;;  %v1376_v10 = vrot.slane %v1374_v63, 4  ;;  %v828_v15 = vsel %vm14551_vm9, %v820_v43, %v827_v4 }
 0x122   : > { %v1842_v11 = vrot.slane %v1840_v0, 7  ;;  %v1851_v12 = vrot.slane %v1849_v2, 7  ;;  %v1852_v13 = vshll.u32 %v1579_v62, 16  ;;  %v1005_v14 = vld [vmem:[#allocation2 + $0xc4] sm:$0xf]  ;;  %v835_v17 = vshrl.u32 %v552_v3, 16  ;;  %13472 = vmatprep.subr.bf16.mxu0 %v13786_v9 }
 0x123   : > { %v1367_v16 = vor.u32 %v1366_v6, %v1363_v5  ;;  %v838_v18 = vshll.u32 %v552_v3, 16  ;;  %v1006_v19 = vld [vmem:[#allocation2 + $0xc8] sm:$0xf]  ;;  %1037 = vst [vmem:[#allocation3 + $0x364] sm:$0xf] %v1005_v14  ;;  %v1377_v21 = vor.u32 %v1376_v10, %v1372_v7  ;;  %v844_v29 = vshrl.u32 %v553_v8, 16 }
 0x124   : > { %v378_v20 = vld [vmem:[#allocation2 + $0xd0] sm:$0x8]  ;;  %972 = vst [vmem:[#allocation3 + $0x33c] sm:$0xf] %v828_v15  ;;  %v1847_v22 = vrot.slane %v1842_v11, 4  ;;  %v1854_v23 = vor.u32 %v1852_v13, %v1851_v12  ;;  %v837_v28 = vrot.slane %v835_v17, 7  ;;  %v1845_v39 = vor.u32 %v1843_v1, %v1842_v11 }
 0x125   : > { %1038 = vst [vmem:[#allocation3 + $0x388] sm:$0xf] %v1006_v19  ;;  %v432_v25 = vld [vmem:[#allocation2 + $0xcc] sm:$0x1]  ;;  %v1081_v26 = vld [vmem:[#allocation2 + $0xc4] sm:$0xf] }
 0x126   : > { %v1368_v27 = vrot.slane %v1367_v16, 4  ;;  %v847_v30 = vshll.u32 %v553_v8, 16  ;;  %v13733_v31 = vld [vmem:[#allocation3 + $0x2dc] ss:$36 sps:$4 sm:$0xff]   ;;  %v1378_v34 = vrot.slane %v1377_v21, 4  ;;  %v1855_v36 = vsel %vm14551_vm9, %v1847_v22, %v1854_v23 }
 0x127   : > { %v13735_v32 = vld [vmem:[#allocation3 + $0x2d8] ss:$36 sps:$4 sm:$0xff]   ;;  %v1577_v40 = vld [vmem:[#allocation2 + $0xc0] sm:$0x8]  ;;  %1999 = vst [vmem:[#allocation3 + $0x348] sm:$0xf] %v1855_v36  ;;  %v840_v41 = vor.u32 %v838_v18, %v837_v28  ;;  %5338 = vmatprep.mubr.bf16.mxu1 %v13733_v31 }
 0x128   : > { %v3703_v37 = vld [vmem:[#allocation3 + $0x318] sm:$0xff]  ;;  %v1373_v35 = vsel %vm14572_vm10, %v1368_v27, %v1372_v7  ;;  %v842_v42 = vrot.slane %v837_v28, 4  ;;  %v1835_v44 = vshrl.u32 %v1577_v40, 16  ;;  %v551_v45 = vld [vmem:[#allocation2 + $0xc0] sm:$0x8]  ;;  %v846_v46 = vrot.slane %v844_v29, 7  ;;  %5339 = vmatmul.mubr.bf16.gmra.mxu1 %v13735_v32 }
 0x129   : > { %v1080_v38 = vld [vmem:[#allocation2 + $0xbc] sm:$0x1]  ;;  %1534 = vst [vmem:[#allocation3 + $0x320] sm:$0xf] %v1373_v35  ;;  %v379_v47 = vsel %vm14536_vm2, 0, %v378_v20  ;;  %v830_v48 = vshrl.u32 %v551_v45, 16 }
 0x12a   : > { %v1380_v43 = vshll.u32 %v1080_v38, 16  ;;  %380 = vst [vmem:[#allocation2 + $0xd0] sm:$0x8] %v379_v47  ;;  %v433_v51 = vsel %vm14545_vm8, 0, %v432_v25  ;;  %v1082_v52 = vld [vmem:[#allocation2 + $0xc8] sm:$0xf]  ;;  %v849_v57 = vor.u32 %v847_v30, %v846_v46 }
 0x12b   : > { %v1385_v53 = vshrl.u32 %v1081_v26, 16  ;;  %v1388_v54 = vshll.u32 %v1081_v26, 16  ;;  %v11873_v56 = vrot.slane %v1835_v44, 11  ;;  %434 = vst [vmem:[#allocation2 + $0xcc] sm:$0x1] %v433_v51  ;;  %v1394_v58 = vshll.u32 %v1082_v52, 16 }
 0x12c   : > { %v1382_v55 = vrot.slane %v1380_v43, 5  ;;  %v1581_v59 = vld [vmem:[#allocation2 + $0xd4] sm:$0xf]  ;;  %v3708_v60 = vld [vmem:[#allocation3 + $0x33c] sm:$0xff]  ;;  %v11858_v62 = vrot.slane %v830_v48, 11  ;;  %v850_v4 = vsel %vm14551_vm9, %v842_v42, %v849_v57  ;;  %v1398_v9 = vshrl.u32 %v1082_v52, 16 }
 0x12d   : > { %v13738_v61 = vld [vmem:[#allocation3 + $0x31c] ss:$36 sps:$4 sm:$0xff]   ;;  %v1387_v63 = vrot.slane %v1385_v53, 4  ;;  %v1390_v0 = vrot.slane %v1388_v54, 5  ;;  %v1846_v2 = vsel %vm14551_vm9, %v11873_v56, %v1845_v39  ;;  %v11993_v3 = vcombine.low %v3703_v37, %v3708_v60  ;;  %v1582_v5 = vld [vmem:[#allocation2 + $0xd8] sm:$0xf] }
 0x12e   : > { %v1383_v1 = vsel %vm14572_vm10, %v1378_v34, %v1382_v55  ;;  %5185 = vmatprep.mubr.bf16.mxu0 %v13738_v61  ;;  %1998 = vst [vmem:[#allocation3 + $0x324] sm:$0xf] %v1846_v2  ;;  %v841_v6 = vsel %vm14551_vm9, %v11858_v62, %v840_v41  ;;  %974 = vst [vmem:[#allocation3 + $0x384] sm:$0xf] %v850_v4  ;;  %v1396_v8 = vrot.slane %v1394_v58, 5  ;;  %v1862_v10 = vshrl.u32 %v1581_v59, 16 }
 0x12f   : > { %1535 = vst [vmem:[#allocation3 + $0x344] sm:$0xf] %v1383_v1  ;;  %v1391_v7 = vor.u32 %v1390_v0, %v1387_v63  ;;  %5186 = vmatmul.mubr.bf16.gmra.mxu0 %v11993_v3  ;;  %973 = vst [vmem:[#allocation3 + $0x360] sm:$0xf] %v841_v6  ;;  %v1865_v11 = vshll.u32 %v1581_v59, 16  ;;  %v1871_v12 = vshrl.u32 %v1582_v5, 16 }
 0x130   : > { %v1874_v13 = vshll.u32 %v1582_v5, 16  ;;  %v1400_v15 = vrot.slane %v1398_v9, 4  ;;  %v1864_v17 = vrot.slane %v1862_v10, 7  ;;  %v555_v31 = vld [vmem:[#allocation2 + $0xd4] sm:$0xf] }
 0x131   : > { %v1392_v14 = vrot.slane %v1391_v7, 4  ;;  %v1580_v16 = vld [vmem:[#allocation2 + $0xd0] sm:$0x8]  ;;  %v1873_v18 = vrot.slane %v1871_v12, 7  ;;  %v556_v32 = vld [vmem:[#allocation2 + $0xd8] sm:$0xf] }
 0x132   : > { %v1083_v19 = vld [vmem:[#allocation2 + $0xcc] sm:$0x1]  ;;  %v1401_v21 = vor.u32 %v1400_v15, %v1396_v8  ;;  %v1857_v22 = vshrl.u32 %v1580_v16, 16  ;;  %v1867_v25 = vor.u32 %v1865_v11, %v1864_v17  ;;  %v1869_v26 = vrot.slane %v1864_v17, 4  ;;  %v554_v28 = vld [vmem:[#allocation2 + $0xd0] sm:$0x8] }
 0x133   : > { %v1397_v20 = vsel %vm14572_vm10, %v1392_v14, %v1396_v8  ;;  %v1404_v23 = vshll.u32 %v1083_v19, 16  ;;  %v1876_v27 = vor.u32 %v1874_v13, %v1873_v18  ;;  %v852_v38 = vshrl.u32 %v554_v28, 16  ;;  %v13743_v44 = vld [vmem:[#allocation3 + $0x364] ss:$36 sps:$4 sm:$0xff]   ;;  %v1007_v51 = vld [vmem:[#allocation2 + $0xd4] sm:$0xf] }
 0x134   : > { %1536 = vst [vmem:[#allocation3 + $0x368] sm:$0xf] %v1397_v20  ;;  %v1402_v29 = vrot.slane %v1401_v21, 4  ;;  %v11874_v30 = vrot.slane %v1857_v22, 11  ;;  %v857_v42 = vshrl.u32 %v555_v31, 16  ;;  %v860_v43 = vshll.u32 %v555_v31, 16  ;;  %5193 = vmatprep.mubr.bf16.mxu0 %v13743_v44 }
 0x135   : > { %v13740_v34 = vld [vmem:[#allocation3 + $0x324] ss:$36 sps:$4 sm:$0xff]   ;;  %v1406_v36 = vrot.slane %v1404_v23, 5  ;;  %v1877_v37 = vsel %vm14551_vm9, %v1869_v26, %v1876_v27  ;;  %v11859_v47 = vrot.slane %v852_v38, 11  ;;  %v866_v48 = vshrl.u32 %v556_v32, 16 }
 0x136   : > { %v13742_v35 = vld [vmem:[#allocation3 + $0x320] ss:$36 sps:$4 sm:$0xff]   ;;  %v1868_v41 = vsel %vm14551_vm9, %v11874_v30, %v1867_v25  ;;  %2001 = vst [vmem:[#allocation3 + $0x390] sm:$0xf] %v1877_v37  ;;  %5346 = vmatprep.mubr.bf16.mxu1 %v13740_v34  ;;  %v859_v52 = vrot.slane %v857_v42, 7  ;;  %v869_v53 = vshll.u32 %v556_v32, 16 }
 0x137   : > { %v3713_v40 = vld [vmem:[#allocation3 + $0x360] sm:$0xff]  ;;  %v1407_v45 = vsel %vm14572_vm10, %v1402_v29, %v1406_v36  ;;  %2000 = vst [vmem:[#allocation3 + $0x36c] sm:$0xf] %v1868_v41  ;;  %5347 = vmatmul.mubr.bf16.gmra.mxu1 %v13742_v35  ;;  %v1008_v54 = vld [vmem:[#allocation2 + $0xd8] sm:$0xf]  ;;  %v868_v56 = vrot.slane %v866_v48, 7 }
 0x138   : > { %v3718_v39 = vld [vmem:[#allocation3 + $0x384] sm:$0xff]  ;;  %1537 = vst [vmem:[#allocation3 + $0x38c] sm:$0xf] %v1407_v45  ;;  %1039 = vst [vmem:[#allocation3 + $0x3ac] sm:$0xf] %v1007_v51  ;;  %v862_v60 = vor.u32 %v860_v43, %v859_v52  ;;  %v864_v61 = vrot.slane %v859_v52, 4 }
 0x139   : > { %v12002_v46 = vcombine.low %v3713_v40, %v3718_v39  ;;  %v381_v55 = vld [vmem:[#allocation2 + $0xe0] sm:$0x8]  ;;  %1040 = vst [vmem:[#allocation3 + $0x3d0] sm:$0xf] %v1008_v54  ;;  %v435_v58 = vld [vmem:[#allocation2 + $0xdc] sm:$0x1]  ;;  %v871_v1 = vor.u32 %v869_v53, %v868_v56 }
 0x13a   : > { %v382_v57 = vsel %vm14536_vm2, 0, %v381_v55  ;;  %v1084_v59 = vld [vmem:[#allocation2 + $0xd4] sm:$0xf]  ;;  %v436_v62 = vsel %vm14545_vm8, 0, %v435_v58  ;;  %v1085_v63 = vld [vmem:[#allocation2 + $0xd8] sm:$0xf]  ;;  %v863_v6 = vsel %vm14551_vm9, %v11859_v47, %v862_v60 }
 0x13b   : > { %5194 = vmatmul.mubr.bf16.gmra.mxu0 %v12002_v46  ;;  %383 = vst [vmem:[#allocation2 + $0xe0] sm:$0x8] %v382_v57  ;;  %v1409_v0 = vshrl.u32 %v1084_v59, 16  ;;  %437 = vst [vmem:[#allocation2 + $0xdc] sm:$0x1] %v436_v62  ;;  %v1412_v2 = vshll.u32 %v1084_v59, 16  ;;  %v872_v11 = vsel %vm14551_vm9, %v864_v61, %v871_v1 }
 0x13c   : > { %v1418_v3 = vshll.u32 %v1085_v63, 16  ;;  %v1422_v4 = vshrl.u32 %v1085_v63, 16  ;;  %v1584_v5 = vld [vmem:[#allocation2 + $0xe4] sm:$0xf]  ;;  %v1585_v8 = vld [vmem:[#allocation2 + $0xe8] sm:$0xf] }
 0x13d   : > { %v1411_v7 = vrot.slane %v1409_v0, 4  ;;  %v1884_v9 = vshrl.u32 %v1584_v5, 16  ;;  %v1887_v10 = vshll.u32 %v1584_v5, 16  ;;  %975 = vst [vmem:[#allocation3 + $0x3a8] sm:$0xf] %v863_v6  ;;  %v1414_v12 = vrot.slane %v1412_v2, 5 }
 0x13e   : > { %v1420_v13 = vrot.slane %v1418_v3, 5  ;;  %v1424_v14 = vrot.slane %v1422_v4, 4  ;;  %976 = vst [vmem:[#allocation3 + $0x3cc] sm:$0xf] %v872_v11  ;;  %v1893_v16 = vshrl.u32 %v1585_v8, 16  ;;  %v1896_v17 = vshll.u32 %v1585_v8, 16 }
 0x13f   : > { %v1886_v15 = vrot.slane %v1884_v9, 7  ;;  %v13745_v18 = vld [vmem:[#allocation3 + $0x36c] ss:$36 sps:$4 sm:$0xff]   ;;  %v1415_v20 = vor.u32 %v1414_v12, %v1411_v7  ;;  %v558_v40 = vld [vmem:[#allocation2 + $0xe4] sm:$0xf] }
 0x140   : > { %v13747_v19 = vld [vmem:[#allocation3 + $0x368] ss:$36 sps:$4 sm:$0xff]   ;;  %v1425_v21 = vor.u32 %v1424_v14, %v1420_v13  ;;  %v1895_v23 = vrot.slane %v1893_v16, 7  ;;  %5354 = vmatprep.mubr.bf16.mxu1 %v13745_v18  ;;  %v879_v47 = vshrl.u32 %v558_v40, 16  ;;  %v1009_v48 = vld [vmem:[#allocation2 + $0xe4] sm:$0xf] }
 0x141   : > { %v1891_v22 = vrot.slane %v1886_v15, 4  ;;  %v1416_v25 = vrot.slane %v1415_v20, 4  ;;  %5355 = vmatmul.mubr.bf16.gmra.mxu1 %v13747_v19  ;;  %v1889_v29 = vor.u32 %v1887_v10, %v1886_v15  ;;  %v13753_v41 = vld [vmem:[#allocation3 + $0x3ac] ss:$36 sps:$4 sm:$0xff]   ;;  %v559_v43 = vld [vmem:[#allocation2 + $0xe8] sm:$0xf] }
 0x142   : > { %v1583_v26 = vld [vmem:[#allocation2 + $0xe0] sm:$0x8]  ;;  %v1086_v27 = vld [vmem:[#allocation2 + $0xdc] sm:$0x1]  ;;  %v1898_v30 = vor.u32 %v1896_v17, %v1895_v23  ;;  %v1426_v32 = vrot.slane %v1425_v21, 4  ;;  %5201 = vmatprep.mubr.bf16.mxu0 %v13753_v41  ;;  %v882_v53 = vshll.u32 %v558_v40, 16 }
 0x143   : > { %v1879_v28 = vshrl.u32 %v1583_v26, 16  ;;  %v1421_v31 = vsel %vm14572_vm10, %v1416_v25, %v1420_v13  ;;  %v1428_v34 = vshll.u32 %v1086_v27, 16  ;;  %v557_v35 = vld [vmem:[#allocation2 + $0xe0] sm:$0x8]  ;;  %v1010_v51 = vld [vmem:[#allocation2 + $0xe8] sm:$0xf] }
 0x144   : > { %v3723_v36 = vld [vmem:[#allocation3 + $0x3a8] sm:$0xff]  ;;  %1538 = vst [vmem:[#allocation3 + $0x3b0] sm:$0xf] %v1421_v31  ;;  %v1899_v38 = vsel %vm14551_vm9, %v1891_v22, %v1898_v30  ;;  %v874_v46 = vshrl.u32 %v557_v35, 16  ;;  %v888_v54 = vshrl.u32 %v559_v43, 16  ;;  %v891_v55 = vshll.u32 %v559_v43, 16 }
 0x145   : > { %v11875_v37 = vrot.slane %v1879_v28, 11  ;;  %v3728_v39 = vld [vmem:[#allocation3 + $0x3cc] sm:$0xff]  ;;  %v1430_v42 = vrot.slane %v1428_v34, 5  ;;  %2003 = vst [vmem:[#allocation3 + $0x3d8] sm:$0xf] %v1899_v38  ;;  %v881_v58 = vrot.slane %v879_v47, 7 }
 0x146   : > { %v12011_v45 = vcombine.low %v3723_v36, %v3728_v39  ;;  %1041 = vst [vmem:[#allocation3 + $0x3f4] sm:$0xf] %v1009_v48  ;;  %1042 = vst [vmem:[#allocation3 + $0x418] sm:$0xf] %v1010_v51  ;;  %v384_v56 = vld [vmem:[#allocation2 + $0xf0] sm:$0x8] }
 0x147   : > { %v1890_v44 = vsel %vm14551_vm9, %v11875_v37, %v1889_v29  ;;  %v1431_v52 = vsel %vm14572_vm10, %v1426_v32, %v1430_v42  ;;  %v11860_v57 = vrot.slane %v874_v46, 11  ;;  %v385_v59 = vsel %vm14536_vm2, 0, %v384_v56  ;;  %v438_v60 = vld [vmem:[#allocation2 + $0xec] sm:$0x1]  ;;  %v1087_v63 = vld [vmem:[#allocation2 + $0xe4] sm:$0xf] }
 0x148   : > { %2002 = vst [vmem:[#allocation3 + $0x3b4] sm:$0xf] %v1890_v44  ;;  %1539 = vst [vmem:[#allocation3 + $0x3d4] sm:$0xf] %v1431_v52  ;;  %5202 = vmatmul.mubr.bf16.gmra.mxu0 %v12011_v45  ;;  %v890_v61 = vrot.slane %v888_v54, 7  ;;  %v439_v62 = vsel %vm14545_vm8, 0, %v438_v60  ;;  %v884_v1 = vor.u32 %v882_v53, %v881_v58 }
 0x149   : > { %386 = vst [vmem:[#allocation2 + $0xf0] sm:$0x8] %v385_v59  ;;  %v1088_v0 = vld [vmem:[#allocation2 + $0xe8] sm:$0xf]  ;;  %v886_v2 = vrot.slane %v881_v58, 4  ;;  %v1433_v3 = vshrl.u32 %v1087_v63, 16 }
 0x14a   : > { %440 = vst [vmem:[#allocation2 + $0xec] sm:$0x1] %v439_v62  ;;  %v1436_v4 = vshll.u32 %v1087_v63, 16  ;;  %v1587_v5 = vld [vmem:[#allocation2 + $0xf4] sm:$0xf]  ;;  %v893_v6 = vor.u32 %v891_v55, %v890_v61  ;;  %v1442_v7 = vshll.u32 %v1088_v0, 16  ;;  %v885_v11 = vsel %vm14551_vm9, %v11860_v57, %v884_v1 }
 0x14b   : > { %v1446_v8 = vshrl.u32 %v1088_v0, 16  ;;  %v1588_v9 = vld [vmem:[#allocation2 + $0xf8] sm:$0xf]  ;;  %v1906_v10 = vshrl.u32 %v1587_v5, 16  ;;  %v1435_v12 = vrot.slane %v1433_v3, 4  ;;  %v1909_v14 = vshll.u32 %v1587_v5, 16 }
 0x14c   : > { %v1438_v13 = vrot.slane %v1436_v4, 5  ;;  %v894_v15 = vsel %vm14551_vm9, %v886_v2, %v893_v6  ;;  %977 = vst [vmem:[#allocation3 + $0x3f0] sm:$0xf] %v885_v11  ;;  %v1444_v16 = vrot.slane %v1442_v7, 5  ;;  %v1915_v20 = vshrl.u32 %v1588_v9, 16 }
 0x14d   : > { %v1448_v17 = vrot.slane %v1446_v8, 4  ;;  %v1908_v18 = vrot.slane %v1906_v10, 7  ;;  %978 = vst [vmem:[#allocation3 + $0x414] sm:$0xf] %v894_v15  ;;  %v1918_v21 = vshll.u32 %v1588_v9, 16 }
 0x14e   : > { %v1439_v19 = vor.u32 %v1438_v13, %v1435_v12  ;;  %v1917_v29 = vrot.slane %v1915_v20, 7  ;;  %v13762_v43 = vld [vmem:[#allocation3 + $0x3f4] ss:$36 sps:$4 sm:$0xff]   ;;  %v387_v59 = vld [vmem:[#allocation2 + $0x100] sm:$0x8] }
 0x14f   : > { %v13755_v22 = vld [vmem:[#allocation3 + $0x3b4] ss:$36 sps:$4 sm:$0xff]   ;;  %v1449_v25 = vor.u32 %v1448_v17, %v1444_v16  ;;  %v1913_v26 = vrot.slane %v1908_v18, 4  ;;  %v1911_v32 = vor.u32 %v1909_v14, %v1908_v18  ;;  %5209 = vmatprep.mubr.bf16.mxu0 %v13762_v43  ;;  %v388_v63 = vsel %vm14536_vm2, 0, %v387_v59  ;;  %v441_v0 = vld [vmem:[#allocation2 + $0xfc] sm:$0x1] }
 0x150   : > { %v13758_v23 = vld [vmem:[#allocation3 + $0x3b0] ss:$36 sps:$4 sm:$0xff]   ;;  %v1440_v27 = vrot.slane %v1439_v19, 4  ;;  %5362 = vmatprep.mubr.bf16.mxu1 %v13755_v22  ;;  %v1920_v38 = vor.u32 %v1918_v21, %v1917_v29  ;;  %v562_v51 = vld [vmem:[#allocation2 + $0xf8] sm:$0xf]  ;;  %v442_v1 = vsel %vm14545_vm8, 0, %v441_v0 }
 0x151   : > { %v1586_v28 = vld [vmem:[#allocation2 + $0xf0] sm:$0x8]  ;;  %v1089_v30 = vld [vmem:[#allocation2 + $0xec] sm:$0x1]  ;;  %5363 = vmatmul.mubr.bf16.gmra.mxu1 %v13758_v23  ;;  %v1450_v36 = vrot.slane %v1449_v25, 4  ;;  %v910_v55 = vshrl.u32 %v562_v51, 16 }
 0x152   : > { %v1901_v31 = vshrl.u32 %v1586_v28, 16  ;;  %v1445_v34 = vsel %vm14572_vm10, %v1440_v27, %v1444_v16  ;;  %v1452_v37 = vshll.u32 %v1089_v30, 16  ;;  %v1921_v41 = vsel %vm14551_vm9, %v1913_v26, %v1920_v38  ;;  %v560_v47 = vld [vmem:[#allocation2 + $0xf0] sm:$0x8]  ;;  %v561_v48 = vld [vmem:[#allocation2 + $0xf4] sm:$0xf]  ;;  %v12544_v38 = vpop.f32.mrf.mxu0 }
 0x153   : > { %1540 = vst [vmem:[#allocation3 + $0x3f8] sm:$0xf] %v1445_v34  ;;  %v3733_v40 = vld [vmem:[#allocation3 + $0x3f0] sm:$0xff]  ;;  %2005 = vst [vmem:[#allocation3 + $0x420] sm:$0xf] %v1921_v41  ;;  %v896_v52 = vshrl.u32 %v560_v47, 16 }
 0x154   : > { %v11876_v35 = vrot.slane %v1901_v31, 11  ;;  %v1454_v39 = vrot.slane %v1452_v37, 5  ;;  %v3738_v42 = vld [vmem:[#allocation3 + $0x414] sm:$0xff]  ;;  %v901_v53 = vshrl.u32 %v561_v48, 16  ;;  %v904_v54 = vshll.u32 %v561_v48, 16 }
 0x155   : > { %v12020_v46 = vcombine.low %v3733_v40, %v3738_v42  ;;  %v1011_v56 = vld [vmem:[#allocation2 + $0xf4] sm:$0xf]  ;;  %v913_v57 = vshll.u32 %v562_v51, 16  ;;  %v1012_v58 = vld [vmem:[#allocation2 + $0xf8] sm:$0xf]  ;;  %v11861_v60 = vrot.slane %v896_v52, 11 }
 0x156   : > { %v1912_v44 = vsel %vm14551_vm9, %v11876_v35, %v1911_v32  ;;  %v1455_v45 = vsel %vm14572_vm10, %v1450_v36, %v1454_v39  ;;  %1043 = vst [vmem:[#allocation3 + $0x43c] sm:$0xf] %v1011_v56  ;;  %v903_v61 = vrot.slane %v901_v53, 7  ;;  %v912_v62 = vrot.slane %v910_v55, 7  ;;  %1044 = vst [vmem:[#allocation3 + $0x460] sm:$0xf] %v1012_v58 }
 0x157   : > { %2004 = vst [vmem:[#allocation3 + $0x3fc] sm:$0xf] %v1912_v44  ;;  %1541 = vst [vmem:[#allocation3 + $0x41c] sm:$0xf] %v1455_v45  ;;  %5210 = vmatmul.mubr.bf16.gmra.mxu0 %v12020_v46  ;;  %v1090_v2 = vld [vmem:[#allocation2 + $0xf4] sm:$0xf]  ;;  %v12545_v46 = vpop.f32.mrf.mxu0 }
 0x158   : > { %389 = vst [vmem:[#allocation2 + $0x100] sm:$0x8] %v388_v63  ;;  %v1091_v3 = vld [vmem:[#allocation2 + $0xf8] sm:$0xf]  ;;  %v906_v4 = vor.u32 %v904_v54, %v903_v61  ;;  %v908_v5 = vrot.slane %v903_v61, 4  ;;  %v915_v6 = vor.u32 %v913_v57, %v912_v62  ;;  %v1457_v7 = vshrl.u32 %v1090_v2, 16 }
 0x159   : > { %443 = vst [vmem:[#allocation2 + $0xfc] sm:$0x1] %v442_v1  ;;  %v1590_v8 = vld [vmem:[#allocation2 + $0x104] sm:$0xf]  ;;  %v1591_v9 = vld [vmem:[#allocation2 + $0x108] sm:$0xf]  ;;  %v12546_v55 = vadd.f32 %v12545_v46, %v12544_v38  ;;  %v12547_v61 = vpop.f32.mrf.mxu0 }
 0x15a   : > { %v1460_v10 = vshll.u32 %v1090_v2, 16  ;;  %v1466_v11 = vshll.u32 %v1091_v3, 16  ;;  %v1470_v12 = vshrl.u32 %v1091_v3, 16  ;;  %v1928_v13 = vshrl.u32 %v1590_v8, 16  ;;  %v2008_v41 = vld [vmem:[#allocation2 + $0x14] sm:$0xf]  ;;  %v12656_v2 = vpop.f32.mrf.mxu1 }
 0x15b   : > { %v907_v14 = vsel %vm14551_vm9, %v11861_v60, %v906_v4  ;;  %v916_v15 = vsel %vm14551_vm9, %v908_v5, %v915_v6  ;;  %v1459_v16 = vrot.slane %v1457_v7, 4  ;;  %v1931_v17 = vshll.u32 %v1590_v8, 16  ;;  %v2009_v44 = vld [vmem:[#allocation2 + $0x18] sm:$0xf]  ;;  %2040 = vst [vmem:[#allocation3 + $0x10] sm:$0xf] %v2008_v41 }
 0x15c   : > { %979 = vst [vmem:[#allocation3 + $0x438] sm:$0xf] %v907_v14  ;;  %980 = vst [vmem:[#allocation3 + $0x45c] sm:$0xf] %v916_v15  ;;  %v1462_v20 = vrot.slane %v1460_v10, 5  ;;  %v1468_v21 = vrot.slane %v1466_v11, 5  ;;  %v12657_v8 = vpop.f32.mrf.mxu1 }
 0x15d   : > { %v1472_v22 = vrot.slane %v1470_v12, 4  ;;  %v1930_v23 = vrot.slane %v1928_v13, 7  ;;  %v1937_v25 = vshrl.u32 %v1591_v9, 16  ;;  %v1940_v27 = vshll.u32 %v1591_v9, 16  ;;  %v2072_v45 = vld [vmem:[#allocation2 + $0x14] sm:$0xf]  ;;  %v12548_v9 = vpop.f32.mrf.mxu0 }
 0x15e   : > { %v13764_v18 = vld [vmem:[#allocation3 + $0x3fc] ss:$36 sps:$4 sm:$0xff]   ;;  %v1463_v26 = vor.u32 %v1462_v20, %v1459_v16  ;;  %2041 = vst [vmem:[#allocation3 + $0x34] sm:$0xf] %v2009_v44  ;;  %v2121_v54 = vshrl.u32 %v2072_v45, 16  ;;  %v2124_v60 = vshll.u32 %v2072_v45, 16  ;;  %v12658_v15 = vadd.f32 %v12657_v8, %v12656_v2 }
 0x15f   : > { %v13767_v19 = vld [vmem:[#allocation3 + $0x3f8] ss:$36 sps:$4 sm:$0xff]   ;;  %5370 = vmatprep.mubr.bf16.mxu1 %v13764_v18  ;;  %v1473_v28 = vor.u32 %v1472_v22, %v1468_v21  ;;  %v1589_v29 = vld [vmem:[#allocation2 + $0x100] sm:$0x8]  ;;  %v1935_v30 = vrot.slane %v1930_v23, 4  ;;  %v1939_v31 = vrot.slane %v1937_v25, 7  ;;  %v1933_v37 = vor.u32 %v1931_v17, %v1930_v23  ;;  %v12550_v45 = vpop.f32.mrf.mxu0 }
 0x160   : > { %5371 = vmatmul.mubr.bf16.gmra.mxu1 %v13767_v19  ;;  %v1092_v32 = vld [vmem:[#allocation2 + $0xfc] sm:$0x1]  ;;  %v1464_v34 = vrot.slane %v1463_v26, 4  ;;  %v1923_v36 = vshrl.u32 %v1589_v29, 16  ;;  %v2073_v58 = vld [vmem:[#allocation2 + $0x18] sm:$0xf]  ;;  %v14893_v26 = vadd.f32 %v12658_v15, %v12546_v55 }
 0x161   : > { %v1474_v35 = vrot.slane %v1473_v28, 4  ;;  %v1476_v40 = vshll.u32 %v1092_v32, 16  ;;  %v1942_v39 = vor.u32 %v1940_v27, %v1939_v31  ;;  %v13773_v51 = vld [vmem:[#allocation3 + $0x43c] ss:$36 sps:$4 sm:$0xff]   ;;  %v2123_v63 = vrot.slane %v2121_v54, 4 }
 0x162   : > { %v1469_v42 = vsel %vm14572_vm10, %v1464_v34, %v1468_v21  ;;  %v11877_v43 = vrot.slane %v1923_v36, 11  ;;  %v2074_v59 = vld [vmem:[#allocation2 + $0x1c] sm:$0x1]  ;;  %5217 = vmatprep.mubr.bf16.mxu0 %v13773_v51  ;;  %v2130_v0 = vshll.u32 %v2073_v58, 16  ;;  %v2134_v1 = vshrl.u32 %v2073_v58, 16  ;;  %v12659_v21 = vpop.f32.mrf.mxu1 }
 0x163   : > { %v3743_v47 = vld [vmem:[#allocation3 + $0x438] sm:$0xff]  ;;  %v1478_v52 = vrot.slane %v1476_v40, 5  ;;  %1542 = vst [vmem:[#allocation3 + $0x440] sm:$0xf] %v1469_v42  ;;  %v1943_v53 = vsel %vm14551_vm9, %v1935_v30, %v1942_v39  ;;  %v2126_v3 = vrot.slane %v2124_v60, 5  ;;  %v2140_v4 = vshll.u32 %v2074_v59, 16  ;;  %v12551_v59 = vpop.f32.mrf.mxu0 }
 0x164   : > { %v3748_v48 = vld [vmem:[#allocation3 + $0x45c] sm:$0xff]  ;;  %v1934_v56 = vsel %vm14551_vm9, %v11877_v43, %v1933_v37  ;;  %2007 = vst [vmem:[#allocation3 + $0x468] sm:$0xf] %v1943_v53  ;;  %v2132_v5 = vrot.slane %v2130_v0, 5  ;;  %v2136_v6 = vrot.slane %v2134_v1, 4  ;;  %v12549_v27 = vadd.f32 %v12548_v9, %v12547_v61  ;;  %v12660_v34 = vpop.f32.mrf.mxu1 }
 0x165   : > { %v12029_v57 = vcombine.low %v3743_v47, %v3748_v48  ;;  %v1479_v62 = vsel %vm14572_vm10, %v1474_v35, %v1478_v52  ;;  %2006 = vst [vmem:[#allocation3 + $0x444] sm:$0xf] %v1934_v56  ;;  %v2569_v7 = vld [vmem:[#allocation2 + $0x20] sm:$0x8]  ;;  %v2127_v10 = vor.u32 %v2126_v3, %v2123_v63  ;;  %v2142_v11 = vrot.slane %v2140_v4, 5 }
 0x166   : > { %1543 = vst [vmem:[#allocation3 + $0x464] sm:$0xf] %v1479_v62  ;;  %v2570_v12 = vld [vmem:[#allocation2 + $0x24] sm:$0xf]  ;;  %v2571_v13 = vld [vmem:[#allocation2 + $0x28] sm:$0xf]  ;;  %v2137_v16 = vor.u32 %v2136_v6, %v2132_v5  ;;  %v12661_v35 = vadd.f32 %v12660_v34, %v12659_v21  ;;  %v14905_v6 = vpop.f32.mrf.mxu0 }
 0x167   : > { %5218 = vmatmul.mubr.bf16.gmra.mxu0 %v12029_v57  ;;  %v2618_v14 = vshrl.u32 %v2569_v7, 16  ;;  %v2623_v17 = vshrl.u32 %v2570_v12, 16  ;;  %v2626_v18 = vshll.u32 %v2570_v12, 16  ;;  %v2632_v19 = vshrl.u32 %v2571_v13, 16  ;;  %v3033_v20 = vld [vmem:[#allocation2 + $0x24] sm:$0xf] }
 0x168   : > { %v2128_v22 = vrot.slane %v2127_v10, 4  ;;  %v2635_v23 = vshll.u32 %v2571_v13, 16  ;;  %v3034_v25 = vld [vmem:[#allocation2 + $0x28] sm:$0xf]  ;;  %3065 = vst [vmem:[#allocation3 + $0x1c] sm:$0xf] %v3033_v20  ;;  %v14899_v52 = vadd.f32 %v12661_v35, %v12549_v27 }
 0x169   : > { %v2138_v28 = vrot.slane %v2137_v16, 4  ;;  %v11878_v29 = vrot.slane %v2618_v14, 11  ;;  %v2625_v30 = vrot.slane %v2623_v17, 7  ;;  %v2634_v31 = vrot.slane %v2632_v19, 7  ;;  %3066 = vst [vmem:[#allocation3 + $0x40] sm:$0xf] %v3034_v25 }
 0x16a   : > { %v2010_v32 = vld [vmem:[#allocation2 + $0x24] sm:$0xf]  ;;  %v2133_v36 = vsel %vm14572_vm10, %v2128_v22, %v2132_v5  ;;  %v2011_v37 = vld [vmem:[#allocation2 + $0x28] sm:$0xf]  ;;  %v2077_v47 = vld [vmem:[#allocation2 + $0x2c] sm:$0x1]  ;;  %v14907_v17 = vadd.f32 %v12551_v59, %v12550_v45 }
 0x16b   : > { %2042 = vst [vmem:[#allocation3 + $0x58] sm:$0xf] %v2010_v32  ;;  %v2075_v38 = vld [vmem:[#allocation2 + $0x24] sm:$0xf]  ;;  %v2143_v41 = vsel %vm14572_vm10, %v2138_v28, %v2142_v11  ;;  %2536 = vst [vmem:[#allocation3 + $0x14] sm:$0xf] %v2133_v36  ;;  %v2628_v42 = vor.u32 %v2626_v18, %v2625_v30  ;;  %v2637_v44 = vor.u32 %v2635_v23, %v2634_v31  ;;  %v12554_v28 = vpop.f32.mrf.mxu0 }
 0x16c   : > { %v13775_v40 = vld [vmem:[#allocation3 + $0x444] ss:$36 sps:$4 sm:$0xff]   ;;  %v2630_v43 = vrot.slane %v2625_v30, 4  ;;  %2043 = vst [vmem:[#allocation3 + $0x7c] sm:$0xf] %v2011_v37  ;;  %v2145_v48 = vshrl.u32 %v2075_v38, 16 }
 0x16d   : > { %v13778_v39 = vld [vmem:[#allocation3 + $0x440] ss:$36 sps:$4 sm:$0xff]   ;;  %2537 = vst [vmem:[#allocation3 + $0x38] sm:$0xf] %v2143_v41  ;;  %v2076_v46 = vld [vmem:[#allocation2 + $0x28] sm:$0xf]  ;;  %5378 = vmatprep.mubr.bf16.mxu1 %v13775_v40  ;;  %v2629_v53 = vsel %vm14551_vm9, %v11878_v29, %v2628_v42  ;;  %v12662_v41 = vpop.f32.mrf.mxu1 }
 0x16e   : > { %v2148_v51 = vshll.u32 %v2075_v38, 16  ;;  %v2638_v54 = vsel %vm14551_vm9, %v2630_v43, %v2637_v44  ;;  %v2154_v55 = vshll.u32 %v2076_v46, 16  ;;  %v2158_v56 = vshrl.u32 %v2076_v46, 16  ;;  %v2572_v57 = vld [vmem:[#allocation2 + $0x30] sm:$0x8]  ;;  %5379 = vmatmul.mubr.bf16.gmra.mxu1 %v13778_v39 }
 0x16f   : > { %v2573_v58 = vld [vmem:[#allocation2 + $0x34] sm:$0xf]  ;;  %3001 = vst [vmem:[#allocation3 + $0x18] sm:$0xf] %v2629_v53  ;;  %3002 = vst [vmem:[#allocation3 + $0x3c] sm:$0xf] %v2638_v54  ;;  %v12663_v54 = vpop.f32.mrf.mxu1 }
 0x170   : > { %v2147_v60 = vrot.slane %v2145_v48, 4  ;;  %v2150_v61 = vrot.slane %v2148_v51, 5  ;;  %v2164_v62 = vshll.u32 %v2077_v47, 16  ;;  %v2574_v63 = vld [vmem:[#allocation2 + $0x38] sm:$0xf]  ;;  %v2640_v0 = vshrl.u32 %v2572_v57, 16 }
 0x171   : > { %v2156_v1 = vrot.slane %v2154_v55, 5  ;;  %v2160_v2 = vrot.slane %v2158_v56, 4  ;;  %v2645_v3 = vshrl.u32 %v2573_v58, 16  ;;  %v2648_v4 = vshll.u32 %v2573_v58, 16  ;;  %v3035_v5 = vld [vmem:[#allocation2 + $0x34] sm:$0xf]  ;;  %v12556_v55 = vpop.f32.mrf.mxu0 }
 0x172   : > { %v2151_v7 = vor.u32 %v2150_v61, %v2147_v60  ;;  %v2166_v8 = vrot.slane %v2164_v62, 5  ;;  %v11879_v9 = vrot.slane %v2640_v0, 11  ;;  %v2654_v10 = vshrl.u32 %v2574_v63, 16  ;;  %v3036_v11 = vld [vmem:[#allocation2 + $0x38] sm:$0xf]  ;;  %v13799_v21 = vld [vmem:[#allocation7 + $0x230] sm:$0xff]  }
 0x173   : > { %3067 = vst [vmem:[#allocation3 + $0x64] sm:$0xf] %v3035_v5  ;;  %v2161_v12 = vor.u32 %v2160_v2, %v2156_v1  ;;  %v2647_v13 = vrot.slane %v2645_v3, 7  ;;  %v2657_v14 = vshll.u32 %v2574_v63, 16  ;;  %3068 = vst [vmem:[#allocation3 + $0x88] sm:$0xf] %v3036_v11  ;;  %v12664_v60 = vadd.f32 %v12663_v54, %v12662_v41  ;;  %v12665_v3 = vpop.f32.mrf.mxu1 }
 0x174   : > { %v2012_v15 = vld [vmem:[#allocation2 + $0x34] sm:$0xf]  ;;  %v2013_v16 = vld [vmem:[#allocation2 + $0x38] sm:$0xf]  ;;  %v2152_v18 = vrot.slane %v2151_v7, 4  ;;  %v2656_v19 = vrot.slane %v2654_v10, 7  ;;  %v12555_v61 = vadd.f32 %v12554_v28, %v14905_v6 }
 0x175   : > { %2044 = vst [vmem:[#allocation3 + $0xa0] sm:$0xf] %v2012_v15  ;;  %2045 = vst [vmem:[#allocation3 + $0xc4] sm:$0xf] %v2013_v16  ;;  %v2078_v20 = vld [vmem:[#allocation2 + $0x34] sm:$0xf]  ;;  %v2650_v27 = vor.u32 %v2648_v4, %v2647_v13  ;;  %v12557_v4 = vpop.f32.mrf.mxu0  ;;  %v14921_v11 = vadd.f32 %v12664_v60, %v14907_v17  ;;  %v12666_v15 = vpop.f32.mrf.mxu1 }
 0x176   : > { %v13782_v22 = vld [vmem:[#allocation3 + $0x14] ss:$36 sps:$4 sm:$0xff]   ;;  %v2162_v25 = vrot.slane %v2161_v12, 4  ;;  %v2157_v29 = vsel %vm14572_vm10, %v2152_v18, %v2156_v1  ;;  %v2652_v30 = vrot.slane %v2647_v13, 4  ;;  %v2659_v31 = vor.u32 %v2657_v14, %v2656_v19  ;;  %v2080_v34 = vld [vmem:[#allocation2 + $0x3c] sm:$0x1] }
 0x177   : > { %v13785_v23 = vld [vmem:[#allocation3 + $0x10] ss:$36 sps:$4 sm:$0xff]   ;;  %v2079_v32 = vld [vmem:[#allocation2 + $0x38] sm:$0xf]  ;;  %v2169_v36 = vshrl.u32 %v2078_v20, 16  ;;  %5419 = vmatprep.mubr.bf16.mxu0 %v13782_v22  ;;  %v2651_v35 = vsel %vm14551_vm9, %v11879_v9, %v2650_v27  ;;  %v2172_v40 = vshll.u32 %v2078_v20, 16  ;;  %v14923_v16 = vadd.f32 %v12557_v4, %v12556_v55  ;;  %v14926_v17 = vpop.f32.mrf.mxu0 }
 0x178   : > { %v13787_v37 = vld [vmem:[#allocation3 + $0x1c] ss:$36 sps:$4 sm:$0xff]   ;;  %v2167_v38 = vsel %vm14572_vm10, %v2162_v25, %v2166_v8  ;;  %2538 = vst [vmem:[#allocation3 + $0x5c] sm:$0xf] %v2157_v29  ;;  %v2178_v39 = vshll.u32 %v2079_v32, 16  ;;  %5420 = vmatmul.mubr.bf16.vlgmr.msra.gmra.mxu0 %v13785_v23  ;;  %v2660_v43 = vsel %vm14551_vm9, %v2652_v30, %v2659_v31  ;;  %v2182_v45 = vshrl.u32 %v2079_v32, 16 }
 0x179   : > { %v13789_v42 = vld [vmem:[#allocation3 + $0x18] ss:$36 sps:$4 sm:$0xff]   ;;  %2539 = vst [vmem:[#allocation3 + $0x80] sm:$0xf] %v2167_v38  ;;  %3003 = vst [vmem:[#allocation3 + $0x60] sm:$0xf] %v2651_v35  ;;  %5580 = vmatprep.mubr.bf16.mxu1 %v13787_v37  ;;  %v12667_v23 = vadd.f32 %v12666_v15, %v12665_v3 }
 0x17a   : > { %v2171_v44 = vrot.slane %v2169_v36, 4  ;;  %v2188_v46 = vshll.u32 %v2080_v34, 16  ;;  %v14917_v47 = vld [vmem:[#allocation7 + $0x228] sm:$0xff]   ;;  %v14182_v48 = vld [vmem:[#allocation7 + $0x238] sm:$0xff]   ;;  %3004 = vst [vmem:[#allocation3 + $0x84] sm:$0xf] %v2660_v43  ;;  %5581 = vmatmul.mubr.bf16.vlgmr.msra.gmra.mxu1 %v13789_v42 }
 0x17b   : > { %13473 = vmatpush3.bf16.msra.mxu0 %v14182_v48  ;;  %v2174_v51 = vrot.slane %v2172_v40, 5  ;;  %v2180_v53 = vrot.slane %v2178_v39, 5  ;;  %v2184_v56 = vrot.slane %v2182_v45, 4  ;;  %v2575_v58 = vld [vmem:[#allocation2 + $0x40] sm:$0x8]  ;;  %v14932_v34 = vadd.f32 %v12667_v23, %v12555_v61  ;;  %v12560_v45 = vpop.f32.mrf.mxu0 }
 0x17c   : > { %v2190_v57 = vrot.slane %v2188_v46, 5  ;;  %13474 = vmatprep.subr.bf16.mxu0 %v13799_v21  ;;  %v2576_v59 = vld [vmem:[#allocation2 + $0x44] sm:$0xf]  ;;  %v2577_v63 = vld [vmem:[#allocation2 + $0x48] sm:$0xf]  ;;  %v2662_v0 = vshrl.u32 %v2575_v58, 16 }
 0x17d   : > { %v2175_v62 = vor.u32 %v2174_v51, %v2171_v44  ;;  %v2667_v1 = vshrl.u32 %v2576_v59, 16  ;;  %v2670_v2 = vshll.u32 %v2576_v59, 16  ;;  %v2185_v5 = vor.u32 %v2184_v56, %v2180_v53  ;;  %v3037_v9 = vld [vmem:[#allocation2 + $0x44] sm:$0xf]  ;;  %v3038_v10 = vld [vmem:[#allocation2 + $0x48] sm:$0xf] }
 0x17e   : > { %v2676_v7 = vshrl.u32 %v2577_v63, 16  ;;  %v2679_v8 = vshll.u32 %v2577_v63, 16  ;;  %v11880_v13 = vrot.slane %v2662_v0, 11  ;;  %3069 = vst [vmem:[#allocation3 + $0xac] sm:$0xf] %v3037_v9  ;;  %v13825_v22 = vld [vmem:[#allocation7 + $0x220] sm:$0xff]   ;;  %v12668_v63 = vpop.f32.mrf.mxu1 }
 0x17f   : > { %v2176_v12 = vrot.slane %v2175_v62, 4  ;;  %v2669_v14 = vrot.slane %v2667_v1, 7  ;;  %3070 = vst [vmem:[#allocation3 + $0xd0] sm:$0xf] %v3038_v10  ;;  %13475 = vmatpush3.bf16.msra.mxu0 %v13799_v21  ;;  %v2014_v6 = vld [vmem:[#allocation2 + $0x44] sm:$0xf] }
 0x180   : > { %v2186_v18 = vrot.slane %v2185_v5, 4  ;;  %v2678_v19 = vrot.slane %v2676_v7, 7  ;;  %v2015_v20 = vld [vmem:[#allocation2 + $0x48] sm:$0xf]  ;;  %2046 = vst [vmem:[#allocation3 + $0xe8] sm:$0xf] %v2014_v6  ;;  %13476 = vmatprep.subr.bf16.mxu0 %v14917_v47  ;;  %v12562_v7 = vpop.f32.mrf.mxu0 }
 0x181   : > { %v13790_v25 = vld [vmem:[#allocation3 + $0x5c] ss:$36 sps:$4 sm:$0xff]   ;;  %v2181_v28 = vsel %vm14572_vm10, %v2176_v12, %v2180_v53  ;;  %v2672_v21 = vor.u32 %v2670_v2, %v2669_v14  ;;  %v2674_v29 = vrot.slane %v2669_v14, 4  ;;  %2047 = vst [vmem:[#allocation3 + $0x10c] sm:$0xf] %v2015_v20  ;;  %v13851_v5 = vld [vmem:[#allocation7 + $0x210] sm:$0xff]  }
 0x182   : > { %v13792_v27 = vld [vmem:[#allocation3 + $0x58] ss:$36 sps:$4 sm:$0xff]   ;;  %v13793_v30 = vld [vmem:[#allocation3 + $0x64] ss:$36 sps:$4 sm:$0xff]   ;;  %v2191_v31 = vsel %vm14572_vm10, %v2186_v18, %v2190_v57  ;;  %2540 = vst [vmem:[#allocation3 + $0xa4] sm:$0xf] %v2181_v28  ;;  %v2681_v32 = vor.u32 %v2679_v8, %v2678_v19  ;;  %5427 = vmatprep.mubr.bf16.mxu0 %v13790_v25  ;;  %v12561_v19 = vadd.f32 %v12560_v45, %v14926_v17  ;;  %v12563_v20 = vpop.f32.mrf.mxu0 }
 0x183   : > { %v13795_v36 = vld [vmem:[#allocation3 + $0x60] ss:$36 sps:$4 sm:$0xff]   ;;  %2541 = vst [vmem:[#allocation3 + $0xc8] sm:$0xf] %v2191_v31  ;;  %v2673_v37 = vsel %vm14551_vm9, %v11880_v13, %v2672_v21  ;;  %v2082_v35 = vld [vmem:[#allocation2 + $0x48] sm:$0xf]  ;;  %13477 = vmatpush3.bf16.msra.mxu0 %v14917_v47  ;;  %5588 = vmatprep.mubr.bf16.mxu1 %v13793_v30  ;;  %v12669_v13 = vpop.f32.mrf.mxu1 }
 0x184   : > { %v2081_v38 = vld [vmem:[#allocation2 + $0x44] sm:$0xf]  ;;  %5428 = vmatmul.mubr.bf16.gmra.mxu0 %v13792_v27  ;;  %v2682_v40 = vsel %vm14551_vm9, %v2674_v29, %v2681_v32  ;;  %3005 = vst [vmem:[#allocation3 + $0xa8] sm:$0xf] %v2673_v37  ;;  %v2083_v39 = vld [vmem:[#allocation2 + $0x4c] sm:$0x1]  ;;  %5589 = vmatmul.mubr.bf16.gmra.mxu1 %v13795_v36  ;;  %v12670_v18 = vadd.f32 %v12669_v13, %v12668_v63 }
 0x185   : > { %v2193_v41 = vshrl.u32 %v2081_v38, 16  ;;  %v2196_v42 = vshll.u32 %v2081_v38, 16  ;;  %v2202_v43 = vshll.u32 %v2082_v35, 16  ;;  %v13838_v44 = vld [vmem:[#allocation7 + $0x218] sm:$0xff]   ;;  %3006 = vst [vmem:[#allocation3 + $0xcc] sm:$0xf] %v2682_v40  ;;  %13478 = vmatprep.subr.bf16.mxu0 %v13825_v22  ;;  %v12671_v29 = vpop.f32.mrf.mxu1  ;;  %v14947_v37 = vadd.f32 %v12563_v20, %v12562_v7 }
 0x186   : > { %v2206_v46 = vshrl.u32 %v2082_v35, 16  ;;  %v2212_v48 = vshll.u32 %v2083_v39, 16  ;;  %v2578_v51 = vld [vmem:[#allocation2 + $0x50] sm:$0x8]  ;;  %v2579_v53 = vld [vmem:[#allocation2 + $0x54] sm:$0xf]  ;;  %v14945_v17 = vadd.f32 %v12670_v18, %v14923_v16 }
 0x187   : > { %v2195_v47 = vrot.slane %v2193_v41, 4  ;;  %v2198_v54 = vrot.slane %v2196_v42, 5  ;;  %v2204_v55 = vrot.slane %v2202_v43, 5  ;;  %v2580_v56 = vld [vmem:[#allocation2 + $0x58] sm:$0xf]  ;;  %v2684_v57 = vshrl.u32 %v2578_v51, 16  ;;  %13479 = vmatpush3.bf16.msra.mxu0 %v13825_v22  ;;  %v12672_v43 = vpop.f32.mrf.mxu1 }
 0x188   : > { %v2208_v58 = vrot.slane %v2206_v46, 4  ;;  %v2214_v59 = vrot.slane %v2212_v48, 5  ;;  %v2689_v60 = vshrl.u32 %v2579_v53, 16  ;;  %v2692_v61 = vshll.u32 %v2579_v53, 16  ;;  %v3039_v62 = vld [vmem:[#allocation2 + $0x54] sm:$0xf]  ;;  %13480 = vmatprep.subr.bf16.mxu0 %v13838_v44 }
 0x189   : > { %v2199_v0 = vor.u32 %v2198_v54, %v2195_v47  ;;  %v11881_v1 = vrot.slane %v2684_v57, 11  ;;  %v2698_v2 = vshrl.u32 %v2580_v56, 16  ;;  %v2701_v3 = vshll.u32 %v2580_v56, 16  ;;  %v3040_v4 = vld [vmem:[#allocation2 + $0x58] sm:$0xf]  ;;  %v14940_v22 = vld [vmem:[#allocation7 + $0x208] sm:$0xff]  }
 0x18a   : > { %3071 = vst [vmem:[#allocation3 + $0xf4] sm:$0xf] %v3039_v62  ;;  %v2209_v8 = vor.u32 %v2208_v58, %v2204_v55  ;;  %v2691_v9 = vrot.slane %v2689_v60, 7  ;;  %3072 = vst [vmem:[#allocation3 + $0x118] sm:$0xf] %v3040_v4  ;;  %v12673_v54 = vadd.f32 %v12672_v43, %v12671_v29 }
 0x18b   : > { %v2016_v10 = vld [vmem:[#allocation2 + $0x54] sm:$0xf]  ;;  %v2017_v12 = vld [vmem:[#allocation2 + $0x58] sm:$0xf]  ;;  %v13796_v14 = vld [vmem:[#allocation3 + $0xa4] ss:$36 sps:$4 sm:$0xff]   ;;  %13481 = vmatpush3.bf16.msra.mxu0 %v13838_v44  ;;  %v14953_v44 = vpop.f32.mrf.mxu0 }
 0x18c   : > { %v13798_v6 = vld [vmem:[#allocation3 + $0xa0] ss:$36 sps:$4 sm:$0xff]   ;;  %v2200_v15 = vrot.slane %v2199_v0, 4  ;;  %2048 = vst [vmem:[#allocation3 + $0x130] sm:$0xf] %v2016_v10  ;;  %v2210_v23 = vrot.slane %v2209_v8, 4  ;;  %v2694_v25 = vor.u32 %v2692_v61, %v2691_v9  ;;  %5435 = vmatprep.mubr.bf16.mxu0 %v13796_v14  ;;  %13482 = vmatprep.subr.bf16.mxu0 %v13851_v5  ;;  %v12674_v10 = vpop.f32.mrf.mxu1 }
 0x18d   : > { %2049 = vst [vmem:[#allocation3 + $0x154] sm:$0xf] %v2017_v12  ;;  %v2696_v27 = vrot.slane %v2691_v9, 4  ;;  %v2700_v28 = vrot.slane %v2698_v2, 7  ;;  %v2084_v21 = vld [vmem:[#allocation2 + $0x54] sm:$0xf]  ;;  %5436 = vmatmul.mubr.bf16.gmra.mxu0 %v13798_v6  ;;  %v14958_v2 = vadd.f32 %v12673_v54, %v12561_v19 }
 0x18e   : > { %v13800_v30 = vld [vmem:[#allocation3 + $0xac] ss:$36 sps:$4 sm:$0xff]   ;;  %v2205_v32 = vsel %vm14572_vm10, %v2200_v15, %v2204_v55  ;;  %v2217_v36 = vshrl.u32 %v2084_v21, 16  ;;  %v2215_v38 = vsel %vm14572_vm10, %v2210_v23, %v2214_v59  ;;  %v2695_v35 = vsel %vm14551_vm9, %v11881_v1, %v2694_v25  ;;  %v2085_v39 = vld [vmem:[#allocation2 + $0x58] sm:$0xf]  ;;  %v13877_v55 = vld [vmem:[#allocation7 + $0x200] sm:$0xff]   ;;  %v12675_v20 = vpop.f32.mrf.mxu1 }
 0x18f   : > { %v13802_v31 = vld [vmem:[#allocation3 + $0xa8] ss:$36 sps:$4 sm:$0xff]   ;;  %2542 = vst [vmem:[#allocation3 + $0xec] sm:$0xf] %v2205_v32  ;;  %v2703_v40 = vor.u32 %v2701_v3, %v2700_v28  ;;  %v2086_v41 = vld [vmem:[#allocation2 + $0x5c] sm:$0x1]  ;;  %5596 = vmatprep.mubr.bf16.mxu1 %v13800_v30  ;;  %13483 = vmatpush3.bf16.msra.mxu0 %v13851_v5  ;;  %v12566_v3 = vpop.f32.mrf.mxu0  ;;  %v12676_v29 = vadd.f32 %v12675_v20, %v12674_v10 }
 0x190   : > { %v2220_v42 = vshll.u32 %v2084_v21, 16  ;;  %2543 = vst [vmem:[#allocation3 + $0x110] sm:$0xf] %v2215_v38  ;;  %3007 = vst [vmem:[#allocation3 + $0xf0] sm:$0xf] %v2695_v35  ;;  %v2219_v16 = vrot.slane %v2217_v36, 4  ;;  %5597 = vmatmul.mubr.bf16.gmra.mxu1 %v13802_v31  ;;  %13484 = vmatprep.subr.bf16.mxu0 %v14940_v22  ;;  %v12677_v35 = vpop.f32.mrf.mxu1 }
 0x191   : > { %v2226_v45 = vshll.u32 %v2085_v39, 16  ;;  %v2230_v46 = vshrl.u32 %v2085_v39, 16  ;;  %v2236_v48 = vshll.u32 %v2086_v41, 16  ;;  %v2704_v51 = vsel %vm14551_vm9, %v2696_v27, %v2703_v40  ;;  %v2581_v47 = vld [vmem:[#allocation2 + $0x60] sm:$0x8]  ;;  %v12568_v30 = vpop.f32.mrf.mxu0 }
 0x192   : > { %v2222_v53 = vrot.slane %v2220_v42, 5  ;;  %3008 = vst [vmem:[#allocation3 + $0x114] sm:$0xf] %v2704_v51  ;;  %v2582_v59 = vld [vmem:[#allocation2 + $0x64] sm:$0xf]  ;;  %v2706_v60 = vshrl.u32 %v2581_v47, 16  ;;  %v14968_v43 = vadd.f32 %v12676_v29, %v14947_v37  ;;  %v12678_v54 = vpop.f32.mrf.mxu1 }
 0x193   : > { %v2228_v56 = vrot.slane %v2226_v45, 5  ;;  %v2232_v57 = vrot.slane %v2230_v46, 4  ;;  %v2238_v58 = vrot.slane %v2236_v48, 5  ;;  %v2583_v62 = vld [vmem:[#allocation2 + $0x68] sm:$0xf]  ;;  %v2711_v63 = vshrl.u32 %v2582_v59, 16  ;;  %13485 = vmatpush3.bf16.msra.mxu0 %v14940_v22  ;;  %v12569_v45 = vpop.f32.mrf.mxu0 }
 0x194   : > { %v2223_v61 = vor.u32 %v2222_v53, %v2219_v16  ;;  %v2714_v0 = vshll.u32 %v2582_v59, 16  ;;  %v3041_v1 = vld [vmem:[#allocation2 + $0x64] sm:$0xf]  ;;  %v11882_v5 = vrot.slane %v2706_v60, 11  ;;  %v2720_v7 = vshrl.u32 %v2583_v62, 16  ;;  %13486 = vmatprep.subr.bf16.mxu0 %v13877_v55 }
 0x195   : > { %v2233_v4 = vor.u32 %v2232_v57, %v2228_v56  ;;  %v2723_v8 = vshll.u32 %v2583_v62, 16  ;;  %v3042_v9 = vld [vmem:[#allocation2 + $0x68] sm:$0xf]  ;;  %3073 = vst [vmem:[#allocation3 + $0x13c] sm:$0xf] %v3041_v1  ;;  %v2713_v13 = vrot.slane %v2711_v63, 7  ;;  %v12567_v16 = vadd.f32 %v12566_v3, %v14953_v44 }
 0x196   : > { %v2224_v12 = vrot.slane %v2223_v61, 4  ;;  %3074 = vst [vmem:[#allocation3 + $0x160] sm:$0xf] %v3042_v9  ;;  %v2018_v14 = vld [vmem:[#allocation2 + $0x64] sm:$0xf]  ;;  %v2722_v18 = vrot.slane %v2720_v7, 7  ;;  %v12679_v59 = vadd.f32 %v12678_v54, %v12677_v35  ;;  %v14973_v44 = vadd.f32 %v12569_v45, %v12568_v30 }
 0x197   : > { %v2019_v6 = vld [vmem:[#allocation2 + $0x68] sm:$0xf]  ;;  %v2234_v15 = vrot.slane %v2233_v4, 4  ;;  %2050 = vst [vmem:[#allocation3 + $0x178] sm:$0xf] %v2018_v14  ;;  %v2716_v28 = vor.u32 %v2714_v0, %v2713_v13  ;;  %v2718_v21 = vrot.slane %v2713_v13, 4  ;;  %13487 = vmatpush3.bf16.msra.mxu0 %v13877_v55  ;;  %v14975_v55 = vpop.f32.mrf.mxu0 }
 0x198   : > { %2051 = vst [vmem:[#allocation3 + $0x19c] sm:$0xf] %v2019_v6  ;;  %v2087_v19 = vld [vmem:[#allocation2 + $0x64] sm:$0xf]  ;;  %v13803_v23 = vld [vmem:[#allocation3 + $0xec] ss:$36 sps:$4 sm:$0xff]   ;;  %v2229_v27 = vsel %vm14572_vm10, %v2224_v12, %v2228_v56  ;;  %v2725_v22 = vor.u32 %v2723_v8, %v2722_v18  ;;  %v14977_v18 = vadd.f32 %v12679_v59, %v12567_v16 }
 0x199   : > { %v13805_v25 = vld [vmem:[#allocation3 + $0xe8] ss:$36 sps:$4 sm:$0xff]   ;;  %v2239_v31 = vsel %vm14572_vm10, %v2234_v15, %v2238_v58  ;;  %2544 = vst [vmem:[#allocation3 + $0x134] sm:$0xf] %v2229_v27  ;;  %v2241_v38 = vshrl.u32 %v2087_v19, 16  ;;  %5443 = vmatprep.mubr.bf16.mxu0 %v13803_v23  ;;  %v2717_v41 = vsel %vm14551_vm9, %v11882_v5, %v2716_v28  ;;  %v2244_v42 = vshll.u32 %v2087_v19, 16  ;;  %v12572_v19 = vpop.f32.mrf.mxu0 }
 0x19a   : > { %v2088_v32 = vld [vmem:[#allocation2 + $0x68] sm:$0xf]  ;;  %v2089_v36 = vld [vmem:[#allocation2 + $0x6c] sm:$0x1]  ;;  %v13806_v40 = vld [vmem:[#allocation3 + $0xf4] ss:$36 sps:$4 sm:$0xff]   ;;  %5444 = vmatmul.mubr.bf16.gmra.mxu0 %v13805_v25  ;;  %v2726_v46 = vsel %vm14551_vm9, %v2718_v21, %v2725_v22 }
 0x19b   : > { %v13808_v39 = vld [vmem:[#allocation3 + $0xf0] ss:$36 sps:$4 sm:$0xff]   ;;  %2545 = vst [vmem:[#allocation3 + $0x158] sm:$0xf] %v2239_v31  ;;  %3009 = vst [vmem:[#allocation3 + $0x138] sm:$0xf] %v2717_v41  ;;  %5604 = vmatprep.mubr.bf16.mxu1 %v13806_v40  ;;  %v12680_v40 = vpop.f32.mrf.mxu1 }
 0x19c   : > { %v2243_v48 = vrot.slane %v2241_v38, 4  ;;  %v2250_v51 = vshll.u32 %v2088_v32, 16  ;;  %v2254_v53 = vshrl.u32 %v2088_v32, 16  ;;  %v2584_v47 = vld [vmem:[#allocation2 + $0x70] sm:$0x8]  ;;  %v2246_v56 = vrot.slane %v2244_v42, 5  ;;  %5605 = vmatmul.mubr.bf16.gmra.mxu1 %v13808_v39 }
 0x19d   : > { %3010 = vst [vmem:[#allocation3 + $0x15c] sm:$0xf] %v2726_v46  ;;  %v2260_v57 = vshll.u32 %v2089_v36, 16  ;;  %v2585_v37 = vld [vmem:[#allocation2 + $0x74] sm:$0xf]  ;;  %v2728_v62 = vshrl.u32 %v2584_v47, 16  ;;  %v12574_v46 = vpop.f32.mrf.mxu0 }
 0x19e   : > { %v2586_v58 = vld [vmem:[#allocation2 + $0x78] sm:$0xf]  ;;  %v2252_v60 = vrot.slane %v2250_v51, 5  ;;  %v2256_v61 = vrot.slane %v2254_v53, 4  ;;  %v2733_v63 = vshrl.u32 %v2585_v37, 16  ;;  %v2247_v1 = vor.u32 %v2246_v56, %v2243_v48  ;;  %v12681_v53 = vpop.f32.mrf.mxu1 }
 0x19f   : > { %v3043_v0 = vld [vmem:[#allocation2 + $0x74] sm:$0xf]  ;;  %v2262_v3 = vrot.slane %v2260_v57, 5  ;;  %v2736_v4 = vshll.u32 %v2585_v37, 16  ;;  %v2742_v5 = vshrl.u32 %v2586_v58, 16  ;;  %v11883_v9 = vrot.slane %v2728_v62, 11 }
 0x1a0   : > { %v3044_v7 = vld [vmem:[#allocation2 + $0x78] sm:$0xf]  ;;  %3075 = vst [vmem:[#allocation3 + $0x184] sm:$0xf] %v3043_v0  ;;  %v2257_v8 = vor.u32 %v2256_v61, %v2252_v60  ;;  %v2735_v10 = vrot.slane %v2733_v63, 7  ;;  %v2745_v12 = vshll.u32 %v2586_v58, 16  ;;  %v12682_v37 = vadd.f32 %v12681_v53, %v12680_v40  ;;  %v12575_v58 = vpop.f32.mrf.mxu0  ;;  %v12683_v63 = vpop.f32.mrf.mxu1 }
 0x1a1   : > { %3076 = vst [vmem:[#allocation3 + $0x1a8] sm:$0xf] %v3044_v7  ;;  %v2020_v13 = vld [vmem:[#allocation2 + $0x74] sm:$0xf]  ;;  %v2248_v14 = vrot.slane %v2247_v1, 4  ;;  %v2744_v6 = vrot.slane %v2742_v5, 7  ;;  %v12573_v0 = vadd.f32 %v12572_v19, %v14975_v55  ;;  %v14988_v1 = vadd.f32 %v12575_v58, %v12574_v46 }
 0x1a2   : > { %v2021_v15 = vld [vmem:[#allocation2 + $0x78] sm:$0xf]  ;;  %2052 = vst [vmem:[#allocation3 + $0x1c0] sm:$0xf] %v2020_v13  ;;  %v13811_v23 = vld [vmem:[#allocation3 + $0x130] ss:$36 sps:$4 sm:$0xff]   ;;  %v2738_v27 = vor.u32 %v2736_v4, %v2735_v10 }
 0x1a3   : > { %v13809_v20 = vld [vmem:[#allocation3 + $0x134] ss:$36 sps:$4 sm:$0xff]   ;;  %v2258_v25 = vrot.slane %v2257_v8, 4  ;;  %2053 = vst [vmem:[#allocation3 + $0x1e4] sm:$0xf] %v2021_v15  ;;  %v2253_v28 = vsel %vm14572_vm10, %v2248_v14, %v2252_v60  ;;  %v2740_v21 = vrot.slane %v2735_v10, 4  ;;  %v2747_v29 = vor.u32 %v2745_v12, %v2744_v6  ;;  %v12684_v15 = vpop.f32.mrf.mxu1 }
 0x1a4   : > { %v2090_v30 = vld [vmem:[#allocation2 + $0x74] sm:$0xf]  ;;  %v2091_v31 = vld [vmem:[#allocation2 + $0x78] sm:$0xf]  ;;  %5451 = vmatprep.mubr.bf16.mxu0 %v13809_v20  ;;  %v13813_v22 = vld [vmem:[#allocation3 + $0x13c] ss:$36 sps:$4 sm:$0xff]   ;;  %v2739_v38 = vsel %vm14551_vm9, %v11883_v9, %v2738_v27  ;;  %v14991_v6 = vadd.f32 %v12682_v37, %v14973_v44 }
 0x1a5   : > { %v13815_v32 = vld [vmem:[#allocation3 + $0x138] ss:$36 sps:$4 sm:$0xff]   ;;  %v2263_v36 = vsel %vm14572_vm10, %v2258_v25, %v2262_v3  ;;  %2546 = vst [vmem:[#allocation3 + $0x17c] sm:$0xf] %v2253_v28  ;;  %v2265_v35 = vshrl.u32 %v2090_v30, 16  ;;  %5452 = vmatmul.mubr.bf16.gmra.mxu0 %v13811_v23  ;;  %v2748_v39 = vsel %vm14551_vm9, %v2740_v21, %v2747_v29  ;;  %v2268_v42 = vshll.u32 %v2090_v30, 16  ;;  %5612 = vmatprep.mubr.bf16.mxu1 %v13813_v22  ;;  %v12577_v29 = vpop.f32.mrf.mxu0 }
 0x1a6   : > { %2547 = vst [vmem:[#allocation3 + $0x1a0] sm:$0xf] %v2263_v36  ;;  %3011 = vst [vmem:[#allocation3 + $0x180] sm:$0xf] %v2739_v38  ;;  %v2092_v41 = vld [vmem:[#allocation2 + $0x7c] sm:$0x1]  ;;  %5613 = vmatmul.mubr.bf16.gmra.mxu1 %v13815_v32  ;;  %v12685_v25 = vadd.f32 %v12684_v15, %v12683_v63 }
 0x1a7   : > { %v2274_v16 = vshll.u32 %v2091_v31, 16  ;;  %v2278_v45 = vshrl.u32 %v2091_v31, 16  ;;  %3012 = vst [vmem:[#allocation3 + $0x1a4] sm:$0xf] %v2748_v39  ;;  %v2267_v48 = vrot.slane %v2265_v35, 4  ;;  %v2284_v51 = vshll.u32 %v2092_v41, 16 }
 0x1a8   : > { %v2270_v47 = vrot.slane %v2268_v42, 5  ;;  %v2587_v57 = vld [vmem:[#allocation2 + $0x80] sm:$0x8]  ;;  %v2588_v60 = vld [vmem:[#allocation2 + $0x84] sm:$0xf]  ;;  %v14997_v39 = vadd.f32 %v12685_v25, %v12573_v0 }
 0x1a9   : > { %v2276_v54 = vrot.slane %v2274_v16, 5  ;;  %v2280_v56 = vrot.slane %v2278_v45, 4  ;;  %v2286_v59 = vrot.slane %v2284_v51, 5  ;;  %v2589_v61 = vld [vmem:[#allocation2 + $0x88] sm:$0xf]  ;;  %v2750_v62 = vshrl.u32 %v2587_v57, 16  ;;  %v12578_v57 = vpop.f32.mrf.mxu0 }
 0x1aa   : > { %v2271_v3 = vor.u32 %v2270_v47, %v2267_v48  ;;  %v2755_v5 = vshrl.u32 %v2588_v60, 16  ;;  %v2758_v7 = vshll.u32 %v2588_v60, 16  ;;  %v3045_v8 = vld [vmem:[#allocation2 + $0x84] sm:$0xf]  ;;  %v3046_v9 = vld [vmem:[#allocation2 + $0x88] sm:$0xf]  ;;  %v12686_v48 = vpop.f32.mrf.mxu1 }
 0x1ab   : > { %v2281_v4 = vor.u32 %v2280_v56, %v2276_v54  ;;  %v11884_v10 = vrot.slane %v2750_v62, 11  ;;  %v2764_v12 = vshrl.u32 %v2589_v61, 16  ;;  %v2767_v13 = vshll.u32 %v2589_v61, 16  ;;  %3077 = vst [vmem:[#allocation3 + $0x1cc] sm:$0xf] %v3045_v8 }
 0x1ac   : > { %3078 = vst [vmem:[#allocation3 + $0x1f0] sm:$0xf] %v3046_v9  ;;  %v2022_v14 = vld [vmem:[#allocation2 + $0x84] sm:$0xf]  ;;  %v2272_v20 = vrot.slane %v2271_v3, 4  ;;  %v2757_v19 = vrot.slane %v2755_v5, 7  ;;  %v12687_v62 = vpop.f32.mrf.mxu1 }
 0x1ad   : > { %v2282_v55 = vrot.slane %v2281_v4, 4  ;;  %v2023_v23 = vld [vmem:[#allocation2 + $0x88] sm:$0xf]  ;;  %2054 = vst [vmem:[#allocation3 + $0x208] sm:$0xf] %v2022_v14  ;;  %v2766_v21 = vrot.slane %v2764_v12, 7 }
 0x1ae   : > { %v13816_v27 = vld [vmem:[#allocation3 + $0x17c] ss:$36 sps:$4 sm:$0xff]   ;;  %2055 = vst [vmem:[#allocation3 + $0x22c] sm:$0xf] %v2023_v23  ;;  %v13819_v30 = vld [vmem:[#allocation3 + $0x184] ss:$36 sps:$4 sm:$0xff]   ;;  %v2277_v31 = vsel %vm14572_vm10, %v2272_v20, %v2276_v54  ;;  %v2760_v22 = vor.u32 %v2758_v7, %v2757_v19  ;;  %v12689_v12 = vpop.f32.mrf.mxu1  ;;  %v12580_v23 = vpop.f32.mrf.mxu0 }
 0x1af   : > { %v13818_v28 = vld [vmem:[#allocation3 + $0x178] ss:$36 sps:$4 sm:$0xff]   ;;  %v2287_v44 = vsel %vm14572_vm10, %v2282_v55, %v2286_v59  ;;  %v2762_v32 = vrot.slane %v2757_v19, 4  ;;  %5459 = vmatprep.mubr.bf16.mxu0 %v13816_v27  ;;  %v13821_v36 = vld [vmem:[#allocation3 + $0x180] ss:$36 sps:$4 sm:$0xff]   ;;  %v2769_v38 = vor.u32 %v2767_v13, %v2766_v21  ;;  %5620 = vmatprep.mubr.bf16.mxu1 %v13819_v30  ;;  %v12688_v19 = vadd.f32 %v12687_v62, %v12686_v48 }
 0x1b0   : > { %2548 = vst [vmem:[#allocation3 + $0x1c4] sm:$0xf] %v2277_v31  ;;  %2549 = vst [vmem:[#allocation3 + $0x1e8] sm:$0xf] %v2287_v44  ;;  %v2093_v35 = vld [vmem:[#allocation2 + $0x84] sm:$0xf]  ;;  %5460 = vmatmul.mubr.bf16.gmra.mxu0 %v13818_v28  ;;  %v2761_v41 = vsel %vm14551_vm9, %v11884_v10, %v2760_v22  ;;  %5621 = vmatmul.mubr.bf16.gmra.mxu1 %v13821_v36  ;;  %v12579_v21 = vadd.f32 %v12578_v57, %v12577_v29  ;;  %v12690_v30 = vpop.f32.mrf.mxu1 }
 0x1b1   : > { %v2094_v40 = vld [vmem:[#allocation2 + $0x88] sm:$0xf]  ;;  %v2095_v42 = vld [vmem:[#allocation2 + $0x8c] sm:$0x1]  ;;  %v2289_v16 = vshrl.u32 %v2093_v35, 16  ;;  %v2292_v45 = vshll.u32 %v2093_v35, 16  ;;  %v2770_v51 = vsel %vm14551_vm9, %v2762_v32, %v2769_v38  ;;  %v15004_v38 = vadd.f32 %v12688_v19, %v14988_v1  ;;  %v12581_v35 = vpop.f32.mrf.mxu0 }
 0x1b2   : > { %v2298_v46 = vshll.u32 %v2094_v40, 16  ;;  %3013 = vst [vmem:[#allocation3 + $0x1c8] sm:$0xf] %v2761_v41  ;;  %v2302_v53 = vshrl.u32 %v2094_v40, 16  ;;  %v2308_v47 = vshll.u32 %v2095_v42, 16  ;;  %v12692_v19 = vpop.f32.mrf.mxu1 }
 0x1b3   : > { %v2590_v54 = vld [vmem:[#allocation2 + $0x90] sm:$0x8]  ;;  %v2591_v56 = vld [vmem:[#allocation2 + $0x94] sm:$0xf]  ;;  %3014 = vst [vmem:[#allocation3 + $0x1ec] sm:$0xf] %v2770_v51 }
 0x1b4   : > { %v2291_v37 = vrot.slane %v2289_v16, 4  ;;  %v2294_v58 = vrot.slane %v2292_v45, 5  ;;  %v2300_v59 = vrot.slane %v2298_v46, 5  ;;  %v2592_v60 = vld [vmem:[#allocation2 + $0x98] sm:$0xf]  ;;  %v2772_v61 = vshrl.u32 %v2590_v54, 16  ;;  %v15012_v54 = vpop.f32.mrf.mxu0 }
 0x1b5   : > { %v2304_v63 = vrot.slane %v2302_v53, 4  ;;  %v2777_v0 = vshrl.u32 %v2591_v56, 16  ;;  %v2780_v3 = vshll.u32 %v2591_v56, 16  ;;  %v3047_v4 = vld [vmem:[#allocation2 + $0x94] sm:$0xf]  ;;  %v2310_v7 = vrot.slane %v2308_v47, 5 }
 0x1b6   : > { %v2295_v5 = vor.u32 %v2294_v58, %v2291_v37  ;;  %v2786_v8 = vshrl.u32 %v2592_v60, 16  ;;  %v2789_v9 = vshll.u32 %v2592_v60, 16  ;;  %v3048_v10 = vld [vmem:[#allocation2 + $0x98] sm:$0xf]  ;;  %3079 = vst [vmem:[#allocation3 + $0x214] sm:$0xf] %v3047_v4  ;;  %v12691_v46 = vadd.f32 %v12690_v30, %v12689_v12 }
 0x1b7   : > { %v2305_v13 = vor.u32 %v2304_v63, %v2300_v59  ;;  %v11885_v14 = vrot.slane %v2772_v61, 11  ;;  %v2779_v15 = vrot.slane %v2777_v0, 7  ;;  %3080 = vst [vmem:[#allocation3 + $0x238] sm:$0xf] %v3048_v10  ;;  %v2024_v20 = vld [vmem:[#allocation2 + $0x94] sm:$0xf]  ;;  %v12582_v47 = vadd.f32 %v12581_v35, %v12580_v23 }
 0x1b8   : > { %v2025_v55 = vld [vmem:[#allocation2 + $0x98] sm:$0xf]  ;;  %v13822_v25 = vld [vmem:[#allocation3 + $0x1c4] ss:$36 sps:$4 sm:$0xff]   ;;  %v2296_v27 = vrot.slane %v2295_v5, 4  ;;  %v2788_v28 = vrot.slane %v2786_v8, 7  ;;  %v15016_v62 = vadd.f32 %v12691_v46, %v12579_v21  ;;  %v12584_v5 = vpop.f32.mrf.mxu0 }
 0x1b9   : > { %2056 = vst [vmem:[#allocation3 + $0x250] sm:$0xf] %v2024_v20  ;;  %2057 = vst [vmem:[#allocation3 + $0x274] sm:$0xf] %v2025_v55  ;;  %v13824_v31 = vld [vmem:[#allocation3 + $0x1c0] ss:$36 sps:$4 sm:$0xff]   ;;  %v2782_v22 = vor.u32 %v2780_v3, %v2779_v15  ;;  %5467 = vmatprep.mubr.bf16.mxu0 %v13822_v25 }
 0x1ba   : > { %v2306_v44 = vrot.slane %v2305_v13, 4  ;;  %v2784_v32 = vrot.slane %v2779_v15, 4  ;;  %v2096_v36 = vld [vmem:[#allocation2 + $0x94] sm:$0xf]  ;;  %v2301_v40 = vsel %vm14572_vm10, %v2296_v27, %v2300_v59  ;;  %v2791_v41 = vor.u32 %v2789_v9, %v2788_v28  ;;  %v2097_v42 = vld [vmem:[#allocation2 + $0x98] sm:$0xf]  ;;  %5468 = vmatmul.mubr.bf16.gmra.mxu0 %v13824_v31 }
 0x1bb   : > { %v2098_v16 = vld [vmem:[#allocation2 + $0x9c] sm:$0x1]  ;;  %v2313_v45 = vshrl.u32 %v2096_v36, 16  ;;  %v13826_v29 = vld [vmem:[#allocation3 + $0x1cc] ss:$36 sps:$4 sm:$0xff]   ;;  %v2783_v1 = vsel %vm14551_vm9, %v11885_v14, %v2782_v22  ;;  %v2316_v53 = vshll.u32 %v2096_v36, 16  ;;  %v12586_v22 = vpop.f32.mrf.mxu0 }
 0x1bc   : > { %v13828_v48 = vld [vmem:[#allocation3 + $0x1c8] ss:$36 sps:$4 sm:$0xff]   ;;  %v2311_v51 = vsel %vm14572_vm10, %v2306_v44, %v2310_v7  ;;  %2550 = vst [vmem:[#allocation3 + $0x20c] sm:$0xf] %v2301_v40  ;;  %v2792_v56 = vsel %vm14551_vm9, %v2784_v32, %v2791_v41  ;;  %3015 = vst [vmem:[#allocation3 + $0x210] sm:$0xf] %v2783_v1  ;;  %5628 = vmatprep.mubr.bf16.mxu1 %v13826_v29  ;;  %v12693_v44 = vpop.f32.mrf.mxu1 }
 0x1bd   : > { %2551 = vst [vmem:[#allocation3 + $0x230] sm:$0xf] %v2311_v51  ;;  %v2315_v57 = vrot.slane %v2313_v45, 4  ;;  %v2322_v37 = vshll.u32 %v2097_v42, 16  ;;  %v2326_v58 = vshrl.u32 %v2097_v42, 16  ;;  %v2318_v59 = vrot.slane %v2316_v53, 5  ;;  %5629 = vmatmul.mubr.bf16.gmra.mxu1 %v13828_v48  ;;  %v12587_v48 = vpop.f32.mrf.mxu0 }
 0x1be   : > { %3016 = vst [vmem:[#allocation3 + $0x234] sm:$0xf] %v2792_v56  ;;  %v2332_v60 = vshll.u32 %v2098_v16, 16  ;;  %v2593_v61 = vld [vmem:[#allocation2 + $0xa0] sm:$0x8]  ;;  %v12694_v42 = vadd.f32 %v12693_v44, %v12692_v19  ;;  %v12695_v29 = vpop.f32.mrf.mxu1 }
 0x1bf   : > { %v2324_v63 = vrot.slane %v2322_v37, 5  ;;  %v2328_v0 = vrot.slane %v2326_v58, 4  ;;  %v2594_v3 = vld [vmem:[#allocation2 + $0xa4] sm:$0xf]  ;;  %v2595_v4 = vld [vmem:[#allocation2 + $0xa8] sm:$0xf]  ;;  %v2319_v7 = vor.u32 %v2318_v59, %v2315_v57  ;;  %v15026_v37 = vadd.f32 %v12587_v48, %v12586_v22 }
 0x1c0   : > { %v2334_v8 = vrot.slane %v2332_v60, 5  ;;  %v2794_v9 = vshrl.u32 %v2593_v61, 16  ;;  %v2799_v10 = vshrl.u32 %v2594_v3, 16  ;;  %v3049_v12 = vld [vmem:[#allocation2 + $0xa4] sm:$0xf]  ;;  %v2802_v14 = vshll.u32 %v2594_v3, 16  ;;  %v12589_v3 = vpop.f32.mrf.mxu0 }
 0x1c1   : > { %v2329_v13 = vor.u32 %v2328_v0, %v2324_v63  ;;  %v2808_v15 = vshrl.u32 %v2595_v4, 16  ;;  %v2811_v20 = vshll.u32 %v2595_v4, 16  ;;  %v3050_v55 = vld [vmem:[#allocation2 + $0xa8] sm:$0xf]  ;;  %3081 = vst [vmem:[#allocation3 + $0x25c] sm:$0xf] %v3049_v12  ;;  %v15024_v57 = vadd.f32 %v12694_v42, %v12582_v47  ;;  %v12696_v0 = vpop.f32.mrf.mxu1 }
 0x1c2   : > { %v2320_v23 = vrot.slane %v2319_v7, 4  ;;  %v11886_v25 = vrot.slane %v2794_v9, 11  ;;  %v2801_v27 = vrot.slane %v2799_v10, 7  ;;  %3082 = vst [vmem:[#allocation3 + $0x280] sm:$0xf] %v3050_v55  ;;  %v12585_v9 = vadd.f32 %v12584_v5, %v15012_v54 }
 0x1c3   : > { %v2026_v28 = vld [vmem:[#allocation2 + $0xa4] sm:$0xf]  ;;  %v2330_v21 = vrot.slane %v2329_v13, 4  ;;  %v2810_v30 = vrot.slane %v2808_v15, 7  ;;  %v2027_v31 = vld [vmem:[#allocation2 + $0xa8] sm:$0xf]  ;;  %v12697_v10 = vadd.f32 %v12696_v0, %v12695_v29  ;;  %v12698_v22 = vpop.f32.mrf.mxu1 }
 0x1c4   : > { %2058 = vst [vmem:[#allocation3 + $0x298] sm:$0xf] %v2026_v28  ;;  %v13829_v32 = vld [vmem:[#allocation3 + $0x20c] ss:$36 sps:$4 sm:$0xff]   ;;  %v2325_v35 = vsel %vm14572_vm10, %v2320_v23, %v2324_v63  ;;  %v2804_v40 = vor.u32 %v2802_v14, %v2801_v27  ;;  %v2806_v41 = vrot.slane %v2801_v27, 4 }
 0x1c5   : > { %v13831_v36 = vld [vmem:[#allocation3 + $0x208] ss:$36 sps:$4 sm:$0xff]   ;;  %2059 = vst [vmem:[#allocation3 + $0x2bc] sm:$0xf] %v2027_v31  ;;  %v13832_v16 = vld [vmem:[#allocation3 + $0x214] ss:$36 sps:$4 sm:$0xff]   ;;  %v2335_v45 = vsel %vm14572_vm10, %v2330_v21, %v2334_v8  ;;  %v2813_v46 = vor.u32 %v2811_v20, %v2810_v30  ;;  %5475 = vmatprep.mubr.bf16.mxu0 %v13829_v32  ;;  %v12590_v32 = vpop.f32.mrf.mxu0 }
 0x1c6   : > { %2552 = vst [vmem:[#allocation3 + $0x254] sm:$0xf] %v2325_v35  ;;  %v13834_v51 = vld [vmem:[#allocation3 + $0x210] ss:$36 sps:$4 sm:$0xff]   ;;  %2553 = vst [vmem:[#allocation3 + $0x278] sm:$0xf] %v2335_v45  ;;  %v2805_v1 = vsel %vm14551_vm9, %v11886_v25, %v2804_v40  ;;  %5476 = vmatmul.mubr.bf16.gmra.mxu0 %v13831_v36  ;;  %5636 = vmatprep.mubr.bf16.mxu1 %v13832_v16  ;;  %v15031_v40 = vadd.f32 %v12697_v10, %v12585_v9  ;;  %v12699_v45 = vpop.f32.mrf.mxu1 }
 0x1c7   : > { %v2099_v53 = vld [vmem:[#allocation2 + $0xa4] sm:$0xf]  ;;  %v2100_v56 = vld [vmem:[#allocation2 + $0xa8] sm:$0xf]  ;;  %v2814_v58 = vsel %vm14551_vm9, %v2806_v41, %v2813_v46  ;;  %3017 = vst [vmem:[#allocation3 + $0x258] sm:$0xf] %v2805_v1  ;;  %5637 = vmatmul.mubr.bf16.gmra.mxu1 %v13834_v51  ;;  %v12592_v0 = vpop.f32.mrf.mxu0 }
 0x1c8   : > { %v2101_v59 = vld [vmem:[#allocation2 + $0xac] sm:$0x1]  ;;  %v2337_v60 = vshrl.u32 %v2099_v53, 16  ;;  %v2340_v61 = vshll.u32 %v2099_v53, 16  ;;  %v2346_v63 = vshll.u32 %v2100_v56, 16  ;;  %v2350_v4 = vshrl.u32 %v2100_v56, 16 }
 0x1c9   : > { %3018 = vst [vmem:[#allocation3 + $0x27c] sm:$0xf] %v2814_v58  ;;  %v2356_v7 = vshll.u32 %v2101_v59, 16  ;;  %v2596_v47 = vld [vmem:[#allocation2 + $0xb0] sm:$0x8] }
 0x1ca   : > { %v2597_v8 = vld [vmem:[#allocation2 + $0xb4] sm:$0xf]  ;;  %v2339_v12 = vrot.slane %v2337_v60, 4  ;;  %v2342_v13 = vrot.slane %v2340_v61, 5  ;;  %v2348_v14 = vrot.slane %v2346_v63, 5  ;;  %v2816_v20 = vshrl.u32 %v2596_v47, 16  ;;  %v12701_v61 = vpop.f32.mrf.mxu1 }
 0x1cb   : > { %v2598_v15 = vld [vmem:[#allocation2 + $0xb8] sm:$0xf]  ;;  %v2352_v55 = vrot.slane %v2350_v4, 4  ;;  %v2358_v19 = vrot.slane %v2356_v7, 5  ;;  %v2821_v23 = vshrl.u32 %v2597_v8, 16  ;;  %v2824_v25 = vshll.u32 %v2597_v8, 16 }
 0x1cc   : > { %v3051_v27 = vld [vmem:[#allocation2 + $0xb4] sm:$0xf]  ;;  %v2343_v28 = vor.u32 %v2342_v13, %v2339_v12  ;;  %v11887_v21 = vrot.slane %v2816_v20, 11  ;;  %v2830_v30 = vshrl.u32 %v2598_v15, 16  ;;  %v2833_v31 = vshll.u32 %v2598_v15, 16  ;;  %v12702_v15 = vpop.f32.mrf.mxu1  ;;  %v12593_v20 = vpop.f32.mrf.mxu0 }
 0x1cd   : > { %v3052_v44 = vld [vmem:[#allocation2 + $0xb8] sm:$0xf]  ;;  %3083 = vst [vmem:[#allocation3 + $0x2a4] sm:$0xf] %v3051_v27  ;;  %v2353_v54 = vor.u32 %v2352_v55, %v2348_v14  ;;  %v2823_v5 = vrot.slane %v2821_v23, 7  ;;  %v12700_v60 = vadd.f32 %v12699_v45, %v12698_v22  ;;  %v12591_v63 = vadd.f32 %v12590_v32, %v12589_v3 }
 0x1ce   : > { %3084 = vst [vmem:[#allocation3 + $0x2c8] sm:$0xf] %v3052_v44  ;;  %v2028_v36 = vld [vmem:[#allocation2 + $0xb4] sm:$0xf]  ;;  %v2029_v35 = vld [vmem:[#allocation2 + $0xb8] sm:$0xf]  ;;  %v12703_v27 = vadd.f32 %v12702_v15, %v12701_v61 }
 0x1cf   : > { %v13835_v41 = vld [vmem:[#allocation3 + $0x254] ss:$36 sps:$4 sm:$0xff]   ;;  %v2344_v16 = vrot.slane %v2343_v28, 4  ;;  %2060 = vst [vmem:[#allocation3 + $0x2e0] sm:$0xf] %v2028_v36  ;;  %v2354_v46 = vrot.slane %v2353_v54, 4  ;;  %v2826_v29 = vor.u32 %v2824_v25, %v2823_v5  ;;  %v15042_v25 = vadd.f32 %v12700_v60, %v15026_v37 }
 0x1d0   : > { %v13837_v42 = vld [vmem:[#allocation3 + $0x250] ss:$36 sps:$4 sm:$0xff]   ;;  %2061 = vst [vmem:[#allocation3 + $0x304] sm:$0xf] %v2029_v35  ;;  %v2828_v48 = vrot.slane %v2823_v5, 4  ;;  %v2832_v51 = vrot.slane %v2830_v30, 7  ;;  %5483 = vmatprep.mubr.bf16.mxu0 %v13835_v41  ;;  %v15044_v35 = vadd.f32 %v12703_v27, %v12591_v63  ;;  %v12595_v41 = vpop.f32.mrf.mxu0 }
 0x1d1   : > { %v2102_v1 = vld [vmem:[#allocation2 + $0xb4] sm:$0xf]  ;;  %v13839_v53 = vld [vmem:[#allocation3 + $0x25c] ss:$36 sps:$4 sm:$0xff]   ;;  %v2349_v58 = vsel %vm14572_vm10, %v2344_v16, %v2348_v14  ;;  %5484 = vmatmul.mubr.bf16.gmra.mxu0 %v13837_v42  ;;  %v2359_v4 = vsel %vm14572_vm10, %v2354_v46, %v2358_v19  ;;  %v2827_v7 = vsel %vm14551_vm9, %v11887_v21, %v2826_v29  ;;  %v2103_v8 = vld [vmem:[#allocation2 + $0xb8] sm:$0xf] }
 0x1d2   : > { %v13841_v56 = vld [vmem:[#allocation3 + $0x258] ss:$36 sps:$4 sm:$0xff]   ;;  %v2361_v59 = vshrl.u32 %v2102_v1, 16  ;;  %2554 = vst [vmem:[#allocation3 + $0x29c] sm:$0xf] %v2349_v58  ;;  %v2835_v47 = vor.u32 %v2833_v31, %v2832_v51  ;;  %v2364_v10 = vshll.u32 %v2102_v1, 16  ;;  %5644 = vmatprep.mubr.bf16.mxu1 %v13839_v53  ;;  %v15046_v53 = vadd.f32 %v12593_v20, %v12592_v0 }
 0x1d3   : > { %v2104_v9 = vld [vmem:[#allocation2 + $0xbc] sm:$0x1]  ;;  %2555 = vst [vmem:[#allocation3 + $0x2c0] sm:$0xf] %v2359_v4  ;;  %3019 = vst [vmem:[#allocation3 + $0x2a0] sm:$0xf] %v2827_v7  ;;  %5645 = vmatmul.mubr.bf16.gmra.mxu1 %v13841_v56 }
 0x1d4   : > { %v2363_v12 = vrot.slane %v2361_v59, 4  ;;  %v2370_v13 = vshll.u32 %v2103_v8, 16  ;;  %v2374_v14 = vshrl.u32 %v2103_v8, 16  ;;  %v2380_v3 = vshll.u32 %v2104_v9, 16  ;;  %v2599_v23 = vld [vmem:[#allocation2 + $0xc0] sm:$0x8] }
 0x1d5   : > { %v2836_v55 = vsel %vm14551_vm9, %v2828_v48, %v2835_v47  ;;  %v2366_v19 = vrot.slane %v2364_v10, 5  ;;  %v2600_v31 = vld [vmem:[#allocation2 + $0xc4] sm:$0xf]  ;;  %v2838_v44 = vshrl.u32 %v2599_v23, 16  ;;  %v2601_v32 = vld [vmem:[#allocation2 + $0xc8] sm:$0xf]  ;;  %v12596_v47 = vpop.f32.mrf.mxu0 }
 0x1d6   : > { %3020 = vst [vmem:[#allocation3 + $0x2c4] sm:$0xf] %v2836_v55  ;;  %v2372_v28 = vrot.slane %v2370_v13, 5  ;;  %v2376_v21 = vrot.slane %v2374_v14, 4  ;;  %v2382_v30 = vrot.slane %v2380_v3, 5  ;;  %v2843_v54 = vshrl.u32 %v2600_v31, 16  ;;  %v12704_v13 = vpop.f32.mrf.mxu1 }
 0x1d7   : > { %v2367_v22 = vor.u32 %v2366_v19, %v2363_v12  ;;  %v2846_v5 = vshll.u32 %v2600_v31, 16  ;;  %v3053_v36 = vld [vmem:[#allocation2 + $0xc4] sm:$0xf]  ;;  %v11888_v16 = vrot.slane %v2838_v44, 11  ;;  %v2852_v45 = vshrl.u32 %v2601_v32, 16 }
 0x1d8   : > { %v2377_v42 = vor.u32 %v2376_v21, %v2372_v28  ;;  %v2855_v37 = vshll.u32 %v2601_v32, 16  ;;  %v3054_v46 = vld [vmem:[#allocation2 + $0xc8] sm:$0xf]  ;;  %3085 = vst [vmem:[#allocation3 + $0x2ec] sm:$0xf] %v3053_v36  ;;  %v2845_v48 = vrot.slane %v2843_v54, 7  ;;  %v12705_v21 = vpop.f32.mrf.mxu1  ;;  %v12597_v54 = vadd.f32 %v12596_v47, %v12595_v41 }
 0x1d9   : > { %v2368_v29 = vrot.slane %v2367_v22, 4  ;;  %3086 = vst [vmem:[#allocation3 + $0x310] sm:$0xf] %v3054_v46  ;;  %v2030_v51 = vld [vmem:[#allocation2 + $0xc4] sm:$0xf]  ;;  %v2854_v58 = vrot.slane %v2852_v45, 7  ;;  %v12706_v32 = vadd.f32 %v12705_v21, %v12704_v13 }
 0x1da   : > { %v2031_v1 = vld [vmem:[#allocation2 + $0xc8] sm:$0xf]  ;;  %v2378_v56 = vrot.slane %v2377_v42, 4  ;;  %2062 = vst [vmem:[#allocation3 + $0x328] sm:$0xf] %v2030_v51  ;;  %v2848_v4 = vor.u32 %v2846_v5, %v2845_v48  ;;  %v2850_v7 = vrot.slane %v2845_v48, 4  ;;  %v12598_v5 = vpop.f32.mrf.mxu0  ;;  %v12707_v46 = vpop.f32.mrf.mxu1 }
 0x1db   : > { %2063 = vst [vmem:[#allocation3 + $0x34c] sm:$0xf] %v2031_v1  ;;  %v2105_v59 = vld [vmem:[#allocation2 + $0xc4] sm:$0xf]  ;;  %v13842_v60 = vld [vmem:[#allocation3 + $0x29c] ss:$36 sps:$4 sm:$0xff]   ;;  %v2373_v63 = vsel %vm14572_vm10, %v2368_v29, %v2372_v28  ;;  %v2857_v9 = vor.u32 %v2855_v37, %v2854_v58 }
 0x1dc   : > { %v13844_v61 = vld [vmem:[#allocation3 + $0x298] ss:$36 sps:$4 sm:$0xff]   ;;  %v2383_v8 = vsel %vm14572_vm10, %v2378_v56, %v2382_v30  ;;  %2556 = vst [vmem:[#allocation3 + $0x2e4] sm:$0xf] %v2373_v63  ;;  %v2106_v0 = vld [vmem:[#allocation2 + $0xc8] sm:$0xf]  ;;  %5491 = vmatprep.mubr.bf16.mxu0 %v13842_v60  ;;  %v2849_v15 = vsel %vm14551_vm9, %v11888_v16, %v2848_v4  ;;  %v12599_v58 = vpop.f32.mrf.mxu0  ;;  %v12708_v4 = vpop.f32.mrf.mxu1 }
 0x1dd   : > { %v2107_v10 = vld [vmem:[#allocation2 + $0xcc] sm:$0x1]  ;;  %v2385_v12 = vshrl.u32 %v2105_v59, 16  ;;  %v13845_v14 = vld [vmem:[#allocation3 + $0x2a4] ss:$36 sps:$4 sm:$0xff]   ;;  %v2388_v20 = vshll.u32 %v2105_v59, 16  ;;  %5492 = vmatmul.mubr.bf16.gmra.mxu0 %v13844_v61  ;;  %v2858_v55 = vsel %vm14551_vm9, %v2850_v7, %v2857_v9  ;;  %v15057_v9 = vadd.f32 %v12706_v32, %v15046_v53 }
 0x1de   : > { %v13847_v3 = vld [vmem:[#allocation3 + $0x2a0] ss:$36 sps:$4 sm:$0xff]   ;;  %2557 = vst [vmem:[#allocation3 + $0x308] sm:$0xf] %v2383_v8  ;;  %3021 = vst [vmem:[#allocation3 + $0x2e8] sm:$0xf] %v2849_v15  ;;  %5652 = vmatprep.mubr.bf16.mxu1 %v13845_v14  ;;  %v15061_v15 = vadd.f32 %v12599_v58, %v12598_v5 }
 0x1df   : > { %v2387_v19 = vrot.slane %v2385_v12, 4  ;;  %v2394_v23 = vshll.u32 %v2106_v0, 16  ;;  %v2398_v27 = vshrl.u32 %v2106_v0, 16  ;;  %v2602_v28 = vld [vmem:[#allocation2 + $0xd0] sm:$0x8]  ;;  %v2390_v30 = vrot.slane %v2388_v20, 5  ;;  %5653 = vmatmul.mubr.bf16.gmra.mxu1 %v13847_v3 }
 0x1e0   : > { %3022 = vst [vmem:[#allocation3 + $0x30c] sm:$0xf] %v2858_v55  ;;  %v2404_v31 = vshll.u32 %v2107_v10, 16  ;;  %v2603_v44 = vld [vmem:[#allocation2 + $0xd4] sm:$0xf]  ;;  %v2860_v16 = vshrl.u32 %v2602_v28, 16  ;;  %v12709_v0 = vadd.f32 %v12708_v4, %v12707_v46  ;;  %v15059_v10 = vpop.f32.mrf.mxu0 }
 0x1e1   : > { %v2604_v22 = vld [vmem:[#allocation2 + $0xd8] sm:$0xf]  ;;  %v2396_v36 = vrot.slane %v2394_v23, 5  ;;  %v2400_v42 = vrot.slane %v2398_v27, 4  ;;  %v2865_v45 = vshrl.u32 %v2603_v44, 16  ;;  %v2391_v29 = vor.u32 %v2390_v30, %v2387_v19 }
 0x1e2   : > { %v3055_v37 = vld [vmem:[#allocation2 + $0xd4] sm:$0xf]  ;;  %v2406_v48 = vrot.slane %v2404_v31, 5  ;;  %v2868_v51 = vshll.u32 %v2603_v44, 16  ;;  %v2874_v1 = vshrl.u32 %v2604_v22, 16  ;;  %v11889_v60 = vrot.slane %v2860_v16, 11 }
 0x1e3   : > { %v3056_v56 = vld [vmem:[#allocation2 + $0xd8] sm:$0xf]  ;;  %3087 = vst [vmem:[#allocation3 + $0x334] sm:$0xf] %v3055_v37  ;;  %v2401_v59 = vor.u32 %v2400_v42, %v2396_v36  ;;  %v2867_v61 = vrot.slane %v2865_v45, 7  ;;  %v2877_v63 = vshll.u32 %v2604_v22, 16  ;;  %v15065_v28 = vadd.f32 %v12709_v0, %v12597_v54  ;;  %v12602_v42 = vpop.f32.mrf.mxu0 }
 0x1e4   : > { %3088 = vst [vmem:[#allocation3 + $0x358] sm:$0xf] %v3056_v56  ;;  %v2032_v41 = vld [vmem:[#allocation2 + $0xd4] sm:$0xf]  ;;  %v2392_v7 = vrot.slane %v2391_v29, 4  ;;  %v2876_v47 = vrot.slane %v2874_v1, 7 }
 0x1e5   : > { %v2033_v8 = vld [vmem:[#allocation2 + $0xd8] sm:$0xf]  ;;  %2064 = vst [vmem:[#allocation3 + $0x370] sm:$0xf] %v2032_v41  ;;  %v13848_v12 = vld [vmem:[#allocation3 + $0x2e4] ss:$36 sps:$4 sm:$0xff]   ;;  %v2870_v3 = vor.u32 %v2868_v51, %v2867_v61 }
 0x1e6   : > { %v13850_v13 = vld [vmem:[#allocation3 + $0x2e0] ss:$36 sps:$4 sm:$0xff]   ;;  %v2402_v14 = vrot.slane %v2401_v59, 4  ;;  %2065 = vst [vmem:[#allocation3 + $0x394] sm:$0xf] %v2033_v8  ;;  %v2397_v20 = vsel %vm14572_vm10, %v2392_v7, %v2396_v36  ;;  %v2872_v55 = vrot.slane %v2867_v61, 4  ;;  %v2879_v19 = vor.u32 %v2877_v63, %v2876_v47  ;;  %5499 = vmatprep.mubr.bf16.mxu0 %v13848_v12  ;;  %v12710_v59 = vpop.f32.mrf.mxu1  ;;  %v12604_v47 = vpop.f32.mrf.mxu0 }
 0x1e7   : > { %v2108_v23 = vld [vmem:[#allocation2 + $0xd4] sm:$0xf]  ;;  %v2109_v27 = vld [vmem:[#allocation2 + $0xd8] sm:$0xf]  ;;  %v13852_v53 = vld [vmem:[#allocation3 + $0x2ec] ss:$36 sps:$4 sm:$0xff]   ;;  %v2871_v31 = vsel %vm14551_vm9, %v11889_v60, %v2870_v3  ;;  %5500 = vmatmul.mubr.bf16.gmra.mxu0 %v13850_v13 }
 0x1e8   : > { %v13854_v21 = vld [vmem:[#allocation3 + $0x2e8] ss:$36 sps:$4 sm:$0xff]   ;;  %v2407_v30 = vsel %vm14572_vm10, %v2402_v14, %v2406_v48  ;;  %2558 = vst [vmem:[#allocation3 + $0x32c] sm:$0xf] %v2397_v20  ;;  %v2409_v44 = vshrl.u32 %v2108_v23, 16  ;;  %v2880_v22 = vsel %vm14551_vm9, %v2872_v55, %v2879_v19  ;;  %v2412_v54 = vshll.u32 %v2108_v23, 16  ;;  %5660 = vmatprep.mubr.bf16.mxu1 %v13852_v53  ;;  %v12711_v14 = vpop.f32.mrf.mxu1 }
 0x1e9   : > { %2559 = vst [vmem:[#allocation3 + $0x350] sm:$0xf] %v2407_v30  ;;  %3023 = vst [vmem:[#allocation3 + $0x330] sm:$0xf] %v2871_v31  ;;  %v2110_v32 = vld [vmem:[#allocation2 + $0xdc] sm:$0x1]  ;;  %5661 = vmatmul.mubr.bf16.gmra.mxu1 %v13854_v21  ;;  %v12712_v23 = vadd.f32 %v12711_v14, %v12710_v59 }
 0x1ea   : > { %v2418_v5 = vshll.u32 %v2109_v27, 16  ;;  %v2422_v36 = vshrl.u32 %v2109_v27, 16  ;;  %3024 = vst [vmem:[#allocation3 + $0x354] sm:$0xf] %v2880_v22  ;;  %v2411_v16 = vrot.slane %v2409_v44, 4  ;;  %v2428_v45 = vshll.u32 %v2110_v32, 16  ;;  %v12605_v27 = vpop.f32.mrf.mxu0  ;;  %v12713_v31 = vpop.f32.mrf.mxu1 }
 0x1eb   : > { %v2414_v37 = vrot.slane %v2412_v54, 5  ;;  %v2605_v48 = vld [vmem:[#allocation2 + $0xe0] sm:$0x8]  ;;  %v2606_v1 = vld [vmem:[#allocation2 + $0xe4] sm:$0xf]  ;;  %v15073_v44 = vadd.f32 %v12605_v27, %v12604_v47 }
 0x1ec   : > { %v2420_v46 = vrot.slane %v2418_v5, 5  ;;  %v2424_v29 = vrot.slane %v2422_v36, 4  ;;  %v2430_v51 = vrot.slane %v2428_v45, 5  ;;  %v2607_v56 = vld [vmem:[#allocation2 + $0xe8] sm:$0xf]  ;;  %v2882_v58 = vshrl.u32 %v2605_v48, 16 }
 0x1ed   : > { %v2415_v60 = vor.u32 %v2414_v37, %v2411_v16  ;;  %v2887_v63 = vshrl.u32 %v2606_v1, 16  ;;  %v2890_v41 = vshll.u32 %v2606_v1, 16  ;;  %v3057_v4 = vld [vmem:[#allocation2 + $0xe4] sm:$0xf]  ;;  %v3058_v7 = vld [vmem:[#allocation2 + $0xe8] sm:$0xf]  ;;  %v15080_v48 = vadd.f32 %v12712_v23, %v15061_v15 }
 0x1ee   : > { %v2425_v61 = vor.u32 %v2424_v29, %v2420_v46  ;;  %v11890_v8 = vrot.slane %v2882_v58, 11  ;;  %v2896_v0 = vshrl.u32 %v2607_v56, 16  ;;  %v2899_v12 = vshll.u32 %v2607_v56, 16  ;;  %3089 = vst [vmem:[#allocation3 + $0x37c] sm:$0xf] %v3057_v4  ;;  %v12714_v56 = vpop.f32.mrf.mxu1 }
 0x1ef   : > { %3090 = vst [vmem:[#allocation3 + $0x3a0] sm:$0xf] %v3058_v7  ;;  %v2034_v13 = vld [vmem:[#allocation2 + $0xe4] sm:$0xf]  ;;  %v2416_v3 = vrot.slane %v2415_v60, 4  ;;  %v2889_v55 = vrot.slane %v2887_v63, 7  ;;  %v12603_v1 = vadd.f32 %v12602_v42, %v15059_v10  ;;  %v12715_v42 = vadd.f32 %v12714_v56, %v12713_v31  ;;  %v15087_v7 = vpop.f32.mrf.mxu0 }
 0x1f0   : > { %v2426_v20 = vrot.slane %v2425_v61, 4  ;;  %v2035_v19 = vld [vmem:[#allocation2 + $0xe8] sm:$0xf]  ;;  %2066 = vst [vmem:[#allocation3 + $0x3b8] sm:$0xf] %v2034_v13  ;;  %v2898_v30 = vrot.slane %v2896_v0, 7 }
 0x1f1   : > { %v13855_v53 = vld [vmem:[#allocation3 + $0x32c] ss:$36 sps:$4 sm:$0xff]   ;;  %2067 = vst [vmem:[#allocation3 + $0x3dc] sm:$0xf] %v2035_v19  ;;  %v13858_v22 = vld [vmem:[#allocation3 + $0x334] ss:$36 sps:$4 sm:$0xff]   ;;  %v2421_v32 = vsel %vm14572_vm10, %v2416_v3, %v2420_v46  ;;  %v2892_v5 = vor.u32 %v2890_v41, %v2889_v55 }
 0x1f2   : > { %v13857_v21 = vld [vmem:[#allocation3 + $0x328] ss:$36 sps:$4 sm:$0xff]   ;;  %v2431_v54 = vsel %vm14572_vm10, %v2426_v20, %v2430_v51  ;;  %v2894_v36 = vrot.slane %v2889_v55, 4  ;;  %5507 = vmatprep.mubr.bf16.mxu0 %v13855_v53  ;;  %v13860_v16 = vld [vmem:[#allocation3 + $0x330] ss:$36 sps:$4 sm:$0xff]   ;;  %v2901_v45 = vor.u32 %v2899_v12, %v2898_v30  ;;  %5668 = vmatprep.mubr.bf16.mxu1 %v13858_v22  ;;  %v13902_v61 = vld [vmem:[#allocation9 + $0x78] sm:$0xff]   ;;  %v12716_v30 = vpop.f32.mrf.mxu1 }
 0x1f3   : > { %2560 = vst [vmem:[#allocation3 + $0x374] sm:$0xf] %v2421_v32  ;;  %2561 = vst [vmem:[#allocation3 + $0x398] sm:$0xf] %v2431_v54  ;;  %v2111_v37 = vld [vmem:[#allocation2 + $0xe4] sm:$0xf]  ;;  %5508 = vmatmul.mubr.bf16.gmra.mxu0 %v13857_v21  ;;  %v2893_v46 = vsel %vm14551_vm9, %v11890_v8, %v2892_v5  ;;  %5669 = vmatmul.mubr.bf16.gmra.mxu1 %v13860_v16  ;;  %v15089_v16 = vadd.f32 %v12715_v42, %v12603_v1 }
 0x1f4   : > { %v2112_v29 = vld [vmem:[#allocation2 + $0xe8] sm:$0xf]  ;;  %v2113_v51 = vld [vmem:[#allocation2 + $0xec] sm:$0x1]  ;;  %v2433_v58 = vshrl.u32 %v2111_v37, 16  ;;  %v2436_v59 = vshll.u32 %v2111_v37, 16  ;;  %v2902_v63 = vsel %vm14551_vm9, %v2894_v36, %v2901_v45  ;;  %13000 = vmatprep.subr.bf16.mxu1 %v13902_v61  ;;  %v12608_v45 = vpop.f32.mrf.mxu0 }
 0x1f5   : > { %v2442_v60 = vshll.u32 %v2112_v29, 16  ;;  %3025 = vst [vmem:[#allocation3 + $0x378] sm:$0xf] %v2893_v46  ;;  %v2446_v15 = vshrl.u32 %v2112_v29, 16  ;;  %v2452_v41 = vshll.u32 %v2113_v51, 16  ;;  %v13903_v31 = vld [vmem:[#allocation9 + $0x38] sm:$0xff]   ;;  %v12717_v46 = vpop.f32.mrf.mxu1 }
 0x1f6   : > { %v2608_v4 = vld [vmem:[#allocation2 + $0xf0] sm:$0x8]  ;;  %v2609_v10 = vld [vmem:[#allocation2 + $0xf4] sm:$0xf]  ;;  %3026 = vst [vmem:[#allocation3 + $0x39c] sm:$0xf] %v2902_v63  ;;  %13001 = vmatpush3.bf16.msra.mxu1 %v13903_v31  ;;  %v12718_v63 = vadd.f32 %v12717_v46, %v12716_v30  ;;  %v12609_v31 = vadd.f32 %v12608_v45, %v15087_v7 }
 0x1f7   : > { %v2435_v47 = vrot.slane %v2433_v58, 4  ;;  %v2438_v8 = vrot.slane %v2436_v59, 5  ;;  %v2444_v0 = vrot.slane %v2442_v60, 5  ;;  %v2610_v12 = vld [vmem:[#allocation2 + $0xf8] sm:$0xf]  ;;  %v2904_v13 = vshrl.u32 %v2608_v4, 16  ;;  %v12719_v42 = vpop.f32.mrf.mxu1 }
 0x1f8   : > { %v2448_v14 = vrot.slane %v2446_v15, 4  ;;  %v2909_v3 = vshrl.u32 %v2609_v10, 16  ;;  %v2912_v20 = vshll.u32 %v2609_v10, 16  ;;  %v3059_v55 = vld [vmem:[#allocation2 + $0xf4] sm:$0xf]  ;;  %v2454_v23 = vrot.slane %v2452_v41, 5 }
 0x1f9   : > { %v2439_v19 = vor.u32 %v2438_v8, %v2435_v47  ;;  %v2918_v27 = vshrl.u32 %v2610_v12, 16  ;;  %v2921_v53 = vshll.u32 %v2610_v12, 16  ;;  %v3060_v21 = vld [vmem:[#allocation2 + $0xf8] sm:$0xf]  ;;  %3091 = vst [vmem:[#allocation3 + $0x3c4] sm:$0xf] %v3059_v55 }
 0x1fa   : > { %v2449_v22 = vor.u32 %v2448_v14, %v2444_v0  ;;  %v11891_v32 = vrot.slane %v2904_v13, 11  ;;  %v2911_v54 = vrot.slane %v2909_v3, 7  ;;  %3092 = vst [vmem:[#allocation3 + $0x3e8] sm:$0xf] %v3060_v21  ;;  %v2036_v5 = vld [vmem:[#allocation2 + $0xf4] sm:$0xf]  ;;  %v15098_v3 = vadd.f32 %v12718_v63, %v15073_v44 }
 0x1fb   : > { %v2037_v36 = vld [vmem:[#allocation2 + $0xf8] sm:$0xf]  ;;  %v2440_v29 = vrot.slane %v2439_v19, 4  ;;  %v2920_v56 = vrot.slane %v2918_v27, 7  ;;  %2068 = vst [vmem:[#allocation3 + $0x400] sm:$0xf] %v2036_v5 }
 0x1fc   : > { %v13861_v37 = vld [vmem:[#allocation3 + $0x374] ss:$36 sps:$4 sm:$0xff]   ;;  %2069 = vst [vmem:[#allocation3 + $0x424] sm:$0xf] %v2037_v36  ;;  %v2450_v58 = vrot.slane %v2449_v22, 4  ;;  %v2914_v59 = vor.u32 %v2912_v20, %v2911_v54  ;;  %v2916_v60 = vrot.slane %v2911_v54, 4 }
 0x1fd   : > { %v13863_v51 = vld [vmem:[#allocation3 + $0x370] ss:$36 sps:$4 sm:$0xff]   ;;  %5515 = vmatprep.mubr.bf16.mxu0 %v13861_v37  ;;  %v2445_v15 = vsel %vm14572_vm10, %v2440_v29, %v2444_v0  ;;  %v2923_v1 = vor.u32 %v2921_v53, %v2920_v56  ;;  %v2115_v41 = vld [vmem:[#allocation2 + $0xf8] sm:$0xf]  ;;  %v2116_v4 = vld [vmem:[#allocation2 + $0xfc] sm:$0x1]  ;;  %v12610_v0 = vpop.f32.mrf.mxu0  ;;  %v12720_v53 = vpop.f32.mrf.mxu1 }
 0x1fe   : > { %v2114_v61 = vld [vmem:[#allocation2 + $0xf4] sm:$0xf]  ;;  %5516 = vmatmul.mubr.bf16.gmra.mxu0 %v13863_v51  ;;  %v13865_v47 = vld [vmem:[#allocation3 + $0x37c] ss:$36 sps:$4 sm:$0xff]   ;;  %v2455_v12 = vsel %vm14572_vm10, %v2450_v58, %v2454_v23  ;;  %2562 = vst [vmem:[#allocation3 + $0x3bc] sm:$0xf] %v2445_v15  ;;  %v2915_v13 = vsel %vm14551_vm9, %v11891_v32, %v2914_v59  ;;  %v12721_v22 = vadd.f32 %v12720_v53, %v12719_v42 }
 0x1ff   : > { %v2457_v10 = vshrl.u32 %v2114_v61, 16  ;;  %v13867_v8 = vld [vmem:[#allocation3 + $0x378] ss:$36 sps:$4 sm:$0xff]   ;;  %v2460_v14 = vshll.u32 %v2114_v61, 16  ;;  %2563 = vst [vmem:[#allocation3 + $0x3e0] sm:$0xf] %v2455_v12  ;;  %v2924_v20 = vsel %vm14551_vm9, %v2916_v60, %v2923_v1  ;;  %5676 = vmatprep.mubr.bf16.mxu1 %v13865_v47  ;;  %v12611_v44 = vpop.f32.mrf.mxu0 }
 0x200   : > { %3027 = vst [vmem:[#allocation3 + $0x3c0] sm:$0xf] %v2915_v13  ;;  %v2466_v19 = vshll.u32 %v2115_v41, 16  ;;  %v2470_v27 = vshrl.u32 %v2115_v41, 16  ;;  %3028 = vst [vmem:[#allocation3 + $0x3e4] sm:$0xf] %v2924_v20  ;;  %5677 = vmatmul.mubr.bf16.gmra.mxu1 %v13867_v8  ;;  %v15103_v37 = vadd.f32 %v12611_v44, %v12610_v0 }
 0x201   : > { %v2459_v55 = vrot.slane %v2457_v10, 4  ;;  %v2462_v23 = vrot.slane %v2460_v14, 5  ;;  %v2476_v21 = vshll.u32 %v2116_v4, 16  ;;  %v2611_v30 = vld [vmem:[#allocation2 + $0x100] sm:$0x8]  ;;  %v12613_v59 = vpop.f32.mrf.mxu0  ;;  %v15105_v10 = vadd.f32 %v12721_v22, %v12609_v31 }
 0x202   : > { %v2468_v32 = vrot.slane %v2466_v19, 5  ;;  %v2472_v54 = vrot.slane %v2470_v27, 4  ;;  %v2612_v5 = vld [vmem:[#allocation2 + $0x104] sm:$0xf]  ;;  %v2613_v36 = vld [vmem:[#allocation2 + $0x108] sm:$0xf] }
 0x203   : > { %v2463_v29 = vor.u32 %v2462_v23, %v2459_v55  ;;  %v2478_v56 = vrot.slane %v2476_v21, 5  ;;  %v2926_v46 = vshrl.u32 %v2611_v30, 16  ;;  %v2931_v51 = vshrl.u32 %v2612_v5, 16  ;;  %v3061_v58 = vld [vmem:[#allocation2 + $0x104] sm:$0xf]  ;;  %v12614_v13 = vpop.f32.mrf.mxu0  ;;  %v12722_v21 = vpop.f32.mrf.mxu1 }
 0x204   : > { %v2473_v60 = vor.u32 %v2472_v54, %v2468_v32  ;;  %v2934_v61 = vshll.u32 %v2612_v5, 16  ;;  %v2940_v63 = vshrl.u32 %v2613_v36, 16  ;;  %v2943_v15 = vshll.u32 %v2613_v36, 16  ;;  %v3062_v7 = vld [vmem:[#allocation2 + $0x108] sm:$0xf] }
 0x205   : > { %3093 = vst [vmem:[#allocation3 + $0x40c] sm:$0xf] %v3061_v58  ;;  %v2464_v45 = vrot.slane %v2463_v29, 4  ;;  %v11892_v1 = vrot.slane %v2926_v46, 11  ;;  %v2933_v41 = vrot.slane %v2931_v51, 7  ;;  %v12615_v46 = vadd.f32 %v12614_v13, %v12613_v59  ;;  %v12616_v51 = vpop.f32.mrf.mxu0 }
 0x206   : > { %3094 = vst [vmem:[#allocation3 + $0x430] sm:$0xf] %v3062_v7  ;;  %v444_v4 = vld [vmem:[#allocation2 + $0x10c] sm:$0x1]  ;;  %v2474_v42 = vrot.slane %v2473_v60, 4  ;;  %v2942_v47 = vrot.slane %v2940_v63, 7 }
 0x207   : > { %v445_v8 = vsel %vm14545_vm8, 0, %v444_v4  ;;  %v2038_v12 = vld [vmem:[#allocation2 + $0x104] sm:$0xf]  ;;  %v13868_v14 = vld [vmem:[#allocation3 + $0x3bc] ss:$36 sps:$4 sm:$0xff]   ;;  %v2469_v20 = vsel %vm14572_vm10, %v2464_v45, %v2468_v32  ;;  %v2936_v55 = vor.u32 %v2934_v61, %v2933_v41  ;;  %v2938_v19 = vrot.slane %v2933_v41, 4 }
 0x208   : > { %v13870_v0 = vld [vmem:[#allocation3 + $0x3b8] ss:$36 sps:$4 sm:$0xff]   ;;  %446 = vst [vmem:[#allocation2 + $0x10c] sm:$0x1] %v445_v8  ;;  %2070 = vst [vmem:[#allocation3 + $0x448] sm:$0xf] %v2038_v12  ;;  %v2479_v53 = vsel %vm14572_vm10, %v2474_v42, %v2478_v56  ;;  %v2945_v23 = vor.u32 %v2943_v15, %v2942_v47  ;;  %5523 = vmatprep.mubr.bf16.mxu0 %v13868_v14  ;;  %v12723_v56 = vpop.f32.mrf.mxu1  ;;  %v12617_v8 = vpop.f32.mrf.mxu0 }
 0x209   : > { %v13871_v27 = vld [vmem:[#allocation3 + $0x3c4] ss:$36 sps:$4 sm:$0xff]   ;;  %2564 = vst [vmem:[#allocation3 + $0x404] sm:$0xf] %v2469_v20  ;;  %2565 = vst [vmem:[#allocation3 + $0x428] sm:$0xf] %v2479_v53  ;;  %v2937_v31 = vsel %vm14551_vm9, %v11892_v1, %v2936_v55  ;;  %5524 = vmatmul.mubr.bf16.gmra.mxu0 %v13870_v0  ;;  %v12724_v15 = vadd.f32 %v12723_v56, %v12722_v21 }
 0x20a   : > { %v13873_v30 = vld [vmem:[#allocation3 + $0x3c0] ss:$36 sps:$4 sm:$0xff]   ;;  %v2039_v22 = vld [vmem:[#allocation2 + $0x108] sm:$0xf]  ;;  %5684 = vmatprep.mubr.bf16.mxu1 %v13871_v27  ;;  %v2946_v32 = vsel %vm14551_vm9, %v2938_v19, %v2945_v23  ;;  %3029 = vst [vmem:[#allocation3 + $0x408] sm:$0xf] %v2937_v31  ;;  %v12725_v47 = vpop.f32.mrf.mxu1  ;;  %v15122_v23 = vadd.f32 %v12617_v8, %v12616_v51  ;;  %v12619_v21 = vpop.f32.mrf.mxu0 }
 0x20b   : > { %v2117_v44 = vld [vmem:[#allocation2 + $0x104] sm:$0xf]  ;;  %2071 = vst [vmem:[#allocation3 + $0x46c] sm:$0xf] %v2039_v22  ;;  %v2118_v54 = vld [vmem:[#allocation2 + $0x108] sm:$0xf]  ;;  %5685 = vmatmul.mubr.bf16.gmra.mxu1 %v13873_v30  ;;  %v15120_v27 = vadd.f32 %v12724_v15, %v15103_v37 }
 0x20c   : > { %v2481_v5 = vshrl.u32 %v2117_v44, 16  ;;  %v2484_v36 = vshll.u32 %v2117_v44, 16  ;;  %v390_v29 = vld [vmem:[#allocation2 + $0x110] sm:$0x8]  ;;  %3030 = vst [vmem:[#allocation3 + $0x42c] sm:$0xf] %v2946_v32  ;;  %v12726_v53 = vpop.f32.mrf.mxu1 }
 0x20d   : > { %v2490_v58 = vshll.u32 %v2118_v54, 16  ;;  %v2494_v60 = vshrl.u32 %v2118_v54, 16  ;;  %v391_v61 = vsel %vm14536_vm2, 0, %v390_v29  ;;  %v2615_v63 = vld [vmem:[#allocation2 + $0x114] sm:$0xf]  ;;  %v12727_v54 = vadd.f32 %v12726_v53, %v12725_v47 }
 0x20e   : > { %v13904_v7 = vld [vmem:[#allocation9 + $0x70] sm:$0xff]   ;;  %v2483_v45 = vrot.slane %v2481_v5, 4  ;;  %v2486_v1 = vrot.slane %v2484_v36, 5  ;;  %392 = vst [vmem:[#allocation2 + $0x110] sm:$0x8] %v391_v61  ;;  %v2953_v4 = vshrl.u32 %v2615_v63, 16 }
 0x20f   : > { %v2616_v41 = vld [vmem:[#allocation2 + $0x118] sm:$0xf]  ;;  %v2956_v42 = vshll.u32 %v2615_v63, 16  ;;  %v2492_v59 = vrot.slane %v2490_v58, 5  ;;  %v2496_v12 = vrot.slane %v2494_v60, 4  ;;  %13002 = vmatprep.subr.bf16.mxu1 %v13904_v7  ;;  %v13905_v30 = vld [vmem:[#allocation9 + $0x30] sm:$0xff]  }
 0x210   : > { %v2962_v13 = vshrl.u32 %v2616_v41, 16  ;;  %v2965_v14 = vshll.u32 %v2616_v41, 16  ;;  %v3063_v0 = vld [vmem:[#allocation2 + $0x114] sm:$0xf]  ;;  %v2119_v20 = vld [vmem:[#allocation2 + $0x10c] sm:$0x1]  ;;  %v2487_v24 = vor.u32 %v2486_v1, %v2483_v45  ;;  %13003 = vmatpush3.bf16.msra.mxu1 %v13905_v30  ;;  %v15126_v1 = vadd.f32 %v12727_v54, %v12615_v46  ;;  %v12728_v41 = vpop.f32.mrf.mxu1 }
 0x211   : > { %v2955_v55 = vrot.slane %v2953_v4, 7  ;;  %v3064_v19 = vld [vmem:[#allocation2 + $0x118] sm:$0xf]  ;;  %3095 = vst [vmem:[#allocation3 + $0x454] sm:$0xf] %v3063_v0  ;;  %v2497_v31 = vor.u32 %v2496_v12, %v2492_v59  ;;  %v2500_v22 = vshll.u32 %v2119_v20, 16  ;;  %v12620_v4 = vpop.f32.mrf.mxu0 }
 0x212   : > { %v2964_v44 = vrot.slane %v2962_v13, 7  ;;  %3096 = vst [vmem:[#allocation3 + $0x478] sm:$0xf] %v3064_v19  ;;  %v8234_v32 = vld [vmem:[#allocation2 + $0x114] sm:$0xf]  ;;  %v2488_v29 = vrot.slane %v2487_v24, 4  ;;  %v12729_v24 = vpop.f32.mrf.mxu1  ;;  %v15132_v30 = vadd.f32 %v12620_v4, %v12619_v21 }
 0x213   : > { %v13874_v5 = vld [vmem:[#allocation3 + $0x404] ss:$36 sps:$4 sm:$0xff]   ;;  %v2498_v56 = vrot.slane %v2497_v31, 4  ;;  %v2502_v58 = vrot.slane %v2500_v22, 5  ;;  %v2960_v60 = vrot.slane %v2955_v55, 4  ;;  %v2958_v7 = vor.u32 %v2956_v42, %v2955_v55  ;;  %17289 = vst [vmem:[#allocation16_spill] sm:$0xff] %v15126_v1 }
 0x214   : > { %v13876_v36 = vld [vmem:[#allocation3 + $0x400] ss:$36 sps:$4 sm:$0xff]   ;;  %v2967_v37 = vor.u32 %v2965_v14, %v2964_v44  ;;  %v8235_v61 = vld [vmem:[#allocation2 + $0x118] sm:$0xf]  ;;  %5531 = vmatprep.mubr.bf16.mxu0 %v13874_v5  ;;  %v13878_v51 = vld [vmem:[#allocation3 + $0x40c] ss:$36 sps:$4 sm:$0xff]   ;;  %v2493_v15 = vsel %vm14572_vm10, %v2488_v29, %v2492_v59  ;;  %v12730_v53 = vadd.f32 %v12729_v24, %v12728_v41  ;;  %v12731_v5 = vpop.f32.mrf.mxu1 }
 0x215   : > { %v13880_v63 = vld [vmem:[#allocation3 + $0x408] ss:$36 sps:$4 sm:$0xff]   ;;  %v8572_v45 = vshrl.u32 %v8234_v32, 16  ;;  %5532 = vmatmul.mubr.bf16.gmra.mxu0 %v13876_v36  ;;  %v2503_v47 = vsel %vm14572_vm10, %v2498_v56, %v2502_v58  ;;  %2566 = vst [vmem:[#allocation3 + $0x44c] sm:$0xf] %v2493_v15  ;;  %v8575_v14 = vshll.u32 %v8234_v32, 16  ;;  %5692 = vmatprep.mubr.bf16.mxu1 %v13878_v51 }
 0x216   : > { %v2614_v8 = vld [vmem:[#allocation2 + $0x110] sm:$0x8]  ;;  %v2968_v12 = vsel %vm14551_vm9, %v2960_v60, %v2967_v37  ;;  %v8581_v0 = vshrl.u32 %v8235_v61, 16  ;;  %2567 = vst [vmem:[#allocation3 + $0x470] sm:$0xf] %v2503_v47  ;;  %v8584_v20 = vshll.u32 %v8235_v61, 16  ;;  %5693 = vmatmul.mubr.bf16.gmra.mxu1 %v13880_v63 }
 0x217   : > { %v8233_v13 = vld [vmem:[#allocation2 + $0x110] sm:$0x8]  ;;  %v2948_v42 = vshrl.u32 %v2614_v8, 16  ;;  %3032 = vst [vmem:[#allocation3 + $0x474] sm:$0xf] %v2968_v12  ;;  %v8574_v59 = vrot.slane %v8572_v45, 7  ;;  %v12732_v45 = vpop.f32.mrf.mxu1 }
 0x218   : > { %v8567_v46 = vshrl.u32 %v8233_v13, 16  ;;  %v8583_v55 = vrot.slane %v8581_v0, 7  ;;  %v3097_v19 = vld [vmem:[#allocation2 + $0x24] sm:$0xf]  ;;  %v3098_v54 = vld [vmem:[#allocation2 + $0x28] sm:$0xf] }
 0x219   : > { %v11893_v31 = vrot.slane %v2948_v42, 11  ;;  %v15136_v44 = vor.u32 %v8575_v14, %v8574_v59  ;;  %v8579_v32 = vrot.slane %v8574_v59, 4  ;;  %v3099_v29 = vld [vmem:[#allocation2 + $0x2c] sm:$0x1]  ;;  %v3146_v56 = vshrl.u32 %v3097_v19, 16  ;;  %v15146_v42 = vpop.f32.mrf.mxu0 }
 0x21a   : > { %v15134_v22 = vrot.slane %v8567_v46, 11  ;;  %v8586_v36 = vor.u32 %v8584_v20, %v8583_v55  ;;  %v3149_v58 = vshll.u32 %v3097_v19, 16  ;;  %v3155_v60 = vshll.u32 %v3098_v54, 16  ;;  %v3100_v63 = vld [vmem:[#allocation2 + $0x34] sm:$0xf] }
 0x21b   : > { %v2959_v37 = vsel %vm14551_vm9, %v11893_v31, %v2958_v7  ;;  %v3159_v61 = vshrl.u32 %v3098_v54, 16  ;;  %v3165_v51 = vshll.u32 %v3099_v29, 16  ;;  %v3101_v15 = vld [vmem:[#allocation2 + $0x38] sm:$0xf]  ;;  %v3148_v4 = vrot.slane %v3146_v56, 4 }
 0x21c   : > { %v8578_v21 = vsel %vm14551_vm9, %v15134_v22, %v15136_v44  ;;  %3031 = vst [vmem:[#allocation3 + $0x450] sm:$0xf] %v2959_v37  ;;  %v8587_v41 = vsel %vm14551_vm9, %v8579_v32, %v8586_v36  ;;  %v3151_v47 = vrot.slane %v3149_v58, 5  ;;  %v3157_v8 = vrot.slane %v3155_v60, 5  ;;  %v3102_v12 = vld [vmem:[#allocation2 + $0x3c] sm:$0x1] }
 0x21d   : > { %v3161_v13 = vrot.slane %v3159_v61, 4  ;;  %v3167_v7 = vrot.slane %v3165_v51, 5  ;;  %v3170_v14 = vshrl.u32 %v3100_v63, 16  ;;  %v3173_v0 = vshll.u32 %v3100_v63, 16  ;;  %v13881_v46 = vld [vmem:[#allocation3 + $0x44c] ss:$36 sps:$4 sm:$0xff]  }
 0x21e   : > { %v13883_v59 = vld [vmem:[#allocation3 + $0x448] ss:$36 sps:$4 sm:$0xff]   ;;  %v3152_v20 = vor.u32 %v3151_v47, %v3148_v4  ;;  %v3179_v24 = vshll.u32 %v3101_v15, 16  ;;  %v15149_v55 = vadd.f32 %v12730_v53, %v15122_v23  ;;  %v15151_v19 = vadd.f32 %v12732_v45, %v12731_v5  ;;  %v3751_v31 = vld [vmem:[#allocation3 + $0x474] sm:$0xff]  ;;  %v3103_v56 = vld [vmem:[#allocation2 + $0x44] sm:$0xf]  ;;  %5539 = vmatprep.mubr.bf16.mxu0 %v13881_v46  ;;  %v15153_v4 = vpop.f32.mrf.mxu0 }
 0x21f   : > { %v8682_v22 = vld [vmem:[#allocation2 + $0x114] sm:$0xf]  ;;  %v8683_v44 = vld [vmem:[#allocation2 + $0x118] sm:$0xf]  ;;  %v3162_v32 = vor.u32 %v3161_v13, %v3157_v8  ;;  %v3172_v54 = vrot.slane %v3170_v14, 4  ;;  %v3175_v36 = vrot.slane %v3173_v0, 5  ;;  %5540 = vmatmul.mubr.bf16.gmra.mxu0 %v13883_v59 }
 0x220   : > { %17290 = vst [vmem:[#allocation17_spill] sm:$0xff] %v15149_v55  ;;  %v3183_v29 = vshrl.u32 %v3101_v15, 16  ;;  %v3153_v58 = vrot.slane %v3152_v20, 4  ;;  %v3181_v60 = vrot.slane %v3179_v24, 5  ;;  %v3189_v37 = vshll.u32 %v3102_v12, 16  ;;  %v13906_v47 = vld [vmem:[#allocation9 + $0x68] sm:$0xff]  }
 0x221   : > { %v3104_v61 = vld [vmem:[#allocation2 + $0x48] sm:$0xf]  ;;  %v3194_v51 = vshrl.u32 %v3103_v56, 16  ;;  %v3163_v63 = vrot.slane %v3162_v32, 4  ;;  %v3176_v23 = vor.u32 %v3175_v36, %v3172_v54  ;;  %v3105_v5 = vld [vmem:[#allocation2 + $0x4c] sm:$0x1]  ;;  %13004 = vmatprep.subr.bf16.mxu1 %v13906_v47 }
 0x222   : > { %v3185_v53 = vrot.slane %v3183_v29, 4  ;;  %v3197_v45 = vshll.u32 %v3103_v56, 16  ;;  %v3158_v13 = vsel %vm14572_vm10, %v3153_v58, %v3157_v8  ;;  %v3191_v15 = vrot.slane %v3189_v37, 5  ;;  %v3106_v46 = vld [vmem:[#allocation2 + $0x54] sm:$0xf]  ;;  %v13907_v20 = vld [vmem:[#allocation9 + $0x28] sm:$0xff]  }
 0x223   : > { %v3196_v14 = vrot.slane %v3194_v51, 4  ;;  %v3203_v0 = vshll.u32 %v3104_v61, 16  ;;  %v3746_v12 = vld [vmem:[#allocation3 + $0x450] sm:$0xff]  ;;  %v3168_v59 = vsel %vm14572_vm10, %v3163_v63, %v3167_v7  ;;  %3561 = vst [vmem:[#allocation3 + $0x20] sm:$0xf] %v3158_v13  ;;  %v3177_v32 = vrot.slane %v3176_v23, 4  ;;  %13005 = vmatpush3.bf16.msra.mxu1 %v13907_v20 }
 0x224   : > { %v13884_v24 = vld [vmem:[#allocation3 + $0x454] ss:$36 sps:$4 sm:$0xff]   ;;  %v3186_v54 = vor.u32 %v3185_v53, %v3181_v60  ;;  %v3199_v36 = vrot.slane %v3197_v45, 5  ;;  %8650 = vst [vmem:[#allocation3 + $0x450] sm:$0xf] %v8578_v21  ;;  %v12035_v8 = vcombine.low %v3746_v12, %v3751_v31  ;;  %v3207_v56 = vshrl.u32 %v3104_v61, 16  ;;  %v15161_v45 = vpop.f32.mrf.mxu1  ;;  %v15163_v21 = vpop.f32.mrf.mxu0 }
 0x225   : > { %8651 = vst [vmem:[#allocation3 + $0x474] sm:$0xf] %v8587_v41  ;;  %8714 = vst [vmem:[#allocation3 + $0x454] sm:$0xf] %v8682_v22  ;;  %v3205_v29 = vrot.slane %v3203_v0, 5  ;;  %v3213_v58 = vshll.u32 %v3105_v5, 16  ;;  %5700 = vmatprep.mubr.bf16.mxu1 %v13884_v24  ;;  %v3182_v7 = vsel %vm14572_vm10, %v3177_v32, %v3181_v60 }
 0x226   : > { %8715 = vst [vmem:[#allocation3 + $0x478] sm:$0xf] %v8683_v44  ;;  %3562 = vst [vmem:[#allocation3 + $0x44] sm:$0xf] %v3168_v59  ;;  %v3107_v37 = vld [vmem:[#allocation2 + $0x58] sm:$0xf]  ;;  %v3200_v63 = vor.u32 %v3199_v36, %v3196_v14  ;;  %5701 = vmatmul.mubr.bf16.gmra.mxu1 %v12035_v8 }
 0x227   : > { %v3187_v51 = vrot.slane %v3186_v54, 4  ;;  %v3108_v23 = vld [vmem:[#allocation2 + $0x5c] sm:$0x1]  ;;  %v3218_v53 = vshrl.u32 %v3106_v46, 16  ;;  %3563 = vst [vmem:[#allocation3 + $0x68] sm:$0xf] %v3182_v7 }
 0x228   : > { %v3209_v41 = vrot.slane %v3207_v56, 4  ;;  %v3215_v31 = vrot.slane %v3213_v58, 5  ;;  %v3221_v22 = vshll.u32 %v3106_v46, 16  ;;  %v3227_v44 = vshll.u32 %v3107_v37, 16  ;;  %v3109_v61 = vld [vmem:[#allocation2 + $0x64] sm:$0xf]  ;;  %v12735_v58 = vpop.f32.mrf.mxu1 }
 0x229   : > { %v3192_v5 = vsel %vm14572_vm10, %v3187_v51, %v3191_v15  ;;  %v3201_v47 = vrot.slane %v3200_v63, 4  ;;  %v3220_v60 = vrot.slane %v3218_v53, 4  ;;  %v3231_v13 = vshrl.u32 %v3107_v37, 16  ;;  %v3110_v14 = vld [vmem:[#allocation2 + $0x68] sm:$0xf]  ;;  %v15169_v15 = vpop.f32.mrf.mxu0 }
 0x22a   : > { %3564 = vst [vmem:[#allocation3 + $0x8c] sm:$0xf] %v3192_v5  ;;  %v3210_v0 = vor.u32 %v3209_v41, %v3205_v29  ;;  %v3223_v20 = vrot.slane %v3221_v22, 5  ;;  %v3229_v12 = vrot.slane %v3227_v44, 5  ;;  %v3237_v24 = vshll.u32 %v3108_v23, 16 }
 0x22b   : > { %v3111_v59 = vld [vmem:[#allocation2 + $0x6c] sm:$0x1]  ;;  %v3112_v32 = vld [vmem:[#allocation2 + $0x74] sm:$0xf]  ;;  %v3206_v54 = vsel %vm14572_vm10, %v3201_v47, %v3205_v29  ;;  %v3233_v46 = vrot.slane %v3231_v13, 4  ;;  %v3242_v36 = vshrl.u32 %v3109_v61, 16  ;;  %v15173_v44 = vadd.f32 %v15151_v19, %v15132_v30 }
 0x22c   : > { %v3245_v8 = vshll.u32 %v3109_v61, 16  ;;  %v3113_v56 = vld [vmem:[#allocation2 + $0x78] sm:$0xf]  ;;  %v3211_v7 = vrot.slane %v3210_v0, 4  ;;  %3565 = vst [vmem:[#allocation3 + $0xb0] sm:$0xf] %v3206_v54  ;;  %v3224_v37 = vor.u32 %v3223_v20, %v3220_v60  ;;  %v15177_v54 = vpop.f32.mrf.mxu1 }
 0x22d   : > { %v3239_v51 = vrot.slane %v3237_v24, 5  ;;  %v3251_v63 = vshll.u32 %v3110_v14, 16  ;;  %v13886_v53 = vld [vmem:[#allocation3 + $0x20] ss:$36 sps:$4 sm:$0xff]   ;;  %v3234_v41 = vor.u32 %v3233_v46, %v3229_v12  ;;  %v3244_v23 = vrot.slane %v3242_v36, 4  ;;  %17291 = vst [vmem:[#allocation18_spill] sm:$0xff] %v15173_v44  ;;  %v15179_v46 = vpop.f32.mrf.mxu0 }
 0x22e   : > { %v3247_v22 = vrot.slane %v3245_v8, 5  ;;  %v3216_v29 = vsel %vm14572_vm10, %v3211_v7, %v3215_v31  ;;  %v3225_v61 = vrot.slane %v3224_v37, 4  ;;  %v3255_v47 = vshrl.u32 %v3110_v14, 16  ;;  %v3114_v13 = vld [vmem:[#allocation2 + $0x7c] sm:$0x1]  ;;  %13488 = vmatprep.mubr.bf16.mxu0 %v13886_v53 }
 0x22f   : > { %v3253_v5 = vrot.slane %v3251_v63, 5  ;;  %3566 = vst [vmem:[#allocation3 + $0xd4] sm:$0xf] %v3216_v29  ;;  %v3235_v60 = vrot.slane %v3234_v41, 4  ;;  %v3261_v20 = vshll.u32 %v3111_v59, 16  ;;  %v3266_v24 = vshrl.u32 %v3112_v32, 16 }
 0x230   : > { %v3248_v0 = vor.u32 %v3247_v22, %v3244_v23  ;;  %v3230_v30 = vsel %vm14572_vm10, %v3225_v61, %v3229_v12  ;;  %v3257_v19 = vrot.slane %v3255_v47, 4  ;;  %v3269_v36 = vshll.u32 %v3112_v32, 16  ;;  %v3115_v8 = vld [vmem:[#allocation2 + $0x84] sm:$0xf]  ;;  %v3116_v12 = vld [vmem:[#allocation2 + $0x88] sm:$0xf] }
 0x231   : > { %v3275_v31 = vshll.u32 %v3113_v56, 16  ;;  %v13887_v7 = vld [vmem:[#allocation3 + $0x68] ss:$36 sps:$4 sm:$0xff]   ;;  %v3240_v14 = vsel %vm14572_vm10, %v3235_v60, %v3239_v51  ;;  %3567 = vst [vmem:[#allocation3 + $0xf8] sm:$0xf] %v3230_v30  ;;  %v3263_v63 = vrot.slane %v3261_v20, 5  ;;  %v12624_v59 = vadd.f32 %v15153_v4, %v15146_v42  ;;  %v15190_v60 = vpop.f32.mrf.mxu1 }
 0x232   : > { %v3249_v37 = vrot.slane %v3248_v0, 4  ;;  %3568 = vst [vmem:[#allocation3 + $0x11c] sm:$0xf] %v3240_v14  ;;  %v3258_v53 = vor.u32 %v3257_v19, %v3253_v5  ;;  %v3268_v41 = vrot.slane %v3266_v24, 4  ;;  %v3271_v23 = vrot.slane %v3269_v36, 5  ;;  %13489 = vmatmul.mubr.bf16.vlgmr.msra.gmra.mxu0 %v13887_v7  ;;  %v15192_v0 = vpop.f32.mrf.mxu0 }
 0x233   : > { %v3277_v22 = vrot.slane %v3275_v31, 5  ;;  %v3279_v29 = vshrl.u32 %v3113_v56, 16  ;;  %v3285_v61 = vshll.u32 %v3114_v13, 16  ;;  %v3117_v47 = vld [vmem:[#allocation2 + $0x8c] sm:$0x1]  ;;  %v12736_v51 = vadd.f32 %v12735_v58, %v15161_v45 }
 0x234   : > { %v3254_v32 = vsel %vm14572_vm10, %v3249_v37, %v3253_v5  ;;  %v3259_v42 = vrot.slane %v3258_v53, 4  ;;  %v3272_v4 = vor.u32 %v3271_v23, %v3268_v41  ;;  %v3290_v20 = vshrl.u32 %v3115_v8, 16  ;;  %v3118_v30 = vld [vmem:[#allocation2 + $0x94] sm:$0xf]  ;;  %v3119_v5 = vld [vmem:[#allocation2 + $0x98] sm:$0xf] }
 0x235   : > { %3569 = vst [vmem:[#allocation3 + $0x140] sm:$0xf] %v3254_v32  ;;  %v3293_v24 = vshll.u32 %v3115_v8, 16  ;;  %v3281_v19 = vrot.slane %v3279_v29, 4  ;;  %v3287_v36 = vrot.slane %v3285_v61, 5  ;;  %v3299_v31 = vshll.u32 %v3116_v12, 16  ;;  %v15198_v32 = vpop.f32.mrf.mxu1  ;;  %v15200_v29 = vpop.f32.mrf.mxu0 }
 0x236   : > { %v3303_v7 = vshrl.u32 %v3116_v12, 16  ;;  %v13888_v56 = vld [vmem:[#allocation3 + $0xb0] ss:$36 sps:$4 sm:$0xff]   ;;  %v3264_v13 = vsel %vm14572_vm10, %v3259_v42, %v3263_v63  ;;  %v3273_v45 = vrot.slane %v3272_v4, 4  ;;  %v3292_v58 = vrot.slane %v3290_v20, 4  ;;  %v13908_v12 = vld [vmem:[#allocation9 + $0x60] sm:$0xff]  }
 0x237   : > { %v15196_v14 = vadd.f32 %v12736_v51, %v12624_v59  ;;  %3570 = vst [vmem:[#allocation3 + $0x164] sm:$0xf] %v3264_v13  ;;  %v3282_v37 = vor.u32 %v3281_v19, %v3277_v22  ;;  %v3295_v53 = vrot.slane %v3293_v24, 5  ;;  %v3301_v41 = vrot.slane %v3299_v31, 5  ;;  %v3120_v8 = vld [vmem:[#allocation2 + $0x9c] sm:$0x1]  ;;  %13492 = vmatprep.mubr.bf16.mxu0 %v13888_v56  ;;  %13006 = vmatprep.subr.bf16.mxu1 %v13908_v12 }
 0x238   : > { %v3305_v23 = vrot.slane %v3303_v7, 4  ;;  %v3278_v61 = vsel %vm14572_vm10, %v3273_v45, %v3277_v22  ;;  %v3309_v63 = vshll.u32 %v3117_v47, 16  ;;  %v3314_v42 = vshrl.u32 %v3118_v30, 16  ;;  %v13909_v59 = vld [vmem:[#allocation9 + $0x20] sm:$0xff]   ;;  %v15206_v45 = vpop.f32.mrf.mxu1  ;;  %v3122_v12 = vld [vmem:[#allocation2 + $0xa8] sm:$0xf] }
 0x239   : > { %17292 = vst [vmem:[#allocation19_spill] sm:$0xff] %v15196_v14  ;;  %v3317_v4 = vshll.u32 %v3118_v30, 16  ;;  %v13889_v51 = vld [vmem:[#allocation3 + $0xf8] ss:$36 sps:$4 sm:$0xff]   ;;  %v3283_v20 = vrot.slane %v3282_v37, 4  ;;  %v3296_v24 = vor.u32 %v3295_v53, %v3292_v58  ;;  %v3323_v31 = vshll.u32 %v3119_v5, 16  ;;  %13007 = vmatpush3.bf16.msra.mxu1 %v13909_v59  ;;  %v15208_v37 = vpop.f32.mrf.mxu0 }
 0x23a   : > { %3571 = vst [vmem:[#allocation3 + $0x188] sm:$0xf] %v3278_v61  ;;  %v3306_v19 = vor.u32 %v3305_v23, %v3301_v41  ;;  %v3311_v7 = vrot.slane %v3309_v63, 5  ;;  %v3316_v13 = vrot.slane %v3314_v42, 4  ;;  %v3327_v14 = vshrl.u32 %v3119_v5, 16  ;;  %13493 = vmatmul.mubr.bf16.gmra.mxu0 %v13889_v51 }
 0x23b   : > { %v3319_v50 = vrot.slane %v3317_v4, 5  ;;  %v3121_v44 = vld [vmem:[#allocation2 + $0xa4] sm:$0xf]  ;;  %v3288_v22 = vsel %vm14572_vm10, %v3283_v20, %v3287_v36  ;;  %v3297_v47 = vrot.slane %v3296_v24, 4  ;;  %v3325_v56 = vrot.slane %v3323_v31, 5 }
 0x23c   : > { %v3307_v30 = vrot.slane %v3306_v19, 4  ;;  %3572 = vst [vmem:[#allocation3 + $0x1ac] sm:$0xf] %v3288_v22  ;;  %v3329_v53 = vrot.slane %v3327_v14, 4  ;;  %v3333_v23 = vshll.u32 %v3120_v8, 16  ;;  %v12627_v5 = vadd.f32 %v15169_v15, %v15163_v21 }
 0x23d   : > { %v3320_v58 = vor.u32 %v3319_v50, %v3316_v13  ;;  %v3123_v61 = vld [vmem:[#allocation2 + $0xac] sm:$0x1]  ;;  %v3302_v63 = vsel %vm14572_vm10, %v3297_v47, %v3301_v41  ;;  %v3338_v42 = vshrl.u32 %v3121_v44, 16  ;;  %v3341_v4 = vshll.u32 %v3121_v44, 16  ;;  %v3124_v59 = vld [vmem:[#allocation2 + $0xb4] sm:$0xf]  ;;  %v15218_v13 = vpop.f32.mrf.mxu1 }
 0x23e   : > { %v3312_v36 = vsel %vm14572_vm10, %v3307_v30, %v3311_v7  ;;  %v3125_v51 = vld [vmem:[#allocation2 + $0xb8] sm:$0xf]  ;;  %v13890_v20 = vld [vmem:[#allocation3 + $0x140] ss:$36 sps:$4 sm:$0xff]   ;;  %3573 = vst [vmem:[#allocation3 + $0x1d0] sm:$0xf] %v3302_v63  ;;  %v3330_v14 = vor.u32 %v3329_v53, %v3325_v56  ;;  %v12739_v24 = vadd.f32 %v15190_v60, %v15177_v54  ;;  %v15220_v7 = vpop.f32.mrf.mxu0 }
 0x23f   : > { %3574 = vst [vmem:[#allocation3 + $0x1f4] sm:$0xf] %v3312_v36  ;;  %v3321_v50 = vrot.slane %v3320_v58, 4  ;;  %v3335_v8 = vrot.slane %v3333_v23, 5  ;;  %v3340_v21 = vrot.slane %v3338_v42, 4  ;;  %v3343_v15 = vrot.slane %v3341_v4, 5  ;;  %13496 = vmatprep.mubr.bf16.mxu0 %v13890_v20 }
 0x240   : > { %v3347_v19 = vshll.u32 %v3122_v12, 16  ;;  %v3351_v41 = vshrl.u32 %v3122_v12, 16  ;;  %v3126_v31 = vld [vmem:[#allocation2 + $0xbc] sm:$0x1]  ;;  %v3331_v22 = vrot.slane %v3330_v14, 4  ;;  %v3357_v47 = vshll.u32 %v3123_v61, 16  ;;  %v15228_v14 = vpop.f32.mrf.mxu1 }
 0x241   : > { %v3326_v44 = vsel %vm14572_vm10, %v3321_v50, %v3325_v56  ;;  %v3362_v30 = vshrl.u32 %v3124_v59, 16  ;;  %v3344_v58 = vor.u32 %v3343_v15, %v3340_v21  ;;  %v3365_v60 = vshll.u32 %v3124_v59, 16  ;;  %v3127_v23 = vld [vmem:[#allocation2 + $0xc4] sm:$0xf]  ;;  %v3128_v4 = vld [vmem:[#allocation2 + $0xc8] sm:$0xf]  ;;  %v15230_v21 = vpop.f32.mrf.mxu0 }
 0x242   : > { %3575 = vst [vmem:[#allocation3 + $0x218] sm:$0xf] %v3326_v44  ;;  %v3349_v53 = vrot.slane %v3347_v19, 5  ;;  %v3353_v54 = vrot.slane %v3351_v41, 4  ;;  %v3336_v12 = vsel %vm14572_vm10, %v3331_v22, %v3335_v8  ;;  %v3359_v63 = vrot.slane %v3357_v47, 5 }
 0x243   : > { %v3364_v36 = vrot.slane %v3362_v30, 4  ;;  %v3371_v42 = vshll.u32 %v3125_v51, 16  ;;  %v13891_v20 = vld [vmem:[#allocation3 + $0x188] ss:$36 sps:$4 sm:$0xff]   ;;  %3576 = vst [vmem:[#allocation3 + $0x23c] sm:$0xf] %v3336_v12  ;;  %v15226_v61 = vadd.f32 %v12739_v24, %v12627_v5  ;;  %v12630_v30 = vadd.f32 %v15192_v0, %v15179_v46 }
 0x244   : > { %v3345_v55 = vrot.slane %v3344_v58, 4  ;;  %v3354_v56 = vor.u32 %v3353_v54, %v3349_v53  ;;  %v3367_v50 = vrot.slane %v3365_v60, 5  ;;  %v3375_v15 = vshrl.u32 %v3125_v51, 16  ;;  %v3129_v41 = vld [vmem:[#allocation2 + $0xcc] sm:$0x1]  ;;  %13497 = vmatmul.mubr.bf16.gmra.mxu0 %v13891_v20 }
 0x245   : > { %17293 = vst [vmem:[#allocation20_spill] sm:$0xff] %v15226_v61  ;;  %v3373_v59 = vrot.slane %v3371_v42, 5  ;;  %v3381_v19 = vshll.u32 %v3126_v31, 16  ;;  %v3386_v8 = vshrl.u32 %v3127_v23, 16  ;;  %v12742_v5 = vadd.f32 %v15206_v45, %v15198_v32  ;;  %v3130_v31 = vld [vmem:[#allocation2 + $0xd4] sm:$0xf] }
 0x246   : > { %v13892_v44 = vld [vmem:[#allocation3 + $0x1d0] ss:$36 sps:$4 sm:$0xff]   ;;  %v3350_v22 = vsel %vm14572_vm10, %v3345_v55, %v3349_v53  ;;  %v3368_v47 = vor.u32 %v3367_v50, %v3364_v36  ;;  %v3355_v24 = vrot.slane %v3354_v56, 4  ;;  %v3377_v58 = vrot.slane %v3375_v15, 4  ;;  %v3131_v61 = vld [vmem:[#allocation2 + $0xd8] sm:$0xf]  ;;  %v15238_v55 = vpop.f32.mrf.mxu1  ;;  %v15240_v53 = vpop.f32.mrf.mxu0 }
 0x247   : > { %3577 = vst [vmem:[#allocation3 + $0x260] sm:$0xf] %v3350_v22  ;;  %v3383_v54 = vrot.slane %v3381_v19, 5  ;;  %v3388_v51 = vrot.slane %v3386_v8, 4  ;;  %13500 = vmatprep.mubr.bf16.mxu0 %v13892_v44  ;;  %v3389_v12 = vshll.u32 %v3127_v23, 16  ;;  %v3395_v42 = vshll.u32 %v3128_v4, 16 }
 0x248   : > { %v3369_v60 = vrot.slane %v3368_v47, 4  ;;  %v3399_v20 = vshrl.u32 %v3128_v4, 16  ;;  %v3360_v46 = vsel %vm14572_vm10, %v3355_v24, %v3359_v63  ;;  %v3378_v0 = vor.u32 %v3377_v58, %v3373_v59  ;;  %v3132_v45 = vld [vmem:[#allocation2 + $0xdc] sm:$0x1]  ;;  %v3133_v4 = vld [vmem:[#allocation2 + $0xe4] sm:$0xf]  ;;  %v15246_v19 = vpop.f32.mrf.mxu1 }
 0x249   : > { %v3405_v32 = vshll.u32 %v3129_v41, 16  ;;  %v3410_v36 = vshrl.u32 %v3130_v31, 16  ;;  %3578 = vst [vmem:[#allocation3 + $0x284] sm:$0xf] %v3360_v46  ;;  %v3391_v50 = vrot.slane %v3389_v12, 5  ;;  %v3397_v23 = vrot.slane %v3395_v42, 5 }
 0x24a   : > { %v3374_v56 = vsel %vm14572_vm10, %v3369_v60, %v3373_v59  ;;  %v3401_v15 = vrot.slane %v3399_v20, 4  ;;  %v13910_v8 = vld [vmem:[#allocation9 + $0x58] sm:$0xff]   ;;  %v3379_v22 = vrot.slane %v3378_v0, 4  ;;  %v15248_v63 = vadd.f32 %v12742_v5, %v12630_v30  ;;  %v3134_v12 = vld [vmem:[#allocation2 + $0xe8] sm:$0xf]  ;;  %v15254_v42 = vpop.f32.mrf.mxu1  ;;  %v15256_v20 = vpop.f32.mrf.mxu0 }
 0x24b   : > { %v13893_v44 = vld [vmem:[#allocation3 + $0x218] ss:$36 sps:$4 sm:$0xff]   ;;  %3579 = vst [vmem:[#allocation3 + $0x2a8] sm:$0xf] %v3374_v56  ;;  %v3407_v47 = vrot.slane %v3405_v32, 5  ;;  %v15252_v41 = vadd.f32 %v15208_v37, %v15200_v29  ;;  %v3392_v24 = vor.u32 %v3391_v50, %v3388_v51  ;;  %v3412_v59 = vrot.slane %v3410_v36, 4  ;;  %13008 = vmatprep.subr.bf16.mxu1 %v13910_v8 }
 0x24c   : > { %17294 = vst [vmem:[#allocation21_spill] sm:$0xff] %v15248_v63  ;;  %v3402_v58 = vor.u32 %v3401_v15, %v3397_v23  ;;  %v3413_v60 = vshll.u32 %v3130_v31, 16  ;;  %v3384_v46 = vsel %vm14572_vm10, %v3379_v22, %v3383_v54  ;;  %v3419_v0 = vshll.u32 %v3131_v61, 16  ;;  %v3135_v32 = vld [vmem:[#allocation2 + $0xec] sm:$0x1]  ;;  %v13911_v56 = vld [vmem:[#allocation9 + $0x18] sm:$0xff]   ;;  %13501 = vmatmul.mubr.bf16.gmra.mxu0 %v13893_v44  ;;  %v12750_v44 = vpop.f32.mrf.mxu1  ;;  %v15264_v22 = vpop.f32.mrf.mxu0 }
 0x24d   : > { %v3423_v30 = vshrl.u32 %v3131_v61, 16  ;;  %v3429_v5 = vshll.u32 %v3132_v45, 16  ;;  %3580 = vst [vmem:[#allocation3 + $0x2cc] sm:$0xf] %v3384_v46  ;;  %v3393_v29 = vrot.slane %v3392_v24, 4  ;;  %v3434_v31 = vshrl.u32 %v3133_v4, 16  ;;  %13009 = vmatpush3.bf16.msra.mxu1 %v13911_v56 }
 0x24e   : > { %v3403_v37 = vrot.slane %v3402_v58, 4  ;;  %v3415_v51 = vrot.slane %v3413_v60, 5  ;;  %v3421_v36 = vrot.slane %v3419_v0, 5  ;;  %v3437_v63 = vshll.u32 %v3133_v4, 16  ;;  %v3136_v1 = vld [vmem:[#allocation2 + $0xf4] sm:$0xf] }
 0x24f   : > { %v3425_v50 = vrot.slane %v3423_v30, 4  ;;  %v3431_v15 = vrot.slane %v3429_v5, 5  ;;  %v3398_v54 = vsel %vm14572_vm10, %v3393_v29, %v3397_v23  ;;  %v3436_v8 = vrot.slane %v3434_v31, 4  ;;  %v3137_v4 = vld [vmem:[#allocation2 + $0xf8] sm:$0xf] }
 0x250   : > { %v3408_v61 = vsel %vm14572_vm10, %v3403_v37, %v3407_v47  ;;  %v3416_v45 = vor.u32 %v3415_v51, %v3412_v59  ;;  %v13894_v24 = vld [vmem:[#allocation3 + $0x260] ss:$36 sps:$4 sm:$0xff]   ;;  %3581 = vst [vmem:[#allocation3 + $0x2f0] sm:$0xf] %v3398_v54  ;;  %v3439_v60 = vrot.slane %v3437_v63, 5  ;;  %v3443_v46 = vshll.u32 %v3134_v12, 16  ;;  %v15268_v47 = vpop.f32.mrf.mxu0  ;;  %v15270_v59 = vpop.f32.mrf.mxu1 }
 0x251   : > { %3582 = vst [vmem:[#allocation3 + $0x314] sm:$0xf] %v3408_v61  ;;  %v3426_v58 = vor.u32 %v3425_v50, %v3421_v36  ;;  %v12745_v0 = vadd.f32 %v15228_v14, %v15218_v13  ;;  %v3447_v23 = vshrl.u32 %v3134_v12, 16  ;;  %v3453_v5 = vshll.u32 %v3135_v32, 16  ;;  %13504 = vmatprep.mubr.bf16.mxu0 %v13894_v24  ;;  %v3138_v31 = vld [vmem:[#allocation2 + $0xfc] sm:$0x1] }
 0x252   : > { %v3417_v30 = vrot.slane %v3416_v45, 4  ;;  %v3458_v56 = vshrl.u32 %v3136_v1, 16  ;;  %v3440_v37 = vor.u32 %v3439_v60, %v3436_v8  ;;  %v3445_v51 = vrot.slane %v3443_v46, 5  ;;  %v3139_v14 = vld [vmem:[#allocation2 + $0x104] sm:$0xf]  ;;  %v15274_v12 = vpop.f32.mrf.mxu0  ;;  %v15276_v32 = vpop.f32.mrf.mxu1 }
 0x253   : > { %v3427_v29 = vrot.slane %v3426_v58, 4  ;;  %v3461_v50 = vshll.u32 %v3136_v1, 16  ;;  %v3449_v54 = vrot.slane %v3447_v23, 4  ;;  %v3455_v61 = vrot.slane %v3453_v5, 5  ;;  %17295 = vst [vmem:[#allocation22_spill] sm:$0xff] %v15276_v32 }
 0x254   : > { %v3422_v63 = vsel %vm14572_vm10, %v3417_v30, %v3421_v36  ;;  %v3460_v13 = vrot.slane %v3458_v56, 4  ;;  %v13895_v45 = vld [vmem:[#allocation3 + $0x2a8] ss:$36 sps:$4 sm:$0xff]   ;;  %v3441_v8 = vrot.slane %v3440_v37, 4  ;;  %v15281_v1 = vadd.f32 %v12745_v0, %v15252_v41  ;;  %v15283_v5 = vpop.f32.mrf.mxu0  ;;  %v15285_v56 = vpop.f32.mrf.mxu1  ;;  %v447_v41 = vld [vmem:[#allocation2 + $0x11c] sm:$0x1] }
 0x255   : > { %v3432_v24 = vsel %vm14572_vm10, %v3427_v29, %v3431_v15  ;;  %3583 = vst [vmem:[#allocation3 + $0x338] sm:$0xf] %v3422_v63  ;;  %v3463_v58 = vrot.slane %v3461_v50, 5  ;;  %v3450_v36 = vor.u32 %v3449_v54, %v3445_v51  ;;  %v3467_v60 = vshll.u32 %v3137_v4, 16  ;;  %v3140_v23 = vld [vmem:[#allocation2 + $0x108] sm:$0xf]  ;;  %13505 = vmatmul.mubr.bf16.gmra.mxu0 %v13895_v45 }
 0x256   : > { %17296 = vst [vmem:[#allocation23_spill] sm:$0xff] %v15281_v1  ;;  %3584 = vst [vmem:[#allocation3 + $0x35c] sm:$0xf] %v3432_v24  ;;  %v3471_v46 = vshrl.u32 %v3137_v4, 16  ;;  %v3477_v30 = vshll.u32 %v3138_v31, 16  ;;  %v3446_v15 = vsel %vm14572_vm10, %v3441_v8, %v3445_v51  ;;  %v3482_v50 = vshrl.u32 %v3139_v14, 16  ;;  %v15296_v24 = vpop.f32.mrf.mxu1  ;;  %v15298_v32 = vpop.f32.mrf.mxu0 }
 0x257   : > { %17297 = vst [vmem:[#allocation24_spill] sm:$0xff] %v15285_v56  ;;  %v3464_v29 = vor.u32 %v3463_v58, %v3460_v13  ;;  %v3141_v37 = vld [vmem:[#allocation2 + $0x10c] sm:$0x1]  ;;  %v3485_v63 = vshll.u32 %v3139_v14, 16  ;;  %3585 = vst [vmem:[#allocation3 + $0x380] sm:$0xf] %v3446_v15  ;;  %v12636_v4 = vadd.f32 %v15230_v21, %v15220_v7  ;;  %v12748_v31 = vadd.f32 %v15246_v19, %v15238_v55 }
 0x258   : > { %v13896_v0 = vld [vmem:[#allocation3 + $0x2f0] ss:$36 sps:$4 sm:$0xff]   ;;  %v12639_v54 = vadd.f32 %v15256_v20, %v15240_v53  ;;  %v12751_v45 = vadd.f32 %v12750_v44, %v15254_v42  ;;  %v3451_v51 = vrot.slane %v3450_v36, 4  ;;  %v3469_v8 = vrot.slane %v3467_v60, 5  ;;  %v3143_v21 = vld [vmem:[#allocation2 + $0x118] sm:$0xf]  ;;  %v15304_v44 = vpop.f32.mrf.mxu1 }
 0x259   : > { %v3465_v13 = vrot.slane %v3464_v29, 4  ;;  %v3473_v14 = vrot.slane %v3471_v46, 4  ;;  %v3142_v58 = vld [vmem:[#allocation2 + $0x114] sm:$0xf]  ;;  %13508 = vmatprep.mubr.bf16.mxu0 %v13896_v0  ;;  %v3479_v15 = vrot.slane %v3477_v30, 5  ;;  %v3484_v1 = vrot.slane %v3482_v50, 4  ;;  %v15308_v29 = vpop.f32.mrf.mxu0 }
 0x25a   : > { %v3487_v56 = vrot.slane %v3485_v63, 5  ;;  %v3491_v7 = vshll.u32 %v3140_v23, 16  ;;  %v3456_v55 = vsel %vm14572_vm10, %v3451_v51, %v3455_v61  ;;  %v3495_v42 = vshrl.u32 %v3140_v23, 16  ;;  %v8761_v20 = vld [vmem:[#allocation2 + $0x114] sm:$0xf] }
 0x25b   : > { %v3470_v53 = vsel %vm14572_vm10, %v3465_v13, %v3469_v8  ;;  %v3474_v19 = vor.u32 %v3473_v14, %v3469_v8  ;;  %3586 = vst [vmem:[#allocation3 + $0x3a4] sm:$0xf] %v3456_v55  ;;  %v3501_v46 = vshll.u32 %v3141_v37, 16  ;;  %v448_v30 = vsel %vm14545_vm8, 0, %v447_v41  ;;  %v8762_v0 = vld [vmem:[#allocation2 + $0x118] sm:$0xf]  ;;  %v15314_v13 = vpop.f32.mrf.mxu1  ;;  %v12777_v14 = vpop.f32.mrf.mxu0 }
 0x25c   : > { %3587 = vst [vmem:[#allocation3 + $0x3c8] sm:$0xf] %v3470_v53  ;;  %v3488_v36 = vor.u32 %v3487_v56, %v3484_v1  ;;  %v3493_v60 = vrot.slane %v3491_v7, 5  ;;  %v3497_v63 = vrot.slane %v3495_v42, 4  ;;  %449 = vst [vmem:[#allocation2 + $0x11c] sm:$0x1] %v448_v30  ;;  %v15310_v51 = vadd.f32 %v12748_v31, %v12636_v4 }
 0x25d   : > { %v13897_v50 = vld [vmem:[#allocation3 + $0x338] ss:$36 sps:$4 sm:$0xff]   ;;  %v3475_v61 = vrot.slane %v3474_v19, 4  ;;  %v15312_v23 = vadd.f32 %v12751_v45, %v12639_v54  ;;  %v3503_v1 = vrot.slane %v3501_v46, 5  ;;  %v3506_v56 = vshrl.u32 %v3142_v58, 16  ;;  %v15318_v53 = vpop.f32.mrf.mxu1  ;;  %v12778_v19 = vpop.f32.mrf.mxu0  ;;  %v13912_v42 = vld [vmem:[#allocation9 + $0x50] sm:$0xff]  }
 0x25e   : > { %v3489_v8 = vrot.slane %v3488_v36, 4  ;;  %v3509_v37 = vshll.u32 %v3142_v58, 16  ;;  %13509 = vmatmul.mubr.bf16.gmra.mxu0 %v13897_v50  ;;  %v3498_v41 = vor.u32 %v3497_v63, %v3493_v60  ;;  %v3515_v7 = vshll.u32 %v3143_v21, 16  ;;  %13010 = vmatprep.subr.bf16.mxu1 %v13912_v42 }
 0x25f   : > { %17298 = vst [vmem:[#allocation25_spill] sm:$0xff] %v15312_v23  ;;  %v3480_v49 = vsel %vm14572_vm10, %v3475_v61, %v3479_v15  ;;  %v3519_v55 = vshrl.u32 %v3143_v21, 16  ;;  %v3508_v31 = vrot.slane %v3506_v56, 4  ;;  %v9125_v45 = vshrl.u32 %v8761_v20, 16  ;;  %v15322_v15 = vpop.f32.mrf.mxu1 }
 0x260   : > { %3588 = vst [vmem:[#allocation3 + $0x3ec] sm:$0xf] %v3480_v49  ;;  %v3494_v4 = vsel %vm14572_vm10, %v3489_v8, %v3493_v60  ;;  %v3511_v54 = vrot.slane %v3509_v37, 5  ;;  %v3499_v58 = vrot.slane %v3498_v41, 4  ;;  %v3517_v36 = vrot.slane %v3515_v7, 5  ;;  %v13913_v49 = vld [vmem:[#allocation9 + $0x10] sm:$0xff]   ;;  %v12780_v37 = vpop.f32.mrf.mxu0 }
 0x261   : > { %3589 = vst [vmem:[#allocation3 + $0x410] sm:$0xf] %v3494_v4  ;;  %v3521_v46 = vrot.slane %v3519_v55, 4  ;;  %v9128_v30 = vshll.u32 %v8761_v20, 16  ;;  %v9127_v21 = vrot.slane %v9125_v45, 4  ;;  %v9134_v61 = vshll.u32 %v8762_v0, 16  ;;  %13011 = vmatpush3.bf16.msra.mxu1 %v13913_v49  ;;  %v15330_v42 = vpop.f32.mrf.mxu1 }
 0x262   : > { %v3512_v50 = vor.u32 %v3511_v54, %v3508_v31  ;;  %v9138_v63 = vshrl.u32 %v8762_v0, 16  ;;  %v13898_v23 = vld [vmem:[#allocation3 + $0x380] ss:$36 sps:$4 sm:$0xff]   ;;  %v3504_v60 = vsel %vm14572_vm10, %v3499_v58, %v3503_v1  ;;  %v12770_v56 = vadd.f32 %v15268_v47, %v15264_v22  ;;  %v12781_v1 = vpop.f32.mrf.mxu0 }
 0x263   : > { %v3522_v8 = vor.u32 %v3521_v46, %v3517_v36  ;;  %3590 = vst [vmem:[#allocation3 + $0x434] sm:$0xf] %v3504_v60  ;;  %v3144_v41 = vld [vmem:[#allocation2 + $0x11c] sm:$0x1]  ;;  %v9130_v55 = vrot.slane %v9128_v30, 5  ;;  %v12773_v4 = vadd.f32 %v15283_v5, %v15274_v12  ;;  %13512 = vmatprep.mubr.bf16.mxu0 %v13898_v23  ;;  %v9136_v54 = vrot.slane %v9134_v61, 5 }
 0x264   : > { %v3513_v20 = vrot.slane %v3512_v50, 4  ;;  %v8763_v7 = vld [vmem:[#allocation2 + $0x11c] sm:$0x1]  ;;  %v3525_v31 = vshll.u32 %v3144_v41, 16  ;;  %v9140_v45 = vrot.slane %v9138_v63, 4  ;;  %v15335_v46 = vadd.f32 %v12770_v56, %v14893_v26  ;;  %v12783_v61 = vpop.f32.mrf.mxu0  ;;  %v15342_v63 = vpop.f32.mrf.mxu1 }
 0x265   : > { %v3523_v0 = vrot.slane %v3522_v8, 4  ;;  %v9131_v47 = vor.u32 %v9130_v55, %v9127_v21  ;;  %v9144_v58 = vshll.u32 %v8763_v7, 16  ;;  %v15338_v5 = vadd.f32 %v12773_v4, %v14899_v52 }
 0x266   : > { %v3518_v22 = vsel %vm14572_vm10, %v3513_v20, %v3517_v36  ;;  %v3527_v50 = vrot.slane %v3525_v31, 5  ;;  %v9141_v12 = vor.u32 %v9140_v45, %v9136_v54  ;;  %v12776_v23 = vadd.f32 %v15308_v29, %v15298_v32  ;;  %v12784_v56 = vpop.f32.mrf.mxu0  ;;  %v15349_v52 = vpop.f32.mrf.mxu1 }
 0x267   : > { %v13899_v30 = vld [vmem:[#allocation3 + $0x3c8] ss:$36 sps:$4 sm:$0xff]   ;;  %3591 = vst [vmem:[#allocation3 + $0x458] sm:$0xf] %v3518_v22  ;;  %v9132_v49 = vrot.slane %v9131_v47, 4  ;;  %v12779_v36 = vadd.f32 %v12778_v19, %v12777_v14  ;;  %v9146_v60 = vrot.slane %v9144_v58, 5  ;;  %v12782_v29 = vadd.f32 %v12781_v1, %v12780_v37 }
 0x268   : > { %13513 = vmatmul.mubr.bf16.gmra.mxu0 %v13899_v30  ;;  %v3528_v26 = vsel %vm14572_vm10, %v3523_v0, %v3527_v50  ;;  %v9142_v21 = vrot.slane %v9141_v12, 4  ;;  %v15347_v8 = vadd.f32 %v12776_v23, %v14921_v11  ;;  %v12785_v20 = vadd.f32 %v12784_v56, %v12783_v61  ;;  %v15357_v19 = vpop.f32.mrf.mxu1  ;;  %v12786_v11 = vpop.f32.mrf.mxu0 }
 0x269   : > { %3592 = vst [vmem:[#allocation3 + $0x47c] sm:$0xf] %v3528_v26  ;;  %v15352_v32 = vadd.f32 %v12779_v36, %v14932_v34  ;;  %v15355_v14 = vadd.f32 %v12782_v29, %v14945_v17  ;;  %v9137_v55 = vsel %vm14572_vm10, %v9132_v49, %v9136_v54  ;;  %v13914_v29 = vld [vmem:[#allocation9 + $0x48] sm:$0xff]  }
 0x26a   : > { %v13900_v41 = vld [vmem:[#allocation3 + $0x410] ss:$36 sps:$4 sm:$0xff]   ;;  %v15360_v7 = vadd.f32 %v12785_v20, %v14958_v2  ;;  %v9147_v34 = vsel %vm14572_vm10, %v9142_v21, %v9146_v60  ;;  %v12787_v4 = vpop.f32.mrf.mxu0  ;;  %v15366_v37 = vpop.f32.mrf.mxu1  ;;  %13012 = vmatprep.subr.bf16.mxu1 %v13914_v29 }
 0x26b   : > { %13516 = vmatprep.mubr.bf16.mxu0 %v13900_v41  ;;  %v12788_v31 = vadd.f32 %v12787_v4, %v12786_v11  ;;  %v13915_v11 = vld [vmem:[#allocation9 + $0x8] sm:$0xff]   ;;  %v13917_v4 = vld [vmem:[#allocation9 + $0xb8] sm:$0xff]  }
 0x26c   : > { %v12789_v17 = vpop.f32.mrf.mxu0  ;;  %v15368_v45 = vpop.f32.mrf.mxu1  ;;  %13013 = vmatpush3.bf16.msra.mxu1 %v13915_v11 }
 0x26d   : > { %v15371_v2 = vadd.f32 %v12788_v31, %v14968_v43 }
 0x26e   : > { %v12790_v1 = vpop.f32.mrf.mxu0  ;;  %v15373_v22 = vpop.f32.mrf.mxu1 }
 0x26f   : > { %v12791_v54 = vadd.f32 %v12790_v1, %v12789_v17  ;;  %v13918_v1 = vld [vmem:[#allocation9 + $0xf0] sm:$0xff]  }
 0x270   : > { %v13901_v0 = vld [vmem:[#allocation3 + $0x458] ss:$36 sps:$4 sm:$0xff]   ;;  %v15375_v47 = vpop.f32.mrf.mxu1  ;;  %v12792_v30 = vpop.f32.mrf.mxu0 }
 0x271   : > { %9210 = vst [vmem:[#allocation3 + $0x458] sm:$0xf] %v9137_v55  ;;  %9211 = vst [vmem:[#allocation3 + $0x47c] sm:$0xf] %v9147_v34  ;;  %13517 = vmatmul.mubr.bf16.gmra.mxu0 %v13901_v0  ;;  %v15378_v58 = vadd.f32 %v12791_v54, %v14977_v18  ;;  %v13916_v55 = vld [vmem:[#allocation9 + $0xf8] sm:$0xff]  }
 0x272   : > { %v12793_v50 = vpop.f32.mrf.mxu0  ;;  %v15380_v12 = vpop.f32.mrf.mxu1  ;;  %13112 = vmatprep.subr.bf16.mxu0 %v13916_v55 }
 0x273   : > { %v12794_v23 = vadd.f32 %v12793_v50, %v12792_v30  ;;  %13113 = vmatpush3.bf16.msra.mxu0 %v13917_v4  ;;  %v13919_v30 = vld [vmem:[#allocation9 + $0xb0] sm:$0xff]  }
 0x274   : > { %v12795_v61 = vpop.f32.mrf.mxu0  ;;  %v15382_v49 = vpop.f32.mrf.mxu1  ;;  %13114 = vmatprep.subr.bf16.mxu0 %v13918_v1  ;;  %v13920_v1 = vld [vmem:[#allocation9 + $0x40] sm:$0xff]  }
 0x275   : > { %v15385_v43 = vadd.f32 %v12794_v23, %v14991_v6  ;;  %13014 = vmatprep.subr.bf16.mxu1 %v13920_v1 }
 0x276   : > { %v12796_v36 = vpop.f32.mrf.mxu0  ;;  %v15387_v26 = vpop.f32.mrf.mxu1 }
 0x277   : > { %v12797_v21 = vadd.f32 %v12796_v36, %v12795_v61  ;;  %13115 = vmatpush3.bf16.msra.mxu0 %v13919_v30  ;;  %v13921_v36 = vld [vmem:[#allocation9 + $0xe8] sm:$0xff]  }
 0x278   : > { %v15389_v60 = vpop.f32.mrf.mxu1  ;;  %v12798_v56 = vpop.f32.mrf.mxu0  ;;  %13116 = vmatprep.subr.bf16.mxu0 %v13921_v36  ;;  %v13927_v36 = vld [vmem:[#allocation9 + $0x98] sm:$0xff]  }
 0x279   : > { %v15392_v18 = vadd.f32 %v12797_v21, %v14997_v39 }
 0x27a   : > { %v15394_v41 = vpop.f32.mrf.mxu1  ;;  %v12799_v20 = vpop.f32.mrf.mxu0 }
 0x27b   : > { %v12800_v34 = vadd.f32 %v12799_v20, %v12798_v56  ;;  %v13923_v56 = vld [vmem:[#allocation9 + $0xa8] sm:$0xff]  }
 0x27c   : > { %v15396_v6 = vpop.f32.mrf.mxu1  ;;  %v12801_v0 = vpop.f32.mrf.mxu0  ;;  %13117 = vmatpush3.bf16.msra.mxu0 %v13923_v56 }
 0x27d   : > { %v15399_v31 = vadd.f32 %v12800_v34, %v15004_v38  ;;  %v13924_v34 = vld [vmem:[#allocation9 + $0xe0] sm:$0xff]  }
 0x27e   : > { %v15401_v39 = vpop.f32.mrf.mxu1  ;;  %v12802_v17 = vpop.f32.mrf.mxu0  ;;  %13118 = vmatprep.subr.bf16.mxu0 %v13924_v34 }
 0x27f   : > { %v12803_v54 = vadd.f32 %v12802_v17, %v12801_v0 }
 0x280   : > { %v15403_v50 = vpop.f32.mrf.mxu1  ;;  %v12804_v61 = vpop.f32.mrf.mxu0 }
 0x281   : > { %v15406_v23 = vadd.f32 %v12803_v54, %v15016_v62  ;;  %v13925_v62 = vld [vmem:[#allocation9 + $0xa0] sm:$0xff]  }
 0x282   : > { %v12805_v21 = vpop.f32.mrf.mxu0  ;;  %v15408_v29 = vpop.f32.mrf.mxu1  ;;  %v13922_v54 = vld [vmem:[#allocation9] sm:$0xff]   ;;  %13119 = vmatpush3.bf16.msra.mxu0 %v13925_v62 }
 0x283   : > { %17299 = vst [vmem:[#allocation26_spill] sm:$0xff] %v15406_v23  ;;  %v12806_v38 = vadd.f32 %v12805_v21, %v12804_v61  ;;  %13015 = vmatpush3.bf16.msra.mxu1 %v13922_v54  ;;  %v13930_v21 = vld [vmem:[#allocation3 + $0x4] ss:$36 sps:$4 sm:$0xff]  }
 0x284   : > { %v12807_v20 = vpop.f32.mrf.mxu0  ;;  %v15413_v55 = vpop.f32.mrf.mxu1  ;;  %10716 = vmatprep.mubr.bf16.mxu1 %v13930_v21  ;;  %v13935_v21 = vld [vmem:[#allocation9 + $0x88] sm:$0xff]  }
 0x285   : > { %v15411_v11 = vadd.f32 %v12806_v38, %v15024_v57  ;;  %v13926_v57 = vld [vmem:[#allocation9 + $0xd8] sm:$0xff]   ;;  %v13928_v38 = vld [vmem:[#allocation3] ss:$36 sps:$4 sm:$0xff]  }
 0x286   : > { %v12808_v4 = vpop.f32.mrf.mxu0  ;;  %v15415_v17 = vpop.f32.mrf.mxu1  ;;  %13120 = vmatprep.subr.bf16.mxu0 %v13926_v57  ;;  %10717 = vmatmul.mubr.bf16.vlgmr.msra.gmra.mxu1 %v13928_v38 }
 0x287   : > { %17300 = vst [vmem:[#allocation27_spill] sm:$0xff] %v15411_v11  ;;  %v12809_v0 = vadd.f32 %v12808_v4, %v12807_v20  ;;  %13121 = vmatpush3.bf16.msra.mxu0 %v13927_v36  ;;  %v13931_v4 = vld [vmem:[#allocation9 + $0xd0] sm:$0xff]  }
 0x288   : > { %v15420_v61 = vpop.f32.mrf.mxu1  ;;  %v12810_v56 = vpop.f32.mrf.mxu0  ;;  %13122 = vmatprep.subr.bf16.mxu0 %v13931_v4 }
 0x289   : > { %v15418_v30 = vadd.f32 %v12809_v0, %v15031_v40  ;;  %v13932_v0 = vld [vmem:[#allocation9 + $0x90] sm:$0xff]  }
 0x28a   : > { %v15422_v20 = vpop.f32.mrf.mxu1  ;;  %v12811_v34 = vpop.f32.mrf.mxu0 }
 0x28b   : > { %17301 = vst [vmem:[#allocation28_spill] sm:$0xff] %v15418_v30  ;;  %v12812_v62 = vadd.f32 %v12811_v34, %v12810_v56  ;;  %13123 = vmatpush3.bf16.msra.mxu0 %v13932_v0  ;;  %v13933_v30 = vld [vmem:[#allocation9 + $0xc8] sm:$0xff]   ;;  %v13937_v34 = vld [vmem:[#allocation9 + $0xc0] sm:$0xff]  }
 0x28c   : > { %v15424_v40 = vpop.f32.mrf.mxu1  ;;  %v12813_v33 = vpop.f32.mrf.mxu0  ;;  %13124 = vmatprep.subr.bf16.mxu0 %v13933_v30 }
 0x28d   : > { %v15427_v1 = vadd.f32 %v12812_v62, %v15042_v25  ;;  %v13938_v25 = vld [vmem:[#allocation9 + $0x80] sm:$0xff]  }
 0x28e   : > { %v15429_v54 = vpop.f32.mrf.mxu1  ;;  %v12814_v57 = vpop.f32.mrf.mxu0 }
 0x28f   : > { %17302 = vst [vmem:[#allocation29_spill] sm:$0xff] %v15427_v1  ;;  %v12815_v11 = vadd.f32 %v12814_v57, %v12813_v33  ;;  %13125 = vmatpush3.bf16.msra.mxu0 %v13935_v21  ;;  %v13936_v21 = vld [vmem:[#allocation9 + $0x138] sm:$0xff]  }
 0x290   : > { %v15431_v36 = vpop.f32.mrf.mxu1  ;;  %13126 = vmatprep.subr.bf16.mxu0 %v13937_v34 }
 0x291   : > { %v15434_v56 = vadd.f32 %v12815_v11, %v15044_v35  ;;  %v12816_v38 = vpop.f32.mrf.mxu0  ;;  %v13934_v35 = vld [vmem:[#allocation9 + $0x178] sm:$0xff]  }
 0x292   : > { %13224 = vmatprep.subr.bf16.mxu1 %v13934_v35 }
 0x293   : > { %17303 = vst [vmem:[#allocation30_spill] sm:$0xff] %v15434_v56  ;;  %v12817_v4 = vpop.f32.mrf.mxu0  ;;  %v15436_v23 = vpop.f32.mrf.mxu1  ;;  %13127 = vmatpush3.bf16.msra.mxu0 %v13938_v25  ;;  %13225 = vmatpush3.bf16.msra.mxu1 %v13936_v21 }
 0x294   : > { %17304 = vst [vmem:[#allocation31_spill] sm:$0xff] %v15436_v23  ;;  %v12818_v62 = vadd.f32 %v12817_v4, %v12816_v38 }
 0x295   : > { %v12819_v0 = vpop.f32.mrf.mxu0  ;;  %v15438_v1 = vpop.f32.mrf.mxu1 }
 0x296   : > { %v15441_v33 = vadd.f32 %v12818_v62, %v15057_v9 }
 0x297   : > { %v12820_v30 = vpop.f32.mrf.mxu0  ;;  %v15443_v57 = vpop.f32.mrf.mxu1 }
 0x298   : > { %17305 = vst [vmem:[#allocation32_spill] sm:$0xff] %v15441_v33  ;;  %v12821_v11 = vadd.f32 %v12820_v30, %v12819_v0 }
 0x299   : > { %v15448_v23 = vpop.f32.mrf.mxu1 }
 0x29a   : > { %v15446_v56 = vadd.f32 %v12821_v11, %v15065_v28  ;;  %17307 = vst [vmem:[#allocation34_spill] sm:$0xff] %v15448_v23 }
 0x29c   : > { %17306 = vst [vmem:[#allocation33_spill] sm:$0xff] %v15446_v56 }
 0x29d   : > { %v12822_v38 = vpop.f32.mrf.mxu0 }
 0x29f   : > { %v12823_v34 = vpop.f32.mrf.mxu0  ;;  %v15450_v4 = vpop.f32.mrf.mxu1 }
 0x2a0   : > { %17308 = vst [vmem:[#allocation35_spill] sm:$0xff] %v15450_v4  ;;  %v12824_v25 = vadd.f32 %v12823_v34, %v12822_v38 }
 0x2a1   : > { %v12825_v9 = vpop.f32.mrf.mxu0  ;;  %v15452_v62 = vpop.f32.mrf.mxu1 }
 0x2a2   : > { %v15455_v33 = vadd.f32 %v12824_v25, %v15080_v48 }
 0x2a3   : > { %v12826_v0 = vpop.f32.mrf.mxu0  ;;  %v15457_v30 = vpop.f32.mrf.mxu1 }
 0x2a4   : > { %17309 = vst [vmem:[#allocation36_spill] sm:$0xff] %v15455_v33  ;;  %v12827_v35 = vadd.f32 %v12826_v0, %v12825_v9 }
 0x2a5   : > { %v15459_v28 = vpop.f32.mrf.mxu1 }
 0x2a6   : > { %17310 = vst [vmem:[#allocation37_spill] sm:$0xff] %v15459_v28  ;;  %v15462_v11 = vadd.f32 %v12827_v35, %v15089_v16  ;;  %v13951_v28 = vld [vmem:[#allocation9 + $0x170] sm:$0xff]  }
 0x2a7   : > { %v12828_v21 = vpop.f32.mrf.mxu0  ;;  %13226 = vmatprep.subr.bf16.mxu1 %v13951_v28 }
 0x2a8   : > { %17311 = vst [vmem:[#allocation38_spill] sm:$0xff] %v15462_v11 }
 0x2a9   : > { %v12829_v56 = vpop.f32.mrf.mxu0  ;;  %v15464_v23 = vpop.f32.mrf.mxu1 }
 0x2aa   : > { %v12830_v38 = vadd.f32 %v12829_v56, %v12828_v21 }
 0x2ab   : > { %v12831_v34 = vpop.f32.mrf.mxu0  ;;  %v15466_v4 = vpop.f32.mrf.mxu1 }
 0x2ac   : > { %17312 = vst [vmem:[#allocation39_spill] sm:$0xff] %v15466_v4  ;;  %v15469_v48 = vadd.f32 %v12830_v38, %v15098_v3 }
 0x2ad   : > { %v12832_v25 = vpop.f32.mrf.mxu0  ;;  %v15471_v33 = vpop.f32.mrf.mxu1 }
 0x2ae   : > { %17313 = vst [vmem:[#allocation40_spill] sm:$0xff] %v15469_v48  ;;  %17314 = vst [vmem:[#allocation41_spill] sm:$0xff] %v15471_v33  ;;  %v12833_v9 = vadd.f32 %v12832_v25, %v12831_v34  ;;  %v17320_v25 = vld [vmem:[#allocation16_spill] sm:$0xff] }
 0x2af   : > { %v15473_v0 = vpop.f32.mrf.mxu1 }
 0x2b0   : > { %17315 = vst [vmem:[#allocation42_spill] sm:$0xff] %v15473_v0  ;;  %v15476_v16 = vadd.f32 %v12833_v9, %v15105_v10  ;;  %v13958_v9 = vld [vmem:[#allocation9 + $0x130] sm:$0xff]  }
 0x2b1   : > { %13227 = vmatpush3.bf16.msra.mxu1 %v13958_v9 }
 0x2b2   : > { %17316 = vst [vmem:[#allocation43_spill] sm:$0xff] %v15476_v16 }
 0x2b3   : > { %v12834_v35 = vpop.f32.mrf.mxu0  ;;  %v15478_v11 = vpop.f32.mrf.mxu1 }
 0x2b4   : > { %17317 = vst [vmem:[#allocation44_spill] sm:$0xff] %v15478_v11 }
 0x2b5   : > { %v12835_v56 = vpop.f32.mrf.mxu0  ;;  %v15483_v38 = vpop.f32.mrf.mxu1 }
 0x2b6   : > { %v12836_v21 = vadd.f32 %v12835_v56, %v12834_v35  ;;  %17319 = vst [vmem:[#allocation46_spill] sm:$0xff] %v15483_v38  ;;  %v17324_v56 = vld [vmem:[#allocation17_spill] sm:$0xff] }
 0x2b7   : > { %v12837_v4 = vpop.f32.mrf.mxu0  ;;  %v15488_v33 = vpop.f32.mrf.mxu1 }
 0x2b8   : > { %v15481_v3 = vadd.f32 %v12836_v21, %v15120_v27  ;;  %17322 = vst [vmem:[#allocation47_spill] sm:$0xff] %v15488_v33 }
 0x2b9   : > { %v12838_v48 = vpop.f32.mrf.mxu0  ;;  %v15490_v11 = vpop.f32.mrf.mxu1 }
 0x2ba   : > { %17318 = vst [vmem:[#allocation45_spill] sm:$0xff] %v15481_v3  ;;  %v12839_v34 = vadd.f32 %v12838_v48, %v12837_v4  ;;  %17323 = vst [vmem:[#allocation48_spill] sm:$0xff] %v15490_v11  ;;  %v17327_v4 = vld [vmem:[#allocation18_spill] sm:$0xff] }
 0x2bc   : > { %v15486_v0 = vadd.f32 %v12839_v34, %v17320_v25 }
 0x2be   : > { %17321 = vst [vmem:[#allocation16_spill] sm:$0xff] %v15486_v0  ;;  %v12840_v10 = vpop.f32.mrf.mxu0 }
 0x2c0   : > { %v12841_v28 = vpop.f32.mrf.mxu0  ;;  %v15495_v38 = vpop.f32.mrf.mxu1 }
 0x2c1   : > { %v12842_v16 = vadd.f32 %v12841_v28, %v12840_v10  ;;  %17326 = vst [vmem:[#allocation49_spill] sm:$0xff] %v15495_v38  ;;  %v17331_v28 = vld [vmem:[#allocation19_spill] sm:$0xff] }
 0x2c2   : > { %v12843_v35 = vpop.f32.mrf.mxu0  ;;  %v15500_v25 = vpop.f32.mrf.mxu1 }
 0x2c3   : > { %v15493_v27 = vadd.f32 %v12842_v16, %v17324_v56  ;;  %17329 = vst [vmem:[#allocation50_spill] sm:$0xff] %v15500_v25  ;;  %v13965_v16 = vld [vmem:[#allocation9 + $0x168] sm:$0xff]  }
 0x2c4   : > { %v12844_v21 = vpop.f32.mrf.mxu0  ;;  %v15502_v10 = vpop.f32.mrf.mxu1  ;;  %13228 = vmatprep.subr.bf16.mxu1 %v13965_v16 }
 0x2c5   : > { %17325 = vst [vmem:[#allocation17_spill] sm:$0xff] %v15493_v27  ;;  %v12845_v3 = vadd.f32 %v12844_v21, %v12843_v35  ;;  %17330 = vst [vmem:[#allocation51_spill] sm:$0xff] %v15502_v10  ;;  %v17333_v21 = vld [vmem:[#allocation20_spill] sm:$0xff] }
 0x2c6   : > { %v15507_v35 = vpop.f32.mrf.mxu1 }
 0x2c7   : > { %v15498_v48 = vadd.f32 %v12845_v3, %v17327_v4 }
 0x2c9   : > { %17328 = vst [vmem:[#allocation18_spill] sm:$0xff] %v15498_v48  ;;  %v12846_v34 = vpop.f32.mrf.mxu0 }
 0x2cb   : > { %v12847_v0 = vpop.f32.mrf.mxu0  ;;  %v15512_v38 = vpop.f32.mrf.mxu1 }
 0x2cc   : > { %v12848_v33 = vadd.f32 %v12847_v0, %v12846_v34  ;;  %v17334_v34 = vld [vmem:[#allocation21_spill] sm:$0xff] }
 0x2cd   : > { %v12849_v9 = vpop.f32.mrf.mxu0 }
 0x2ce   : > { %v15505_v11 = vadd.f32 %v12848_v33, %v17331_v28  ;;  %v13972_v33 = vld [vmem:[#allocation9 + $0x128] sm:$0xff]  }
 0x2cf   : > { %v12850_v56 = vpop.f32.mrf.mxu0  ;;  %13229 = vmatpush3.bf16.msra.mxu1 %v13972_v33 }
 0x2d0   : > { %17332 = vst [vmem:[#allocation19_spill] sm:$0xff] %v15505_v11  ;;  %v12851_v27 = vadd.f32 %v12850_v56, %v12849_v9  ;;  %v17335_v9 = vld [vmem:[#allocation22_spill] sm:$0xff]  ;;  %v12891_v56 = vadd.f32 %v15322_v15, %v15318_v53  ;;  %v12906_v53 = vadd.f32 %v15382_v49, %v15380_v12  ;;  %v7164_v49 = vld [vmem:[#allocation2 + $0x10] sm:$0x8] }
 0x2d1   : > { %v12882_v16 = vadd.f32 %v17335_v9, %v15270_v59  ;;  %v12897_v59 = vadd.f32 %v15357_v19, %v15349_v52 }
 0x2d2   : > { %v15510_v3 = vadd.f32 %v12851_v27, %v17333_v21  ;;  %v12888_v27 = vadd.f32 %v15314_v13, %v15304_v44  ;;  %v17336_v21 = vld [vmem:[#allocation24_spill] sm:$0xff]  ;;  %v12900_v44 = vadd.f32 %v15368_v45, %v15366_v37  ;;  %v12903_v13 = vadd.f32 %v15375_v47, %v15373_v22 }
 0x2d3   : > { %v15548_v52 = vadd.f32 %v12882_v16, %v15335_v46  ;;  %v15551_v19 = vadd.f32 %v12891_v56, %v15352_v32  ;;  %v6143_v37 = vld [vmem:[#allocation2 + $0x10] sm:$0x8]  ;;  %v12912_v45 = vadd.f32 %v15396_v6, %v15394_v41  ;;  %v12915_v22 = vadd.f32 %v15403_v50, %v15401_v39  ;;  %v7167_v50 = vld [vmem:[#allocation2 + $0x20] sm:$0x8] }
 0x2d4   : > { %v15567_v32 = vadd.f32 %v12897_v59, %v15360_v7  ;;  %v12918_v41 = vadd.f32 %v15413_v55, %v15408_v29  ;;  %v15572_v39 = vadd.f32 %v12903_v13, %v15378_v58  ;;  %v7213_v29 = vshrl.u32 %v7164_v49, 16  ;;  %v6673_v55 = vld [vmem:[#allocation2 + $0x1c] sm:$0x1]  ;;  %v6676_v59 = vld [vmem:[#allocation2 + $0x2c] sm:$0x1] }
 0x2d5   : > { %v12852_v4 = vpop.f32.mrf.mxu0  ;;  %v12924_v58 = vadd.f32 %v15424_v40, %v15422_v20  ;;  %v15592_v16 = vadd.f32 %v12912_v45, %v15399_v31  ;;  %v17340_v20 = vld [vmem:[#allocation34_spill] sm:$0xff]  ;;  %v17342_v13 = vld [vmem:[#allocation35_spill] sm:$0xff]  ;;  %v7170_v45 = vld [vmem:[#allocation2 + $0x30] sm:$0x8] }
 0x2d6   : > { %v12933_v40 = vadd.f32 %v17340_v20, %v15443_v57  ;;  %v15618_v57 = vrot.slane %v7213_v29, 11  ;;  %v17353_v20 = vld [vmem:[#allocation41_spill] sm:$0xff] }
 0x2d7   : > { %v12853_v48 = vpop.f32.mrf.mxu0 }
 0x2d8   : > { %v12854_v25 = vadd.f32 %v12853_v48, %v12852_v4  ;;  %v15523_v48 = vpop.f32.mrf.mxu1  ;;  %v12885_v4 = vadd.f32 %v15296_v24, %v17336_v21  ;;  %v6146_v24 = vld [vmem:[#allocation2 + $0x20] sm:$0x8] }
 0x2d9   : > { %v12855_v0 = vpop.f32.mrf.mxu0 }
 0x2da   : > { %v15515_v10 = vadd.f32 %v12854_v25, %v17334_v34  ;;  %v12894_v25 = vadd.f32 %v15342_v63, %v15330_v42  ;;  %v17337_v34 = vld [vmem:[#allocation23_spill] sm:$0xff]  ;;  %v12909_v42 = vadd.f32 %v15389_v60, %v15387_v26  ;;  %v15542_v63 = vpop.f32.mrf.mxu1  ;;  %v15558_v12 = vadd.f32 %v12885_v4, %v15338_v5 }
 0x2db   : > { %v12856_v28 = vpop.f32.mrf.mxu0  ;;  %v15564_v26 = vadd.f32 %v12900_v44, %v15371_v2  ;;  %v6233_v60 = vshrl.u32 %v6146_v24, 16  ;;  %v15575_v5 = vadd.f32 %v12906_v53, %v15385_v43  ;;  %v12921_v2 = vadd.f32 %v15420_v61, %v15415_v17  ;;  %v17338_v17 = vld [vmem:[#allocation26_spill] sm:$0xff] }
 0x2dc   : > { %v12857_v11 = vadd.f32 %v12856_v28, %v12855_v0  ;;  %v15579_v33 = vpop.f32.mrf.mxu1  ;;  %v15585_v28 = vadd.f32 %v12909_v42, %v15392_v18  ;;  %v12927_v43 = vadd.f32 %v15431_v36, %v15429_v54  ;;  %v15595_v61 = vadd.f32 %v12915_v22, %v17338_v17  ;;  %v17341_v54 = vld [vmem:[#allocation27_spill] sm:$0xff]  ;;  %v6152_v44 = vld [vmem:[#allocation2 + $0x40] sm:$0x8]  ;;  %v17344_v42 = vld [vmem:[#allocation28_spill] sm:$0xff] }
 0x2dd   : > { %v15599_v21 = vrot.slane %v6233_v60, 11  ;;  %v7235_v4 = vshrl.u32 %v7167_v50, 16  ;;  %v15604_v36 = vadd.f32 %v12918_v41, %v17341_v54  ;;  %v7173_v22 = vld [vmem:[#allocation2 + $0x40] sm:$0x8]  ;;  %v6277_v29 = vshrl.u32 %v6152_v44, 16  ;;  %v17350_v17 = vld [vmem:[#allocation33_spill] sm:$0xff] }
 0x2de   : > { %v15530_v0 = vadd.f32 %v12857_v11, %v17337_v34  ;;  %v15545_v11 = vadd.f32 %v12888_v27, %v15347_v8  ;;  %v15561_v8 = vadd.f32 %v12894_v25, %v15355_v14  ;;  %v6211_v14 = vshrl.u32 %v6143_v37, 16  ;;  %v17339_v27 = vld [vmem:[#allocation31_spill] sm:$0xff]  ;;  %v6149_v25 = vld [vmem:[#allocation2 + $0x30] sm:$0x8]  ;;  %v15610_v53 = vpop.f32.mrf.mxu1  ;;  %v17347_v41 = vld [vmem:[#allocation30_spill] sm:$0xff] }
 0x2df   : > { %v12858_v15 = vpop.f32.mrf.mxu0  ;;  %v12930_v18 = vadd.f32 %v15438_v1, %v17339_v27  ;;  %v6760_v34 = vshll.u32 %v6673_v55, 16  ;;  %v12936_v1 = vadd.f32 %v15452_v62, %v17342_v13  ;;  %v15616_v37 = vadd.f32 %v12921_v2, %v17344_v42  ;;  %v17356_v13 = vld [vmem:[#allocation46_spill] sm:$0xff]  ;;  %v6155_v42 = vld [vmem:[#allocation2 + $0x50] sm:$0x8] }
 0x2e0   : > { %v15606_v31 = vrot.slane %v6211_v14, 11  ;;  %v15626_v62 = vadd.f32 %v12927_v43, %v17347_v41  ;;  %v17348_v14 = vld [vmem:[#allocation32_spill] sm:$0xff]  ;;  %v15631_v55 = vrot.slane %v7235_v4, 11  ;;  %v6784_v2 = vshll.u32 %v6676_v59, 16 }
 0x2e1   : > { %v12859_v47 = vpop.f32.mrf.mxu0  ;;  %v15629_v50 = vadd.f32 %v12930_v18, %v17348_v14  ;;  %v15636_v27 = vrot.slane %v6760_v34, 5  ;;  %v17355_v18 = vld [vmem:[#allocation44_spill] sm:$0xff]  ;;  %v13986_v14 = vld [vmem:[#allocation9 + $0x120] sm:$0xff]  }
 0x2e2   : > { %v12860_v46 = vadd.f32 %v12859_v47, %v12858_v15  ;;  %v17343_v15 = vld [vmem:[#allocation25_spill] sm:$0xff]  ;;  %17349 = vst [vmem:[#allocation20_spill] sm:$0xff] %v15631_v55  ;;  %v12948_v4 = vadd.f32 %v17356_v13, %v17355_v18  ;;  %v17357_v59 = vld [vmem:[#allocation36_spill] sm:$0xff]  ;;  %v15660_v13 = vrot.slane %v6277_v29, 11 }
 0x2e3   : > { %v12861_v6 = vpop.f32.mrf.mxu0  ;;  %v17345_v47 = vld [vmem:[#allocation37_spill] sm:$0xff]  ;;  %17351 = vst [vmem:[#allocation21_spill] sm:$0xff] %v15636_v27  ;;  %v15645_v44 = vadd.f32 %v12936_v1, %v17357_v59  ;;  %v17359_v34 = vld [vmem:[#allocation48_spill] sm:$0xff]  ;;  %v15658_v1 = vrot.slane %v6784_v2, 5  ;;  %v6158_v59 = vld [vmem:[#allocation2 + $0x60] sm:$0x8] }
 0x2e4   : > { %v15582_v7 = vadd.f32 %v12860_v46, %v15310_v51  ;;  %v13979_v51 = vld [vmem:[#allocation9 + $0x160] sm:$0xff]   ;;  %v12939_v49 = vadd.f32 %v17345_v47, %v15457_v30  ;;  %v17346_v46 = vld [vmem:[#allocation29_spill] sm:$0xff]  ;;  %v7257_v30 = vshrl.u32 %v7170_v45, 16  ;;  %v17358_v47 = vld [vmem:[#allocation47_spill] sm:$0xff]  ;;  %17366 = vst [vmem:[#allocation23_spill] sm:$0xff] %v15660_v13 }
 0x2e5   : > { %v12862_v9 = vpop.f32.mrf.mxu0  ;;  %13230 = vmatprep.subr.bf16.mxu1 %v13979_v51  ;;  %v15623_v60 = vadd.f32 %v12924_v58, %v17346_v46  ;;  %v15634_v51 = vadd.f32 %v12933_v40, %v17350_v17  ;;  %v7279_v58 = vshrl.u32 %v7173_v22, 16  ;;  %v6682_v40 = vld [vmem:[#allocation2 + $0x4c] sm:$0x1]  ;;  %v12951_v46 = vadd.f32 %v17359_v34, %v17358_v47  ;;  %v17360_v45 = vld [vmem:[#allocation38_spill] sm:$0xff]  ;;  %v17362_v17 = vld [vmem:[#allocation49_spill] sm:$0xff]  ;;  %17365 = vst [vmem:[#allocation24_spill] sm:$0xff] %v15658_v1 }
 0x2e6   : > { %v12863_v56 = vadd.f32 %v12862_v9, %v12861_v6  ;;  %v6255_v6 = vshrl.u32 %v6149_v25, 16  ;;  %v6679_v9 = vld [vmem:[#allocation2 + $0x3c] sm:$0x1]  ;;  %v17354_v25 = vld [vmem:[#allocation42_spill] sm:$0xff]  ;;  %v15650_v22 = vadd.f32 %v12939_v49, %v17360_v45  ;;  %v6299_v47 = vshrl.u32 %v6155_v42, 16  ;;  %13231 = vmatpush3.bf16.msra.mxu1 %v13986_v14 }
 0x2e7   : > { %v12945_v54 = vadd.f32 %v17354_v25, %v17353_v20  ;;  %v17364_v25 = vld [vmem:[#allocation51_spill] sm:$0xff]  ;;  %v15665_v49 = vld [vmem:[%s17250_s3] ss:$0 sm:$0xff]  ;;  %v6832_v34 = vshll.u32 %v6682_v40, 16  ;;  %v17369_v2 = vld [vmem:[#allocation45_spill] sm:$0xff]  ;;  %v6321_v40 = vshrl.u32 %v6158_v59, 16 }
 0x2e8   : > { %v15613_v24 = vadd.f32 %v12863_v56, %v17343_v15  ;;  %v17352_v56 = vld [vmem:[#allocation39_spill] sm:$0xff]  ;;  %v12965_v15 = vpop.f32.mrf.mxu1  ;;  %v15652_v41 = vrot.slane %v6255_v6, 11  ;;  %v12957_v18 = vadd.f32 %v15507_v35, %v17364_v25  ;;  %v15667_v6 = vrot.slane %v7257_v30, 11  ;;  %v7176_v1 = vld [vmem:[#allocation2 + $0x50] sm:$0x8] }
 0x2e9   : > { %v12942_v43 = vadd.f32 %v17352_v56, %v15464_v23  ;;  %v6808_v23 = vshll.u32 %v6679_v9, 16  ;;  %v17363_v56 = vld [vmem:[#allocation50_spill] sm:$0xff]  ;;  %v15669_v9 = vrot.slane %v7279_v58, 11  ;;  %v15673_v29 = vadd.f32 %v12948_v4, %v17369_v2  ;;  %v17371_v25 = vld [vmem:[#allocation43_spill] sm:$0xff]  ;;  %v6685_v30 = vld [vmem:[#allocation2 + $0x5c] sm:$0x1] }
 0x2ea   : > { %17361 = vst [vmem:[#allocation22_spill] sm:$0xff] %v15652_v41  ;;  %v12954_v20 = vadd.f32 %v17363_v56, %v17362_v17  ;;  %17367 = vst [vmem:[#allocation26_spill] sm:$0xff] %v15667_v6  ;;  %v12967_v45 = vpop.f32.mrf.mxu1  ;;  %v17370_v17 = vld [vmem:[#allocation40_spill] sm:$0xff]  ;;  %v15679_v13 = vadd.f32 %v12945_v54, %v17371_v25  ;;  %v7179_v6 = vld [vmem:[#allocation2 + $0x60] sm:$0x8]  ;;  %v12960_v58 = vadd.f32 %v15523_v48, %v15512_v38  ;;  %v15701_v41 = vrot.slane %v6299_v47, 11 }
 0x2eb   : > { %17368 = vst [vmem:[#allocation31_spill] sm:$0xff] %v15669_v9  ;;  %v15676_v56 = vadd.f32 %v12942_v43, %v17370_v17  ;;  %v15686_v42 = vld [vmem:[%s17251_s4] ss:$0 sm:$0xff]  ;;  %v15691_v43 = vrot.slane %v6808_v23, 5  ;;  %v17373_v2 = vld [vmem:[#allocation17_spill] sm:$0xff]  ;;  %v7301_v27 = vshrl.u32 %v7176_v1, 16 }
 0x2ec   : > { %v15696_v17 = vadd.f32 %v12954_v20, %v17373_v2  ;;  %v17374_v38 = vld [vmem:[#allocation18_spill] sm:$0xff]  ;;  %v6161_v25 = vld [vmem:[#allocation2 + $0x70] sm:$0x8]  ;;  %v12968_v23 = vpop.f32.mrf.mxu1  ;;  %v15710_v20 = vadd.f32 %v15579_v33, %v15542_v63  ;;  %v17376_v2 = vld [vmem:[#allocation19_spill] sm:$0xff]  ;;  %v15715_v1 = vrot.slane %v6321_v40, 11 }
 0x2ed   : > { %v15699_v48 = vadd.f32 %v12957_v18, %v17374_v38  ;;  %v15713_v47 = vadd.f32 %v12960_v58, %v17376_v2  ;;  %v15723_v33 = vrot.slane %v7301_v27, 11  ;;  %v6164_v40 = vld [vmem:[#allocation2 + $0x80] sm:$0x8] }
 0x2ee   : > { %17377 = vst [vmem:[#allocation27_spill] sm:$0xff] %v15715_v1  ;;  %v15733_v1 = vadd.f32 %v12968_v23, %v12967_v45 }
 0x2ef   : > { %17378 = vst [vmem:[#allocation35_spill] sm:$0xff] %v15723_v33  ;;  %v6694_v33 = vld [vmem:[#allocation2 + $0x8c] sm:$0x1] }
 0x2f2   : > { %v13490_v55 = vpop.f32.mrf.mxu0 }
 0x2f3   : > { %v5752_v35 = vadd.f32 %v13490_v55, %v15545_v11  ;;  %v17372_v55 = vld [vmem:[#allocation16_spill] sm:$0xff] }
 0x2f4   : > { %v5743_v11 = vpop.f32.mrf.mxu0  ;;  %v15689_v4 = vadd.f32 %v12951_v46, %v17372_v55  ;;  %v6856_v46 = vshll.u32 %v6685_v30, 16  ;;  %v7323_v55 = vshrl.u32 %v7179_v6, 16  ;;  %v6343_v6 = vshrl.u32 %v6161_v25, 16  ;;  %v13993_v25 = vld [vmem:[#allocation9 + $0x1f8] sm:$0xff]  }
 0x2f5   : > { %v5879_v54 = vmul.f32 %v15665_v49, %v5752_v35  ;;  %v5744_v14 = vadd.f32 %v5743_v11, %v15548_v52  ;;  %v15706_v11 = vrot.slane %v6832_v34, 5  ;;  %v15721_v34 = vadd.f32 %v12965_v15, %v15610_v53  ;;  %v7185_v53 = vld [vmem:[#allocation2 + $0x80] sm:$0x8]  ;;  %v13995_v15 = vld [vmem:[#allocation9 + $0x158] sm:$0xff]   ;;  %13336 = vmatprep.subr.bf16.mxu0 %v13993_v25 }
 0x2f6   : > { %v13491_v9 = vpop.f32.mrf.mxu0  ;;  %v15725_v38 = vrot.slane %v6856_v46, 5  ;;  %v15727_v58 = vrot.slane %v7323_v55, 11  ;;  %v15736_v55 = vrot.slane %v6343_v6, 11  ;;  %13232 = vmatprep.subr.bf16.mxu1 %v13995_v15  ;;  %v7367_v6 = vshrl.u32 %v7185_v53, 16 }
 0x2f7   : > { %v5918_v59 = vadd.f32 %v15686_v42, %v5879_v54  ;;  %v5877_v35 = vmul.f32 %v15665_v49, %v5744_v14  ;;  %v5755_v52 = vadd.f32 %v13491_v9, %v15551_v19  ;;  %17375 = vst [vmem:[#allocation34_spill] sm:$0xff] %v15706_v11  ;;  %v6688_v9 = vld [vmem:[#allocation2 + $0x6c] sm:$0x1]  ;;  %v6167_v11 = vld [vmem:[#allocation2 + $0x90] sm:$0x8] }
 0x2f8   : > { %v5746_v18 = vpop.f32.mrf.mxu0  ;;  %17379 = vst [vmem:[#allocation25_spill] sm:$0xff] %v15725_v38  ;;  %17380 = vst [vmem:[#allocation28_spill] sm:$0xff] %v15727_v58  ;;  %v6880_v58 = vshll.u32 %v6688_v9, 16  ;;  %v6691_v38 = vld [vmem:[#allocation2 + $0x7c] sm:$0x1]  ;;  %v6387_v15 = vshrl.u32 %v6167_v11, 16 }
 0x2f9   : > { %v5950_v30 = vmax.f32 %v5918_v59, 0.0  ;;  %v5916_v54 = vadd.f32 %v15686_v42, %v5877_v35  ;;  %v5880_v14 = vmul.f32 %v15665_v49, %v5755_v52  ;;  %v5747_v19 = vadd.f32 %v5746_v18, %v15558_v12  ;;  %v15729_v59 = vpop.f32.mrf.mxu1  ;;  %v7182_v18 = vld [vmem:[#allocation2 + $0x70] sm:$0x8]  ;;  %17381 = vst [vmem:[#allocation37_spill] sm:$0xff] %v15736_v55 }
 0x2fa   : > { %v13494_v63 = vpop.f32.mrf.mxu0 }
 0x2fb   : > { %v12418_v35 = vpack.c.bf16 %v5950_v30, %v5950_v30  ;;  %v5948_v2 = vmax.f32 %v5916_v54, 0.0  ;;  %v5919_v52 = vadd.f32 %v15686_v42, %v5880_v14  ;;  %v5878_v12 = vmul.f32 %v15665_v49, %v5747_v19  ;;  %v12971_v55 = vpop.f32.mrf.mxu1 }
 0x2fc   : > { %v5768_v27 = vadd.f32 %v13494_v63, %v15564_v26  ;;  %v5759_v46 = vpop.f32.mrf.mxu0  ;;  %v7345_v26 = vshrl.u32 %v7182_v18, 16  ;;  %v6365_v63 = vshrl.u32 %v6164_v40, 16 }
 0x2fd   : > { %6110 = vst [vmem:[#allocation2 + $0x24] sm:$0xf] %v12418_v35  ;;  %v12416_v30 = vpack.c.bf16 %v5948_v2, %v5948_v2  ;;  %v5951_v54 = vmax.f32 %v5919_v52, 0.0  ;;  %v5917_v14 = vadd.f32 %v15686_v42, %v5878_v12  ;;  %v5760_v19 = vadd.f32 %v5759_v46, %v15561_v8 }
 0x2fe   : > { %v5883_v45 = vmul.f32 %v15665_v49, %v5768_v27  ;;  %v13495_v23 = vpop.f32.mrf.mxu0  ;;  %v6904_v12 = vshll.u32 %v6691_v38, 16  ;;  %v6928_v46 = vshll.u32 %v6694_v33, 16 }
 0x2ff   : > { %6108 = vst [vmem:[#allocation2 + $0x14] sm:$0xf] %v12416_v30  ;;  %v12419_v9 = vpack.c.bf16 %v5951_v54, %v5951_v54  ;;  %v5949_v25 = vmax.f32 %v5917_v14, 0.0  ;;  %v5881_v35 = vmul.f32 %v15665_v49, %v5760_v19  ;;  %v5771_v2 = vadd.f32 %v13495_v23, %v15572_v39  ;;  %v12973_v19 = vpop.f32.mrf.mxu1  ;;  %v14002_v23 = vld [vmem:[#allocation9 + $0x118] sm:$0xff]  }
 0x300   : > { %v5922_v52 = vadd.f32 %v15686_v42, %v5883_v45  ;;  %v5762_v8 = vpop.f32.mrf.mxu0  ;;  %v15747_v54 = vrot.slane %v6880_v58, 5  ;;  %v15749_v14 = vrot.slane %v6365_v63, 11  ;;  %v15751_v39 = vrot.slane %v7367_v6, 11  ;;  %13233 = vmatpush3.bf16.msra.mxu1 %v14002_v23 }
 0x301   : > { %6111 = vst [vmem:[#allocation2 + $0x28] sm:$0xf] %v12419_v9  ;;  %v12417_v27 = vpack.c.bf16 %v5949_v25, %v5949_v25  ;;  %v5920_v18 = vadd.f32 %v15686_v42, %v5881_v35  ;;  %v5884_v40 = vmul.f32 %v15665_v49, %v5771_v2  ;;  %v5763_v53 = vadd.f32 %v5762_v8, %v15567_v32 }
 0x302   : > { %v5954_v30 = vmax.f32 %v5922_v52, 0.0  ;;  %v15755_v45 = vrot.slane %v7345_v26, 11  ;;  %v15757_v35 = vrot.slane %v6904_v12, 5  ;;  %v15759_v58 = vrot.slane %v6387_v15, 11 }
 0x303   : > { %6109 = vst [vmem:[#allocation2 + $0x18] sm:$0xf] %v12417_v27  ;;  %v5952_v38 = vmax.f32 %v5920_v18, 0.0  ;;  %v5923_v11 = vadd.f32 %v15686_v42, %v5884_v40  ;;  %v5882_v33 = vmul.f32 %v15665_v49, %v5763_v53  ;;  %v15761_v63 = vrot.slane %v6928_v46, 5  ;;  %v12974_v53 = vpop.f32.mrf.mxu1 }
 0x304   : > { %v12422_v9 = vpack.c.bf16 %v5954_v30, %v5954_v30  ;;  %v13498_v25 = vpop.f32.mrf.mxu0  ;;  %v6608_v32 = vld [vmem:[#allocation2 + $0x24] sm:$0xf]  ;;  %v12972_v26 = vadd.f32 %v12971_v55, %v15729_v59  ;;  %v15768_v15 = vadd.f32 %v15710_v20, %v15510_v3  ;;  %v15772_v46 = vadd.f32 %v15721_v34, %v15515_v10 }
 0x305   : > { %v12420_v6 = vpack.c.bf16 %v5952_v38, %v5952_v38  ;;  %v5955_v2 = vmax.f32 %v5923_v11, 0.0  ;;  %v5921_v52 = vadd.f32 %v15686_v42, %v5882_v33  ;;  %v5784_v8 = vadd.f32 %v13498_v25, %v15592_v16  ;;  %6640 = vst [vmem:[#allocation3 + $0x94] sm:$0xf] %v6608_v32 }
 0x306   : > { %6114 = vst [vmem:[#allocation2 + $0x44] sm:$0xf] %v12422_v9  ;;  %v5775_v27 = vpop.f32.mrf.mxu0  ;;  %v6144_v18 = vld [vmem:[#allocation2 + $0x14] sm:$0xf]  ;;  %v15776_v16 = vadd.f32 %v15733_v1, %v15530_v0  ;;  %v15783_v25 = vadd.f32 %v12974_v53, %v12973_v19 }
 0x307   : > { %v6606_v40 = vld [vmem:[#allocation2 + $0x14] sm:$0xf]  ;;  %6112 = vst [vmem:[#allocation2 + $0x34] sm:$0xf] %v12420_v6  ;;  %v12423_v59 = vpack.c.bf16 %v5955_v2, %v5955_v2  ;;  %v5953_v55 = vmax.f32 %v5921_v52, 0.0  ;;  %v5887_v30 = vmul.f32 %v15665_v49, %v5784_v8  ;;  %v5776_v38 = vadd.f32 %v5775_v27, %v15575_v5 }
 0x308   : > { %v7165_v12 = vld [vmem:[#allocation2 + $0x14] sm:$0xf]  ;;  %6638 = vst [vmem:[#allocation3 + $0x4c] sm:$0xf] %v6606_v40  ;;  %v13499_v11 = vpop.f32.mrf.mxu0  ;;  %v6216_v3 = vshrl.u32 %v6144_v18, 16  ;;  %v6219_v20 = vshll.u32 %v6144_v18, 16  ;;  %v15788_v8 = vadd.f32 %v12972_v26, %v15582_v7 }
 0x309   : > { %v7218_v33 = vshrl.u32 %v7165_v12, 16  ;;  %v7221_v23 = vshll.u32 %v7165_v12, 16  ;;  %6115 = vst [vmem:[#allocation2 + $0x48] sm:$0xf] %v12423_v59  ;;  %v12421_v10 = vpack.c.bf16 %v5953_v55, %v5953_v55  ;;  %v5926_v34 = vadd.f32 %v15686_v42, %v5887_v30  ;;  %v6609_v9 = vld [vmem:[#allocation2 + $0x28] sm:$0xf] }
 0x30a   : > { %v5885_v0 = vmul.f32 %v15665_v49, %v5776_v38  ;;  %v5787_v1 = vadd.f32 %v13499_v11, %v15595_v61  ;;  %v5778_v32 = vpop.f32.mrf.mxu0  ;;  %v6145_v6 = vld [vmem:[#allocation2 + $0x18] sm:$0xf]  ;;  %v6218_v5 = vrot.slane %v6216_v3, 7  ;;  %6641 = vst [vmem:[#allocation3 + $0xb8] sm:$0xf] %v6609_v9  ;;  %v14011_v3 = vld [vmem:[#allocation9 + $0x150] sm:$0xff]  }
 0x30b   : > { %v6607_v2 = vld [vmem:[#allocation2 + $0x18] sm:$0xf]  ;;  %v15785_v52 = vrot.slane %v7218_v33, 7  ;;  %6113 = vst [vmem:[#allocation2 + $0x38] sm:$0xf] %v12421_v10  ;;  %v5958_v27 = vmax.f32 %v5926_v34, 0.0  ;;  %v5779_v61 = vadd.f32 %v5778_v32, %v15585_v28  ;;  %13234 = vmatprep.subr.bf16.mxu1 %v14011_v3 }
 0x30c   : > { %v5924_v18 = vadd.f32 %v15686_v42, %v5885_v0  ;;  %v5888_v40 = vmul.f32 %v15665_v49, %v5787_v1  ;;  %6639 = vst [vmem:[#allocation3 + $0x70] sm:$0xf] %v6607_v2  ;;  %v13502_v19 = vpop.f32.mrf.mxu0  ;;  %v6221_v12 = vor.u32 %v6219_v20, %v6218_v5  ;;  %v6223_v53 = vrot.slane %v6218_v5, 4  ;;  %v7166_v2 = vld [vmem:[#allocation2 + $0x18] sm:$0xf] }
 0x30d   : > { %v6225_v59 = vshrl.u32 %v6145_v6, 16  ;;  %v6228_v55 = vshll.u32 %v6145_v6, 16  ;;  %v12426_v30 = vpack.c.bf16 %v5958_v27, %v5958_v27  ;;  %v5886_v7 = vmul.f32 %v15665_v49, %v5779_v61  ;;  %v6612_v26 = vld [vmem:[#allocation2 + $0x44] sm:$0xf] }
 0x30e   : > { %v5956_v38 = vmax.f32 %v5924_v18, 0.0  ;;  %v5927_v11 = vadd.f32 %v15686_v42, %v5888_v40  ;;  %v5800_v33 = vadd.f32 %v13502_v19, %v15623_v60  ;;  %v5791_v10 = vpop.f32.mrf.mxu0  ;;  %v6222_v28 = vsel %vm14551_vm9, %v15606_v31, %v6221_v12  ;;  %v6610_v1 = vld [vmem:[#allocation2 + $0x34] sm:$0xf]  ;;  %6644 = vst [vmem:[#allocation3 + $0x124] sm:$0xf] %v6612_v26 }
 0x30f   : > { %v6227_v0 = vrot.slane %v6225_v59, 7  ;;  %v7223_v20 = vor.u32 %v7221_v23, %v15785_v52  ;;  %6118 = vst [vmem:[#allocation2 + $0x64] sm:$0xf] %v12426_v30  ;;  %v5925_v6 = vadd.f32 %v15686_v42, %v5886_v7  ;;  %v5792_v5 = vadd.f32 %v5791_v10, %v15604_v36  ;;  %6574 = vst [vmem:[#allocation3 + $0x48] sm:$0xf] %v6222_v28 }
 0x310   : > { %v12424_v9 = vpack.c.bf16 %v5956_v38, %v5956_v38  ;;  %v5959_v32 = vmax.f32 %v5927_v11, 0.0  ;;  %6642 = vst [vmem:[#allocation3 + $0xdc] sm:$0xf] %v6610_v1  ;;  %v5891_v60 = vmul.f32 %v15665_v49, %v5800_v33  ;;  %v13503_v27 = vpop.f32.mrf.mxu0  ;;  %v7225_v18 = vrot.slane %v15785_v52, 4  ;;  %v6613_v40 = vld [vmem:[#allocation2 + $0x48] sm:$0xf] }
 0x311   : > { %v6230_v31 = vor.u32 %v6228_v55, %v6227_v0  ;;  %v7224_v23 = vsel %vm14551_vm9, %v15618_v57, %v7223_v20  ;;  %v5957_v19 = vmax.f32 %v5925_v6, 0.0  ;;  %v5889_v36 = vmul.f32 %v15665_v49, %v5792_v5  ;;  %v6147_v59 = vld [vmem:[#allocation2 + $0x24] sm:$0xf]  ;;  %6645 = vst [vmem:[#allocation3 + $0x148] sm:$0xf] %v6613_v40 }
 0x312   : > { %6116 = vst [vmem:[#allocation2 + $0x54] sm:$0xf] %v12424_v9  ;;  %v12427_v61 = vpack.c.bf16 %v5959_v32, %v5959_v32  ;;  %v5803_v12 = vadd.f32 %v13503_v27, %v15626_v62  ;;  %7596 = vst [vmem:[#allocation3 + $0xc] sm:$0xf] %v7224_v23  ;;  %v5930_v30 = vadd.f32 %v15686_v42, %v5891_v60  ;;  %v5794_v55 = vpop.f32.mrf.mxu0  ;;  %v7227_v57 = vshrl.u32 %v7166_v2, 16 }
 0x313   : > { %v6231_v38 = vsel %vm14551_vm9, %v6223_v53, %v6230_v31  ;;  %v7230_v11 = vshll.u32 %v7166_v2, 16  ;;  %v6148_v52 = vld [vmem:[#allocation2 + $0x28] sm:$0xf]  ;;  %v6611_v7 = vld [vmem:[#allocation2 + $0x38] sm:$0xf]  ;;  %v12425_v26 = vpack.c.bf16 %v5957_v19, %v5957_v19  ;;  %v5928_v3 = vadd.f32 %v15686_v42, %v5889_v36 }
 0x314   : > { %6119 = vst [vmem:[#allocation2 + $0x68] sm:$0xf] %v12427_v61  ;;  %v5892_v33 = vmul.f32 %v15665_v49, %v5803_v12  ;;  %v5795_v62 = vadd.f32 %v5794_v55, %v15616_v37  ;;  %6575 = vst [vmem:[#allocation3 + $0x6c] sm:$0xf] %v6231_v38  ;;  %v5962_v10 = vmax.f32 %v5930_v30, 0.0  ;;  %v7229_v28 = vrot.slane %v7227_v57, 7 }
 0x315   : > { %6643 = vst [vmem:[#allocation3 + $0x100] sm:$0xf] %v6611_v7  ;;  %v6238_v0 = vshrl.u32 %v6147_v59, 16  ;;  %v6241_v20 = vshll.u32 %v6147_v59, 16  ;;  %6117 = vst [vmem:[#allocation2 + $0x58] sm:$0xf] %v12425_v26  ;;  %v13506_v32 = vpop.f32.mrf.mxu0 }
 0x316   : > { %v5960_v53 = vmax.f32 %v5928_v3, 0.0  ;;  %v5931_v1 = vadd.f32 %v15686_v42, %v5892_v33  ;;  %v5890_v9 = vmul.f32 %v15665_v49, %v5795_v62  ;;  %v6247_v6 = vshrl.u32 %v6148_v52, 16  ;;  %v6616_v37 = vld [vmem:[#allocation2 + $0x64] sm:$0xf]  ;;  %v6672_v3 = vld [vmem:[#allocation2 + $0x18] sm:$0xf] }
 0x317   : > { %v12430_v5 = vpack.c.bf16 %v5962_v10, %v5962_v10  ;;  %v5816_v2 = vadd.f32 %v13506_v32, %v15645_v44  ;;  %v7232_v60 = vor.u32 %v7230_v11, %v7229_v28  ;;  %v6240_v27 = vrot.slane %v6238_v0, 7  ;;  %v5807_v61 = vpop.f32.mrf.mxu0  ;;  %6648 = vst [vmem:[#allocation3 + $0x1b4] sm:$0xf] %v6616_v37  ;;  %v6671_v44 = vld [vmem:[#allocation2 + $0x14] sm:$0xf] }
 0x318   : > { %v12428_v31 = vpack.c.bf16 %v5960_v53, %v5960_v53  ;;  %v5963_v23 = vmax.f32 %v5931_v1, 0.0  ;;  %v5929_v40 = vadd.f32 %v15686_v42, %v5890_v9  ;;  %v6249_v19 = vrot.slane %v6247_v6, 7  ;;  %v14018_v33 = vld [vmem:[#allocation9 + $0x110] sm:$0xff]  }
 0x319   : > { %6122 = vst [vmem:[#allocation2 + $0x84] sm:$0xf] %v12430_v5  ;;  %v5895_v36 = vmul.f32 %v15665_v49, %v5816_v2  ;;  %v5808_v12 = vadd.f32 %v5807_v61, %v15629_v50  ;;  %v7233_v59 = vsel %vm14551_vm9, %v7225_v18, %v7232_v60  ;;  %v6243_v30 = vor.u32 %v6241_v20, %v6240_v27  ;;  %v6614_v55 = vld [vmem:[#allocation2 + $0x54] sm:$0xf]  ;;  %v13507_v11 = vpop.f32.mrf.mxu0  ;;  %v13941_v28 = vld [vmem:[#allocation3 + $0x4c] ss:$36 sps:$4 sm:$0xff]  }
 0x31a   : > { %6120 = vst [vmem:[#allocation2 + $0x74] sm:$0xf] %v12428_v31  ;;  %v12431_v38 = vpack.c.bf16 %v5963_v23, %v5963_v23  ;;  %v5961_v57 = vmax.f32 %v5929_v40, 0.0  ;;  %7597 = vst [vmem:[#allocation3 + $0x30] sm:$0xf] %v7233_v59  ;;  %v6245_v7 = vrot.slane %v6240_v27, 4  ;;  %v5819_v10 = vadd.f32 %v13507_v11, %v15650_v22  ;;  %13235 = vmatpush3.bf16.msra.mxu1 %v14018_v33 }
 0x31b   : > { %v6250_v26 = vshll.u32 %v6148_v52, 16  ;;  %6646 = vst [vmem:[#allocation3 + $0x16c] sm:$0xf] %v6614_v55  ;;  %v5934_v62 = vadd.f32 %v15686_v42, %v5895_v36  ;;  %v5893_v50 = vmul.f32 %v15665_v49, %v5808_v12  ;;  %v13939_v18 = vld [vmem:[#allocation3 + $0x48] ss:$36 sps:$4 sm:$0xff]   ;;  %v6244_v0 = vsel %vm14551_vm9, %v15599_v21, %v6243_v30  ;;  %v5810_v53 = vpop.f32.mrf.mxu0  ;;  %10724 = vmatprep.mubr.bf16.mxu1 %v13941_v28 }
 0x31c   : > { %6123 = vst [vmem:[#allocation2 + $0x88] sm:$0xf] %v12431_v38  ;;  %v12429_v20 = vpack.c.bf16 %v5961_v57, %v5961_v57  ;;  %6576 = vst [vmem:[#allocation3 + $0x90] sm:$0xf] %v6244_v0  ;;  %v6741_v52 = vshrl.u32 %v6671_v44, 16  ;;  %v6744_v9 = vshll.u32 %v6671_v44, 16  ;;  %v5896_v22 = vmul.f32 %v15665_v49, %v5819_v10  ;;  %10725 = vmatmul.mubr.bf16.gmra.mxu1 %v13939_v18 }
 0x31d   : > { %v6252_v1 = vor.u32 %v6250_v26, %v6249_v19  ;;  %v6617_v32 = vld [vmem:[#allocation2 + $0x68] sm:$0xf]  ;;  %v5966_v6 = vmax.f32 %v5934_v62, 0.0  ;;  %v5932_v5 = vadd.f32 %v15686_v42, %v5893_v50  ;;  %v5811_v2 = vadd.f32 %v5810_v53, %v15634_v51  ;;  %v6615_v60 = vld [vmem:[#allocation2 + $0x58] sm:$0xf]  ;;  %v14009_v0 = vld [vmem:[#allocation9 + $0x1f0] sm:$0xff]  }
 0x31e   : > { %6649 = vst [vmem:[#allocation3 + $0x1d8] sm:$0xf] %v6617_v32  ;;  %6121 = vst [vmem:[#allocation2 + $0x78] sm:$0xf] %v12429_v20  ;;  %v13510_v21 = vpop.f32.mrf.mxu0  ;;  %v6743_v37 = vrot.slane %v6741_v52, 4  ;;  %v6746_v31 = vrot.slane %v6744_v9, 5  ;;  %v5935_v19 = vadd.f32 %v15686_v42, %v5896_v22 }
 0x31f   : > { %v6253_v27 = vsel %vm14551_vm9, %v6245_v7, %v6252_v1  ;;  %v6750_v23 = vshll.u32 %v6672_v3, 16  ;;  %6647 = vst [vmem:[#allocation3 + $0x190] sm:$0xf] %v6615_v60  ;;  %v12434_v40 = vpack.c.bf16 %v5966_v6, %v5966_v6  ;;  %v5964_v61 = vmax.f32 %v5932_v5, 0.0  ;;  %v7168_v51 = vld [vmem:[#allocation2 + $0x24] sm:$0xf] }
 0x320   : > { %v5894_v36 = vmul.f32 %v15665_v49, %v5811_v2  ;;  %6577 = vst [vmem:[#allocation3 + $0xb4] sm:$0xf] %v6253_v27  ;;  %v5832_v12 = vadd.f32 %v13510_v21, %v15673_v29  ;;  %v5823_v59 = vpop.f32.mrf.mxu0  ;;  %v6747_v30 = vor.u32 %v6746_v31, %v6743_v37  ;;  %v6754_v55 = vshrl.u32 %v6672_v3, 16  ;;  %v13994_v38 = vld [vmem:[#allocation9 + $0x1b8] sm:$0xff]   ;;  %v13942_v33 = vld [vmem:[#allocation3 + $0x8] ss:$36 sps:$4 sm:$0xff]  }
 0x321   : > { %v6752_v44 = vrot.slane %v6750_v23, 5  ;;  %6126 = vst [vmem:[#allocation2 + $0xa4] sm:$0xf] %v12434_v40  ;;  %v12432_v57 = vpack.c.bf16 %v5964_v61, %v5964_v61  ;;  %v5967_v11 = vmax.f32 %v5935_v19, 0.0  ;;  %v5824_v26 = vadd.f32 %v5823_v59, %v15676_v56  ;;  %v13944_v62 = vld [vmem:[#allocation3 + $0xc] ss:$36 sps:$4 sm:$0xff]  }
 0x322   : > { %v5933_v7 = vadd.f32 %v15686_v42, %v5894_v36  ;;  %v5899_v50 = vmul.f32 %v15665_v49, %v5832_v12  ;;  %v13511_v10 = vpop.f32.mrf.mxu0  ;;  %v6748_v18 = vrot.slane %v6747_v30, 4  ;;  %v6756_v28 = vrot.slane %v6754_v55, 4  ;;  %10877 = vmatprep.mubr.bf16.mxu0 %v13944_v62  ;;  %v6618_v52 = vld [vmem:[#allocation2 + $0x74] sm:$0xf]  ;;  %v15842_v9 = vld [vmem:[#allocation2 + $0xa0] sm:$0x8] }
 0x323   : > { %v7240_v29 = vshrl.u32 %v7168_v51, 16  ;;  %6124 = vst [vmem:[#allocation2 + $0x94] sm:$0xf] %v12432_v57  ;;  %v12435_v20 = vpack.c.bf16 %v5967_v11, %v5967_v11  ;;  %v5897_v53 = vmul.f32 %v15665_v49, %v5824_v26  ;;  %v5835_v1 = vadd.f32 %v13511_v10, %v15689_v4  ;;  %10878 = vmatmul.mubr.bf16.vlgmr.msra.gmra.mxu0 %v13942_v33  ;;  %v15847_v22 = vld [vmem:[#allocation2 + $0x28] sm:$0xf]  ;;  %v14010_v40 = vld [vmem:[#allocation9 + $0x1b0] sm:$0xff]  }
 0x324   : > { %v5965_v3 = vmax.f32 %v5933_v7, 0.0  ;;  %v5938_v56 = vadd.f32 %v15686_v42, %v5899_v50  ;;  %v6753_v6 = vsel %vm14572_vm10, %v6748_v18, %v6752_v44  ;;  %v6757_v5 = vor.u32 %v6756_v28, %v6752_v44  ;;  %v5826_v60 = vpop.f32.mrf.mxu0  ;;  %6650 = vst [vmem:[#allocation3 + $0x1fc] sm:$0xf] %v6618_v52  ;;  %v15853_v31 = vld [vmem:[#allocation2 + $0x34] sm:$0xf]  ;;  %13337 = vmatpush3.bf16.msra.mxu0 %v13994_v38  ;;  %v14027_v50 = vld [vmem:[#allocation9 + $0x148] sm:$0xff]  }
 0x325   : > { %v15849_v2 = vrot.slane %v7240_v29, 7  ;;  %6127 = vst [vmem:[#allocation2 + $0xa8] sm:$0xf] %v12435_v20  ;;  %v5936_v4 = vadd.f32 %v15686_v42, %v5897_v53  ;;  %v5900_v27 = vmul.f32 %v15665_v49, %v5835_v1  ;;  %7134 = vst [vmem:[#allocation3 + $0x50] sm:$0xf] %v6753_v6  ;;  %v7243_v37 = vshll.u32 %v7168_v51, 16  ;;  %13338 = vmatprep.subr.bf16.mxu0 %v14009_v0 }
 0x326   : > { %v12433_v21 = vpack.c.bf16 %v5965_v3, %v5965_v3  ;;  %v6619_v23 = vld [vmem:[#allocation2 + $0x78] sm:$0xf]  ;;  %v5970_v61 = vmax.f32 %v5938_v56, 0.0  ;;  %v5827_v36 = vadd.f32 %v5826_v60, %v15679_v13  ;;  %v15860_v59 = vadd.f32 %v15783_v25, %v15613_v24  ;;  %v14025_v51 = vld [vmem:[#allocation9 + $0x1e8] sm:$0xff]   ;;  %v6620_v13 = vld [vmem:[#allocation2 + $0x84] sm:$0xf]  ;;  %13236 = vmatprep.subr.bf16.mxu1 %v14027_v50 }
 0x327   : > { %v13947_v19 = vld [vmem:[#allocation3 + $0x94] ss:$36 sps:$4 sm:$0xff]   ;;  %6651 = vst [vmem:[#allocation3 + $0x220] sm:$0xf] %v6619_v23  ;;  %v6409_v30 = vshrl.u32 %v15842_v9, 16  ;;  %v5968_v44 = vmax.f32 %v5936_v4, 0.0  ;;  %v5939_v55 = vadd.f32 %v15686_v42, %v5900_v27  ;;  %v7245_v11 = vor.u32 %v7243_v37, %v15849_v2 }
 0x328   : > { %v15856_v12 = vld [vmem:[#allocation2 + $0x38] sm:$0xf]  ;;  %6125 = vst [vmem:[#allocation2 + $0x98] sm:$0xf] %v12433_v21  ;;  %v13945_v38 = vld [vmem:[#allocation3 + $0x90] ss:$36 sps:$4 sm:$0xff]   ;;  %v12438_v7 = vpack.c.bf16 %v5970_v61, %v5970_v61  ;;  %10732 = vmatprep.mubr.bf16.mxu1 %v13947_v19  ;;  %v13514_v33 = vpop.f32.mrf.mxu0  ;;  %13339 = vmatpush3.bf16.msra.mxu0 %v14010_v40  ;;  %v5898_v1 = vmul.f32 %v15665_v49, %v5827_v36 }
 0x329   : > { %v6758_v57 = vrot.slane %v6757_v5, 4  ;;  %v7247_v26 = vrot.slane %v15849_v2, 4  ;;  %v7249_v24 = vshrl.u32 %v15847_v22, 16  ;;  %v7252_v25 = vshll.u32 %v15847_v22, 16  ;;  %v6621_v62 = vld [vmem:[#allocation2 + $0x88] sm:$0xf]  ;;  %10733 = vmatmul.mubr.bf16.gmra.mxu1 %v13945_v38  ;;  %13340 = vmatprep.subr.bf16.mxu0 %v14025_v51 }
 0x32a   : > { %6652 = vst [vmem:[#allocation3 + $0x244] sm:$0xf] %v6620_v13  ;;  %v12436_v10 = vpack.c.bf16 %v5968_v44, %v5968_v44  ;;  %v5971_v18 = vmax.f32 %v5939_v55, 0.0  ;;  %v17384_v28 = vld [vmem:[#allocation21_spill] sm:$0xff]  ;;  %v17385_v0 = vld [vmem:[#allocation20_spill] sm:$0xff]  ;;  %v14026_v3 = vld [vmem:[#allocation9 + $0x1a8] sm:$0xff]   ;;  %v5848_v52 = vadd.f32 %v13514_v33, %v15713_v47  ;;  %v5839_v56 = vpop.f32.mrf.mxu0  ;;  %v5937_v27 = vadd.f32 %v15686_v42, %v5898_v1 }
 0x32b   : > { %v6763_v29 = vsel %vm14572_vm10, %v6758_v57, %v17384_v28  ;;  %v7246_v20 = vsel %vm14551_vm9, %v17385_v0, %v7245_v11  ;;  %6653 = vst [vmem:[#allocation3 + $0x268] sm:$0xf] %v6621_v62  ;;  %6130 = vst [vmem:[#allocation2 + $0xc4] sm:$0xf] %v12438_v7  ;;  %v7251_v53 = vrot.slane %v7249_v24, 7  ;;  %v6260_v6 = vshrl.u32 %v15853_v31, 16 }
 0x32c   : > { %7135 = vst [vmem:[#allocation3 + $0x74] sm:$0xf] %v6763_v29  ;;  %7598 = vst [vmem:[#allocation3 + $0x54] sm:$0xf] %v7246_v20  ;;  %v12439_v5 = vpack.c.bf16 %v5971_v18, %v5971_v18  ;;  %v5840_v22 = vadd.f32 %v5839_v56, %v15696_v17  ;;  %v6263_v2 = vshll.u32 %v15853_v31, 16  ;;  %v6269_v60 = vshrl.u32 %v15856_v12, 16  ;;  %v13515_v47 = vpop.f32.mrf.mxu0  ;;  %13341 = vmatpush3.bf16.msra.mxu0 %v14026_v3 }
 0x32d   : > { %6128 = vst [vmem:[#allocation2 + $0xb4] sm:$0xf] %v12436_v10  ;;  %v6622_v21 = vld [vmem:[#allocation2 + $0x94] sm:$0xf]  ;;  %v7254_v4 = vor.u32 %v7252_v25, %v7251_v53  ;;  %v5903_v37 = vmul.f32 %v15665_v49, %v5848_v52  ;;  %v6262_v23 = vrot.slane %v6260_v6, 7  ;;  %v5851_v61 = vadd.f32 %v13515_v47, %v15768_v15  ;;  %v14034_v11 = vld [vmem:[#allocation9 + $0x108] sm:$0xff]  }
 0x32e   : > { %6654 = vst [vmem:[#allocation3 + $0x28c] sm:$0xf] %v6622_v21  ;;  %6131 = vst [vmem:[#allocation2 + $0xc8] sm:$0xf] %v12439_v5  ;;  %v5901_v40 = vmul.f32 %v15665_v49, %v5840_v22  ;;  %v6271_v19 = vrot.slane %v6269_v60, 7  ;;  %v6272_v17 = vshll.u32 %v15856_v12, 16  ;;  %v5842_v38 = vpop.f32.mrf.mxu0  ;;  %13237 = vmatpush3.bf16.msra.mxu1 %v14034_v11 }
 0x32f   : > { %v6674_v31 = vld [vmem:[#allocation2 + $0x24] sm:$0xf]  ;;  %v7255_v36 = vsel %vm14551_vm9, %v7247_v26, %v7254_v4  ;;  %v5969_v51 = vmax.f32 %v5937_v27, 0.0  ;;  %v5942_v44 = vadd.f32 %v15686_v42, %v5903_v37  ;;  %v6265_v55 = vor.u32 %v6263_v2, %v6262_v23  ;;  %v6623_v57 = vld [vmem:[#allocation2 + $0x98] sm:$0xf] }
 0x330   : > { %7599 = vst [vmem:[#allocation3 + $0x78] sm:$0xf] %v7255_v36  ;;  %v5940_v13 = vadd.f32 %v15686_v42, %v5901_v40  ;;  %v5904_v15 = vmul.f32 %v15665_v49, %v5851_v61  ;;  %v6267_v7 = vrot.slane %v6262_v23, 4  ;;  %v6274_v24 = vor.u32 %v6272_v17, %v6271_v19  ;;  %v6675_v12 = vld [vmem:[#allocation2 + $0x28] sm:$0xf]  ;;  %v17386_v26 = vld [vmem:[#allocation22_spill] sm:$0xff] }
 0x331   : > { %v7171_v25 = vld [vmem:[#allocation2 + $0x34] sm:$0xf]  ;;  %6655 = vst [vmem:[#allocation3 + $0x2b0] sm:$0xf] %v6623_v57  ;;  %v12437_v33 = vpack.c.bf16 %v5969_v51, %v5969_v51  ;;  %v5974_v62 = vmax.f32 %v5942_v44, 0.0  ;;  %v6266_v50 = vsel %vm14551_vm9, %v17386_v26, %v6265_v55  ;;  %v6765_v10 = vshrl.u32 %v6674_v31, 16  ;;  %v13518_v5 = vpop.f32.mrf.mxu0 }
 0x332   : > { %v6624_v18 = vld [vmem:[#allocation2 + $0xa4] sm:$0xf]  ;;  %v6625_v28 = vld [vmem:[#allocation2 + $0xa8] sm:$0xf]  ;;  %v5972_v29 = vmax.f32 %v5940_v13, 0.0  ;;  %v5943_v0 = vadd.f32 %v15686_v42, %v5904_v15  ;;  %v6275_v20 = vsel %vm14551_vm9, %v6267_v7, %v6274_v24  ;;  %v6768_v3 = vshll.u32 %v6674_v31, 16 }
 0x333   : > { %6578 = vst [vmem:[#allocation3 + $0xd8] sm:$0xf] %v6266_v50  ;;  %v7172_v53 = vld [vmem:[#allocation2 + $0x38] sm:$0xf]  ;;  %6656 = vst [vmem:[#allocation3 + $0x2d4] sm:$0xf] %v6624_v18  ;;  %v12442_v1 = vpack.c.bf16 %v5974_v62, %v5974_v62  ;;  %v5855_v23 = vpop.f32.mrf.mxu0  ;;  %v5843_v55 = vadd.f32 %v5842_v38, %v15699_v48  ;;  %v5864_v57 = vadd.f32 %v13518_v5, %v15788_v8 }
 0x334   : > { %6657 = vst [vmem:[#allocation3 + $0x2f8] sm:$0xf] %v6625_v28  ;;  %6129 = vst [vmem:[#allocation2 + $0xb8] sm:$0xf] %v12437_v33  ;;  %v6767_v52 = vrot.slane %v6765_v10, 4  ;;  %v6774_v56 = vshll.u32 %v6675_v12, 16  ;;  %v12440_v22 = vpack.c.bf16 %v5972_v29, %v5972_v29 }
 0x335   : > { %6579 = vst [vmem:[#allocation3 + $0xfc] sm:$0xf] %v6275_v20  ;;  %v6778_v6 = vshrl.u32 %v6675_v12, 16  ;;  %v5975_v2 = vmax.f32 %v5943_v0, 0.0  ;;  %v6770_v60 = vrot.slane %v6768_v3, 5  ;;  %v7262_v21 = vshrl.u32 %v7171_v25, 16  ;;  %v13519_v11 = vpop.f32.mrf.mxu0 }
 0x336   : > { %6134 = vst [vmem:[#allocation2 + $0xe4] sm:$0xf] %v12442_v1  ;;  %v6776_v4 = vrot.slane %v6774_v56, 5  ;;  %v7265_v37 = vshll.u32 %v7171_v25, 16  ;;  %v7271_v47 = vshrl.u32 %v7172_v53, 16  ;;  %v7274_v17 = vshll.u32 %v7172_v53, 16 }
 0x337   : > { %v6780_v27 = vrot.slane %v6778_v6, 4  ;;  %6132 = vst [vmem:[#allocation2 + $0xd4] sm:$0xf] %v12440_v22  ;;  %v12443_v40 = vpack.c.bf16 %v5975_v2, %v5975_v2  ;;  %v6771_v61 = vor.u32 %v6770_v60, %v6767_v52  ;;  %v7264_v19 = vrot.slane %v7262_v21, 7  ;;  %v6626_v31 = vld [vmem:[#allocation2 + $0xb4] sm:$0xf] }
 0x338   : > { %v13950_v36 = vld [vmem:[#allocation3 + $0x54] ss:$36 sps:$4 sm:$0xff]   ;;  %v7273_v44 = vrot.slane %v7271_v47, 7  ;;  %6658 = vst [vmem:[#allocation3 + $0x31c] sm:$0xf] %v6626_v31  ;;  %v5856_v12 = vadd.f32 %v5855_v23, %v15772_v46  ;;  %v5902_v62 = vmul.f32 %v15665_v49, %v5843_v55  ;;  %v5907_v26 = vmul.f32 %v15665_v49, %v5864_v57  ;;  %v17387_v38 = vld [vmem:[#allocation26_spill] sm:$0xff] }
 0x339   : > { %v6781_v51 = vor.u32 %v6780_v27, %v6776_v4  ;;  %v13948_v13 = vld [vmem:[#allocation3 + $0x50] ss:$36 sps:$4 sm:$0xff]   ;;  %6135 = vst [vmem:[#allocation2 + $0xe8] sm:$0xf] %v12443_v40  ;;  %v6772_v15 = vrot.slane %v6771_v61, 4  ;;  %v7267_v7 = vor.u32 %v7265_v37, %v7264_v19  ;;  %v7269_v24 = vrot.slane %v7264_v19, 4  ;;  %10885 = vmatprep.mubr.bf16.mxu0 %v13950_v36 }
 0x33a   : > { %v7276_v33 = vor.u32 %v7274_v17, %v7273_v44  ;;  %v6153_v50 = vld [vmem:[#allocation2 + $0x44] sm:$0xf]  ;;  %10886 = vmatmul.mubr.bf16.gmra.mxu0 %v13948_v13  ;;  %v13954_v48 = vld [vmem:[#allocation3 + $0xdc] ss:$36 sps:$4 sm:$0xff]   ;;  %v5905_v18 = vmul.f32 %v15665_v49, %v5856_v12  ;;  %v5867_v46 = vadd.f32 %v13519_v11, %v15860_v59  ;;  %v6154_v28 = vld [vmem:[#allocation2 + $0x48] sm:$0xf]  ;;  %v5941_v53 = vadd.f32 %v15686_v42, %v5902_v62 }
 0x33b   : > { %v6782_v25 = vrot.slane %v6781_v51, 4  ;;  %v6777_v8 = vsel %vm14572_vm10, %v6772_v15, %v6776_v4  ;;  %v7268_v10 = vsel %vm14551_vm9, %v17387_v38, %v7267_v7  ;;  %v17388_v0 = vld [vmem:[#allocation24_spill] sm:$0xff]  ;;  %v5946_v1 = vadd.f32 %v15686_v42, %v5907_v26  ;;  %v6627_v56 = vld [vmem:[#allocation2 + $0xb8] sm:$0xf]  ;;  %10740 = vmatprep.mubr.bf16.mxu1 %v13954_v48  ;;  %v6628_v2 = vld [vmem:[#allocation2 + $0xc4] sm:$0xf]  ;;  %v5858_v15 = vpop.f32.mrf.mxu0 }
 0x33c   : > { %v13952_v29 = vld [vmem:[#allocation3 + $0xd8] ss:$36 sps:$4 sm:$0xff]   ;;  %7136 = vst [vmem:[#allocation3 + $0x98] sm:$0xf] %v6777_v8  ;;  %v7277_v3 = vsel %vm14551_vm9, %v7269_v24, %v7276_v33  ;;  %7600 = vst [vmem:[#allocation3 + $0x9c] sm:$0xf] %v7268_v10  ;;  %v5944_v59 = vadd.f32 %v15686_v42, %v5905_v18  ;;  %v5908_v6 = vmul.f32 %v15665_v49, %v5867_v46 }
 0x33d   : > { %v6787_v20 = vsel %vm14572_vm10, %v6782_v25, %v17388_v0  ;;  %v6677_v52 = vld [vmem:[#allocation2 + $0x34] sm:$0xf]  ;;  %7601 = vst [vmem:[#allocation3 + $0xc0] sm:$0xf] %v7277_v3  ;;  %v6282_v5 = vshrl.u32 %v6153_v50, 16  ;;  %v6285_v22 = vshll.u32 %v6153_v50, 16  ;;  %10741 = vmatmul.mubr.bf16.gmra.mxu1 %v13952_v29  ;;  %v5859_v0 = vadd.f32 %v5858_v15, %v15776_v16 }
 0x33e   : > { %7137 = vst [vmem:[#allocation3 + $0xbc] sm:$0xf] %v6787_v20  ;;  %6659 = vst [vmem:[#allocation3 + $0x340] sm:$0xf] %v6627_v56  ;;  %v5973_v60 = vmax.f32 %v5941_v53, 0.0  ;;  %v5978_v21 = vmax.f32 %v5946_v1, 0.0  ;;  %v5947_v23 = vadd.f32 %v15686_v42, %v5908_v6 }
 0x33f   : > { %v6291_v4 = vshrl.u32 %v6154_v28, 16  ;;  %v6294_v27 = vshll.u32 %v6154_v28, 16  ;;  %v6629_v37 = vld [vmem:[#allocation2 + $0xc8] sm:$0xf]  ;;  %6660 = vst [vmem:[#allocation3 + $0x364] sm:$0xf] %v6628_v2 }
 0x340   : > { %v5976_v47 = vmax.f32 %v5944_v59, 0.0  ;;  %v6284_v40 = vrot.slane %v6282_v5, 7  ;;  %v6678_v61 = vld [vmem:[#allocation2 + $0x38] sm:$0xf]  ;;  %v6789_v19 = vshrl.u32 %v6677_v52, 16  ;;  %v14041_v17 = vld [vmem:[#allocation9 + $0x1e0] sm:$0xff]   ;;  %v12441_v49 = vpack.c.bf16 %v5973_v60, %v5973_v60 }
 0x341   : > { %6661 = vst [vmem:[#allocation3 + $0x388] sm:$0xf] %v6629_v37  ;;  %v12446_v31 = vpack.c.bf16 %v5978_v21, %v5978_v21  ;;  %v6293_v36 = vrot.slane %v6291_v4, 7  ;;  %v6792_v51 = vshll.u32 %v6677_v52, 16  ;;  %v7174_v44 = vld [vmem:[#allocation2 + $0x44] sm:$0xf]  ;;  %13342 = vmatprep.subr.bf16.mxu0 %v14041_v17 }
 0x342   : > { %v12444_v55 = vpack.c.bf16 %v5976_v47, %v5976_v47  ;;  %v5979_v57 = vmax.f32 %v5947_v23, 0.0  ;;  %v6287_v11 = vor.u32 %v6285_v22, %v6284_v40  ;;  %v6289_v13 = vrot.slane %v6284_v40, 4  ;;  %6133 = vst [vmem:[#allocation2 + $0xd8] sm:$0xf] %v12441_v49  ;;  %v7175_v25 = vld [vmem:[#allocation2 + $0x48] sm:$0xf] }
 0x343   : > { %6138 = vst [vmem:[#allocation2 + $0x104] sm:$0xf] %v12446_v31  ;;  %v6296_v7 = vor.u32 %v6294_v27, %v6293_v36  ;;  %v6791_v42 = vrot.slane %v6789_v19, 4  ;;  %v6794_v24 = vrot.slane %v6792_v51, 5  ;;  %v6798_v12 = vshll.u32 %v6678_v61, 16  ;;  %v14042_v33 = vld [vmem:[#allocation9 + $0x1a0] sm:$0xff]  }
 0x344   : > { %6136 = vst [vmem:[#allocation2 + $0xf4] sm:$0xf] %v12444_v55  ;;  %v12447_v62 = vpack.c.bf16 %v5979_v57, %v5979_v57  ;;  %v17389_v26 = vld [vmem:[#allocation23_spill] sm:$0xff]  ;;  %v6802_v48 = vshrl.u32 %v6678_v61, 16  ;;  %v7284_v8 = vshrl.u32 %v7174_v44, 16  ;;  %v14043_v10 = vld [vmem:[#allocation9 + $0x140] sm:$0xff]   ;;  %13343 = vmatpush3.bf16.msra.mxu0 %v14042_v33 }
 0x345   : > { %v6288_v50 = vsel %vm14551_vm9, %v17389_v26, %v6287_v11  ;;  %v6156_v38 = vld [vmem:[#allocation2 + $0x54] sm:$0xf]  ;;  %v13957_v18 = vld [vmem:[#allocation3 + $0x9c] ss:$36 sps:$4 sm:$0xff]   ;;  %v6297_v46 = vsel %vm14551_vm9, %v6289_v13, %v6296_v7  ;;  %v6795_v28 = vor.u32 %v6794_v24, %v6791_v42  ;;  %v6800_v29 = vrot.slane %v6798_v12, 5  ;;  %13238 = vmatprep.subr.bf16.mxu1 %v14043_v10  ;;  %v17390_v31 = vld [vmem:[#allocation31_spill] sm:$0xff] }
 0x346   : > { %6580 = vst [vmem:[#allocation3 + $0x120] sm:$0xf] %v6288_v50  ;;  %v6157_v20 = vld [vmem:[#allocation2 + $0x58] sm:$0xf]  ;;  %6139 = vst [vmem:[#allocation2 + $0x108] sm:$0xf] %v12447_v62  ;;  %10893 = vmatprep.mubr.bf16.mxu0 %v13957_v18 }
 0x347   : > { %v13955_v3 = vld [vmem:[#allocation3 + $0x98] ss:$36 sps:$4 sm:$0xff]   ;;  %6581 = vst [vmem:[#allocation3 + $0x144] sm:$0xf] %v6297_v46  ;;  %v6804_v53 = vrot.slane %v6802_v48, 4  ;;  %v7286_v1 = vrot.slane %v7284_v8, 7 }
 0x348   : > { %v7287_v52 = vshll.u32 %v7174_v44, 16  ;;  %v7293_v56 = vshrl.u32 %v7175_v25, 16  ;;  %v6796_v59 = vrot.slane %v6795_v28, 4  ;;  %v7296_v6 = vshll.u32 %v7175_v25, 16  ;;  %v14183_v5 = vld [vmem:[%s17250_s3] ss:$0 sm:$0xff]  ;;  %10894 = vmatmul.mubr.bf16.gmra.mxu0 %v13955_v3 }
 0x349   : > { %v5906_v22 = vmul.f32 %v14183_v5, %v5859_v0  ;;  %v6304_v2 = vshrl.u32 %v6156_v38, 16  ;;  %v6630_v16 = vld [vmem:[#allocation2 + $0xd4] sm:$0xf]  ;;  %v6805_v60 = vor.u32 %v6804_v53, %v6800_v29  ;;  %v7291_v4 = vrot.slane %v7286_v1, 4  ;;  %v15927_v37 = vld [vmem:[#allocation2 + $0xa0] sm:$0x8] }
 0x34a   : > { %v7289_v21 = vor.u32 %v7287_v52, %v7286_v1  ;;  %v7295_v27 = vrot.slane %v7293_v56, 7  ;;  %6662 = vst [vmem:[#allocation3 + $0x3ac] sm:$0xf] %v6630_v16  ;;  %v6801_v47 = vsel %vm14572_vm10, %v6796_v59, %v6800_v29  ;;  %v14184_v23 = vld [vmem:[%s17251_s4] ss:$0 sm:$0xff]  ;;  %v6307_v19 = vshll.u32 %v6156_v38, 16 }
 0x34b   : > { %v5945_v40 = vadd.f32 %v14184_v23, %v5906_v22  ;;  %v6306_v61 = vrot.slane %v6304_v2, 7  ;;  %v6680_v17 = vld [vmem:[#allocation2 + $0x44] sm:$0xf]  ;;  %v6806_v49 = vrot.slane %v6805_v60, 4  ;;  %7138 = vst [vmem:[#allocation3 + $0xe0] sm:$0xf] %v6801_v47 }
 0x34c   : > { %v7290_v36 = vsel %vm14551_vm9, %v17390_v31, %v7289_v21  ;;  %v7298_v51 = vor.u32 %v7296_v6, %v7295_v27  ;;  %v6313_v44 = vshrl.u32 %v6157_v20, 16  ;;  %v6681_v55 = vld [vmem:[#allocation2 + $0x48] sm:$0xf]  ;;  %v6631_v57 = vld [vmem:[#allocation2 + $0xd8] sm:$0xf]  ;;  %v6316_v15 = vshll.u32 %v6157_v20, 16 }
 0x34d   : > { %7602 = vst [vmem:[#allocation3 + $0xe4] sm:$0xf] %v7290_v36  ;;  %v5977_v11 = vmax.f32 %v5945_v40, 0.0  ;;  %v6309_v13 = vor.u32 %v6307_v19, %v6306_v61  ;;  %v7177_v7 = vld [vmem:[#allocation2 + $0x54] sm:$0xf]  ;;  %v7411_v42 = vshrl.u32 %v15927_v37, 16  ;;  %v6811_v12 = vsel %vm14572_vm10, %v6806_v49, %v15691_v43 }
 0x34e   : > { %6663 = vst [vmem:[#allocation3 + $0x3d0] sm:$0xf] %v6631_v57  ;;  %v14050_v24 = vld [vmem:[#allocation9 + $0x100] sm:$0xff]   ;;  %v7299_v25 = vsel %vm14551_vm9, %v7291_v4, %v7298_v51  ;;  %v6315_v33 = vrot.slane %v6313_v44, 7  ;;  %v6813_v62 = vshrl.u32 %v6680_v17, 16  ;;  %v14051_v48 = vld [vmem:[#allocation9 + $0x1d8] sm:$0xff]  }
 0x34f   : > { %v7178_v26 = vld [vmem:[#allocation2 + $0x58] sm:$0xf]  ;;  %v15943_v50 = vld [vmem:[#allocation2 + $0x64] sm:$0xf]  ;;  %7139 = vst [vmem:[#allocation3 + $0x104] sm:$0xf] %v6811_v12  ;;  %v12445_v38 = vpack.c.bf16 %v5977_v11, %v5977_v11  ;;  %v6310_v10 = vsel %vm14551_vm9, %v15701_v41, %v6309_v13  ;;  %13239 = vmatpush3.bf16.msra.mxu1 %v14050_v24  ;;  %13344 = vmatprep.subr.bf16.mxu0 %v14051_v48 }
 0x350   : > { %v13961_v8 = vld [vmem:[#allocation3 + $0x124] ss:$36 sps:$4 sm:$0xff]   ;;  %7603 = vst [vmem:[#allocation3 + $0x108] sm:$0xf] %v7299_v25  ;;  %v6311_v18 = vrot.slane %v6306_v61, 4  ;;  %v6816_v46 = vshll.u32 %v6680_v17, 16  ;;  %v6318_v28 = vor.u32 %v6316_v15, %v6315_v33 }
 0x351   : > { %v13959_v43 = vld [vmem:[#allocation3 + $0x120] ss:$36 sps:$4 sm:$0xff]   ;;  %6582 = vst [vmem:[#allocation3 + $0x168] sm:$0xf] %v6310_v10  ;;  %v6815_v29 = vrot.slane %v6813_v62, 4  ;;  %v6822_v0 = vshll.u32 %v6681_v55, 16  ;;  %10748 = vmatprep.mubr.bf16.mxu1 %v13961_v8 }
 0x352   : > { %v6826_v20 = vshrl.u32 %v6681_v55, 16  ;;  %6137 = vst [vmem:[#allocation2 + $0xf8] sm:$0xf] %v12445_v38  ;;  %v6818_v3 = vrot.slane %v6816_v46, 5  ;;  %v7306_v53 = vshrl.u32 %v7177_v7, 16  ;;  %v7309_v1 = vshll.u32 %v7177_v7, 16  ;;  %10749 = vmatmul.mubr.bf16.gmra.mxu1 %v13959_v43 }
 0x353   : > { %v7315_v52 = vshrl.u32 %v7178_v26, 16  ;;  %v6160_v56 = vld [vmem:[#allocation2 + $0x68] sm:$0xf]  ;;  %v6319_v41 = vsel %vm14551_vm9, %v6311_v18, %v6318_v28  ;;  %v6824_v59 = vrot.slane %v6822_v0, 5  ;;  %v7318_v5 = vshll.u32 %v7178_v26, 16  ;;  %v17392_v33 = vld [vmem:[#allocation34_spill] sm:$0xff] }
 0x354   : > { %v6828_v6 = vrot.slane %v6826_v20, 4  ;;  %6583 = vst [vmem:[#allocation3 + $0x18c] sm:$0xf] %v6319_v41  ;;  %v6819_v22 = vor.u32 %v6818_v3, %v6815_v29  ;;  %v7308_v2 = vrot.slane %v7306_v53, 7  ;;  %v6326_v60 = vshrl.u32 %v15943_v50, 16  ;;  %v17391_v13 = vld [vmem:[#allocation35_spill] sm:$0xff] }
 0x355   : > { %v7317_v16 = vrot.slane %v7315_v52, 7  ;;  %v6632_v21 = vld [vmem:[#allocation2 + $0xe4] sm:$0xf]  ;;  %v6335_v27 = vshrl.u32 %v6160_v56, 16  ;;  %v15951_v47 = vld [vmem:[#allocation2 + $0x90] sm:$0x8] }
 0x356   : > { %v6829_v4 = vor.u32 %v6828_v6, %v6824_v59  ;;  %v6633_v23 = vld [vmem:[#allocation2 + $0xe8] sm:$0xf]  ;;  %6664 = vst [vmem:[#allocation3 + $0x3f4] sm:$0xf] %v6632_v21  ;;  %v6820_v40 = vrot.slane %v6819_v22, 4  ;;  %v7311_v61 = vor.u32 %v7309_v1, %v7308_v2  ;;  %v7313_v19 = vrot.slane %v7308_v2, 4 }
 0x357   : > { %v7320_v17 = vor.u32 %v7318_v5, %v7317_v16  ;;  %v6683_v49 = vld [vmem:[#allocation2 + $0x54] sm:$0xf]  ;;  %v6684_v31 = vld [vmem:[#allocation2 + $0x58] sm:$0xf]  ;;  %6665 = vst [vmem:[#allocation3 + $0x418] sm:$0xf] %v6633_v23 }
 0x358   : > { %v13964_v36 = vld [vmem:[#allocation3 + $0xe4] ss:$36 sps:$4 sm:$0xff]   ;;  %v6830_v51 = vrot.slane %v6829_v4, 4  ;;  %v6329_v44 = vshll.u32 %v15943_v50, 16  ;;  %v6338_v55 = vshll.u32 %v6160_v56, 16  ;;  %v6825_v11 = vsel %vm14572_vm10, %v6820_v40, %v6824_v59  ;;  %v14058_v38 = vld [vmem:[#allocation9 + $0x198] sm:$0xff]  }
 0x359   : > { %v13962_v57 = vld [vmem:[#allocation3 + $0xe0] ss:$36 sps:$4 sm:$0xff]   ;;  %v7312_v15 = vsel %vm14551_vm9, %v17391_v13, %v7311_v61  ;;  %v7321_v7 = vsel %vm14551_vm9, %v7313_v19, %v7320_v17  ;;  %v6328_v24 = vrot.slane %v6326_v60, 7  ;;  %v15963_v25 = vld [vmem:[#allocation2 + $0x68] sm:$0xf]  ;;  %10901 = vmatprep.mubr.bf16.mxu0 %v13964_v36  ;;  %v6337_v26 = vrot.slane %v6335_v27, 7  ;;  %13345 = vmatpush3.bf16.msra.mxu0 %v14058_v38 }
 0x35a   : > { %v15961_v12 = vld [vmem:[#allocation2 + $0x64] sm:$0xf]  ;;  %v6835_v62 = vsel %vm14572_vm10, %v6830_v51, %v17392_v33  ;;  %7140 = vst [vmem:[#allocation3 + $0x128] sm:$0xf] %v6825_v11  ;;  %7604 = vst [vmem:[#allocation3 + $0x12c] sm:$0xf] %v7312_v15  ;;  %10902 = vmatmul.mubr.bf16.gmra.mxu0 %v13962_v57 }
 0x35b   : > { %7605 = vst [vmem:[#allocation3 + $0x150] sm:$0xf] %v7321_v7  ;;  %v6837_v50 = vshrl.u32 %v6683_v49, 16  ;;  %v6840_v48 = vshll.u32 %v6683_v49, 16  ;;  %v6162_v8 = vld [vmem:[#allocation2 + $0x74] sm:$0xf]  ;;  %v6331_v10 = vor.u32 %v6329_v44, %v6328_v24  ;;  %v6340_v3 = vor.u32 %v6338_v55, %v6337_v26 }
 0x35c   : > { %7141 = vst [vmem:[#allocation3 + $0x14c] sm:$0xf] %v6835_v62  ;;  %v6846_v18 = vshll.u32 %v6684_v31, 16  ;;  %v6850_v46 = vshrl.u32 %v6684_v31, 16  ;;  %v15968_v43 = vld [vmem:[#allocation2 + $0x78] sm:$0xf] }
 0x35d   : > { %v7389_v28 = vshrl.u32 %v15951_v47, 16  ;;  %v14059_v29 = vld [vmem:[#allocation9 + $0x1d0] sm:$0xff]   ;;  %v6333_v20 = vrot.slane %v6328_v24, 4  ;;  %v6839_v53 = vrot.slane %v6837_v50, 4  ;;  %v15973_v1 = vrot.slane %v6409_v30, 11  ;;  %v17393_v56 = vld [vmem:[#allocation27_spill] sm:$0xff] }
 0x35e   : > { %v13968_v0 = vld [vmem:[#allocation3 + $0x16c] ss:$36 sps:$4 sm:$0xff]   ;;  %v6332_v41 = vsel %vm14551_vm9, %v17393_v56, %v6331_v10  ;;  %v6842_v59 = vrot.slane %v6840_v48, 5  ;;  %v6848_v6 = vrot.slane %v6846_v18, 5  ;;  %v6852_v5 = vrot.slane %v6850_v46, 4  ;;  %13346 = vmatprep.subr.bf16.mxu0 %v14059_v29  ;;  %v14062_v55 = vld [vmem:[#allocation9 + $0x238] sm:$0xff]  }
 0x35f   : > { %v13966_v52 = vld [vmem:[#allocation3 + $0x168] ss:$36 sps:$4 sm:$0xff]   ;;  %v14060_v22 = vld [vmem:[#allocation9 + $0x190] sm:$0xff]   ;;  %10756 = vmatprep.mubr.bf16.mxu1 %v13968_v0  ;;  %v6341_v2 = vsel %vm14551_vm9, %v6333_v20, %v6340_v3  ;;  %6584 = vst [vmem:[#allocation3 + $0x1b0] sm:$0xf] %v6332_v41  ;;  %v7328_v9 = vshrl.u32 %v15961_v12, 16  ;;  %13520 = vmatprep.subr.bf16.mxu1 %v14062_v55 }
 0x360   : > { %v7337_v30 = vshrl.u32 %v15963_v25, 16  ;;  %v15984_v16 = vrot.slane %v7411_v42, 11  ;;  %v14061_v60 = vld [vmem:[#allocation9 + $0x1c8] sm:$0xff]   ;;  %10757 = vmatmul.mubr.bf16.gmra.mxu1 %v13966_v52  ;;  %6585 = vst [vmem:[#allocation3 + $0x1d4] sm:$0xf] %v6341_v2  ;;  %v6843_v21 = vor.u32 %v6842_v59, %v6839_v53  ;;  %v6853_v4 = vor.u32 %v6852_v5, %v6848_v6  ;;  %13347 = vmatpush3.bf16.msra.mxu0 %v14060_v22 }
 0x361   : > { %v7331_v27 = vshll.u32 %v15961_v12, 16  ;;  %v6348_v23 = vshrl.u32 %v6162_v8, 16  ;;  %v6686_v40 = vld [vmem:[#allocation2 + $0x64] sm:$0xf]  ;;  %v6634_v61 = vld [vmem:[#allocation2 + $0xf4] sm:$0xf]  ;;  %13348 = vmatprep.subr.bf16.mxu0 %v14061_v60 }
 0x362   : > { %v7330_v19 = vrot.slane %v7328_v9, 7  ;;  %v7339_v17 = vrot.slane %v7337_v30, 7  ;;  %v7340_v49 = vshll.u32 %v15963_v25, 16  ;;  %v6357_v31 = vshrl.u32 %v15968_v43, 16  ;;  %v6635_v36 = vld [vmem:[#allocation2 + $0xf8] sm:$0xf] }
 0x363   : > { %6666 = vst [vmem:[#allocation3 + $0x43c] sm:$0xf] %v6634_v61  ;;  %v6844_v37 = vrot.slane %v6843_v21, 4  ;;  %v6854_v42 = vrot.slane %v6853_v4, 4  ;;  %v6350_v51 = vrot.slane %v6348_v23, 7  ;;  %v6351_v44 = vshll.u32 %v6162_v8, 16 }
 0x364   : > { %6667 = vst [vmem:[#allocation3 + $0x460] sm:$0xf] %v6635_v36  ;;  %v13971_v57 = vld [vmem:[#allocation3 + $0x12c] ss:$36 sps:$4 sm:$0xff]   ;;  %v7333_v11 = vor.u32 %v7331_v27, %v7330_v19  ;;  %v7335_v13 = vrot.slane %v7330_v19, 4  ;;  %v7342_v15 = vor.u32 %v7340_v49, %v7339_v17  ;;  %v17394_v25 = vld [vmem:[#allocation25_spill] sm:$0xff] }
 0x365   : > { %v6687_v7 = vld [vmem:[#allocation2 + $0x68] sm:$0xf]  ;;  %v6849_v12 = vsel %vm14572_vm10, %v6844_v37, %v6848_v6  ;;  %v6859_v33 = vsel %vm14572_vm10, %v6854_v42, %v17394_v25  ;;  %v6353_v62 = vor.u32 %v6351_v44, %v6350_v51  ;;  %v6360_v26 = vshll.u32 %v15968_v43, 16  ;;  %v15995_v50 = vld [vmem:[#allocation2 + $0x9c] sm:$0x1]  ;;  %10909 = vmatprep.mubr.bf16.mxu0 %v13971_v57  ;;  %v17395_v8 = vld [vmem:[#allocation28_spill] sm:$0xff] }
 0x366   : > { %v13969_v24 = vld [vmem:[#allocation3 + $0x128] ss:$36 sps:$4 sm:$0xff]   ;;  %7142 = vst [vmem:[#allocation3 + $0x170] sm:$0xf] %v6849_v12  ;;  %7143 = vst [vmem:[#allocation3 + $0x194] sm:$0xf] %v6859_v33  ;;  %v7334_v38 = vsel %vm14551_vm9, %v17395_v8, %v7333_v11  ;;  %v7343_v10 = vsel %vm14551_vm9, %v7335_v13, %v7342_v15 }
 0x367   : > { %v14066_v48 = vld [vmem:[#allocation9 + $0x188] sm:$0xff]   ;;  %v6359_v18 = vrot.slane %v6357_v31, 7  ;;  %v6861_v46 = vshrl.u32 %v6686_v40, 16  ;;  %v7183_v29 = vld [vmem:[#allocation2 + $0x74] sm:$0xf]  ;;  %10910 = vmatmul.mubr.bf16.gmra.mxu0 %v13969_v24  ;;  %v17396_v43 = vld [vmem:[#allocation37_spill] sm:$0xff] }
 0x368   : > { %v16002_v0 = vld [vmem:[#allocation2 + $0x84] sm:$0xf]  ;;  %7606 = vst [vmem:[#allocation3 + $0x174] sm:$0xf] %v7334_v38  ;;  %7607 = vst [vmem:[#allocation3 + $0x198] sm:$0xf] %v7343_v10  ;;  %v6354_v20 = vsel %vm14551_vm9, %v17396_v43, %v6353_v62  ;;  %13349 = vmatpush3.bf16.msra.mxu0 %v14066_v48 }
 0x369   : > { %v6864_v3 = vshll.u32 %v6686_v40, 16  ;;  %v6870_v53 = vshll.u32 %v6687_v7, 16  ;;  %v6874_v52 = vshrl.u32 %v6687_v7, 16  ;;  %v7184_v56 = vld [vmem:[#allocation2 + $0x78] sm:$0xf]  ;;  %v6355_v6 = vrot.slane %v6350_v51, 4 }
 0x36a   : > { %v6166_v41 = vld [vmem:[#allocation2 + $0x88] sm:$0xf]  ;;  %v13975_v59 = vld [vmem:[#allocation3 + $0x1b4] ss:$36 sps:$4 sm:$0xff]   ;;  %v6362_v5 = vor.u32 %v6360_v26, %v6359_v18  ;;  %6586 = vst [vmem:[#allocation3 + $0x1f8] sm:$0xf] %v6354_v20 }
 0x36b   : > { %v6863_v22 = vrot.slane %v6861_v46, 4  ;;  %v16009_v2 = vrot.slane %v7389_v28, 11  ;;  %v13973_v9 = vld [vmem:[#allocation3 + $0x1b0] ss:$36 sps:$4 sm:$0xff]   ;;  %v6866_v30 = vrot.slane %v6864_v3, 5  ;;  %v6872_v60 = vrot.slane %v6870_v53, 5  ;;  %10764 = vmatprep.mubr.bf16.mxu1 %v13975_v59 }
 0x36c   : > { %v6876_v21 = vrot.slane %v6874_v52, 4  ;;  %v7350_v4 = vshrl.u32 %v7183_v29, 16  ;;  %v6363_v27 = vsel %vm14551_vm9, %v6355_v6, %v6362_v5  ;;  %v7353_v23 = vshll.u32 %v7183_v29, 16  ;;  %v14070_v19 = vld [vmem:[#allocation9 + $0x1c0] sm:$0xff]   ;;  %10765 = vmatmul.mubr.bf16.gmra.mxu1 %v13973_v9  ;;  %v6689_v31 = vld [vmem:[#allocation2 + $0x74] sm:$0xf] }
 0x36d   : > { %v7359_v40 = vshrl.u32 %v7184_v56, 16  ;;  %v6952_v61 = vshll.u32 %v15995_v50, 16  ;;  %6587 = vst [vmem:[#allocation3 + $0x21c] sm:$0xf] %v6363_v27  ;;  %v6867_v47 = vor.u32 %v6866_v30, %v6863_v22  ;;  %v6370_v49 = vshrl.u32 %v16002_v0, 16  ;;  %13350 = vmatprep.subr.bf16.mxu0 %v14070_v19  ;;  %v14071_v7 = vld [vmem:[#allocation9 + $0x180] sm:$0xff]  }
 0x36e   : > { %v6877_v28 = vor.u32 %v6876_v21, %v6872_v60  ;;  %v7352_v17 = vrot.slane %v7350_v4, 7  ;;  %v7362_v37 = vshll.u32 %v7184_v56, 16  ;;  %v6373_v42 = vshll.u32 %v16002_v0, 16  ;;  %v6690_v44 = vld [vmem:[#allocation2 + $0x78] sm:$0xf]  ;;  %13351 = vmatpush3.bf16.msra.mxu0 %v14071_v7 }
 0x36f   : > { %v7361_v36 = vrot.slane %v7359_v40, 7  ;;  %v6379_v51 = vshrl.u32 %v6166_v41, 16  ;;  %v6868_v55 = vrot.slane %v6867_v47, 4  ;;  %v6382_v13 = vshll.u32 %v6166_v41, 16  ;;  %v7186_v15 = vld [vmem:[#allocation2 + $0x84] sm:$0xf] }
 0x370   : > { %v6878_v57 = vrot.slane %v6877_v28, 4  ;;  %v7355_v11 = vor.u32 %v7353_v23, %v7352_v17  ;;  %v7357_v24 = vrot.slane %v7352_v17, 4  ;;  %v6372_v25 = vrot.slane %v6370_v49, 7  ;;  %v13976_v62 = vld [vmem:[#allocation3 + $0x170] ss:$36 sps:$4 sm:$0xff]  }
 0x371   : > { %v7364_v12 = vor.u32 %v7362_v37, %v7361_v36  ;;  %v6381_v33 = vrot.slane %v6379_v51, 7  ;;  %v13978_v26 = vld [vmem:[#allocation3 + $0x174] ss:$36 sps:$4 sm:$0xff]   ;;  %v6873_v48 = vsel %vm14572_vm10, %v6868_v55, %v6872_v60  ;;  %v6885_v10 = vshrl.u32 %v6689_v31, 16  ;;  %v7187_v18 = vld [vmem:[#allocation2 + $0x88] sm:$0xf] }
 0x372   : > { %v6883_v8 = vsel %vm14572_vm10, %v6878_v57, %v15747_v54  ;;  %v7356_v38 = vsel %vm14551_vm9, %v15755_v45, %v7355_v11  ;;  %7144 = vst [vmem:[#allocation3 + $0x1b8] sm:$0xf] %v6873_v48  ;;  %v6375_v29 = vor.u32 %v6373_v42, %v6372_v25  ;;  %v6377_v0 = vrot.slane %v6372_v25, 4  ;;  %v7628_v20 = vld [vmem:[#allocation2 + $0x14] sm:$0xf]  ;;  %10917 = vmatprep.mubr.bf16.mxu0 %v13978_v26 }
 0x373   : > { %7145 = vst [vmem:[#allocation3 + $0x1dc] sm:$0xf] %v6883_v8  ;;  %v7365_v46 = vsel %vm14551_vm9, %v7357_v24, %v7364_v12  ;;  %7608 = vst [vmem:[#allocation3 + $0x1bc] sm:$0xf] %v7356_v38  ;;  %v6384_v43 = vor.u32 %v6382_v13, %v6381_v33  ;;  %v7629_v3 = vld [vmem:[#allocation2 + $0x18] sm:$0xf]  ;;  %10918 = vmatmul.mubr.bf16.gmra.mxu0 %v13976_v62 }
 0x374   : > { %7609 = vst [vmem:[#allocation3 + $0x1e0] sm:$0xf] %v7365_v46  ;;  %v6887_v54 = vrot.slane %v6885_v10, 4  ;;  %v6888_v53 = vshll.u32 %v6689_v31, 16  ;;  %v6894_v52 = vshll.u32 %v6690_v44, 16  ;;  %v6898_v45 = vshrl.u32 %v6690_v44, 16 }
 0x375   : > { %v6168_v56 = vld [vmem:[#allocation2 + $0x94] sm:$0xf]  ;;  %7660 = vst [vmem:[#allocation3 + $0x10] sm:$0xf] %v7628_v20  ;;  %7661 = vst [vmem:[#allocation3 + $0x34] sm:$0xf] %v7629_v3  ;;  %v6376_v59 = vsel %vm14551_vm9, %v15749_v14, %v6375_v29  ;;  %v6385_v6 = vsel %vm14551_vm9, %v6377_v0, %v6384_v43 }
 0x376   : > { %v13982_v41 = vld [vmem:[#allocation3 + $0x1fc] ss:$36 sps:$4 sm:$0xff]   ;;  %v7372_v5 = vshrl.u32 %v7186_v15, 16  ;;  %v6169_v22 = vld [vmem:[#allocation2 + $0x98] sm:$0xf]  ;;  %v6890_v30 = vrot.slane %v6888_v53, 5 }
 0x377   : > { %v13980_v9 = vld [vmem:[#allocation3 + $0x1f8] ss:$36 sps:$4 sm:$0xff]   ;;  %6588 = vst [vmem:[#allocation3 + $0x240] sm:$0xf] %v6376_v59  ;;  %6589 = vst [vmem:[#allocation3 + $0x264] sm:$0xf] %v6385_v6  ;;  %10772 = vmatprep.mubr.bf16.mxu1 %v13982_v41 }
 0x378   : > { %v6896_v60 = vrot.slane %v6894_v52, 5  ;;  %v6900_v21 = vrot.slane %v6898_v45, 4  ;;  %v7375_v4 = vshll.u32 %v7186_v15, 16  ;;  %v7374_v27 = vrot.slane %v7372_v5, 7  ;;  %v6692_v47 = vld [vmem:[#allocation2 + $0x84] sm:$0xf]  ;;  %10773 = vmatmul.mubr.bf16.gmra.mxu1 %v13980_v9 }
 0x379   : > { %v7381_v23 = vshrl.u32 %v7187_v18, 16  ;;  %v7384_v40 = vshll.u32 %v7187_v18, 16  ;;  %v6392_v19 = vshrl.u32 %v6168_v56, 16  ;;  %v6891_v14 = vor.u32 %v6890_v30, %v6887_v54  ;;  %v6693_v31 = vld [vmem:[#allocation2 + $0x88] sm:$0xf] }
 0x37a   : > { %v6901_v28 = vor.u32 %v6900_v21, %v6896_v60  ;;  %v6395_v17 = vshll.u32 %v6168_v56, 16  ;;  %v6401_v49 = vshrl.u32 %v6169_v22, 16  ;;  %v7630_v36 = vld [vmem:[#allocation2 + $0x24] sm:$0xf]  ;;  %v7631_v37 = vld [vmem:[#allocation2 + $0x28] sm:$0xf]  ;;  %v7377_v42 = vor.u32 %v7375_v4, %v7374_v27 }
 0x37b   : > { %v7379_v51 = vrot.slane %v7374_v27, 4  ;;  %v7383_v44 = vrot.slane %v7381_v23, 7  ;;  %v6394_v55 = vrot.slane %v6392_v19, 7  ;;  %v7189_v57 = vld [vmem:[#allocation2 + $0x94] sm:$0xf]  ;;  %v6892_v11 = vrot.slane %v6891_v14, 4 }
 0x37c   : > { %7662 = vst [vmem:[#allocation3 + $0x58] sm:$0xf] %v7630_v36  ;;  %7663 = vst [vmem:[#allocation3 + $0x7c] sm:$0xf] %v7631_v37  ;;  %v6902_v13 = vrot.slane %v6901_v28, 4  ;;  %v6403_v15 = vrot.slane %v6401_v49, 7  ;;  %v7378_v12 = vsel %vm14551_vm9, %v15751_v39, %v7377_v42 }
 0x37d   : > { %v6404_v7 = vshll.u32 %v6169_v22, 16  ;;  %v13985_v24 = vld [vmem:[#allocation3 + $0x1bc] ss:$36 sps:$4 sm:$0xff]   ;;  %v7386_v25 = vor.u32 %v7384_v40, %v7383_v44  ;;  %v6397_v33 = vor.u32 %v6395_v17, %v6394_v55  ;;  %v6399_v62 = vrot.slane %v6394_v55, 4  ;;  %v6171_v26 = vld [vmem:[#allocation2 + $0xa4] sm:$0xf] }
 0x37e   : > { %v13983_v48 = vld [vmem:[#allocation3 + $0x1b8] ss:$36 sps:$4 sm:$0xff]   ;;  %v6897_v8 = vsel %vm14572_vm10, %v6892_v11, %v6896_v60  ;;  %v6907_v38 = vsel %vm14572_vm10, %v6902_v13, %v15757_v35  ;;  %7610 = vst [vmem:[#allocation3 + $0x204] sm:$0xf] %v7378_v12  ;;  %v6909_v18 = vshrl.u32 %v6692_v47, 16  ;;  %10925 = vmatprep.mubr.bf16.mxu0 %v13985_v24  ;;  %v6912_v0 = vshll.u32 %v6692_v47, 16 }
 0x37f   : > { %v6406_v10 = vor.u32 %v6404_v7, %v6403_v15  ;;  %v7190_v46 = vld [vmem:[#allocation2 + $0x98] sm:$0xf]  ;;  %7146 = vst [vmem:[#allocation3 + $0x200] sm:$0xf] %v6897_v8  ;;  %7147 = vst [vmem:[#allocation3 + $0x224] sm:$0xf] %v6907_v38  ;;  %v7387_v39 = vsel %vm14551_vm9, %v7379_v51, %v7386_v25  ;;  %v6398_v29 = vsel %vm14551_vm9, %v15759_v58, %v6397_v33  ;;  %10926 = vmatmul.mubr.bf16.gmra.mxu0 %v13983_v48 }
 0x380   : > { %v6918_v43 = vshll.u32 %v6693_v31, 16  ;;  %v6172_v20 = vld [vmem:[#allocation2 + $0xa8] sm:$0xf]  ;;  %7611 = vst [vmem:[#allocation3 + $0x228] sm:$0xf] %v7387_v39  ;;  %v6911_v54 = vrot.slane %v6909_v18, 4 }
 0x381   : > { %v13989_v3 = vld [vmem:[#allocation3 + $0x244] ss:$36 sps:$4 sm:$0xff]   ;;  %v6407_v35 = vsel %vm14551_vm9, %v6399_v62, %v6406_v10  ;;  %6590 = vst [vmem:[#allocation3 + $0x288] sm:$0xf] %v6398_v29  ;;  %v6922_v53 = vshrl.u32 %v6693_v31, 16  ;;  %v7394_v52 = vshrl.u32 %v7189_v57, 16 }
 0x382   : > { %v13987_v45 = vld [vmem:[#allocation3 + $0x240] ss:$36 sps:$4 sm:$0xff]   ;;  %6591 = vst [vmem:[#allocation3 + $0x2ac] sm:$0xf] %v6407_v35  ;;  %v6914_v56 = vrot.slane %v6912_v0, 5  ;;  %v6920_v41 = vrot.slane %v6918_v43, 5  ;;  %10780 = vmatprep.mubr.bf16.mxu1 %v13989_v3 }
 0x383   : > { %v7397_v59 = vshll.u32 %v7189_v57, 16  ;;  %v7403_v6 = vshrl.u32 %v7190_v46, 16  ;;  %v6924_v58 = vrot.slane %v6922_v53, 4  ;;  %v7396_v5 = vrot.slane %v7394_v52, 7  ;;  %v6695_v30 = vld [vmem:[#allocation2 + $0x94] sm:$0xf]  ;;  %10781 = vmatmul.mubr.bf16.gmra.mxu1 %v13987_v45 }
 0x384   : > { %v7406_v22 = vshll.u32 %v7190_v46, 16  ;;  %v6414_v9 = vshrl.u32 %v6171_v26, 16  ;;  %v6915_v60 = vor.u32 %v6914_v56, %v6911_v54  ;;  %v6417_v4 = vshll.u32 %v6171_v26, 16  ;;  %v6696_v23 = vld [vmem:[#allocation2 + $0x98] sm:$0xf] }
 0x385   : > { %v7405_v21 = vrot.slane %v7403_v6, 7  ;;  %v6423_v27 = vshrl.u32 %v6172_v20, 16  ;;  %v6925_v40 = vor.u32 %v6924_v58, %v6920_v41  ;;  %v7399_v19 = vor.u32 %v7397_v59, %v7396_v5  ;;  %v8652_v28 = vld [vmem:[#allocation2 + $0x24] sm:$0xf]  ;;  %v8653_v17 = vld [vmem:[#allocation2 + $0x28] sm:$0xf] }
 0x386   : > { %v7401_v47 = vrot.slane %v7396_v5, 4  ;;  %v6416_v14 = vrot.slane %v6414_v9, 7  ;;  %v6916_v49 = vrot.slane %v6915_v60, 4  ;;  %v6426_v37 = vshll.u32 %v6172_v20, 16  ;;  %v7192_v42 = vld [vmem:[#allocation2 + $0xa4] sm:$0xf] }
 0x387   : > { %v7408_v31 = vor.u32 %v7406_v22, %v7405_v21  ;;  %v6425_v36 = vrot.slane %v6423_v27, 7  ;;  %8684 = vst [vmem:[#allocation3 + $0x1c] sm:$0xf] %v8652_v28  ;;  %8685 = vst [vmem:[#allocation3 + $0x40] sm:$0xf] %v8653_v17  ;;  %v6926_v44 = vrot.slane %v6925_v40, 4  ;;  %v7400_v55 = vsel %vm14551_vm9, %v16009_v2, %v7399_v19 }
 0x388   : > { %v7632_v51 = vld [vmem:[#allocation2 + $0x34] sm:$0xf]  ;;  %v6419_v57 = vor.u32 %v6417_v4, %v6416_v14  ;;  %v6421_v11 = vrot.slane %v6416_v14, 4  ;;  %v7193_v13 = vld [vmem:[#allocation2 + $0xa8] sm:$0xf]  ;;  %v6921_v12 = vsel %vm14572_vm10, %v6916_v49, %v6920_v41  ;;  %v6933_v62 = vshrl.u32 %v6695_v30, 16 }
 0x389   : > { %v6173_v15 = vld [vmem:[#allocation2 + $0xb0] sm:$0x8]  ;;  %v7633_v7 = vld [vmem:[#allocation2 + $0x38] sm:$0xf]  ;;  %7664 = vst [vmem:[#allocation3 + $0xa0] sm:$0xf] %v7632_v51  ;;  %v7409_v25 = vsel %vm14551_vm9, %v7401_v47, %v7408_v31  ;;  %v6428_v33 = vor.u32 %v6426_v37, %v6425_v36  ;;  %v6931_v2 = vsel %vm14572_vm10, %v6926_v44, %v15761_v63 }
 0x38a   : > { %v13992_v24 = vld [vmem:[#allocation3 + $0x204] ss:$36 sps:$4 sm:$0xff]   ;;  %7612 = vst [vmem:[#allocation3 + $0x24c] sm:$0xf] %v7400_v55  ;;  %v6174_v26 = vld [vmem:[#allocation2 + $0xb4] sm:$0xf]  ;;  %v6420_v8 = vsel %vm14551_vm9, %v15973_v1, %v6419_v57 }
 0x38b   : > { %7665 = vst [vmem:[#allocation3 + $0xc4] sm:$0xf] %v7633_v7  ;;  %v13990_v48 = vld [vmem:[#allocation3 + $0x200] ss:$36 sps:$4 sm:$0xff]   ;;  %7148 = vst [vmem:[#allocation3 + $0x248] sm:$0xf] %v6921_v12  ;;  %10933 = vmatprep.mubr.bf16.mxu0 %v13992_v24  ;;  %v6429_v39 = vsel %vm14551_vm9, %v6421_v11, %v6428_v33 }
 0x38c   : > { %7613 = vst [vmem:[#allocation3 + $0x270] sm:$0xf] %v7409_v25  ;;  %v6936_v38 = vshll.u32 %v6695_v30, 16  ;;  %v6942_v10 = vshll.u32 %v6696_v23, 16  ;;  %v6175_v18 = vld [vmem:[#allocation2 + $0xb8] sm:$0xf]  ;;  %10934 = vmatmul.mubr.bf16.gmra.mxu0 %v13990_v48 }
 0x38d   : > { %v13998_v46 = vld [vmem:[#allocation3 + $0x28c] ss:$36 sps:$4 sm:$0xff]   ;;  %7149 = vst [vmem:[#allocation3 + $0x26c] sm:$0xf] %v6931_v2  ;;  %6592 = vst [vmem:[#allocation3 + $0x2d0] sm:$0xf] %v6420_v8 }
 0x38e   : > { %v6935_v29 = vrot.slane %v6933_v62, 4  ;;  %v6946_v0 = vshrl.u32 %v6696_v23, 16  ;;  %v6954_v63 = vrot.slane %v6952_v61, 5  ;;  %v13996_v43 = vld [vmem:[#allocation3 + $0x288] ss:$36 sps:$4 sm:$0xff]   ;;  %v6938_v20 = vrot.slane %v6936_v38, 5  ;;  %10788 = vmatprep.mubr.bf16.mxu1 %v13998_v46 }
 0x38f   : > { %6593 = vst [vmem:[#allocation3 + $0x2f4] sm:$0xf] %v6429_v39  ;;  %v6944_v1 = vrot.slane %v6942_v10, 5  ;;  %v7416_v3 = vshrl.u32 %v7192_v42, 16  ;;  %v7419_v35 = vshll.u32 %v7192_v42, 16  ;;  %v7425_v53 = vshrl.u32 %v7193_v13, 16  ;;  %10789 = vmatmul.mubr.bf16.gmra.mxu1 %v13996_v43 }
 0x390   : > { %v6948_v54 = vrot.slane %v6946_v0, 4  ;;  %v7428_v52 = vshll.u32 %v7193_v13, 16  ;;  %v6431_v45 = vshrl.u32 %v6173_v15, 16  ;;  %v6939_v56 = vor.u32 %v6938_v20, %v6935_v29  ;;  %v6698_v22 = vld [vmem:[#allocation2 + $0xa4] sm:$0xf] }
 0x391   : > { %v7418_v41 = vrot.slane %v7416_v3, 7  ;;  %v6436_v59 = vshrl.u32 %v6174_v26, 16  ;;  %v6439_v6 = vshll.u32 %v6174_v26, 16  ;;  %v7427_v50 = vrot.slane %v7425_v53, 7  ;;  %v6699_v4 = vld [vmem:[#allocation2 + $0xa8] sm:$0xf] }
 0x392   : > { %v6949_v58 = vor.u32 %v6948_v54, %v6944_v1  ;;  %v12155_v61 = vrot.slane %v6431_v45, 11  ;;  %v6445_v5 = vshrl.u32 %v6175_v18, 16  ;;  %v6940_v9 = vrot.slane %v6939_v56, 4  ;;  %v6700_v27 = vld [vmem:[#allocation2 + $0xac] sm:$0x1] }
 0x393   : > { %v7421_v30 = vor.u32 %v7419_v35, %v7418_v41  ;;  %v7423_v60 = vrot.slane %v7418_v41, 4  ;;  %v6438_v21 = vrot.slane %v6436_v59, 7  ;;  %v7194_v23 = vld [vmem:[#allocation2 + $0xb0] sm:$0x8]  ;;  %v7430_v19 = vor.u32 %v7428_v52, %v7427_v50  ;;  %v7195_v28 = vld [vmem:[#allocation2 + $0xb4] sm:$0xf] }
 0x394   : > { %v6950_v40 = vrot.slane %v6949_v58, 4  ;;  %v6447_v47 = vrot.slane %v6445_v5, 7  ;;  %v6448_v14 = vshll.u32 %v6175_v18, 16  ;;  %v13999_v17 = vld [vmem:[#allocation3 + $0x248] ss:$36 sps:$4 sm:$0xff]   ;;  %v6945_v31 = vsel %vm14572_vm10, %v6940_v9, %v6944_v1 }
 0x395   : > { %v14001_v49 = vld [vmem:[#allocation3 + $0x24c] ss:$36 sps:$4 sm:$0xff]   ;;  %v7422_v36 = vsel %vm14551_vm9, %v15984_v16, %v7421_v30  ;;  %v6441_v37 = vor.u32 %v6439_v6, %v6438_v21  ;;  %v6443_v42 = vrot.slane %v6438_v21, 4  ;;  %v7196_v51 = vld [vmem:[#allocation2 + $0xb8] sm:$0xf]  ;;  %v7431_v57 = vsel %vm14551_vm9, %v7423_v60, %v7430_v19 }
 0x396   : > { %v14003_v44 = vld [vmem:[#allocation3 + $0x2d0] ss:$36 sps:$4 sm:$0xff]   ;;  %v6955_v55 = vsel %vm14572_vm10, %v6950_v40, %v6954_v63  ;;  %7150 = vst [vmem:[#allocation3 + $0x290] sm:$0xf] %v6945_v31  ;;  %7614 = vst [vmem:[#allocation3 + $0x294] sm:$0xf] %v7422_v36  ;;  %v6450_v11 = vor.u32 %v6448_v14, %v6447_v47  ;;  %10941 = vmatprep.mubr.bf16.mxu0 %v14001_v49 }
 0x397   : > { %v6957_v13 = vshrl.u32 %v6698_v22, 16  ;;  %v14005_v15 = vld [vmem:[#allocation3 + $0x2d4] ss:$36 sps:$4 sm:$0xff]   ;;  %7151 = vst [vmem:[#allocation3 + $0x2b4] sm:$0xf] %v6955_v55  ;;  %v6442_v16 = vsel %vm14551_vm9, %v12155_v61, %v6441_v37  ;;  %v6960_v7 = vshll.u32 %v6698_v22, 16  ;;  %10942 = vmatmul.mubr.bf16.gmra.mxu0 %v13999_v17 }
 0x398   : > { %7615 = vst [vmem:[#allocation3 + $0x2b8] sm:$0xf] %v7431_v57  ;;  %v6966_v24 = vshll.u32 %v6699_v4, 16  ;;  %v6970_v12 = vshrl.u32 %v6699_v4, 16  ;;  %v6176_v25 = vld [vmem:[#allocation2 + $0xc0] sm:$0x8]  ;;  %v6451_v62 = vsel %vm14551_vm9, %v6443_v42, %v6450_v11  ;;  %10796 = vmatprep.mubr.bf16.mxu1 %v14005_v15 }
 0x399   : > { %v16074_v33 = vld [vmem:[#allocation2 + $0xc4] sm:$0xf]  ;;  %6594 = vst [vmem:[#allocation3 + $0x318] sm:$0xf] %v6442_v16  ;;  %v6959_v26 = vrot.slane %v6957_v13, 4  ;;  %v6976_v48 = vshll.u32 %v6700_v27, 16  ;;  %10797 = vmatmul.mubr.bf16.gmra.mxu1 %v14003_v44 }
 0x39a   : > { %v7433_v2 = vshrl.u32 %v7194_v23, 16  ;;  %v8654_v8 = vld [vmem:[#allocation2 + $0x34] sm:$0xf]  ;;  %6595 = vst [vmem:[#allocation3 + $0x33c] sm:$0xf] %v6451_v62  ;;  %v6962_v38 = vrot.slane %v6960_v7, 5 }
 0x39b   : > { %v6968_v10 = vrot.slane %v6966_v24, 5  ;;  %v6972_v18 = vrot.slane %v6970_v12, 4  ;;  %v7438_v46 = vshrl.u32 %v7195_v28, 16  ;;  %v8655_v39 = vld [vmem:[#allocation2 + $0x38] sm:$0xf]  ;;  %v6978_v29 = vrot.slane %v6976_v48, 5 }
 0x39c   : > { %8686 = vst [vmem:[#allocation3 + $0x64] sm:$0xf] %v8654_v8  ;;  %v12170_v0 = vrot.slane %v7433_v2, 11  ;;  %v7447_v63 = vshrl.u32 %v7196_v51, 16  ;;  %8687 = vst [vmem:[#allocation3 + $0x88] sm:$0xf] %v8655_v39  ;;  %v6963_v20 = vor.u32 %v6962_v38, %v6959_v26 }
 0x39d   : > { %v7634_v43 = vld [vmem:[#allocation2 + $0x44] sm:$0xf]  ;;  %v6973_v1 = vor.u32 %v6972_v18, %v6968_v10  ;;  %v7440_v3 = vrot.slane %v7438_v46, 7  ;;  %v7441_v35 = vshll.u32 %v7195_v28, 16  ;;  %v6178_v54 = vld [vmem:[#allocation2 + $0xc8] sm:$0xf] }
 0x39e   : > { %v7635_v53 = vld [vmem:[#allocation2 + $0x48] sm:$0xf]  ;;  %7666 = vst [vmem:[#allocation3 + $0xe8] sm:$0xf] %v7634_v43  ;;  %v7449_v52 = vrot.slane %v7447_v63, 7  ;;  %v7450_v45 = vshll.u32 %v7196_v51, 16 }
 0x39f   : > { %v6453_v56 = vshrl.u32 %v6176_v25, 16  ;;  %v6458_v41 = vshrl.u32 %v16074_v33, 16  ;;  %v6701_v59 = vld [vmem:[#allocation2 + $0xb4] sm:$0xf]  ;;  %7667 = vst [vmem:[#allocation3 + $0x10c] sm:$0xf] %v7635_v53  ;;  %v7443_v50 = vor.u32 %v7441_v35, %v7440_v3 }
 0x3a0   : > { %v6964_v6 = vrot.slane %v6963_v20, 4  ;;  %v6974_v58 = vrot.slane %v6973_v1, 4  ;;  %v6702_v61 = vld [vmem:[#allocation2 + $0xb8] sm:$0xf]  ;;  %v7445_v22 = vrot.slane %v7440_v3, 4  ;;  %v7452_v9 = vor.u32 %v7450_v45, %v7449_v52 }
 0x3a1   : > { %v14008_v5 = vld [vmem:[#allocation3 + $0x294] ss:$36 sps:$4 sm:$0xff]   ;;  %v12156_v30 = vrot.slane %v6453_v56, 11  ;;  %v6461_v60 = vshll.u32 %v16074_v33, 16  ;;  %v6703_v21 = vld [vmem:[#allocation2 + $0xbc] sm:$0x1]  ;;  %v7444_v40 = vsel %vm14551_vm9, %v12170_v0, %v7443_v50 }
 0x3a2   : > { %v14006_v4 = vld [vmem:[#allocation3 + $0x290] ss:$36 sps:$4 sm:$0xff]   ;;  %v6969_v27 = vsel %vm14572_vm10, %v6964_v6, %v6968_v10  ;;  %v6979_v23 = vsel %vm14572_vm10, %v6974_v58, %v6978_v29  ;;  %v6460_v19 = vrot.slane %v6458_v41, 7  ;;  %v7197_v47 = vld [vmem:[#allocation2 + $0xc0] sm:$0x8]  ;;  %10949 = vmatprep.mubr.bf16.mxu0 %v14008_v5  ;;  %v7453_v28 = vsel %vm14551_vm9, %v7445_v22, %v7452_v9 }
 0x3a3   : > { %v14014_v14 = vld [vmem:[#allocation3 + $0x31c] ss:$36 sps:$4 sm:$0xff]   ;;  %7152 = vst [vmem:[#allocation3 + $0x2d8] sm:$0xf] %v6969_v27  ;;  %7153 = vst [vmem:[#allocation3 + $0x2fc] sm:$0xf] %v6979_v23  ;;  %10950 = vmatmul.mubr.bf16.gmra.mxu0 %v14006_v4 }
 0x3a4   : > { %7616 = vst [vmem:[#allocation3 + $0x2dc] sm:$0xf] %v7444_v40  ;;  %v6467_v17 = vshrl.u32 %v6178_v54, 16  ;;  %v7198_v49 = vld [vmem:[#allocation2 + $0xc4] sm:$0xf]  ;;  %v6463_v36 = vor.u32 %v6461_v60, %v6460_v19  ;;  %v6465_v37 = vrot.slane %v6460_v19, 4  ;;  %10804 = vmatprep.mubr.bf16.mxu1 %v14014_v14 }
 0x3a5   : > { %v14012_v31 = vld [vmem:[#allocation3 + $0x318] ss:$36 sps:$4 sm:$0xff]   ;;  %7617 = vst [vmem:[#allocation3 + $0x300] sm:$0xf] %v7453_v28  ;;  %v6470_v42 = vshll.u32 %v6178_v54, 16  ;;  %v6981_v51 = vshrl.u32 %v6701_v59, 16 }
 0x3a6   : > { %v7199_v44 = vld [vmem:[#allocation2 + $0xc8] sm:$0xf]  ;;  %v6469_v55 = vrot.slane %v6467_v17, 7  ;;  %v6984_v57 = vshll.u32 %v6701_v59, 16  ;;  %v6990_v11 = vshll.u32 %v6702_v61, 16  ;;  %v6994_v13 = vshrl.u32 %v6702_v61, 16  ;;  %10805 = vmatmul.mubr.bf16.gmra.mxu1 %v14012_v31  ;;  %v13016_v61 = vpop.f32.mrf.mxu1 }
 0x3a7   : > { %v6179_v15 = vld [vmem:[#allocation2 + $0xd0] sm:$0x8]  ;;  %v6180_v16 = vld [vmem:[#allocation2 + $0xd4] sm:$0xf]  ;;  %v8656_v7 = vld [vmem:[#allocation2 + $0x44] sm:$0xf]  ;;  %v6464_v24 = vsel %vm14551_vm9, %v12156_v30, %v6463_v36 }
 0x3a8   : > { %v6983_v12 = vrot.slane %v6981_v51, 4  ;;  %v7000_v25 = vshll.u32 %v6703_v21, 16  ;;  %v7455_v33 = vshrl.u32 %v7197_v47, 16  ;;  %v8657_v62 = vld [vmem:[#allocation2 + $0x48] sm:$0xf]  ;;  %v6472_v26 = vor.u32 %v6470_v42, %v6469_v55 }
 0x3a9   : > { %8688 = vst [vmem:[#allocation3 + $0xac] sm:$0xf] %v8656_v7  ;;  %6596 = vst [vmem:[#allocation3 + $0x360] sm:$0xf] %v6464_v24  ;;  %v6986_v48 = vrot.slane %v6984_v57, 5  ;;  %v6992_v2 = vrot.slane %v6990_v11, 5  ;;  %v13017_v57 = vpop.f32.mrf.mxu1 }
 0x3aa   : > { %v6996_v8 = vrot.slane %v6994_v13, 4  ;;  %8689 = vst [vmem:[#allocation3 + $0xd0] sm:$0xf] %v8657_v62  ;;  %v7636_v38 = vld [vmem:[#allocation2 + $0x54] sm:$0xf]  ;;  %v7002_v10 = vrot.slane %v7000_v25, 5  ;;  %v6473_v29 = vsel %vm14551_vm9, %v6465_v37, %v6472_v26  ;;  %v16102_v24 = vadd.f32 %v13017_v57, %v13016_v61 }
 0x3ab   : > { %v12171_v18 = vrot.slane %v7455_v33, 11  ;;  %v7460_v46 = vshrl.u32 %v7198_v49, 16  ;;  %v7637_v39 = vld [vmem:[#allocation2 + $0x58] sm:$0xf]  ;;  %7668 = vst [vmem:[#allocation3 + $0x130] sm:$0xf] %v7636_v38  ;;  %v6987_v0 = vor.u32 %v6986_v48, %v6983_v12 }
 0x3ac   : > { %v6997_v63 = vor.u32 %v6996_v8, %v6992_v2  ;;  %v7469_v43 = vshrl.u32 %v7199_v44, 16  ;;  %v6181_v20 = vld [vmem:[#allocation2 + $0xd8] sm:$0xf]  ;;  %7669 = vst [vmem:[#allocation3 + $0x154] sm:$0xf] %v7637_v39  ;;  %v7463_v3 = vshll.u32 %v7198_v49, 16 }
 0x3ad   : > { %6597 = vst [vmem:[#allocation3 + $0x384] sm:$0xf] %v6473_v29  ;;  %v7462_v1 = vrot.slane %v7460_v46, 7  ;;  %v6475_v35 = vshrl.u32 %v6179_v15, 16  ;;  %v6480_v54 = vshrl.u32 %v6180_v16, 16  ;;  %v6988_v45 = vrot.slane %v6987_v0, 4 }
 0x3ae   : > { %v6704_v53 = vld [vmem:[#allocation2 + $0xc4] sm:$0xf]  ;;  %v14017_v52 = vld [vmem:[#allocation3 + $0x2dc] ss:$36 sps:$4 sm:$0xff]   ;;  %v7472_v56 = vshll.u32 %v7199_v44, 16  ;;  %v6998_v59 = vrot.slane %v6997_v63, 4 }
 0x3af   : > { %v14015_v41 = vld [vmem:[#allocation3 + $0x2d8] ss:$36 sps:$4 sm:$0xff]   ;;  %v7465_v6 = vor.u32 %v7463_v3, %v7462_v1  ;;  %v7467_v58 = vrot.slane %v7462_v1, 4  ;;  %v7471_v50 = vrot.slane %v7469_v43, 7  ;;  %10957 = vmatprep.mubr.bf16.mxu0 %v14017_v52  ;;  %v6993_v5 = vsel %vm14572_vm10, %v6988_v45, %v6992_v2  ;;  %v6705_v60 = vld [vmem:[#allocation2 + $0xc8] sm:$0xf] }
 0x3b0   : > { %v12157_v22 = vrot.slane %v6475_v35, 11  ;;  %v6482_v9 = vrot.slane %v6480_v54, 7  ;;  %v6483_v30 = vshll.u32 %v6180_v16, 16  ;;  %10958 = vmatmul.mubr.bf16.gmra.mxu0 %v14015_v41  ;;  %v7003_v21 = vsel %vm14572_vm10, %v6998_v59, %v7002_v10  ;;  %7154 = vst [vmem:[#allocation3 + $0x320] sm:$0xf] %v6993_v5 }
 0x3b1   : > { %v7466_v4 = vsel %vm14551_vm9, %v12171_v18, %v7465_v6  ;;  %v7474_v27 = vor.u32 %v7472_v56, %v7471_v50  ;;  %v6489_v23 = vshrl.u32 %v6181_v20, 16  ;;  %v6706_v40 = vld [vmem:[#allocation2 + $0xcc] sm:$0x1]  ;;  %v7200_v19 = vld [vmem:[#allocation2 + $0xd0] sm:$0x8]  ;;  %v6492_v17 = vshll.u32 %v6181_v20, 16 }
 0x3b2   : > { %v7201_v47 = vld [vmem:[#allocation2 + $0xd4] sm:$0xf]  ;;  %7155 = vst [vmem:[#allocation3 + $0x344] sm:$0xf] %v7003_v21  ;;  %7618 = vst [vmem:[#allocation3 + $0x324] sm:$0xf] %v7466_v4  ;;  %v6485_v14 = vor.u32 %v6483_v30, %v6482_v9 }
 0x3b3   : > { %v6487_v28 = vrot.slane %v6482_v9, 4  ;;  %v7005_v49 = vshrl.u32 %v6704_v53, 16  ;;  %v7202_v31 = vld [vmem:[#allocation2 + $0xd8] sm:$0xf]  ;;  %v8658_v36 = vld [vmem:[#allocation2 + $0x54] sm:$0xf]  ;;  %v7475_v37 = vsel %vm14551_vm9, %v7467_v58, %v7474_v27 }
 0x3b4   : > { %v6491_v42 = vrot.slane %v6489_v23, 7  ;;  %v7008_v51 = vshll.u32 %v6704_v53, 16  ;;  %v7014_v44 = vshll.u32 %v6705_v60, 16  ;;  %v8659_v55 = vld [vmem:[#allocation2 + $0x58] sm:$0xf]  ;;  %v6486_v15 = vsel %vm14551_vm9, %v12157_v22, %v6485_v14 }
 0x3b5   : > { %8690 = vst [vmem:[#allocation3 + $0xf4] sm:$0xf] %v8658_v36  ;;  %v14019_v11 = vld [vmem:[#allocation3 + $0x360] ss:$36 sps:$4 sm:$0xff]   ;;  %7619 = vst [vmem:[#allocation3 + $0x348] sm:$0xf] %v7475_v37 }
 0x3b6   : > { %v14021_v13 = vld [vmem:[#allocation3 + $0x364] ss:$36 sps:$4 sm:$0xff]   ;;  %v7007_v16 = vrot.slane %v7005_v49, 4  ;;  %v6182_v7 = vld [vmem:[#allocation2 + $0xe0] sm:$0x8]  ;;  %v6494_v12 = vor.u32 %v6492_v17, %v6491_v42  ;;  %v7010_v25 = vrot.slane %v7008_v51, 5 }
 0x3b7   : > { %8691 = vst [vmem:[#allocation3 + $0x118] sm:$0xf] %v8659_v55  ;;  %6598 = vst [vmem:[#allocation3 + $0x3a8] sm:$0xf] %v6486_v15  ;;  %v7016_v33 = vrot.slane %v7014_v44, 5  ;;  %v7018_v62 = vshrl.u32 %v6705_v60, 16  ;;  %10812 = vmatprep.mubr.bf16.mxu1 %v14021_v13 }
 0x3b8   : > { %v7638_v26 = vld [vmem:[#allocation2 + $0x64] sm:$0xf]  ;;  %v7024_v48 = vshll.u32 %v6706_v40, 16  ;;  %v7477_v2 = vshrl.u32 %v7200_v19, 16  ;;  %v7482_v8 = vshrl.u32 %v7201_v47, 16  ;;  %v7485_v38 = vshll.u32 %v7201_v47, 16  ;;  %10813 = vmatmul.mubr.bf16.gmra.mxu1 %v14019_v11 }
 0x3b9   : > { %v7639_v10 = vld [vmem:[#allocation2 + $0x68] sm:$0xf]  ;;  %7670 = vst [vmem:[#allocation3 + $0x178] sm:$0xf] %v7638_v26  ;;  %v6495_v18 = vsel %vm14551_vm9, %v6487_v28, %v6494_v12  ;;  %v7011_v46 = vor.u32 %v7010_v25, %v7007_v16  ;;  %v7020_v39 = vrot.slane %v7018_v62, 4  ;;  %v7491_v29 = vshrl.u32 %v7202_v31, 16 }
 0x3ba   : > { %v6183_v0 = vld [vmem:[#allocation2 + $0xe4] sm:$0xf]  ;;  %7671 = vst [vmem:[#allocation3 + $0x19c] sm:$0xf] %v7639_v10  ;;  %6599 = vst [vmem:[#allocation3 + $0x3cc] sm:$0xf] %v6495_v18 }
 0x3bb   : > { %v7026_v63 = vrot.slane %v7024_v48, 5  ;;  %v12172_v43 = vrot.slane %v7477_v2, 11  ;;  %v7484_v20 = vrot.slane %v7482_v8, 7  ;;  %v7494_v1 = vshll.u32 %v7202_v31, 16  ;;  %v6184_v53 = vld [vmem:[#allocation2 + $0xe8] sm:$0xf] }
 0x3bc   : > { %v7012_v3 = vrot.slane %v7011_v46, 4  ;;  %v7021_v35 = vor.u32 %v7020_v39, %v7016_v33  ;;  %v7493_v54 = vrot.slane %v7491_v29, 7  ;;  %v6497_v52 = vshrl.u32 %v6182_v7, 16  ;;  %v6707_v59 = vld [vmem:[#allocation2 + $0xd4] sm:$0xf] }
 0x3bd   : > { %v7487_v45 = vor.u32 %v7485_v38, %v7484_v20  ;;  %v7489_v56 = vrot.slane %v7484_v20, 4  ;;  %v6502_v41 = vshrl.u32 %v6183_v0, 16  ;;  %v14024_v6 = vld [vmem:[#allocation3 + $0x324] ss:$36 sps:$4 sm:$0xff]   ;;  %v6505_v5 = vshll.u32 %v6183_v0, 16 }
 0x3be   : > { %v7017_v58 = vsel %vm14572_vm10, %v7012_v3, %v7016_v33  ;;  %v7022_v50 = vrot.slane %v7021_v35, 4  ;;  %v7496_v61 = vor.u32 %v7494_v1, %v7493_v54  ;;  %v6708_v22 = vld [vmem:[#allocation2 + $0xd8] sm:$0xf]  ;;  %v14022_v9 = vld [vmem:[#allocation3 + $0x320] ss:$36 sps:$4 sm:$0xff]   ;;  %v12158_v60 = vrot.slane %v6497_v52, 11  ;;  %10965 = vmatprep.mubr.bf16.mxu0 %v14024_v6 }
 0x3bf   : > { %7156 = vst [vmem:[#allocation3 + $0x368] sm:$0xf] %v7017_v58  ;;  %v7488_v30 = vsel %vm14551_vm9, %v12172_v43, %v7487_v45  ;;  %v6504_v21 = vrot.slane %v6502_v41, 7  ;;  %v6511_v4 = vshrl.u32 %v6184_v53, 16  ;;  %v6709_v27 = vld [vmem:[#allocation2 + $0xdc] sm:$0x1]  ;;  %10966 = vmatmul.mubr.bf16.gmra.mxu0 %v14022_v9 }
 0x3c0   : > { %v7203_v23 = vld [vmem:[#allocation2 + $0xe0] sm:$0x8]  ;;  %v7204_v40 = vld [vmem:[#allocation2 + $0xe4] sm:$0xf]  ;;  %v7027_v19 = vsel %vm14572_vm10, %v7022_v50, %v7026_v63  ;;  %v7497_v47 = vsel %vm14551_vm9, %v7489_v56, %v7496_v61  ;;  %7620 = vst [vmem:[#allocation3 + $0x36c] sm:$0xf] %v7488_v30 }
 0x3c1   : > { %v7029_v14 = vshrl.u32 %v6707_v59, 16  ;;  %v8660_v28 = vld [vmem:[#allocation2 + $0x64] sm:$0xf]  ;;  %v8661_v17 = vld [vmem:[#allocation2 + $0x68] sm:$0xf]  ;;  %v6507_v49 = vor.u32 %v6505_v5, %v6504_v21  ;;  %v6513_v31 = vrot.slane %v6511_v4, 7 }
 0x3c2   : > { %7157 = vst [vmem:[#allocation3 + $0x38c] sm:$0xf] %v7027_v19  ;;  %7621 = vst [vmem:[#allocation3 + $0x390] sm:$0xf] %v7497_v47  ;;  %v6514_v36 = vshll.u32 %v6184_v53, 16  ;;  %v7032_v37 = vshll.u32 %v6707_v59, 16 }
 0x3c3   : > { %8692 = vst [vmem:[#allocation3 + $0x13c] sm:$0xf] %v8660_v28  ;;  %8693 = vst [vmem:[#allocation3 + $0x160] sm:$0xf] %v8661_v17  ;;  %v7640_v42 = vld [vmem:[#allocation2 + $0x74] sm:$0xf]  ;;  %v6508_v13 = vsel %vm14551_vm9, %v12158_v60, %v6507_v49 }
 0x3c4   : > { %v14030_v51 = vld [vmem:[#allocation3 + $0x3ac] ss:$36 sps:$4 sm:$0xff]   ;;  %v6509_v44 = vrot.slane %v6504_v21, 4  ;;  %v7031_v55 = vrot.slane %v7029_v14, 4  ;;  %v7205_v57 = vld [vmem:[#allocation2 + $0xe8] sm:$0xf]  ;;  %v6516_v15 = vor.u32 %v6514_v36, %v6513_v31 }
 0x3c5   : > { %7672 = vst [vmem:[#allocation3 + $0x1c0] sm:$0xf] %v7640_v42  ;;  %v14028_v11 = vld [vmem:[#allocation3 + $0x3a8] ss:$36 sps:$4 sm:$0xff]   ;;  %v7034_v16 = vrot.slane %v7032_v37, 5  ;;  %v7038_v7 = vshll.u32 %v6708_v22, 16  ;;  %10820 = vmatprep.mubr.bf16.mxu1 %v14030_v51 }
 0x3c6   : > { %v7641_v12 = vld [vmem:[#allocation2 + $0x78] sm:$0xf]  ;;  %6600 = vst [vmem:[#allocation3 + $0x3f0] sm:$0xf] %v6508_v13  ;;  %v7042_v25 = vshrl.u32 %v6708_v22, 16  ;;  %v7048_v33 = vshll.u32 %v6709_v27, 16  ;;  %10821 = vmatmul.mubr.bf16.gmra.mxu1 %v14028_v11  ;;  %v6517_v2 = vsel %vm14551_vm9, %v6509_v44, %v6516_v15 }
 0x3c7   : > { %v7499_v62 = vshrl.u32 %v7203_v23, 16  ;;  %v7504_v26 = vshrl.u32 %v7204_v40, 16  ;;  %v6185_v48 = vld [vmem:[#allocation2 + $0xf0] sm:$0x8]  ;;  %7673 = vst [vmem:[#allocation3 + $0x1e4] sm:$0xf] %v7641_v12  ;;  %v7035_v8 = vor.u32 %v7034_v16, %v7031_v55 }
 0x3c8   : > { %v7040_v38 = vrot.slane %v7038_v7, 5  ;;  %v6186_v10 = vld [vmem:[#allocation2 + $0xf4] sm:$0xf]  ;;  %v6187_v18 = vld [vmem:[#allocation2 + $0xf8] sm:$0xf]  ;;  %v7044_v46 = vrot.slane %v7042_v25, 4 }
 0x3c9   : > { %6601 = vst [vmem:[#allocation3 + $0x414] sm:$0xf] %v6517_v2  ;;  %v12173_v39 = vrot.slane %v7499_v62, 11  ;;  %v7506_v29 = vrot.slane %v7504_v26, 7  ;;  %v7507_v0 = vshll.u32 %v7204_v40, 16  ;;  %v7036_v43 = vrot.slane %v7035_v8, 4 }
 0x3ca   : > { %v6710_v63 = vld [vmem:[#allocation2 + $0xe4] sm:$0xf]  ;;  %v7050_v20 = vrot.slane %v7048_v33, 5  ;;  %v7513_v1 = vshrl.u32 %v7205_v57, 16  ;;  %v6519_v3 = vshrl.u32 %v6185_v48, 16  ;;  %v7045_v53 = vor.u32 %v7044_v46, %v7040_v38 }
 0x3cb   : > { %v16118_v35 = vld [vmem:[#allocation2 + $0xe8] sm:$0xf]  ;;  %v14033_v54 = vld [vmem:[#allocation3 + $0x36c] ss:$36 sps:$4 sm:$0xff]   ;;  %v7509_v52 = vor.u32 %v7507_v0, %v7506_v29  ;;  %v7511_v45 = vrot.slane %v7506_v29, 4  ;;  %v7516_v56 = vshll.u32 %v7205_v57, 16  ;;  %v7041_v59 = vsel %vm14572_vm10, %v7036_v43, %v7040_v38 }
 0x3cc   : > { %v14031_v41 = vld [vmem:[#allocation3 + $0x368] ss:$36 sps:$4 sm:$0xff]   ;;  %v7515_v6 = vrot.slane %v7513_v1, 7  ;;  %v12159_v58 = vrot.slane %v6519_v3, 11  ;;  %v6524_v50 = vshrl.u32 %v6186_v10, 16  ;;  %10973 = vmatprep.mubr.bf16.mxu0 %v14033_v54  ;;  %v7046_v61 = vrot.slane %v7045_v53, 4 }
 0x3cd   : > { %7158 = vst [vmem:[#allocation3 + $0x3b0] sm:$0xf] %v7041_v59  ;;  %v7510_v5 = vsel %vm14551_vm9, %v12173_v39, %v7509_v52  ;;  %v6527_v22 = vshll.u32 %v6186_v10, 16  ;;  %v6533_v9 = vshrl.u32 %v6187_v18, 16  ;;  %v6712_v30 = vld [vmem:[#allocation2 + $0xec] sm:$0x1]  ;;  %10974 = vmatmul.mubr.bf16.gmra.mxu0 %v14031_v41 }
 0x3ce   : > { %v7206_v60 = vld [vmem:[#allocation2 + $0xf0] sm:$0x8]  ;;  %v8662_v21 = vld [vmem:[#allocation2 + $0x74] sm:$0xf]  ;;  %v7518_v4 = vor.u32 %v7516_v56, %v7515_v6  ;;  %7622 = vst [vmem:[#allocation3 + $0x3b4] sm:$0xf] %v7510_v5  ;;  %v7051_v14 = vsel %vm14572_vm10, %v7046_v61, %v7050_v20 }
 0x3cf   : > { %v6526_v27 = vrot.slane %v6524_v50, 7  ;;  %v6536_v23 = vshll.u32 %v6187_v18, 16  ;;  %v7053_v40 = vshrl.u32 %v6710_v63, 16  ;;  %v7207_v19 = vld [vmem:[#allocation2 + $0xf4] sm:$0xf]  ;;  %v6535_v28 = vrot.slane %v6533_v9, 7 }
 0x3d0   : > { %v8663_v47 = vld [vmem:[#allocation2 + $0x78] sm:$0xf]  ;;  %8694 = vst [vmem:[#allocation3 + $0x184] sm:$0xf] %v8662_v21  ;;  %v7056_v17 = vshll.u32 %v6710_v63, 16  ;;  %v7062_v49 = vshll.u32 %v16118_v35, 16  ;;  %v7519_v51 = vsel %vm14551_vm9, %v7511_v45, %v7518_v4 }
 0x3d1   : > { %v7208_v31 = vld [vmem:[#allocation2 + $0xf8] sm:$0xf]  ;;  %8695 = vst [vmem:[#allocation3 + $0x1a8] sm:$0xf] %v8663_v47  ;;  %v7642_v36 = vld [vmem:[#allocation2 + $0x84] sm:$0xf]  ;;  %v6529_v44 = vor.u32 %v6527_v22, %v6526_v27  ;;  %v6538_v57 = vor.u32 %v6536_v23, %v6535_v28 }
 0x3d2   : > { %v14035_v37 = vld [vmem:[#allocation3 + $0x3f0] ss:$36 sps:$4 sm:$0xff]   ;;  %7159 = vst [vmem:[#allocation3 + $0x3d4] sm:$0xf] %v7051_v14  ;;  %v6531_v55 = vrot.slane %v6526_v27, 4  ;;  %v7055_v11 = vrot.slane %v7053_v40, 4 }
 0x3d3   : > { %v14037_v42 = vld [vmem:[#allocation3 + $0x3f4] ss:$36 sps:$4 sm:$0xff]   ;;  %7674 = vst [vmem:[#allocation3 + $0x208] sm:$0xf] %v7642_v36  ;;  %7623 = vst [vmem:[#allocation3 + $0x3d8] sm:$0xf] %v7519_v51  ;;  %v6530_v7 = vsel %vm14551_vm9, %v12159_v58, %v6529_v44 }
 0x3d4   : > { %v7058_v13 = vrot.slane %v7056_v17, 5  ;;  %v7064_v15 = vrot.slane %v7062_v49, 5  ;;  %v7643_v16 = vld [vmem:[#allocation2 + $0x88] sm:$0xf]  ;;  %10828 = vmatprep.mubr.bf16.mxu1 %v14037_v42  ;;  %v7066_v12 = vshrl.u32 %v16118_v35, 16  ;;  %v7072_v25 = vshll.u32 %v6712_v30, 16 }
 0x3d5   : > { %v7521_v33 = vshrl.u32 %v7206_v60, 16  ;;  %v6713_v62 = vld [vmem:[#allocation2 + $0xf4] sm:$0xf]  ;;  %7675 = vst [vmem:[#allocation3 + $0x22c] sm:$0xf] %v7643_v16  ;;  %10829 = vmatmul.mubr.bf16.gmra.mxu1 %v14035_v37  ;;  %v6539_v26 = vsel %vm14551_vm9, %v6531_v55, %v6538_v57  ;;  %v7526_v2 = vshrl.u32 %v7207_v19, 16 }
 0x3d6   : > { %6602 = vst [vmem:[#allocation3 + $0x438] sm:$0xf] %v6530_v7  ;;  %v7059_v48 = vor.u32 %v7058_v13, %v7055_v11  ;;  %v7529_v8 = vshll.u32 %v7207_v19, 16  ;;  %v6714_v38 = vld [vmem:[#allocation2 + $0xf8] sm:$0xf]  ;;  %v7068_v10 = vrot.slane %v7066_v12, 4 }
 0x3d7   : > { %6603 = vst [vmem:[#allocation3 + $0x45c] sm:$0xf] %v6539_v26  ;;  %v7074_v18 = vrot.slane %v7072_v25, 5  ;;  %v12174_v46 = vrot.slane %v7521_v33, 11  ;;  %v7535_v39 = vshrl.u32 %v7208_v31, 16  ;;  %v7528_v0 = vrot.slane %v7526_v2, 7 }
 0x3d8   : > { %v7060_v29 = vrot.slane %v7059_v48, 4  ;;  %v7538_v63 = vshll.u32 %v7208_v31, 16  ;;  %v6715_v43 = vld [vmem:[#allocation2 + $0xfc] sm:$0x1]  ;;  %v7077_v20 = vshrl.u32 %v6713_v62, 16  ;;  %v7069_v1 = vor.u32 %v7068_v10, %v7064_v15 }
 0x3d9   : > { %v7537_v3 = vrot.slane %v7535_v39, 7  ;;  %v7080_v35 = vshll.u32 %v6713_v62, 16  ;;  %v7086_v54 = vshll.u32 %v6714_v38, 16  ;;  %v7209_v53 = vld [vmem:[#allocation2 + $0x100] sm:$0x8]  ;;  %v7531_v45 = vor.u32 %v7529_v8, %v7528_v0 }
 0x3da   : > { %v7065_v52 = vsel %vm14572_vm10, %v7060_v29, %v7064_v15  ;;  %v7533_v56 = vrot.slane %v7528_v0, 4  ;;  %v7079_v41 = vrot.slane %v7077_v20, 4  ;;  %v7210_v59 = vld [vmem:[#allocation2 + $0x104] sm:$0xf]  ;;  %v14038_v58 = vld [vmem:[#allocation3 + $0x3b0] ss:$36 sps:$4 sm:$0xff]  }
 0x3db   : > { %v8664_v6 = vld [vmem:[#allocation2 + $0x84] sm:$0xf]  ;;  %v14040_v50 = vld [vmem:[#allocation3 + $0x3b4] ss:$36 sps:$4 sm:$0xff]   ;;  %v7070_v61 = vrot.slane %v7069_v1, 4  ;;  %v7540_v5 = vor.u32 %v7538_v63, %v7537_v3  ;;  %v7532_v9 = vsel %vm14551_vm9, %v12174_v46, %v7531_v45  ;;  %v7082_v30 = vrot.slane %v7080_v35, 5 }
 0x3dc   : > { %7160 = vst [vmem:[#allocation3 + $0x3f8] sm:$0xf] %v7065_v52  ;;  %v7211_v22 = vld [vmem:[#allocation2 + $0x108] sm:$0xf]  ;;  %8696 = vst [vmem:[#allocation3 + $0x1cc] sm:$0xf] %v8664_v6  ;;  %10981 = vmatprep.mubr.bf16.mxu0 %v14040_v50 }
 0x3dd   : > { %v7088_v60 = vrot.slane %v7086_v54, 5  ;;  %v7090_v21 = vshrl.u32 %v6714_v38, 16  ;;  %v7692_v4 = vld [vmem:[#allocation2 + $0x14] sm:$0xf]  ;;  %v7693_v27 = vld [vmem:[#allocation2 + $0x18] sm:$0xf]  ;;  %v7075_v40 = vsel %vm14572_vm10, %v7070_v61, %v7074_v18  ;;  %v7541_v19 = vsel %vm14551_vm9, %v7533_v56, %v7540_v5  ;;  %10982 = vmatmul.mubr.bf16.gmra.mxu0 %v14038_v58 }
 0x3de   : > { %v8665_v23 = vld [vmem:[#allocation2 + $0x88] sm:$0xf]  ;;  %7624 = vst [vmem:[#allocation3 + $0x3fc] sm:$0xf] %v7532_v9  ;;  %v7096_v47 = vshll.u32 %v6715_v43, 16  ;;  %v7543_v14 = vshrl.u32 %v7209_v53, 16  ;;  %v7083_v31 = vor.u32 %v7082_v30, %v7079_v41 }
 0x3df   : > { %8697 = vst [vmem:[#allocation3 + $0x1f0] sm:$0xf] %v8665_v23  ;;  %v7644_v28 = vld [vmem:[#allocation2 + $0x94] sm:$0xf]  ;;  %v14044_v17 = vld [vmem:[#allocation3 + $0x438] ss:$36 sps:$4 sm:$0xff]  }
 0x3e0   : > { %v14046_v49 = vld [vmem:[#allocation3 + $0x43c] ss:$36 sps:$4 sm:$0xff]   ;;  %7161 = vst [vmem:[#allocation3 + $0x41c] sm:$0xf] %v7075_v40  ;;  %7625 = vst [vmem:[#allocation3 + $0x420] sm:$0xf] %v7541_v19 }
 0x3e1   : > { %v7092_v36 = vrot.slane %v7090_v21, 4  ;;  %7676 = vst [vmem:[#allocation3 + $0x250] sm:$0xf] %v7644_v28  ;;  %v7098_v37 = vrot.slane %v7096_v47, 5  ;;  %v12175_v42 = vrot.slane %v7543_v14, 11  ;;  %v7548_v51 = vshrl.u32 %v7210_v59, 16  ;;  %10836 = vmatprep.mubr.bf16.mxu1 %v14046_v49 }
 0x3e2   : > { %v7551_v44 = vshll.u32 %v7210_v59, 16  ;;  %v7645_v55 = vld [vmem:[#allocation2 + $0x98] sm:$0xf]  ;;  %v7084_v57 = vrot.slane %v7083_v31, 4  ;;  %v7557_v13 = vshrl.u32 %v7211_v22, 16  ;;  %v7560_v15 = vshll.u32 %v7211_v22, 16  ;;  %10837 = vmatmul.mubr.bf16.gmra.mxu1 %v14044_v17 }
 0x3e3   : > { %v7093_v11 = vor.u32 %v7092_v36, %v7088_v60  ;;  %v7694_v16 = vld [vmem:[#allocation2 + $0x1c] sm:$0x1]  ;;  %7677 = vst [vmem:[#allocation3 + $0x274] sm:$0xf] %v7645_v55  ;;  %v7550_v7 = vrot.slane %v7548_v51, 7  ;;  %v7741_v12 = vshrl.u32 %v7692_v4, 16 }
 0x3e4   : > { %v7744_v25 = vshll.u32 %v7692_v4, 16  ;;  %v7750_v33 = vshll.u32 %v7693_v27, 16  ;;  %v7695_v62 = vld [vmem:[#allocation2 + $0x24] sm:$0xf]  ;;  %v7089_v26 = vsel %vm14572_vm10, %v7084_v57, %v7088_v60  ;;  %v7559_v2 = vrot.slane %v7557_v13, 7 }
 0x3e5   : > { %v7094_v48 = vrot.slane %v7093_v11, 4  ;;  %v7754_v8 = vshrl.u32 %v7693_v27, 16  ;;  %v7696_v38 = vld [vmem:[#allocation2 + $0x28] sm:$0xf]  ;;  %7162 = vst [vmem:[#allocation3 + $0x440] sm:$0xf] %v7089_v26  ;;  %v7553_v10 = vor.u32 %v7551_v44, %v7550_v7 }
 0x3e6   : > { %v7555_v18 = vrot.slane %v7550_v7, 4  ;;  %v7743_v46 = vrot.slane %v7741_v12, 4  ;;  %v7746_v39 = vrot.slane %v7744_v25, 5  ;;  %v7697_v29 = vld [vmem:[#allocation2 + $0x2c] sm:$0x1]  ;;  %v7562_v63 = vor.u32 %v7560_v15, %v7559_v2 }
 0x3e7   : > { %v7099_v0 = vsel %vm14572_vm10, %v7094_v48, %v7098_v37  ;;  %v7752_v43 = vrot.slane %v7750_v33, 5  ;;  %v7756_v20 = vrot.slane %v7754_v8, 4  ;;  %v8188_v1 = vld [vmem:[#allocation2 + $0x20] sm:$0x8]  ;;  %v7554_v35 = vsel %vm14551_vm9, %v12175_v42, %v7553_v10  ;;  %v8189_v52 = vld [vmem:[#allocation2 + $0x24] sm:$0xf] }
 0x3e8   : > { %v14049_v3 = vld [vmem:[#allocation3 + $0x3fc] ss:$36 sps:$4 sm:$0xff]   ;;  %7163 = vst [vmem:[#allocation3 + $0x464] sm:$0xf] %v7099_v0  ;;  %v7747_v54 = vor.u32 %v7746_v39, %v7743_v46  ;;  %v7760_v53 = vshll.u32 %v7694_v16, 16  ;;  %v7563_v56 = vsel %vm14551_vm9, %v7555_v18, %v7562_v63  ;;  %v7765_v59 = vshrl.u32 %v7695_v62, 16 }
 0x3e9   : > { %v14047_v45 = vld [vmem:[#allocation3 + $0x3f8] ss:$36 sps:$4 sm:$0xff]   ;;  %7626 = vst [vmem:[#allocation3 + $0x444] sm:$0xf] %v7554_v35  ;;  %v7757_v41 = vor.u32 %v7756_v20, %v7752_v43  ;;  %v7768_v6 = vshll.u32 %v7695_v62, 16  ;;  %10989 = vmatprep.mubr.bf16.mxu0 %v14049_v3  ;;  %v7774_v22 = vshll.u32 %v7696_v38, 16 }
 0x3ea   : > { %v8190_v58 = vld [vmem:[#allocation2 + $0x28] sm:$0xf]  ;;  %v8666_v50 = vld [vmem:[#allocation2 + $0x94] sm:$0xf]  ;;  %7627 = vst [vmem:[#allocation3 + $0x468] sm:$0xf] %v7563_v56  ;;  %10990 = vmatmul.mubr.bf16.gmra.mxu0 %v14047_v45 }
 0x3eb   : > { %v7748_v61 = vrot.slane %v7747_v54, 4  ;;  %v7762_v5 = vrot.slane %v7760_v53, 5  ;;  %v7778_v9 = vshrl.u32 %v7696_v38, 16  ;;  %v7698_v30 = vld [vmem:[#allocation2 + $0x34] sm:$0xf]  ;;  %v7758_v21 = vrot.slane %v7757_v41, 4 }
 0x3ec   : > { %v8667_v60 = vld [vmem:[#allocation2 + $0x98] sm:$0xf]  ;;  %8698 = vst [vmem:[#allocation3 + $0x214] sm:$0xf] %v8666_v50  ;;  %v7767_v4 = vrot.slane %v7765_v59, 4  ;;  %v7770_v27 = vrot.slane %v7768_v6, 5 }
 0x3ed   : > { %v7784_v23 = vshll.u32 %v7697_v29, 16  ;;  %8699 = vst [vmem:[#allocation3 + $0x238] sm:$0xf] %v8667_v60  ;;  %v7646_v40 = vld [vmem:[#allocation2 + $0xa4] sm:$0xf]  ;;  %v7753_v19 = vsel %vm14572_vm10, %v7748_v61, %v7752_v43  ;;  %v7776_v47 = vrot.slane %v7774_v22, 5  ;;  %v7763_v49 = vsel %vm14572_vm10, %v7758_v21, %v7762_v5 }
 0x3ee   : > { %v7780_v14 = vrot.slane %v7778_v9, 4  ;;  %v8237_v28 = vshrl.u32 %v8188_v1, 16  ;;  %v7647_v17 = vld [vmem:[#allocation2 + $0xa8] sm:$0xf]  ;;  %7678 = vst [vmem:[#allocation3 + $0x298] sm:$0xf] %v7646_v40  ;;  %v7771_v31 = vor.u32 %v7770_v27, %v7767_v4 }
 0x3ef   : > { %8156 = vst [vmem:[#allocation3 + $0x14] sm:$0xf] %v7753_v19  ;;  %v7786_v36 = vrot.slane %v7784_v23, 5  ;;  %v8242_v37 = vshrl.u32 %v8189_v52, 16  ;;  %v7699_v42 = vld [vmem:[#allocation2 + $0x38] sm:$0xf] }
 0x3f0   : > { %7679 = vst [vmem:[#allocation3 + $0x2bc] sm:$0xf] %v7647_v17  ;;  %8157 = vst [vmem:[#allocation3 + $0x38] sm:$0xf] %v7763_v49  ;;  %v7781_v51 = vor.u32 %v7780_v14, %v7776_v47  ;;  %v12176_v44 = vrot.slane %v8237_v28, 11  ;;  %v8245_v55 = vshll.u32 %v8189_v52, 16 }
 0x3f1   : > { %v8251_v57 = vshrl.u32 %v8190_v58, 16  ;;  %v7700_v11 = vld [vmem:[#allocation2 + $0x3c] sm:$0x1]  ;;  %v7772_v13 = vrot.slane %v7771_v31, 4  ;;  %v8244_v15 = vrot.slane %v8242_v37, 7  ;;  %v8254_v16 = vshll.u32 %v8190_v58, 16 }
 0x3f2   : > { %v7789_v7 = vshrl.u32 %v7698_v30, 16  ;;  %v8191_v12 = vld [vmem:[#allocation2 + $0x30] sm:$0x8]  ;;  %v7782_v25 = vrot.slane %v7781_v51, 4  ;;  %v7792_v62 = vshll.u32 %v7698_v30, 16  ;;  %v7798_v26 = vshll.u32 %v7699_v42, 16 }
 0x3f3   : > { %v8253_v33 = vrot.slane %v8251_v57, 7  ;;  %v14054_v48 = vld [vmem:[#allocation3 + $0x444] ss:$36 sps:$4 sm:$0xff]   ;;  %v7777_v2 = vsel %vm14572_vm10, %v7772_v13, %v7776_v47  ;;  %v8247_v8 = vor.u32 %v8245_v55, %v8244_v15  ;;  %v8249_v38 = vrot.slane %v8244_v15, 4  ;;  %v8192_v10 = vld [vmem:[#allocation2 + $0x34] sm:$0xf] }
 0x3f4   : > { %v14052_v18 = vld [vmem:[#allocation3 + $0x440] ss:$36 sps:$4 sm:$0xff]   ;;  %v7787_v46 = vsel %vm14572_vm10, %v7782_v25, %v7786_v36  ;;  %8158 = vst [vmem:[#allocation3 + $0x5c] sm:$0xf] %v7777_v2  ;;  %v7791_v29 = vrot.slane %v7789_v7, 4  ;;  %v7794_v0 = vrot.slane %v7792_v62, 5  ;;  %10997 = vmatprep.mubr.bf16.mxu0 %v14054_v48 }
 0x3f5   : > { %v8256_v39 = vor.u32 %v8254_v16, %v8253_v33  ;;  %v8193_v63 = vld [vmem:[#allocation2 + $0x38] sm:$0xf]  ;;  %8159 = vst [vmem:[#allocation3 + $0x80] sm:$0xf] %v7787_v46  ;;  %v8248_v43 = vsel %vm14551_vm9, %v12176_v44, %v8247_v8  ;;  %v7800_v20 = vrot.slane %v7798_v26, 5  ;;  %v7802_v1 = vshrl.u32 %v7699_v42, 16  ;;  %10998 = vmatmul.mubr.bf16.gmra.mxu0 %v14052_v18 }
 0x3f6   : > { %v7808_v3 = vshll.u32 %v7700_v11, 16  ;;  %v7701_v35 = vld [vmem:[#allocation2 + $0x44] sm:$0xf]  ;;  %8620 = vst [vmem:[#allocation3 + $0x18] sm:$0xf] %v8248_v43  ;;  %v7795_v52 = vor.u32 %v7794_v0, %v7791_v29  ;;  %v8259_v45 = vshrl.u32 %v8191_v12, 16 }
 0x3f7   : > { %v8668_v54 = vld [vmem:[#allocation2 + $0xa4] sm:$0xf]  ;;  %v8257_v53 = vsel %vm14551_vm9, %v8249_v38, %v8256_v39  ;;  %v8264_v56 = vshrl.u32 %v8192_v10, 16  ;;  %v16162_v41 = vld [vmem:[#allocation2 + $0x48] sm:$0xf]  ;;  %v7804_v50 = vrot.slane %v7802_v1, 4  ;;  %v16180_v39 = vpop.f32.mrf.mxu1 }
 0x3f8   : > { %v8669_v59 = vld [vmem:[#allocation2 + $0xa8] sm:$0xf]  ;;  %8700 = vst [vmem:[#allocation3 + $0x25c] sm:$0xf] %v8668_v54  ;;  %v14055_v6 = vld [vmem:[#allocation3 + $0x10] ss:$36 sps:$4 sm:$0xff]  }
 0x3f9   : > { %v14057_v58 = vld [vmem:[#allocation3 + $0x14] ss:$36 sps:$4 sm:$0xff]   ;;  %8621 = vst [vmem:[#allocation3 + $0x3c] sm:$0xf] %v8257_v53  ;;  %8701 = vst [vmem:[#allocation3 + $0x280] sm:$0xf] %v8669_v59  ;;  %v7805_v60 = vor.u32 %v7804_v50, %v7800_v20 }
 0x3fa   : > { %v7796_v61 = vrot.slane %v7795_v52, 4  ;;  %v7810_v5 = vrot.slane %v7808_v3, 5  ;;  %v8266_v22 = vrot.slane %v8264_v56, 7  ;;  %v14078_v9 = vld [vmem:[#allocation9 + $0x230] sm:$0xff]   ;;  %11038 = vmatprep.mubr.bf16.mxu1 %v14057_v58  ;;  %v12177_v21 = vrot.slane %v8259_v45, 11  ;;  %v14185_v17 = vld [vmem:[#allocation9 + $0x238] sm:$0xff]  }
 0x3fb   : > { %v7648_v30 = vld [vmem:[#allocation2 + $0xb4] sm:$0xf]  ;;  %v8267_v4 = vshll.u32 %v8192_v10, 16  ;;  %v8273_v27 = vshrl.u32 %v8193_v63, 16  ;;  %v7649_v23 = vld [vmem:[#allocation2 + $0xb8] sm:$0xf]  ;;  %11039 = vmatmul.mubr.bf16.vlgmr.msra.gmra.mxu1 %v14055_v6 }
 0x3fc   : > { %7680 = vst [vmem:[#allocation3 + $0x2e0] sm:$0xf] %v7648_v30  ;;  %v7801_v40 = vsel %vm14572_vm10, %v7796_v61, %v7800_v20  ;;  %v8276_v19 = vshll.u32 %v8193_v63, 16  ;;  %v7703_v47 = vld [vmem:[#allocation2 + $0x4c] sm:$0x1]  ;;  %v7813_v14 = vshrl.u32 %v7701_v35, 16  ;;  %13521 = vmatpush3.bf16.msra.mxu1 %v14185_v17 }
 0x3fd   : > { %v7816_v28 = vshll.u32 %v7701_v35, 16  ;;  %7681 = vst [vmem:[#allocation3 + $0x304] sm:$0xf] %v7649_v23  ;;  %v7806_v49 = vrot.slane %v7805_v60, 4  ;;  %8160 = vst [vmem:[#allocation3 + $0xa4] sm:$0xf] %v7801_v40  ;;  %v8269_v31 = vor.u32 %v8267_v4, %v8266_v22  ;;  %13522 = vmatprep.subr.bf16.mxu1 %v14078_v9 }
 0x3fe   : > { %v8275_v36 = vrot.slane %v8273_v27, 7  ;;  %v7822_v37 = vshll.u32 %v16162_v41, 16  ;;  %v8194_v42 = vld [vmem:[#allocation2 + $0x40] sm:$0x8]  ;;  %v8195_v51 = vld [vmem:[#allocation2 + $0x44] sm:$0xf] }
 0x3ff   : > { %v14065_v44 = vld [vmem:[#allocation3 + $0x5c] ss:$36 sps:$4 sm:$0xff]   ;;  %v8271_v55 = vrot.slane %v8266_v22, 4  ;;  %v7815_v57 = vrot.slane %v7813_v14, 4  ;;  %v14091_v11 = vld [vmem:[#allocation9 + $0x228] sm:$0xff]   ;;  %v7811_v13 = vsel %vm14572_vm10, %v7806_v49, %v7810_v5  ;;  %v8270_v15 = vsel %vm14551_vm9, %v12177_v21, %v8269_v31  ;;  %v16189_v22 = vpop.f32.mrf.mxu1 }
 0x400   : > { %v8278_v16 = vor.u32 %v8276_v19, %v8275_v36  ;;  %v7818_v7 = vrot.slane %v7816_v28, 5  ;;  %v8196_v12 = vld [vmem:[#allocation2 + $0x48] sm:$0xf]  ;;  %v16171_v25 = vld [vmem:[#allocation2 + $0x54] sm:$0xf]  ;;  %11046 = vmatprep.mubr.bf16.mxu1 %v14065_v44  ;;  %v7824_v62 = vrot.slane %v7822_v37, 5  ;;  %13523 = vmatpush3.bf16.msra.mxu1 %v14078_v9 }
 0x401   : > { %v14069_v33 = vld [vmem:[#allocation3 + $0x1c] ss:$36 sps:$4 sm:$0xff]   ;;  %8161 = vst [vmem:[#allocation3 + $0xc8] sm:$0xf] %v7811_v13  ;;  %8622 = vst [vmem:[#allocation3 + $0x60] sm:$0xf] %v8270_v15  ;;  %13524 = vmatprep.subr.bf16.mxu1 %v14091_v11  ;;  %v16192_v28 = vpop.f32.mrf.mxu1 }
 0x402   : > { %v16173_v26 = vld [vmem:[#allocation2 + $0x58] sm:$0xf]  ;;  %v16175_v48 = vld [vmem:[#allocation9 + $0x220] sm:$0xff]   ;;  %v8279_v38 = vsel %vm14551_vm9, %v8271_v55, %v8278_v16  ;;  %v7819_v10 = vor.u32 %v7818_v7, %v7815_v57  ;;  %v7826_v18 = vshrl.u32 %v16162_v41, 16  ;;  %v7832_v46 = vshll.u32 %v7703_v47, 16  ;;  %11199 = vmatprep.mubr.bf16.mxu0 %v14069_v33 }
 0x403   : > { %v14063_v2 = vld [vmem:[#allocation3 + $0x58] ss:$36 sps:$4 sm:$0xff]   ;;  %8623 = vst [vmem:[#allocation3 + $0x84] sm:$0xf] %v8279_v38  ;;  %v8281_v29 = vshrl.u32 %v8194_v42, 16  ;;  %v8286_v0 = vshrl.u32 %v8195_v51, 16  ;;  %v13023_v57 = vpop.f32.mrf.mxu1 }
 0x404   : > { %v14067_v8 = vld [vmem:[#allocation3 + $0x18] ss:$36 sps:$4 sm:$0xff]   ;;  %v8289_v63 = vshll.u32 %v8195_v51, 16  ;;  %v8295_v43 = vshrl.u32 %v8196_v12, 16  ;;  %v8670_v20 = vld [vmem:[#allocation2 + $0xb4] sm:$0xf]  ;;  %11047 = vmatmul.mubr.bf16.gmra.mxu1 %v14063_v2 }
 0x405   : > { %11200 = vmatmul.mubr.bf16.vlgmr.msra.gmra.mxu0 %v14067_v8  ;;  %v7820_v1 = vrot.slane %v7819_v10, 4  ;;  %v7828_v3 = vrot.slane %v7826_v18, 4  ;;  %v7834_v35 = vrot.slane %v7832_v46, 5  ;;  %v8298_v54 = vshll.u32 %v8196_v12, 16  ;;  %v8671_v53 = vld [vmem:[#allocation2 + $0xb8] sm:$0xf]  ;;  %13525 = vmatpush3.bf16.msra.mxu1 %v14091_v11  ;;  %v16203_v38 = vpop.f32.mrf.mxu1 }
 0x406   : > { %8702 = vst [vmem:[#allocation3 + $0x2a4] sm:$0xf] %v8670_v20  ;;  %v12178_v52 = vrot.slane %v8281_v29, 11  ;;  %v8288_v45 = vrot.slane %v8286_v0, 7  ;;  %v8297_v56 = vrot.slane %v8295_v43, 7  ;;  %v7837_v41 = vshrl.u32 %v16171_v25, 16  ;;  %13526 = vmatprep.subr.bf16.mxu1 %v16175_v48 }
 0x407   : > { %v16183_v59 = vld [vmem:[#allocation9 + $0x218] sm:$0xff]   ;;  %8703 = vst [vmem:[#allocation3 + $0x2c8] sm:$0xf] %v8671_v53  ;;  %v7825_v6 = vsel %vm14572_vm10, %v7820_v1, %v7824_v62  ;;  %v7829_v58 = vor.u32 %v7828_v3, %v7824_v62  ;;  %v7840_v61 = vshll.u32 %v16171_v25, 16  ;;  %v7846_v5 = vshll.u32 %v16173_v26, 16  ;;  %v14130_v12 = vld [vmem:[#allocation9 + $0x210] sm:$0xff]  }
 0x408   : > { %v7706_v50 = vld [vmem:[#allocation2 + $0x5c] sm:$0x1]  ;;  %v7650_v9 = vld [vmem:[#allocation2 + $0xc4] sm:$0xf]  ;;  %v7651_v30 = vld [vmem:[#allocation2 + $0xc8] sm:$0xf]  ;;  %v8291_v60 = vor.u32 %v8289_v63, %v8288_v45  ;;  %v8300_v4 = vor.u32 %v8298_v54, %v8297_v56 }
 0x409   : > { %8162 = vst [vmem:[#allocation3 + $0xec] sm:$0xf] %v7825_v6  ;;  %v8293_v21 = vrot.slane %v8288_v45, 4  ;;  %v7839_v27 = vrot.slane %v7837_v41, 4  ;;  %v8197_v23 = vld [vmem:[#allocation2 + $0x50] sm:$0x8]  ;;  %13527 = vmatpush3.bf16.msra.mxu1 %v16175_v48 }
 0x40a   : > { %v8198_v40 = vld [vmem:[#allocation2 + $0x54] sm:$0xf]  ;;  %7682 = vst [vmem:[#allocation3 + $0x328] sm:$0xf] %v7650_v9  ;;  %7683 = vst [vmem:[#allocation3 + $0x34c] sm:$0xf] %v7651_v30  ;;  %v8292_v49 = vsel %vm14551_vm9, %v12178_v52, %v8291_v60  ;;  %13528 = vmatprep.subr.bf16.mxu1 %v16183_v59  ;;  %v16218_v60 = vpop.f32.mrf.mxu1 }
 0x40b   : > { %v14074_v19 = vld [vmem:[#allocation3 + $0xa4] ss:$36 sps:$4 sm:$0xff]   ;;  %v7830_v47 = vrot.slane %v7829_v58, 4  ;;  %v8199_v14 = vld [vmem:[#allocation2 + $0x58] sm:$0xf]  ;;  %v8301_v31 = vsel %vm14551_vm9, %v8293_v21, %v8300_v4  ;;  %v7842_v36 = vrot.slane %v7840_v61, 5 }
 0x40c   : > { %v14072_v17 = vld [vmem:[#allocation3 + $0xa0] ss:$36 sps:$4 sm:$0xff]   ;;  %11054 = vmatprep.mubr.bf16.mxu1 %v14074_v19  ;;  %8624 = vst [vmem:[#allocation3 + $0xa8] sm:$0xf] %v8292_v49  ;;  %8625 = vst [vmem:[#allocation3 + $0xcc] sm:$0xf] %v8301_v31  ;;  %v16225_v19 = vadd.f32 %v13023_v57, %v16192_v28 }
 0x40d   : > { %v7707_v37 = vld [vmem:[#allocation2 + $0x64] sm:$0xf]  ;;  %v7835_v51 = vsel %vm14572_vm10, %v7830_v47, %v7834_v35  ;;  %v7848_v44 = vrot.slane %v7846_v5, 5  ;;  %v7850_v55 = vshrl.u32 %v16173_v26, 16  ;;  %v7843_v13 = vor.u32 %v7842_v36, %v7839_v27  ;;  %v7708_v8 = vld [vmem:[#allocation2 + $0x68] sm:$0xf]  ;;  %11055 = vmatmul.mubr.bf16.gmra.mxu1 %v14072_v17  ;;  %v16210_v35 = vpop.f32.mrf.mxu0 }
 0x40e   : > { %v14077_v42 = vld [vmem:[#allocation3 + $0x64] ss:$36 sps:$4 sm:$0xff]   ;;  %8163 = vst [vmem:[#allocation3 + $0x110] sm:$0xf] %v7835_v51  ;;  %v7856_v15 = vshll.u32 %v7706_v50, 16  ;;  %v8303_v16 = vshrl.u32 %v8197_v23, 16  ;;  %13529 = vmatpush3.bf16.msra.mxu1 %v16183_v59 }
 0x40f   : > { %v14075_v11 = vld [vmem:[#allocation3 + $0x60] ss:$36 sps:$4 sm:$0xff]   ;;  %v8308_v7 = vshrl.u32 %v8198_v40, 16  ;;  %11207 = vmatprep.mubr.bf16.mxu0 %v14077_v42  ;;  %v7852_v25 = vrot.slane %v7850_v55, 4  ;;  %v8311_v33 = vshll.u32 %v8198_v40, 16  ;;  %v8317_v62 = vshrl.u32 %v8199_v14, 16  ;;  %13530 = vmatprep.subr.bf16.mxu1 %v14130_v12  ;;  %v16216_v30 = vpop.f32.mrf.mxu0 }
 0x410   : > { %v8320_v2 = vshll.u32 %v8199_v14, 16  ;;  %11208 = vmatmul.mubr.bf16.gmra.mxu0 %v14075_v11  ;;  %v7844_v26 = vrot.slane %v7843_v13, 4  ;;  %v7858_v48 = vrot.slane %v7856_v15, 5  ;;  %v12179_v10 = vrot.slane %v8303_v16, 11  ;;  %v7709_v46 = vld [vmem:[#allocation2 + $0x6c] sm:$0x1] }
 0x411   : > { %v8310_v18 = vrot.slane %v8308_v7, 7  ;;  %v16205_v29 = vld [vmem:[#allocation9 + $0x208] sm:$0xff]   ;;  %v7853_v0 = vor.u32 %v7852_v25, %v7848_v44  ;;  %v8319_v63 = vrot.slane %v8317_v62, 7  ;;  %v7861_v43 = vshrl.u32 %v7707_v37, 16  ;;  %v8200_v1 = vld [vmem:[#allocation2 + $0x60] sm:$0x8]  ;;  %v13131_v7 = vpop.f32.mrf.mxu0 }
 0x412   : > { %v7864_v20 = vshll.u32 %v7707_v37, 16  ;;  %v16207_v3 = vld [vmem:[#allocation2 + $0x64] sm:$0xf]  ;;  %v7849_v53 = vsel %vm14572_vm10, %v7844_v26, %v7848_v44  ;;  %v7870_v56 = vshll.u32 %v7708_v8, 16  ;;  %v16214_v41 = vld [vmem:[#allocation2 + $0x68] sm:$0xf]  ;;  %13531 = vmatpush3.bf16.msra.mxu1 %v14130_v12  ;;  %v13028_v12 = vpop.f32.mrf.mxu1 }
 0x413   : > { %v8672_v54 = vld [vmem:[#allocation2 + $0xc4] sm:$0xf]  ;;  %v8313_v52 = vor.u32 %v8311_v33, %v8310_v18  ;;  %v8315_v45 = vrot.slane %v8310_v18, 4  ;;  %v8673_v6 = vld [vmem:[#allocation2 + $0xc8] sm:$0xf]  ;;  %v7854_v50 = vrot.slane %v7853_v0, 4  ;;  %v8322_v61 = vor.u32 %v8320_v2, %v8319_v63  ;;  %13532 = vmatprep.subr.bf16.mxu1 %v16205_v29 }
 0x414   : > { %8704 = vst [vmem:[#allocation3 + $0x2ec] sm:$0xf] %v8672_v54  ;;  %v7652_v58 = vld [vmem:[#allocation2 + $0xd4] sm:$0xf]  ;;  %8164 = vst [vmem:[#allocation3 + $0x134] sm:$0xf] %v7849_v53 }
 0x415   : > { %v7863_v5 = vrot.slane %v7861_v43, 4  ;;  %v7866_v59 = vrot.slane %v7864_v20, 5  ;;  %v7710_v9 = vld [vmem:[#allocation2 + $0x74] sm:$0xf]  ;;  %8705 = vst [vmem:[#allocation3 + $0x310] sm:$0xf] %v8673_v6  ;;  %v8314_v4 = vsel %vm14551_vm9, %v12179_v10, %v8313_v52  ;;  %v7859_v49 = vsel %vm14572_vm10, %v7854_v50, %v7858_v48 }
 0x416   : > { %v7653_v21 = vld [vmem:[#allocation2 + $0xd8] sm:$0xf]  ;;  %7684 = vst [vmem:[#allocation3 + $0x370] sm:$0xf] %v7652_v58  ;;  %v7872_v27 = vrot.slane %v7870_v56, 5  ;;  %v7874_v23 = vshrl.u32 %v7708_v8, 16  ;;  %v8323_v31 = vsel %vm14551_vm9, %v8315_v45, %v8322_v61  ;;  %13533 = vmatpush3.bf16.msra.mxu1 %v16205_v29  ;;  %v13132_v56 = vpop.f32.mrf.mxu0 }
 0x417   : > { %v16222_v40 = vld [vmem:[#allocation2 + $0x78] sm:$0xf]  ;;  %7685 = vst [vmem:[#allocation3 + $0x394] sm:$0xf] %v7653_v21  ;;  %v16227_v47 = vld [vmem:[#allocation9 + $0x200] sm:$0xff]   ;;  %v7867_v36 = vor.u32 %v7866_v59, %v7863_v5  ;;  %v7880_v37 = vshll.u32 %v7709_v46, 16 }
 0x418   : > { %v14079_v14 = vld [vmem:[#allocation3 + $0xe8] ss:$36 sps:$4 sm:$0xff]   ;;  %8626 = vst [vmem:[#allocation3 + $0xf0] sm:$0xf] %v8314_v4  ;;  %8165 = vst [vmem:[#allocation3 + $0x158] sm:$0xf] %v7859_v49  ;;  %13534 = vmatprep.subr.bf16.mxu1 %v16227_v47  ;;  %v13021_v49 = vadd.f32 %v16189_v22, %v16180_v39 }
 0x419   : > { %v14081_v17 = vld [vmem:[#allocation3 + $0xec] ss:$36 sps:$4 sm:$0xff]   ;;  %8627 = vst [vmem:[#allocation3 + $0x114] sm:$0xf] %v8323_v31  ;;  %v7876_v28 = vrot.slane %v7874_v23, 4  ;;  %v8325_v51 = vshrl.u32 %v8200_v1, 16  ;;  %v13130_v23 = vadd.f32 %v16216_v30, %v16210_v35  ;;  %v13133_v31 = vadd.f32 %v13132_v56, %v13131_v7 }
 0x41a   : > { %v14084_v42 = vld [vmem:[#allocation3 + $0xac] ss:$36 sps:$4 sm:$0xff]   ;;  %v8330_v44 = vshrl.u32 %v16207_v3, 16  ;;  %v8333_v55 = vshll.u32 %v16207_v3, 16  ;;  %11062 = vmatprep.mubr.bf16.mxu1 %v14081_v17  ;;  %v7868_v11 = vrot.slane %v7867_v36, 4  ;;  %v7882_v13 = vrot.slane %v7880_v37, 5  ;;  %13535 = vmatpush3.bf16.msra.mxu1 %v16227_v47 }
 0x41b   : > { %v14082_v57 = vld [vmem:[#allocation3 + $0xa8] ss:$36 sps:$4 sm:$0xff]   ;;  %v8339_v15 = vshrl.u32 %v16214_v41, 16  ;;  %v8342_v16 = vshll.u32 %v16214_v41, 16  ;;  %11215 = vmatprep.mubr.bf16.mxu0 %v14084_v42  ;;  %11063 = vmatmul.mubr.bf16.gmra.mxu1 %v14079_v14  ;;  %v7877_v25 = vor.u32 %v7876_v28, %v7872_v27  ;;  %v12180_v33 = vrot.slane %v8325_v51, 11  ;;  %v13029_v41 = vpop.f32.mrf.mxu1 }
 0x41c   : > { %v8332_v62 = vrot.slane %v8330_v44, 7  ;;  %v7712_v2 = vld [vmem:[#allocation2 + $0x7c] sm:$0x1]  ;;  %v7885_v8 = vshrl.u32 %v7710_v9, 16  ;;  %11216 = vmatmul.mubr.bf16.gmra.mxu0 %v14082_v57  ;;  %v7873_v26 = vsel %vm14572_vm10, %v7868_v11, %v7872_v27  ;;  %v7888_v10 = vshll.u32 %v7710_v9, 16 }
 0x41d   : > { %v8341_v48 = vrot.slane %v8339_v15, 7  ;;  %v7894_v18 = vshll.u32 %v16222_v40, 16  ;;  %v8203_v46 = vld [vmem:[#allocation2 + $0x70] sm:$0x8]  ;;  %v7878_v0 = vrot.slane %v7877_v25, 4  ;;  %v7898_v52 = vshrl.u32 %v16222_v40, 16 }
 0x41e   : > { %8166 = vst [vmem:[#allocation3 + $0x17c] sm:$0xf] %v7873_v26  ;;  %v8335_v63 = vor.u32 %v8333_v55, %v8332_v62  ;;  %v8337_v43 = vrot.slane %v8332_v62, 4  ;;  %v7887_v20 = vrot.slane %v7885_v8, 4  ;;  %v16242_v1 = vld [vmem:[#allocation2 + $0x74] sm:$0xf]  ;;  %v16259_v36 = vadd.f32 %v13029_v41, %v13028_v12 }
 0x41f   : > { %v8344_v3 = vor.u32 %v8342_v16, %v8341_v48  ;;  %v7890_v54 = vrot.slane %v7888_v10, 5  ;;  %v7896_v53 = vrot.slane %v7894_v18, 5  ;;  %v16246_v45 = vld [vmem:[#allocation2 + $0x78] sm:$0xf]  ;;  %v7883_v29 = vsel %vm14572_vm10, %v7878_v0, %v7882_v13  ;;  %v7713_v61 = vld [vmem:[#allocation2 + $0x84] sm:$0xf] }
 0x420   : > { %v8336_v6 = vsel %vm14551_vm9, %v12180_v33, %v8335_v63  ;;  %v7904_v58 = vshll.u32 %v7712_v2, 16  ;;  %v8347_v50 = vshrl.u32 %v8203_v46, 16  ;;  %v14085_v5 = vld [vmem:[#allocation3 + $0x130] ss:$36 sps:$4 sm:$0xff]   ;;  %8167 = vst [vmem:[#allocation3 + $0x1a0] sm:$0xf] %v7883_v29  ;;  %v16267_v2 = vpop.f32.mrf.mxu1 }
 0x421   : > { %v14087_v59 = vld [vmem:[#allocation3 + $0x134] ss:$36 sps:$4 sm:$0xff]   ;;  %v8345_v9 = vsel %vm14551_vm9, %v8337_v43, %v8344_v3  ;;  %8628 = vst [vmem:[#allocation3 + $0x138] sm:$0xf] %v8336_v6  ;;  %v7891_v21 = vor.u32 %v7890_v54, %v7887_v20  ;;  %v7900_v4 = vrot.slane %v7898_v52, 4  ;;  %v8352_v51 = vshrl.u32 %v16242_v1, 16 }
 0x422   : > { %v7714_v27 = vld [vmem:[#allocation2 + $0x88] sm:$0xf]  ;;  %v14088_v40 = vld [vmem:[#allocation3 + $0xf0] ss:$36 sps:$4 sm:$0xff]   ;;  %8629 = vst [vmem:[#allocation3 + $0x15c] sm:$0xf] %v8345_v9  ;;  %11070 = vmatprep.mubr.bf16.mxu1 %v14087_v59  ;;  %v16272_v3 = vadd.f32 %v13130_v23, %v16102_v24  ;;  %v16274_v54 = vadd.f32 %v13133_v31, %v13021_v49  ;;  %v16282_v59 = vpop.f32.mrf.mxu1 }
 0x423   : > { %v14090_v14 = vld [vmem:[#allocation3 + $0xf4] ss:$36 sps:$4 sm:$0xff]   ;;  %v7906_v17 = vrot.slane %v7904_v58, 5  ;;  %v7892_v37 = vrot.slane %v7891_v21, 4  ;;  %v7901_v42 = vor.u32 %v7900_v4, %v7896_v53  ;;  %v12181_v28 = vrot.slane %v8347_v50, 11  ;;  %11071 = vmatmul.mubr.bf16.gmra.mxu1 %v14085_v5  ;;  %v13134_v5 = vpop.f32.mrf.mxu0 }
 0x424   : > { %v8674_v44 = vld [vmem:[#allocation2 + $0xd4] sm:$0xf]  ;;  %11223 = vmatprep.mubr.bf16.mxu0 %v14090_v14  ;;  %v8355_v35 = vshll.u32 %v16242_v1, 16  ;;  %v8361_v30 = vshrl.u32 %v16246_v45, 16  ;;  %v8364_v47 = vshll.u32 %v16246_v45, 16  ;;  %v7909_v39 = vshrl.u32 %v7713_v61, 16 }
 0x425   : > { %v7715_v55 = vld [vmem:[#allocation2 + $0x8c] sm:$0x1]  ;;  %v8675_v22 = vld [vmem:[#allocation2 + $0xd8] sm:$0xf]  ;;  %8706 = vst [vmem:[#allocation3 + $0x334] sm:$0xf] %v8674_v44  ;;  %11224 = vmatmul.mubr.bf16.gmra.mxu0 %v14088_v40  ;;  %v7897_v57 = vsel %vm14572_vm10, %v7892_v37, %v7896_v53  ;;  %v13135_v37 = vpop.f32.mrf.mxu0 }
 0x426   : > { %v7902_v11 = vrot.slane %v7901_v42, 4  ;;  %v8354_v13 = vrot.slane %v8352_v51, 7  ;;  %v7912_v15 = vshll.u32 %v7713_v61, 16  ;;  %v8206_v16 = vld [vmem:[#allocation2 + $0x80] sm:$0x8]  ;;  %v8363_v12 = vrot.slane %v8361_v30, 7 }
 0x427   : > { %8707 = vst [vmem:[#allocation3 + $0x358] sm:$0xf] %v8675_v22  ;;  %v7654_v7 = vld [vmem:[#allocation2 + $0xe4] sm:$0xf]  ;;  %8168 = vst [vmem:[#allocation3 + $0x1c4] sm:$0xf] %v7897_v57  ;;  %v13137_v57 = vpop.f32.mrf.mxu0 }
 0x428   : > { %v7911_v25 = vrot.slane %v7909_v39, 4  ;;  %v7918_v33 = vshll.u32 %v7714_v27, 16  ;;  %v7922_v62 = vshrl.u32 %v7714_v27, 16  ;;  %v7655_v8 = vld [vmem:[#allocation2 + $0xe8] sm:$0xf]  ;;  %v7907_v26 = vsel %vm14572_vm10, %v7902_v11, %v7906_v17  ;;  %v16287_v11 = vpop.f32.mrf.mxu1 }
 0x429   : > { %7686 = vst [vmem:[#allocation3 + $0x3b8] sm:$0xf] %v7654_v7  ;;  %v8357_v48 = vor.u32 %v8355_v35, %v8354_v13  ;;  %v8359_v10 = vrot.slane %v8354_v13, 4  ;;  %v7914_v18 = vrot.slane %v7912_v15, 5  ;;  %v8207_v46 = vld [vmem:[#allocation2 + $0x84] sm:$0xf]  ;;  %v8366_v43 = vor.u32 %v8364_v47, %v8363_v12 }
 0x42a   : > { %v8208_v0 = vld [vmem:[#allocation2 + $0x88] sm:$0xf]  ;;  %7687 = vst [vmem:[#allocation3 + $0x3dc] sm:$0xf] %v7655_v8  ;;  %v14094_v63 = vld [vmem:[#allocation3 + $0x17c] ss:$36 sps:$4 sm:$0xff]  }
 0x42b   : > { %8169 = vst [vmem:[#allocation3 + $0x1e8] sm:$0xf] %v7907_v26  ;;  %v7920_v20 = vrot.slane %v7918_v33, 5  ;;  %v7716_v1 = vld [vmem:[#allocation2 + $0x94] sm:$0xf]  ;;  %v8358_v52 = vsel %vm14551_vm9, %v12181_v28, %v8357_v48  ;;  %v7915_v45 = vor.u32 %v7914_v18, %v7911_v25  ;;  %v7924_v56 = vrot.slane %v7922_v62, 4  ;;  %11078 = vmatprep.mubr.bf16.mxu1 %v14094_v63  ;;  %v13138_v18 = vpop.f32.mrf.mxu0 }
 0x42c   : > { %v14092_v53 = vld [vmem:[#allocation3 + $0x178] ss:$36 sps:$4 sm:$0xff]   ;;  %v7928_v41 = vshll.u32 %v7715_v55, 16  ;;  %v8367_v58 = vsel %vm14551_vm9, %v8359_v10, %v8366_v43  ;;  %8630 = vst [vmem:[#allocation3 + $0x180] sm:$0xf] %v8358_v52  ;;  %v8369_v50 = vshrl.u32 %v8206_v16, 16  ;;  %v13136_v25 = vadd.f32 %v13135_v37, %v13134_v5 }
 0x42d   : > { %v16278_v29 = vld [vmem:[#allocation2 + $0x98] sm:$0xf]  ;;  %v14097_v6 = vld [vmem:[#allocation3 + $0x13c] ss:$36 sps:$4 sm:$0xff]   ;;  %v8374_v24 = vshrl.u32 %v8207_v46, 16  ;;  %v8377_v61 = vshll.u32 %v8207_v46, 16  ;;  %v7925_v4 = vor.u32 %v7924_v56, %v7920_v20  ;;  %11079 = vmatmul.mubr.bf16.gmra.mxu1 %v14092_v53 }
 0x42e   : > { %v14095_v9 = vld [vmem:[#allocation3 + $0x138] ss:$36 sps:$4 sm:$0xff]   ;;  %8631 = vst [vmem:[#allocation3 + $0x1a4] sm:$0xf] %v8367_v58  ;;  %v7916_v21 = vrot.slane %v7915_v45, 4  ;;  %v7930_v27 = vrot.slane %v7928_v41, 5  ;;  %11231 = vmatprep.mubr.bf16.mxu0 %v14097_v6  ;;  %v13027_v41 = vadd.f32 %v16218_v60, %v16203_v38  ;;  %v13035_v6 = vpop.f32.mrf.mxu1 }
 0x42f   : > { %v8383_v23 = vshrl.u32 %v8208_v0, 16  ;;  %v12182_v40 = vrot.slane %v8369_v50, 11  ;;  %v8376_v14 = vrot.slane %v8374_v24, 7  ;;  %v8386_v17 = vshll.u32 %v8208_v0, 16  ;;  %v7718_v49 = vld [vmem:[#allocation2 + $0x9c] sm:$0x1]  ;;  %11232 = vmatmul.mubr.bf16.gmra.mxu0 %v14095_v9 }
 0x430   : > { %v7933_v31 = vshrl.u32 %v7716_v1, 16  ;;  %v7921_v42 = vsel %vm14572_vm10, %v7916_v21, %v7920_v20  ;;  %v7926_v28 = vrot.slane %v7925_v4, 4  ;;  %v7936_v44 = vshll.u32 %v7716_v1, 16  ;;  %v8209_v35 = vld [vmem:[#allocation2 + $0x90] sm:$0x8] }
 0x431   : > { %v8385_v51 = vrot.slane %v8383_v23, 7  ;;  %8170 = vst [vmem:[#allocation3 + $0x20c] sm:$0xf] %v7921_v42  ;;  %v8379_v30 = vor.u32 %v8377_v61, %v8376_v14  ;;  %v8381_v47 = vrot.slane %v8376_v14, 4  ;;  %v7942_v39 = vshll.u32 %v16278_v29, 16 }
 0x432   : > { %v7935_v55 = vrot.slane %v7933_v31, 4  ;;  %v8210_v22 = vld [vmem:[#allocation2 + $0x94] sm:$0xf]  ;;  %v14100_v13 = vld [vmem:[#allocation3 + $0x1c4] ss:$36 sps:$4 sm:$0xff]   ;;  %v7931_v15 = vsel %vm14572_vm10, %v7926_v28, %v7930_v27  ;;  %v7938_v7 = vrot.slane %v7936_v44, 5  ;;  %v13139_v61 = vadd.f32 %v13138_v18, %v13137_v57  ;;  %v16310_v44 = vpop.f32.mrf.mxu1 }
 0x433   : > { %v8388_v16 = vor.u32 %v8386_v17, %v8385_v51  ;;  %v16291_v12 = vld [vmem:[#allocation2 + $0x98] sm:$0xf]  ;;  %v14098_v33 = vld [vmem:[#allocation3 + $0x1c0] ss:$36 sps:$4 sm:$0xff]   ;;  %8171 = vst [vmem:[#allocation3 + $0x230] sm:$0xf] %v7931_v15  ;;  %v8380_v62 = vsel %vm14551_vm9, %v12182_v40, %v8379_v30  ;;  %11086 = vmatprep.mubr.bf16.mxu1 %v14100_v13  ;;  %v13140_v51 = vpop.f32.mrf.mxu0 }
 0x434   : > { %v7944_v8 = vrot.slane %v7942_v39, 5  ;;  %v7946_v26 = vshrl.u32 %v16278_v29, 16  ;;  %v7952_v48 = vshll.u32 %v7718_v49, 16  ;;  %v7719_v10 = vld [vmem:[#allocation2 + $0xa4] sm:$0xf]  ;;  %v7939_v63 = vor.u32 %v7938_v7, %v7935_v55 }
 0x435   : > { %v8676_v46 = vld [vmem:[#allocation2 + $0xe4] sm:$0xf]  ;;  %v8389_v0 = vsel %vm14551_vm9, %v8381_v47, %v8388_v16  ;;  %8632 = vst [vmem:[#allocation3 + $0x1c8] sm:$0xf] %v8380_v62  ;;  %v8391_v43 = vshrl.u32 %v8209_v35, 16  ;;  %v8396_v20 = vshrl.u32 %v8210_v22, 16  ;;  %v16303_v29 = vadd.f32 %v13136_v25, %v16225_v19  ;;  %11087 = vmatmul.mubr.bf16.gmra.mxu1 %v14098_v33 }
 0x436   : > { %v16298_v1 = vld [vmem:[#allocation2 + $0xa8] sm:$0xf]  ;;  %8708 = vst [vmem:[#allocation3 + $0x37c] sm:$0xf] %v8676_v46  ;;  %v14101_v52 = vld [vmem:[#allocation3 + $0x180] ss:$36 sps:$4 sm:$0xff]   ;;  %v16312_v55 = vadd.f32 %v13139_v61, %v13027_v41  ;;  %v16315_v39 = vadd.f32 %v13035_v6, %v16287_v11  ;;  %v16327_v11 = vadd.f32 %v16282_v59, %v16267_v2 }
 0x437   : > { %v8677_v53 = vld [vmem:[#allocation2 + $0xe8] sm:$0xf]  ;;  %8633 = vst [vmem:[#allocation3 + $0x1ec] sm:$0xf] %v8389_v0  ;;  %v7948_v56 = vrot.slane %v7946_v26, 4  ;;  %v7940_v58 = vrot.slane %v7939_v63, 4 }
 0x438   : > { %v14103_v45 = vld [vmem:[#allocation3 + $0x184] ss:$36 sps:$4 sm:$0xff]   ;;  %8709 = vst [vmem:[#allocation3 + $0x3a0] sm:$0xf] %v8677_v53  ;;  %v7954_v50 = vrot.slane %v7952_v48, 5  ;;  %v8398_v24 = vrot.slane %v8396_v20, 7 }
 0x439   : > { %v7656_v5 = vld [vmem:[#allocation2 + $0xf4] sm:$0xf]  ;;  %11239 = vmatprep.mubr.bf16.mxu0 %v14103_v45  ;;  %v7949_v9 = vor.u32 %v7948_v56, %v7944_v8  ;;  %v12183_v21 = vrot.slane %v8391_v43, 11  ;;  %v8399_v4 = vshll.u32 %v8210_v22, 16  ;;  %v8405_v27 = vshrl.u32 %v16291_v12, 16  ;;  %v13038_v43 = vpop.f32.mrf.mxu1 }
 0x43a   : > { %v7657_v23 = vld [vmem:[#allocation2 + $0xf8] sm:$0xf]  ;;  %7688 = vst [vmem:[#allocation3 + $0x400] sm:$0xf] %v7656_v5  ;;  %11240 = vmatmul.mubr.bf16.gmra.mxu0 %v14101_v52  ;;  %v7945_v38 = vsel %vm14572_vm10, %v7940_v58, %v7944_v8  ;;  %v8408_v60 = vshll.u32 %v16291_v12, 16  ;;  %v7957_v40 = vshrl.u32 %v7719_v10, 16  ;;  %v13141_v12 = vpop.f32.mrf.mxu0 }
 0x43b   : > { %v7721_v19 = vld [vmem:[#allocation2 + $0xac] sm:$0x1]  ;;  %v7960_v14 = vshll.u32 %v7719_v10, 16  ;;  %7689 = vst [vmem:[#allocation3 + $0x424] sm:$0xf] %v7657_v23  ;;  %v7950_v17 = vrot.slane %v7949_v9, 4  ;;  %v8401_v49 = vor.u32 %v8399_v4, %v8398_v24  ;;  %v13142_v8 = vadd.f32 %v13141_v12, %v13140_v51 }
 0x43c   : > { %8172 = vst [vmem:[#allocation3 + $0x254] sm:$0xf] %v7945_v38  ;;  %v8407_v31 = vrot.slane %v8405_v27, 7  ;;  %v7966_v37 = vshll.u32 %v16298_v1, 16  ;;  %v8212_v42 = vld [vmem:[#allocation2 + $0xa0] sm:$0x8]  ;;  %v13143_v63 = vpop.f32.mrf.mxu0  ;;  %v13040_v38 = vpop.f32.mrf.mxu1 }
 0x43d   : > { %v8213_v28 = vld [vmem:[#allocation2 + $0xa4] sm:$0xf]  ;;  %v14107_v35 = vld [vmem:[#allocation3 + $0x20c] ss:$36 sps:$4 sm:$0xff]   ;;  %v8403_v30 = vrot.slane %v8398_v24, 4  ;;  %v7959_v47 = vrot.slane %v7957_v40, 4  ;;  %v7955_v22 = vsel %vm14572_vm10, %v7950_v17, %v7954_v50  ;;  %v8402_v57 = vsel %vm14551_vm9, %v12183_v21, %v8401_v49 }
 0x43e   : > { %v8410_v13 = vor.u32 %v8408_v60, %v8407_v31  ;;  %v7962_v15 = vrot.slane %v7960_v14, 5  ;;  %v8214_v16 = vld [vmem:[#allocation2 + $0xa8] sm:$0xf]  ;;  %v16321_v7 = vld [vmem:[#allocation2 + $0xb4] sm:$0xf]  ;;  %11094 = vmatprep.mubr.bf16.mxu1 %v14107_v35  ;;  %v7968_v33 = vrot.slane %v7966_v37, 5  ;;  %v13144_v5 = vpop.f32.mrf.mxu0  ;;  %v16338_v35 = vadd.f32 %v13142_v8, %v16259_v36 }
 0x43f   : > { %v14110_v25 = vld [vmem:[#allocation3 + $0x1cc] ss:$36 sps:$4 sm:$0xff]   ;;  %8173 = vst [vmem:[#allocation3 + $0x278] sm:$0xf] %v7955_v22  ;;  %8634 = vst [vmem:[#allocation3 + $0x210] sm:$0xf] %v8402_v57  ;;  %v13041_v22 = vpop.f32.mrf.mxu1 }
 0x440   : > { %v16323_v62 = vld [vmem:[#allocation2 + $0xb8] sm:$0xf]  ;;  %v14105_v26 = vld [vmem:[#allocation3 + $0x208] ss:$36 sps:$4 sm:$0xff]   ;;  %v8411_v10 = vsel %vm14551_vm9, %v8403_v30, %v8410_v13  ;;  %v7963_v18 = vor.u32 %v7962_v15, %v7959_v47  ;;  %v7970_v46 = vshrl.u32 %v16298_v1, 16  ;;  %v7976_v0 = vshll.u32 %v7721_v19, 16  ;;  %11247 = vmatprep.mubr.bf16.mxu0 %v14110_v25 }
 0x441   : > { %v14108_v48 = vld [vmem:[#allocation3 + $0x1c8] ss:$36 sps:$4 sm:$0xff]   ;;  %8635 = vst [vmem:[#allocation3 + $0x234] sm:$0xf] %v8411_v10  ;;  %v8413_v20 = vshrl.u32 %v8212_v42, 16  ;;  %v8418_v53 = vshrl.u32 %v8213_v28, 16  ;;  %11095 = vmatmul.mubr.bf16.gmra.mxu1 %v14105_v26  ;;  %v16341_v30 = vadd.f32 %v13038_v43, %v16310_v44  ;;  %v13145_v47 = vadd.f32 %v13144_v5, %v13143_v63  ;;  %v16355_v26 = vpop.f32.mrf.mxu1 }
 0x442   : > { %v8421_v52 = vshll.u32 %v8213_v28, 16  ;;  %v8427_v45 = vshrl.u32 %v8214_v16, 16  ;;  %v8678_v2 = vld [vmem:[#allocation2 + $0xf4] sm:$0xf]  ;;  %v7964_v59 = vrot.slane %v7963_v18, 4  ;;  %v7972_v56 = vrot.slane %v7970_v46, 4  ;;  %11248 = vmatmul.mubr.bf16.gmra.mxu0 %v14108_v48 }
 0x443   : > { %v7978_v41 = vrot.slane %v7976_v0, 5  ;;  %v8430_v6 = vshll.u32 %v8214_v16, 16  ;;  %v8679_v58 = vld [vmem:[#allocation2 + $0xf8] sm:$0xf]  ;;  %8710 = vst [vmem:[#allocation3 + $0x3c4] sm:$0xf] %v8678_v2  ;;  %v16353_v8 = vadd.f32 %v13041_v22, %v13040_v38 }
 0x444   : > { %v12184_v50 = vrot.slane %v8413_v20, 11  ;;  %v8420_v1 = vrot.slane %v8418_v53, 7  ;;  %v8429_v24 = vrot.slane %v8427_v45, 7  ;;  %v7981_v61 = vshrl.u32 %v16321_v7, 16  ;;  %8711 = vst [vmem:[#allocation3 + $0x3e8] sm:$0xf] %v8679_v58 }
 0x445   : > { %v7969_v9 = vsel %vm14572_vm10, %v7964_v59, %v7968_v33  ;;  %v7973_v21 = vor.u32 %v7972_v56, %v7968_v33  ;;  %v7724_v4 = vld [vmem:[#allocation2 + $0xbc] sm:$0x1]  ;;  %v7984_v27 = vshll.u32 %v16321_v7, 16  ;;  %v7990_v23 = vshll.u32 %v16323_v62, 16  ;;  %v7658_v60 = vld [vmem:[#allocation2 + $0x104] sm:$0xf]  ;;  %v13146_v56 = vpop.f32.mrf.mxu0 }
 0x446   : > { %v7659_v19 = vld [vmem:[#allocation2 + $0x108] sm:$0xf]  ;;  %8174 = vst [vmem:[#allocation3 + $0x29c] sm:$0xf] %v7969_v9  ;;  %v8423_v40 = vor.u32 %v8421_v52, %v8420_v1  ;;  %v8425_v14 = vrot.slane %v8420_v1, 4  ;;  %v8432_v17 = vor.u32 %v8430_v6, %v8429_v24  ;;  %v7983_v49 = vrot.slane %v7981_v61, 4 }
 0x447   : > { %v8215_v31 = vld [vmem:[#allocation2 + $0xb0] sm:$0x8]  ;;  %v8216_v37 = vld [vmem:[#allocation2 + $0xb4] sm:$0xf]  ;;  %7690 = vst [vmem:[#allocation3 + $0x448] sm:$0xf] %v7658_v60  ;;  %v16351_v33 = vadd.f32 %v13145_v47, %v16327_v11  ;;  %v13147_v38 = vpop.f32.mrf.mxu0 }
 0x448   : > { %7691 = vst [vmem:[#allocation3 + $0x46c] sm:$0xf] %v7659_v19  ;;  %v14113_v42 = vld [vmem:[#allocation3 + $0x254] ss:$36 sps:$4 sm:$0xff]   ;;  %v7974_v28 = vrot.slane %v7973_v21, 4  ;;  %v8424_v57 = vsel %vm14551_vm9, %v12184_v50, %v8423_v40  ;;  %v8433_v13 = vsel %vm14551_vm9, %v8425_v14, %v8432_v17  ;;  %v7986_v15 = vrot.slane %v7984_v27, 5 }
 0x449   : > { %v8217_v51 = vld [vmem:[#allocation2 + $0xb8] sm:$0xf]  ;;  %v7992_v16 = vrot.slane %v7990_v23, 5  ;;  %v7725_v7 = vld [vmem:[#allocation2 + $0xc4] sm:$0xf]  ;;  %11102 = vmatprep.mubr.bf16.mxu1 %v14113_v42  ;;  %v7994_v44 = vshrl.u32 %v16323_v62, 16  ;;  %v16371_v47 = vpop.f32.mrf.mxu0 }
 0x44a   : > { %v14111_v12 = vld [vmem:[#allocation3 + $0x250] ss:$36 sps:$4 sm:$0xff]   ;;  %v7979_v36 = vsel %vm14572_vm10, %v7974_v28, %v7978_v41  ;;  %8636 = vst [vmem:[#allocation3 + $0x258] sm:$0xf] %v8424_v57  ;;  %8637 = vst [vmem:[#allocation3 + $0x27c] sm:$0xf] %v8433_v13  ;;  %v7987_v10 = vor.u32 %v7986_v15, %v7983_v49  ;;  %v16357_v41 = vpop.f32.mrf.mxu1 }
 0x44b   : > { %v14116_v25 = vld [vmem:[#allocation3 + $0x214] ss:$36 sps:$4 sm:$0xff]   ;;  %8175 = vst [vmem:[#allocation3 + $0x2c0] sm:$0xf] %v7979_v36  ;;  %v8000_v18 = vshll.u32 %v7724_v4, 16  ;;  %v8435_v46 = vshrl.u32 %v8215_v31, 16  ;;  %11103 = vmatmul.mubr.bf16.gmra.mxu1 %v14111_v12 }
 0x44c   : > { %v14114_v48 = vld [vmem:[#allocation3 + $0x210] ss:$36 sps:$4 sm:$0xff]   ;;  %v8440_v0 = vshrl.u32 %v8216_v37, 16  ;;  %11255 = vmatprep.mubr.bf16.mxu0 %v14116_v25  ;;  %v7996_v63 = vrot.slane %v7994_v44, 4  ;;  %v8443_v43 = vshll.u32 %v8216_v37, 16  ;;  %v8449_v20 = vshrl.u32 %v8217_v51, 16  ;;  %v16373_v22 = vpop.f32.mrf.mxu1 }
 0x44d   : > { %v8452_v53 = vshll.u32 %v8217_v51, 16  ;;  %v7726_v62 = vld [vmem:[#allocation2 + $0xc8] sm:$0xf]  ;;  %11256 = vmatmul.mubr.bf16.gmra.mxu0 %v14114_v48  ;;  %v7988_v11 = vrot.slane %v7987_v10, 4  ;;  %v8002_v52 = vrot.slane %v8000_v18, 5  ;;  %v12185_v45 = vrot.slane %v8435_v46, 11  ;;  %v13150_v18 = vpop.f32.mrf.mxu0 }
 0x44e   : > { %v8442_v2 = vrot.slane %v8440_v0, 7  ;;  %v7727_v59 = vld [vmem:[#allocation2 + $0xcc] sm:$0x1]  ;;  %v7997_v6 = vor.u32 %v7996_v63, %v7992_v16  ;;  %v8451_v58 = vrot.slane %v8449_v20, 7  ;;  %v8005_v50 = vshrl.u32 %v7725_v7, 16  ;;  %v13047_v46 = vpop.f32.mrf.mxu1 }
 0x44f   : > { %v8008_v1 = vshll.u32 %v7725_v7, 16  ;;  %v8218_v24 = vld [vmem:[#allocation2 + $0xc0] sm:$0x8]  ;;  %v16359_v61 = vld [vmem:[#allocation2 + $0xc4] sm:$0xf]  ;;  %v7993_v9 = vsel %vm14572_vm10, %v7988_v11, %v7992_v16  ;;  %v8014_v27 = vshll.u32 %v7726_v62, 16  ;;  %v16369_v51 = vadd.f32 %v13147_v38, %v13146_v56 }
 0x450   : > { %v8680_v5 = vld [vmem:[#allocation2 + $0x104] sm:$0xf]  ;;  %v8445_v21 = vor.u32 %v8443_v43, %v8442_v2  ;;  %v8447_v4 = vrot.slane %v8442_v2, 4  ;;  %v16363_v23 = vld [vmem:[#allocation2 + $0xc8] sm:$0xf]  ;;  %v7998_v19 = vrot.slane %v7997_v6, 4  ;;  %v8454_v40 = vor.u32 %v8452_v53, %v8451_v58 }
 0x451   : > { %v8681_v60 = vld [vmem:[#allocation2 + $0x108] sm:$0xf]  ;;  %8712 = vst [vmem:[#allocation3 + $0x40c] sm:$0xf] %v8680_v5  ;;  %8176 = vst [vmem:[#allocation3 + $0x2e4] sm:$0xf] %v7993_v9 }
 0x452   : > { %v8007_v14 = vrot.slane %v8005_v50, 4  ;;  %v8010_v17 = vrot.slane %v8008_v1, 5  ;;  %v7728_v49 = vld [vmem:[#allocation2 + $0xd4] sm:$0xf]  ;;  %8713 = vst [vmem:[#allocation3 + $0x430] sm:$0xf] %v8681_v60  ;;  %v8446_v31 = vsel %vm14551_vm9, %v12185_v45, %v8445_v21  ;;  %v8003_v15 = vsel %vm14572_vm10, %v7998_v19, %v8002_v52 }
 0x453   : > { %v8016_v37 = vrot.slane %v8014_v27, 5  ;;  %v8018_v42 = vshrl.u32 %v7726_v62, 16  ;;  %v16367_v28 = vld [vmem:[#allocation2 + $0xd8] sm:$0xf]  ;;  %v14120_v13 = vld [vmem:[#allocation3 + $0x29c] ss:$36 sps:$4 sm:$0xff]   ;;  %v8455_v16 = vsel %vm14551_vm9, %v8447_v4, %v8454_v40  ;;  %v16388_v4 = vpop.f32.mrf.mxu0 }
 0x454   : > { %v14118_v57 = vld [vmem:[#allocation3 + $0x298] ss:$36 sps:$4 sm:$0xff]   ;;  %8638 = vst [vmem:[#allocation3 + $0x2a0] sm:$0xf] %v8446_v31  ;;  %v8011_v7 = vor.u32 %v8010_v17, %v8007_v14  ;;  %v8024_v12 = vshll.u32 %v7727_v59, 16  ;;  %v8457_v44 = vshrl.u32 %v8218_v24, 16  ;;  %11110 = vmatprep.mubr.bf16.mxu1 %v14120_v13  ;;  %v16383_v59 = vpop.f32.mrf.mxu1 }
 0x455   : > { %v14123_v25 = vld [vmem:[#allocation3 + $0x25c] ss:$36 sps:$4 sm:$0xff]   ;;  %8177 = vst [vmem:[#allocation3 + $0x308] sm:$0xf] %v8003_v15  ;;  %8639 = vst [vmem:[#allocation3 + $0x2c4] sm:$0xf] %v8455_v16  ;;  %11111 = vmatmul.mubr.bf16.gmra.mxu1 %v14118_v57 }
 0x456   : > { %v8020_v36 = vrot.slane %v8018_v42, 4  ;;  %v8462_v48 = vshrl.u32 %v16359_v61, 16  ;;  %v8465_v10 = vshll.u32 %v16359_v61, 16  ;;  %v14121_v0 = vld [vmem:[#allocation3 + $0x258] ss:$36 sps:$4 sm:$0xff]   ;;  %v8012_v63 = vrot.slane %v8011_v7, 4  ;;  %11263 = vmatprep.mubr.bf16.mxu0 %v14123_v25  ;;  %v16390_v27 = vpop.f32.mrf.mxu1  ;;  %v13153_v42 = vpop.f32.mrf.mxu0 }
 0x457   : > { %v8026_v43 = vrot.slane %v8024_v12, 5  ;;  %v8471_v20 = vshrl.u32 %v16363_v23, 16  ;;  %v8474_v53 = vshll.u32 %v16363_v23, 16  ;;  %v12186_v11 = vrot.slane %v8457_v44, 11  ;;  %v7730_v45 = vld [vmem:[#allocation2 + $0xdc] sm:$0x1]  ;;  %11264 = vmatmul.mubr.bf16.gmra.mxu0 %v14121_v0 }
 0x458   : > { %v8021_v62 = vor.u32 %v8020_v36, %v8016_v37  ;;  %v8464_v52 = vrot.slane %v8462_v48, 7  ;;  %v8029_v2 = vshrl.u32 %v7728_v49, 16  ;;  %v8017_v56 = vsel %vm14572_vm10, %v8012_v63, %v8016_v37  ;;  %v8221_v1 = vld [vmem:[#allocation2 + $0xd0] sm:$0x8]  ;;  %v8222_v21 = vld [vmem:[#allocation2 + $0xd4] sm:$0xf]  ;;  %v16411_v0 = vpop.f32.mrf.mxu0  ;;  %v16413_v63 = vpop.f32.mrf.mxu1 }
 0x459   : > { %v8473_v6 = vrot.slane %v8471_v20, 7  ;;  %v8032_v58 = vshll.u32 %v7728_v49, 16  ;;  %v8038_v50 = vshll.u32 %v16367_v28, 16  ;;  %8178 = vst [vmem:[#allocation3 + $0x32c] sm:$0xf] %v8017_v56  ;;  %v8042_v19 = vshrl.u32 %v16367_v28, 16 }
 0x45a   : > { %v8022_v24 = vrot.slane %v8021_v62, 4  ;;  %v8467_v61 = vor.u32 %v8465_v10, %v8464_v52  ;;  %v8469_v5 = vrot.slane %v8464_v52, 4  ;;  %v8031_v9 = vrot.slane %v8029_v2, 4  ;;  %v8223_v40 = vld [vmem:[#allocation2 + $0xd8] sm:$0xf]  ;;  %v16419_v2 = vpop.f32.mrf.mxu0 }
 0x45b   : > { %v8476_v23 = vor.u32 %v8474_v53, %v8473_v6  ;;  %v8034_v38 = vrot.slane %v8032_v58, 5  ;;  %v8040_v60 = vrot.slane %v8038_v50, 5  ;;  %v8048_v49 = vshll.u32 %v7730_v45, 16  ;;  %v7731_v37 = vld [vmem:[#allocation2 + $0xe4] sm:$0xf] }
 0x45c   : > { %v8027_v14 = vsel %vm14572_vm10, %v8022_v24, %v8026_v43  ;;  %v8468_v17 = vsel %vm14551_vm9, %v12186_v11, %v8467_v61  ;;  %v8479_v31 = vshrl.u32 %v8221_v1, 16  ;;  %v14126_v57 = vld [vmem:[#allocation3 + $0x2e4] ss:$36 sps:$4 sm:$0xff]   ;;  %v8044_v16 = vrot.slane %v8042_v19, 4  ;;  %v7733_v52 = vld [vmem:[#allocation2 + $0xec] sm:$0x1] }
 0x45d   : > { %8179 = vst [vmem:[#allocation3 + $0x350] sm:$0xf] %v8027_v14  ;;  %v8477_v13 = vsel %vm14551_vm9, %v8469_v5, %v8476_v23  ;;  %8640 = vst [vmem:[#allocation3 + $0x2e8] sm:$0xf] %v8468_v17  ;;  %v8035_v15 = vor.u32 %v8034_v38, %v8031_v9  ;;  %v7732_v28 = vld [vmem:[#allocation2 + $0xe8] sm:$0xf]  ;;  %v16401_v7 = vadd.f32 %v16369_v51, %v16315_v39  ;;  %11118 = vmatprep.mubr.bf16.mxu1 %v14126_v57 }
 0x45e   : > { %v14124_v12 = vld [vmem:[#allocation3 + $0x2e0] ss:$36 sps:$4 sm:$0xff]   ;;  %8641 = vst [vmem:[#allocation3 + $0x30c] sm:$0xf] %v8477_v13  ;;  %v8050_v36 = vrot.slane %v8048_v49, 5  ;;  %v16405_v44 = vadd.f32 %v16357_v41, %v16355_v26  ;;  %v13151_v48 = vadd.f32 %v13150_v18, %v16371_v47  ;;  %v16409_v10 = vadd.f32 %v13047_v46, %v16373_v22  ;;  %v16415_v47 = vpop.f32.mrf.mxu1 }
 0x45f   : > { %v14129_v25 = vld [vmem:[#allocation3 + $0x2a4] ss:$36 sps:$4 sm:$0xff]   ;;  %v8036_v51 = vrot.slane %v8035_v15, 4  ;;  %v8045_v43 = vor.u32 %v8044_v16, %v8040_v60  ;;  %v12187_v20 = vrot.slane %v8479_v31, 11  ;;  %v8484_v53 = vshrl.u32 %v8222_v21, 16  ;;  %11119 = vmatmul.mubr.bf16.gmra.mxu1 %v14124_v12  ;;  %v16433_v12 = vpop.f32.mrf.mxu0 }
 0x460   : > { %v14127_v39 = vld [vmem:[#allocation3 + $0x2a0] ss:$36 sps:$4 sm:$0xff]   ;;  %11271 = vmatprep.mubr.bf16.mxu0 %v14129_v25  ;;  %v8487_v62 = vshll.u32 %v8222_v21, 16  ;;  %v8493_v26 = vshrl.u32 %v8223_v40, 16  ;;  %v8496_v41 = vshll.u32 %v8223_v40, 16  ;;  %v8053_v11 = vshrl.u32 %v7731_v37, 16  ;;  %v16421_v24 = vpop.f32.mrf.mxu1 }
 0x461   : > { %11272 = vmatmul.mubr.bf16.gmra.mxu0 %v14127_v39  ;;  %v8041_v22 = vsel %vm14572_vm10, %v8036_v51, %v8040_v60  ;;  %v8046_v18 = vrot.slane %v8045_v43, 4  ;;  %v8486_v46 = vrot.slane %v8484_v53, 7  ;;  %v8056_v45 = vshll.u32 %v7731_v37, 16  ;;  %v8224_v1 = vld [vmem:[#allocation2 + $0xe0] sm:$0x8]  ;;  %v16437_v53 = vpop.f32.mrf.mxu0 }
 0x462   : > { %8180 = vst [vmem:[#allocation3 + $0x374] sm:$0xf] %v8041_v22  ;;  %v8495_v56 = vrot.slane %v8493_v26, 7  ;;  %v8055_v6 = vrot.slane %v8053_v11, 4  ;;  %v8062_v58 = vshll.u32 %v7732_v28, 16  ;;  %v8066_v50 = vshrl.u32 %v7732_v28, 16  ;;  %v16429_v31 = vpop.f32.mrf.mxu1 }
 0x463   : > { %v8051_v61 = vsel %vm14572_vm10, %v8046_v18, %v8050_v36  ;;  %v8489_v5 = vor.u32 %v8487_v62, %v8486_v46  ;;  %v8491_v9 = vrot.slane %v8486_v46, 4  ;;  %v8058_v21 = vrot.slane %v8056_v45, 5  ;;  %v8225_v23 = vld [vmem:[#allocation2 + $0xe4] sm:$0xf]  ;;  %v8226_v38 = vld [vmem:[#allocation2 + $0xe8] sm:$0xf] }
 0x464   : > { %v14133_v60 = vld [vmem:[#allocation3 + $0x32c] ss:$36 sps:$4 sm:$0xff]   ;;  %8181 = vst [vmem:[#allocation3 + $0x398] sm:$0xf] %v8051_v61  ;;  %v8498_v19 = vor.u32 %v8496_v41, %v8495_v56  ;;  %v8064_v40 = vrot.slane %v8062_v58, 5  ;;  %v16426_v14 = vadd.f32 %v13151_v48, %v16341_v30  ;;  %v13154_v49 = vadd.f32 %v13153_v42, %v16388_v4  ;;  %v16439_v18 = vpop.f32.mrf.mxu1  ;;  %v16443_v58 = vpop.f32.mrf.mxu0 }
 0x465   : > { %v7734_v17 = vld [vmem:[#allocation2 + $0xf4] sm:$0xf]  ;;  %v14131_v37 = vld [vmem:[#allocation3 + $0x328] ss:$36 sps:$4 sm:$0xff]   ;;  %v8490_v57 = vsel %vm14551_vm9, %v12187_v20, %v8489_v5  ;;  %v8059_v13 = vor.u32 %v8058_v21, %v8055_v6  ;;  %v8068_v15 = vrot.slane %v8066_v50, 4  ;;  %v8072_v16 = vshll.u32 %v7733_v52, 16  ;;  %11126 = vmatprep.mubr.bf16.mxu1 %v14133_v60 }
 0x466   : > { %v7735_v28 = vld [vmem:[#allocation2 + $0xf8] sm:$0xf]  ;;  %v14136_v25 = vld [vmem:[#allocation3 + $0x2ec] ss:$36 sps:$4 sm:$0xff]   ;;  %v8499_v30 = vsel %vm14551_vm9, %v8491_v9, %v8498_v19  ;;  %8642 = vst [vmem:[#allocation3 + $0x330] sm:$0xf] %v8490_v57  ;;  %v16445_v21 = vpop.f32.mrf.mxu1 }
 0x467   : > { %v8501_v36 = vshrl.u32 %v8224_v1, 16  ;;  %v8506_v4 = vshrl.u32 %v8225_v23, 16  ;;  %v8509_v42 = vshll.u32 %v8225_v23, 16  ;;  %v14134_v48 = vld [vmem:[#allocation3 + $0x2e8] ss:$36 sps:$4 sm:$0xff]   ;;  %v8060_v39 = vrot.slane %v8059_v13, 4  ;;  %11279 = vmatprep.mubr.bf16.mxu0 %v14136_v25  ;;  %11127 = vmatmul.mubr.bf16.gmra.mxu1 %v14131_v37 }
 0x468   : > { %8643 = vst [vmem:[#allocation3 + $0x354] sm:$0xf] %v8499_v30  ;;  %v8069_v51 = vor.u32 %v8068_v15, %v8064_v40  ;;  %v8074_v43 = vrot.slane %v8072_v16, 5  ;;  %v8515_v20 = vshrl.u32 %v8226_v38, 16  ;;  %v8518_v41 = vshll.u32 %v8226_v38, 16  ;;  %v16454_v25 = vpop.f32.mrf.mxu1 }
 0x469   : > { %v12188_v62 = vrot.slane %v8501_v36, 11  ;;  %v8508_v26 = vrot.slane %v8506_v4, 7  ;;  %v7736_v11 = vld [vmem:[#allocation2 + $0xfc] sm:$0x1]  ;;  %v8077_v22 = vshrl.u32 %v7734_v17, 16  ;;  %11280 = vmatmul.mubr.bf16.gmra.mxu0 %v14134_v48  ;;  %v8065_v46 = vsel %vm14572_vm10, %v8060_v39, %v8064_v40 }
 0x46a   : > { %v8070_v52 = vrot.slane %v8069_v51, 4  ;;  %v8517_v45 = vrot.slane %v8515_v20, 7  ;;  %v8080_v56 = vshll.u32 %v7734_v17, 16  ;;  %v8227_v6 = vld [vmem:[#allocation2 + $0xf0] sm:$0x8]  ;;  %v8086_v5 = vshll.u32 %v7735_v28, 16  ;;  %v13162_v17 = vpop.f32.mrf.mxu0 }
 0x46b   : > { %8182 = vst [vmem:[#allocation3 + $0x3bc] sm:$0xf] %v8065_v46  ;;  %v8511_v50 = vor.u32 %v8509_v42, %v8508_v26  ;;  %v8513_v1 = vrot.slane %v8508_v26, 4  ;;  %v8079_v61 = vrot.slane %v8077_v22, 4  ;;  %v8228_v9 = vld [vmem:[#allocation2 + $0xf4] sm:$0xf]  ;;  %v16450_v40 = vadd.f32 %v13154_v49, %v16353_v8 }
 0x46c   : > { %v14139_v23 = vld [vmem:[#allocation3 + $0x374] ss:$36 sps:$4 sm:$0xff]   ;;  %v8075_v38 = vsel %vm14572_vm10, %v8070_v52, %v8074_v43  ;;  %v8520_v60 = vor.u32 %v8518_v41, %v8517_v45  ;;  %v8082_v19 = vrot.slane %v8080_v56, 5  ;;  %v8088_v57 = vrot.slane %v8086_v5, 5  ;;  %v7737_v49 = vld [vmem:[#allocation2 + $0x104] sm:$0xf]  ;;  %v16466_v20 = vpop.f32.mrf.mxu0 }
 0x46d   : > { %8183 = vst [vmem:[#allocation3 + $0x3e0] sm:$0xf] %v8075_v38  ;;  %v8512_v37 = vsel %vm14551_vm9, %v12188_v62, %v8511_v50  ;;  %v8090_v13 = vshrl.u32 %v7735_v28, 16  ;;  %v8096_v15 = vshll.u32 %v7736_v11, 16  ;;  %v8229_v16 = vld [vmem:[#allocation2 + $0xf8] sm:$0xf]  ;;  %11134 = vmatprep.mubr.bf16.mxu1 %v14139_v23  ;;  %v13051_v28 = vadd.f32 %v16390_v27, %v16383_v59  ;;  %v16468_v62 = vpop.f32.mrf.mxu1 }
 0x46e   : > { %v8521_v30 = vsel %vm14551_vm9, %v8513_v1, %v8520_v60  ;;  %8644 = vst [vmem:[#allocation3 + $0x378] sm:$0xf] %v8512_v37  ;;  %v8083_v36 = vor.u32 %v8082_v19, %v8079_v61  ;;  %v8523_v4 = vshrl.u32 %v8227_v6, 16  ;;  %v8528_v8 = vshrl.u32 %v8228_v9, 16  ;;  %v14137_v42 = vld [vmem:[#allocation3 + $0x370] ss:$36 sps:$4 sm:$0xff]  }
 0x46f   : > { %v14142_v48 = vld [vmem:[#allocation3 + $0x334] ss:$36 sps:$4 sm:$0xff]   ;;  %8645 = vst [vmem:[#allocation3 + $0x39c] sm:$0xf] %v8521_v30  ;;  %v8092_v39 = vrot.slane %v8090_v13, 4  ;;  %v13157_v51 = vadd.f32 %v16419_v2, %v16411_v0  ;;  %v16464_v43 = vadd.f32 %v16415_v47, %v16413_v63  ;;  %v8098_v11 = vrot.slane %v8096_v15, 5  ;;  %11135 = vmatmul.mubr.bf16.gmra.mxu1 %v14137_v42  ;;  %v16470_v0 = vpop.f32.mrf.mxu0  ;;  %v16477_v6 = vpop.f32.mrf.mxu1 }
 0x470   : > { %v14140_v26 = vld [vmem:[#allocation3 + $0x330] ss:$36 sps:$4 sm:$0xff]   ;;  %v8084_v41 = vrot.slane %v8083_v36, 4  ;;  %v12189_v22 = vrot.slane %v8523_v4, 11  ;;  %v8530_v46 = vrot.slane %v8528_v8, 7  ;;  %11287 = vmatprep.mubr.bf16.mxu0 %v14142_v48  ;;  %v8531_v59 = vshll.u32 %v8228_v9, 16 }
 0x471   : > { %v8093_v52 = vor.u32 %v8092_v39, %v8088_v57  ;;  %v8537_v27 = vshrl.u32 %v8229_v16, 16  ;;  %v8540_v45 = vshll.u32 %v8229_v16, 16  ;;  %11288 = vmatmul.mubr.bf16.gmra.mxu0 %v14140_v26  ;;  %v16475_v2 = vadd.f32 %v13157_v51, %v16405_v44  ;;  %v7738_v5 = vld [vmem:[#allocation2 + $0x108] sm:$0xf]  ;;  %v16479_v23 = vpop.f32.mrf.mxu0  ;;  %v7739_v60 = vld [vmem:[#allocation2 + $0x10c] sm:$0x1]  ;;  %v16488_v13 = vpop.f32.mrf.mxu1 }
 0x472   : > { %v8089_v63 = vsel %vm14572_vm10, %v8084_v41, %v8088_v57  ;;  %v8535_v47 = vrot.slane %v8530_v46, 4  ;;  %v8101_v56 = vshrl.u32 %v7737_v49, 16  ;;  %v8533_v1 = vor.u32 %v8531_v59, %v8530_v46  ;;  %v8230_v4 = vld [vmem:[#allocation2 + $0x100] sm:$0x8]  ;;  %v8231_v8 = vld [vmem:[#allocation2 + $0x104] sm:$0xf] }
 0x473   : > { %v8094_v50 = vrot.slane %v8093_v52, 4  ;;  %8184 = vst [vmem:[#allocation3 + $0x404] sm:$0xf] %v8089_v63  ;;  %v8539_v61 = vrot.slane %v8537_v27, 7  ;;  %v8104_v9 = vshll.u32 %v7737_v49, 16  ;;  %v13160_v37 = vadd.f32 %v16437_v53, %v16433_v12  ;;  %v16494_v49 = vpop.f32.mrf.mxu0  ;;  %v16505_v42 = vpop.f32.mrf.mxu1 }
 0x474   : > { %v14146_v38 = vld [vmem:[#allocation3 + $0x3bc] ss:$36 sps:$4 sm:$0xff]   ;;  %v8103_v19 = vrot.slane %v8101_v56, 4  ;;  %v16485_v44 = vadd.f32 %v16429_v31, %v16421_v24  ;;  %v13163_v57 = vadd.f32 %v13162_v17, %v16443_v58  ;;  %v8534_v16 = vsel %vm14551_vm9, %v12189_v22, %v8533_v1  ;;  %v8232_v31 = vld [vmem:[#allocation2 + $0x108] sm:$0xf] }
 0x475   : > { %v8099_v15 = vsel %vm14572_vm10, %v8094_v50, %v8098_v11  ;;  %v8542_v30 = vor.u32 %v8540_v45, %v8539_v61  ;;  %v8106_v36 = vrot.slane %v8104_v9, 5  ;;  %11142 = vmatprep.mubr.bf16.mxu1 %v14146_v38  ;;  %v14149_v12 = vld [vmem:[#allocation3 + $0x37c] ss:$36 sps:$4 sm:$0xff]   ;;  %8646 = vst [vmem:[#allocation3 + $0x3c0] sm:$0xf] %v8534_v16  ;;  %v8110_v24 = vshll.u32 %v7738_v5, 16  ;;  %v16509_v59 = vpop.f32.mrf.mxu1 }
 0x476   : > { %8185 = vst [vmem:[#allocation3 + $0x428] sm:$0xf] %v8099_v15  ;;  %v16497_v53 = vadd.f32 %v13160_v37, %v16409_v10  ;;  %v16499_v58 = vadd.f32 %v13163_v57, %v13051_v28  ;;  %v16503_v17 = vadd.f32 %v16445_v21, %v16439_v18  ;;  %v14144_v48 = vld [vmem:[#allocation3 + $0x3b8] ss:$36 sps:$4 sm:$0xff]   ;;  %v8114_v26 = vshrl.u32 %v7738_v5, 16  ;;  %11295 = vmatprep.mubr.bf16.mxu0 %v14149_v12 }
 0x477   : > { %v8543_v39 = vsel %vm14551_vm9, %v8535_v47, %v8542_v30  ;;  %v8107_v51 = vor.u32 %v8106_v36, %v8103_v19  ;;  %v8120_v41 = vshll.u32 %v7739_v60, 16  ;;  %v8716_v11 = vld [vmem:[#allocation2 + $0x24] sm:$0xf]  ;;  %v14147_v22 = vld [vmem:[#allocation3 + $0x378] ss:$36 sps:$4 sm:$0xff]   ;;  %v8112_v10 = vrot.slane %v8110_v24, 5  ;;  %11143 = vmatmul.mubr.bf16.gmra.mxu1 %v14144_v48  ;;  %v16511_v47 = vpop.f32.mrf.mxu0  ;;  %v16517_v37 = vpop.f32.mrf.mxu1 }
 0x478   : > { %8647 = vst [vmem:[#allocation3 + $0x3e4] sm:$0xf] %v8543_v39  ;;  %v8545_v28 = vshrl.u32 %v8230_v4, 16  ;;  %v8550_v46 = vshrl.u32 %v8231_v8, 16  ;;  %v8553_v52 = vshll.u32 %v8231_v8, 16  ;;  %v8116_v21 = vrot.slane %v8114_v26, 4 }
 0x479   : > { %v8108_v18 = vrot.slane %v8107_v51, 4  ;;  %v8122_v27 = vrot.slane %v8120_v41, 5  ;;  %v8559_v45 = vshrl.u32 %v8232_v31, 16  ;;  %v8717_v63 = vld [vmem:[#allocation2 + $0x28] sm:$0xf]  ;;  %11296 = vmatmul.mubr.bf16.gmra.mxu0 %v14147_v22  ;;  %v8562_v1 = vshll.u32 %v8232_v31, 16  ;;  %v16515_v19 = vpop.f32.mrf.mxu0  ;;  %v16527_v51 = vpop.f32.mrf.mxu1 }
 0x47a   : > { %v12190_v56 = vrot.slane %v8545_v28, 11  ;;  %v8552_v50 = vrot.slane %v8550_v46, 7  ;;  %v8765_v61 = vshrl.u32 %v8716_v11, 16  ;;  %v8117_v9 = vor.u32 %v8116_v21, %v8112_v10  ;;  %v8718_v16 = vld [vmem:[#allocation2 + $0x2c] sm:$0x1] }
 0x47b   : > { %v8113_v5 = vsel %vm14572_vm10, %v8108_v18, %v8112_v10  ;;  %v8561_v38 = vrot.slane %v8559_v45, 7  ;;  %v8768_v60 = vshll.u32 %v8716_v11, 16  ;;  %v8774_v36 = vshll.u32 %v8717_v63, 16  ;;  %v8719_v48 = vld [vmem:[#allocation2 + $0x34] sm:$0xf]  ;;  %v16525_v39 = vpop.f32.mrf.mxu0  ;;  %v16538_v18 = vpop.f32.mrf.mxu1 }
 0x47c   : > { %8186 = vst [vmem:[#allocation3 + $0x44c] sm:$0xf] %v8113_v5  ;;  %v8555_v57 = vor.u32 %v8553_v52, %v8552_v50  ;;  %v8557_v15 = vrot.slane %v8552_v50, 4  ;;  %v8767_v30 = vrot.slane %v8765_v61, 4  ;;  %v8118_v8 = vrot.slane %v8117_v9, 4 }
 0x47d   : > { %v14152_v4 = vld [vmem:[#allocation3 + $0x404] ss:$36 sps:$4 sm:$0xff]   ;;  %v8564_v12 = vor.u32 %v8562_v1, %v8561_v38  ;;  %v13166_v24 = vadd.f32 %v16470_v0, %v16466_v20  ;;  %v16523_v31 = vadd.f32 %v16468_v62, %v16454_v25  ;;  %v8770_v41 = vrot.slane %v8768_v60, 5  ;;  %v8720_v10 = vld [vmem:[#allocation2 + $0x38] sm:$0xf]  ;;  %v13174_v52 = vpop.f32.mrf.mxu0  ;;  %v16542_v9 = vpop.f32.mrf.mxu1 }
 0x47e   : > { %v8556_v26 = vsel %vm14551_vm9, %v12190_v56, %v8555_v57  ;;  %v8776_v11 = vrot.slane %v8774_v36, 5  ;;  %v8778_v22 = vshrl.u32 %v8717_v63, 16  ;;  %v14150_v28 = vld [vmem:[#allocation3 + $0x400] ss:$36 sps:$4 sm:$0xff]   ;;  %11150 = vmatprep.mubr.bf16.mxu1 %v14152_v4  ;;  %v8123_v20 = vsel %vm14572_vm10, %v8118_v8, %v8122_v27  ;;  %v8721_v27 = vld [vmem:[#allocation2 + $0x3c] sm:$0x1] }
 0x47f   : > { %v14155_v46 = vld [vmem:[#allocation3 + $0x3c4] ss:$36 sps:$4 sm:$0xff]   ;;  %v8565_v25 = vsel %vm14551_vm9, %v8557_v15, %v8564_v12  ;;  %8648 = vst [vmem:[#allocation3 + $0x408] sm:$0xf] %v8556_v26  ;;  %v8784_v62 = vshll.u32 %v8718_v16, 16  ;;  %v16536_v0 = vadd.f32 %v13166_v24, %v16464_v43  ;;  %v8771_v45 = vor.u32 %v8770_v41, %v8767_v30  ;;  %11151 = vmatmul.mubr.bf16.gmra.mxu1 %v14150_v28  ;;  %v16553_v41 = vpop.f32.mrf.mxu1 }
 0x480   : > { %v14153_v21 = vld [vmem:[#allocation3 + $0x3c0] ss:$36 sps:$4 sm:$0xff]   ;;  %8187 = vst [vmem:[#allocation3 + $0x470] sm:$0xf] %v8123_v20  ;;  %8649 = vst [vmem:[#allocation3 + $0x42c] sm:$0xf] %v8565_v25  ;;  %v13169_v56 = vadd.f32 %v16494_v49, %v16479_v23  ;;  %11303 = vmatprep.mubr.bf16.mxu0 %v14155_v46  ;;  %v16547_v23 = vpop.f32.mrf.mxu0 }
 0x481   : > { %v8780_v63 = vrot.slane %v8778_v22, 4  ;;  %v8789_v50 = vshrl.u32 %v8719_v48, 16  ;;  %v8786_v34 = vrot.slane %v8784_v62, 5  ;;  %v8792_v1 = vshll.u32 %v8719_v48, 16  ;;  %v8722_v5 = vld [vmem:[#allocation2 + $0x44] sm:$0xf]  ;;  %11304 = vmatmul.mubr.bf16.gmra.mxu0 %v14153_v21 }
 0x482   : > { %v8798_v61 = vshll.u32 %v8720_v10, 16  ;;  %v8802_v43 = vshrl.u32 %v8720_v10, 16  ;;  %v8772_v38 = vrot.slane %v8771_v45, 4  ;;  %v16545_v57 = vadd.f32 %v13169_v56, %v16485_v44  ;;  %v8723_v16 = vld [vmem:[#allocation2 + $0x48] sm:$0xf]  ;;  %v16551_v26 = vpop.f32.mrf.mxu0  ;;  %v16559_v56 = vpop.f32.mrf.mxu1 }
 0x483   : > { %v8781_v60 = vor.u32 %v8780_v63, %v8776_v11  ;;  %v8791_v15 = vrot.slane %v8789_v50, 4  ;;  %v8794_v49 = vrot.slane %v8792_v1, 5  ;;  %v8808_v4 = vshll.u32 %v8721_v27, 16  ;;  %v8724_v28 = vld [vmem:[#allocation2 + $0x4c] sm:$0x1] }
 0x484   : > { %v8800_v30 = vrot.slane %v8798_v61, 5  ;;  %v8804_v36 = vrot.slane %v8802_v43, 4  ;;  %v8777_v8 = vsel %vm14572_vm10, %v8772_v38, %v8776_v11  ;;  %v8813_v24 = vshrl.u32 %v8722_v5, 16  ;;  %v14166_v25 = vld [vmem:[#allocation3 + $0x454] ss:$36 sps:$4 sm:$0xff]   ;;  %v16557_v63 = vpop.f32.mrf.mxu0 }
 0x485   : > { %v8782_v12 = vrot.slane %v8781_v60, 4  ;;  %v8816_v48 = vshll.u32 %v8722_v5, 16  ;;  %9180 = vst [vmem:[#allocation3 + $0x20] sm:$0xf] %v8777_v8  ;;  %v8795_v44 = vor.u32 %v8794_v49, %v8791_v15  ;;  %v8810_v10 = vrot.slane %v8808_v4, 5 }
 0x486   : > { %v8805_v22 = vor.u32 %v8804_v36, %v8800_v30  ;;  %v8822_v46 = vshll.u32 %v8723_v16, 16  ;;  %v8815_v62 = vrot.slane %v8813_v24, 4  ;;  %v8826_v11 = vshrl.u32 %v8723_v16, 16  ;;  %v8725_v45 = vld [vmem:[#allocation2 + $0x54] sm:$0xf] }
 0x487   : > { %v8787_v20 = vsel %vm14572_vm10, %v8782_v12, %v8786_v34  ;;  %v8818_v21 = vrot.slane %v8816_v48, 5  ;;  %v14159_v27 = vld [vmem:[#allocation3 + $0x44c] ss:$36 sps:$4 sm:$0xff]   ;;  %v8796_v50 = vrot.slane %v8795_v44, 4  ;;  %v16563_v1 = vadd.f32 %v16488_v13, %v16477_v6  ;;  %v8726_v43 = vld [vmem:[#allocation2 + $0x58] sm:$0xf]  ;;  %v13180_v6 = vpop.f32.mrf.mxu0  ;;  %v16576_v13 = vpop.f32.mrf.mxu1 }
 0x488   : > { %9181 = vst [vmem:[#allocation3 + $0x44] sm:$0xf] %v8787_v20  ;;  %v13172_v61 = vadd.f32 %v16515_v19, %v16511_v47  ;;  %v16569_v34 = vadd.f32 %v16509_v59, %v16505_v42  ;;  %v8727_v5 = vld [vmem:[#allocation2 + $0x5c] sm:$0x1]  ;;  %v14157_v38 = vld [vmem:[#allocation3 + $0x448] ss:$36 sps:$4 sm:$0xff]   ;;  %v13175_v49 = vadd.f32 %v13174_v52, %v16525_v39  ;;  %v16574_v36 = vadd.f32 %v16527_v51, %v16517_v37 }
 0x489   : > { %v14162_v60 = vld [vmem:[#allocation3 + $0x40c] ss:$36 sps:$4 sm:$0xff]   ;;  %v8806_v15 = vrot.slane %v8805_v22, 4  ;;  %v8819_v16 = vor.u32 %v8818_v21, %v8815_v62  ;;  %11158 = vmatprep.mubr.bf16.mxu1 %v14159_v27  ;;  %v8801_v42 = vsel %vm14572_vm10, %v8796_v50, %v8800_v30  ;;  %v8824_v59 = vrot.slane %v8822_v46, 5  ;;  %v8728_v8 = vld [vmem:[#allocation2 + $0x64] sm:$0xf]  ;;  %v16588_v12 = vpop.f32.mrf.mxu1 }
 0x48a   : > { %v14160_v47 = vld [vmem:[#allocation3 + $0x408] ss:$36 sps:$4 sm:$0xff]   ;;  %v8828_v19 = vrot.slane %v8826_v11, 4  ;;  %v8832_v4 = vshll.u32 %v8724_v28, 16  ;;  %11311 = vmatprep.mubr.bf16.mxu0 %v14162_v60  ;;  %11159 = vmatmul.mubr.bf16.gmra.mxu1 %v14157_v38  ;;  %9182 = vst [vmem:[#allocation3 + $0x68] sm:$0xf] %v8801_v42  ;;  %v16583_v37 = vadd.f32 %v13172_v61, %v16503_v17  ;;  %v16586_v51 = vadd.f32 %v13175_v49, %v16523_v31  ;;  %v13182_v28 = vpop.f32.mrf.mxu0 }
 0x48b   : > { %v8811_v39 = vsel %vm14572_vm10, %v8806_v15, %v8810_v10  ;;  %v8820_v52 = vrot.slane %v8819_v16, 4  ;;  %11312 = vmatmul.mubr.bf16.gmra.mxu0 %v14160_v47  ;;  %v8837_v48 = vshrl.u32 %v8725_v45, 16  ;;  %v8840_v44 = vshll.u32 %v8725_v45, 16  ;;  %v8729_v22 = vld [vmem:[#allocation2 + $0x68] sm:$0xf]  ;;  %v16592_v61 = vpop.f32.mrf.mxu1 }
 0x48c   : > { %9183 = vst [vmem:[#allocation3 + $0x8c] sm:$0xf] %v8811_v39  ;;  %v8829_v30 = vor.u32 %v8828_v19, %v8824_v59  ;;  %v8834_v24 = vrot.slane %v8832_v4, 5  ;;  %11319 = vmatprep.mubr.bf16.mxu0 %v14166_v25  ;;  %v8846_v17 = vshll.u32 %v8726_v43, 16  ;;  %v8850_v46 = vshrl.u32 %v8726_v43, 16  ;;  %v13183_v50 = vpop.f32.mrf.mxu0 }
 0x48d   : > { %v8825_v10 = vsel %vm14572_vm10, %v8820_v52, %v8824_v59  ;;  %v8856_v20 = vshll.u32 %v8727_v5, 16  ;;  %v8839_v62 = vrot.slane %v8837_v48, 4  ;;  %v8842_v21 = vrot.slane %v8840_v44, 5  ;;  %v8730_v11 = vld [vmem:[#allocation2 + $0x6c] sm:$0x1]  ;;  %v16604_v19 = vpop.f32.mrf.mxu1 }
 0x48e   : > { %v8830_v31 = vrot.slane %v8829_v30, 4  ;;  %9184 = vst [vmem:[#allocation3 + $0xb0] sm:$0xf] %v8825_v10  ;;  %v8861_v27 = vshrl.u32 %v8728_v8, 16  ;;  %v8848_v45 = vrot.slane %v8846_v17, 5  ;;  %v8852_v60 = vrot.slane %v8850_v46, 4  ;;  %v16602_v59 = vpop.f32.mrf.mxu0 }
 0x48f   : > { %v14163_v38 = vld [vmem:[#allocation3 + $0x20] ss:$36 sps:$4 sm:$0xff]   ;;  %v13178_v25 = vadd.f32 %v16551_v26, %v16547_v23  ;;  %v16598_v15 = vadd.f32 %v16542_v9, %v16538_v18  ;;  %v14164_v43 = vld [vmem:[#allocation3 + $0x450] ss:$36 sps:$4 sm:$0xff]   ;;  %v8843_v16 = vor.u32 %v8842_v21, %v8839_v62  ;;  %v8858_v49 = vrot.slane %v8856_v20, 5 }
 0x490   : > { %v8835_v5 = vsel %vm14572_vm10, %v8830_v31, %v8834_v24  ;;  %v8863_v47 = vrot.slane %v8861_v27, 4  ;;  %v8731_v42 = vld [vmem:[#allocation2 + $0x74] sm:$0xf]  ;;  %13536 = vmatprep.mubr.bf16.mxu1 %v14163_v38  ;;  %v8853_v4 = vor.u32 %v8852_v60, %v8848_v45  ;;  %v8864_v23 = vshll.u32 %v8728_v8, 16  ;;  %v8732_v18 = vld [vmem:[#allocation2 + $0x78] sm:$0xf]  ;;  %v13186_v44 = vpop.f32.mrf.mxu0 }
 0x491   : > { %9185 = vst [vmem:[#allocation3 + $0xd4] sm:$0xf] %v8835_v5  ;;  %v8870_v26 = vshll.u32 %v8729_v22, 16  ;;  %v8874_v39 = vshrl.u32 %v8729_v22, 16  ;;  %v8844_v9 = vrot.slane %v8843_v16, 4  ;;  %v8880_v52 = vshll.u32 %v8730_v11, 16  ;;  %v16616_v11 = vpop.f32.mrf.mxu1 }
 0x492   : > { %v16607_v30 = vadd.f32 %v13178_v25, %v16563_v1  ;;  %v13181_v24 = vadd.f32 %v13180_v6, %v16557_v63  ;;  %v8733_v48 = vld [vmem:[#allocation2 + $0x7c] sm:$0x1]  ;;  %v8854_v17 = vrot.slane %v8853_v4, 4  ;;  %v8866_v46 = vrot.slane %v8864_v23, 5  ;;  %v8734_v21 = vld [vmem:[#allocation2 + $0x84] sm:$0xf]  ;;  %v13188_v60 = vpop.f32.mrf.mxu0 }
 0x493   : > { %v14167_v10 = vld [vmem:[#allocation3 + $0x68] ss:$36 sps:$4 sm:$0xff]   ;;  %v16612_v20 = vadd.f32 %v16559_v56, %v16553_v41  ;;  %v13184_v8 = vadd.f32 %v13183_v50, %v13182_v28  ;;  %11320 = vmatmul.mubr.bf16.gmra.mxu0 %v14164_v43  ;;  %v8849_v22 = vsel %vm14572_vm10, %v8844_v9, %v8848_v45  ;;  %v8872_v31 = vrot.slane %v8870_v26, 5  ;;  %v14181_v32 = vld [vmem:[#allocation3 + $0x458] ss:$36 sps:$4 sm:$0xff]  }
 0x494   : > { %v8876_v62 = vrot.slane %v8874_v39, 4  ;;  %v8882_v1 = vrot.slane %v8880_v52, 5  ;;  %13537 = vmatmul.mubr.bf16.vlgmr.msra.gmra.mxu1 %v14167_v10  ;;  %v8859_v63 = vsel %vm14572_vm10, %v8854_v17, %v8858_v49  ;;  %9186 = vst [vmem:[#allocation3 + $0xf8] sm:$0xf] %v8849_v22  ;;  %v8867_v6 = vor.u32 %v8866_v46, %v8863_v47  ;;  %v8735_v45 = vld [vmem:[#allocation2 + $0x88] sm:$0xf]  ;;  %v16630_v39 = vpop.f32.mrf.mxu1 }
 0x495   : > { %v16621_v41 = vadd.f32 %v13181_v24, %v16569_v34  ;;  %v8885_v56 = vshrl.u32 %v8731_v42, 16  ;;  %9187 = vst [vmem:[#allocation3 + $0x11c] sm:$0xf] %v8859_v63  ;;  %v8888_v27 = vshll.u32 %v8731_v42, 16  ;;  %v8894_v50 = vshll.u32 %v8732_v18, 16  ;;  %v13189_v42 = vpop.f32.mrf.mxu0 }
 0x496   : > { %v8877_v28 = vor.u32 %v8876_v62, %v8872_v31  ;;  %v8898_v38 = vshrl.u32 %v8732_v18, 16  ;;  %v8868_v25 = vrot.slane %v8867_v6, 4  ;;  %v8904_v5 = vshll.u32 %v8733_v48, 16  ;;  %v8736_v16 = vld [vmem:[#allocation2 + $0x8c] sm:$0x1] }
 0x497   : > { %v8887_v43 = vrot.slane %v8885_v56, 4  ;;  %v8909_v4 = vshrl.u32 %v8734_v21, 16  ;;  %v8890_v26 = vrot.slane %v8888_v27, 5  ;;  %v16624_v47 = vadd.f32 %v13184_v8, %v16574_v36  ;;  %v8737_v48 = vld [vmem:[#allocation2 + $0x94] sm:$0xf]  ;;  %v16636_v63 = vpop.f32.mrf.mxu0  ;;  %v16639_v27 = vpop.f32.mrf.mxu1 }
 0x498   : > { %v14168_v23 = vld [vmem:[#allocation3 + $0xb0] ss:$36 sps:$4 sm:$0xff]   ;;  %v8878_v49 = vrot.slane %v8877_v28, 4  ;;  %v16628_v34 = vadd.f32 %v16588_v12, %v16576_v13  ;;  %v8873_v18 = vsel %vm14572_vm10, %v8868_v25, %v8872_v31  ;;  %v8896_v9 = vrot.slane %v8894_v50, 5  ;;  %v8738_v62 = vld [vmem:[#allocation2 + $0x98] sm:$0xf] }
 0x499   : > { %v8900_v52 = vrot.slane %v8898_v38, 4  ;;  %v8906_v24 = vrot.slane %v8904_v5, 5  ;;  %13540 = vmatprep.mubr.bf16.mxu1 %v14168_v23  ;;  %9188 = vst [vmem:[#allocation3 + $0x140] sm:$0xf] %v8873_v18  ;;  %v8891_v36 = vor.u32 %v8890_v26, %v8887_v43  ;;  %v8911_v17 = vrot.slane %v8909_v4, 4  ;;  %v13192_v26 = vpop.f32.mrf.mxu0 }
 0x49a   : > { %v8883_v10 = vsel %vm14572_vm10, %v8878_v49, %v8882_v1  ;;  %v8912_v46 = vshll.u32 %v8734_v21, 16  ;;  %v8918_v12 = vshll.u32 %v8735_v45, 16  ;;  %v8922_v8 = vshrl.u32 %v8735_v45, 16  ;;  %v8739_v4 = vld [vmem:[#allocation2 + $0x9c] sm:$0x1] }
 0x49b   : > { %9189 = vst [vmem:[#allocation3 + $0x164] sm:$0xf] %v8883_v10  ;;  %v8901_v13 = vor.u32 %v8900_v52, %v8896_v9  ;;  %v8928_v22 = vshll.u32 %v8736_v16, 16  ;;  %v8892_v31 = vrot.slane %v8891_v36, 4  ;;  %v13187_v56 = vadd.f32 %v13186_v44, %v16602_v59  ;;  %v8740_v23 = vld [vmem:[#allocation2 + $0xa4] sm:$0xf]  ;;  %v13089_v59 = vpop.f32.mrf.mxu1 }
 0x49c   : > { %v8914_v6 = vrot.slane %v8912_v46, 5  ;;  %v8933_v28 = vshrl.u32 %v8737_v48, 16  ;;  %v14169_v1 = vld [vmem:[#allocation3 + $0xf8] ss:$36 sps:$4 sm:$0xff]   ;;  %v8920_v38 = vrot.slane %v8918_v12, 5  ;;  %v16643_v21 = vadd.f32 %v16604_v19, %v16592_v61 }
 0x49d   : > { %v8902_v50 = vrot.slane %v8901_v13, 4  ;;  %v13190_v25 = vadd.f32 %v13189_v42, %v13188_v60  ;;  %v8897_v45 = vsel %vm14572_vm10, %v8892_v31, %v8896_v9  ;;  %v8924_v5 = vrot.slane %v8922_v8, 4  ;;  %13541 = vmatmul.mubr.bf16.gmra.mxu1 %v14169_v1  ;;  %v8741_v60 = vld [vmem:[#allocation2 + $0xa8] sm:$0xf]  ;;  %v8742_v10 = vld [vmem:[#allocation2 + $0xac] sm:$0x1]  ;;  %v16652_v36 = vpop.f32.mrf.mxu1 }
 0x49e   : > { %v8915_v43 = vor.u32 %v8914_v6, %v8911_v17  ;;  %v8930_v16 = vrot.slane %v8928_v22, 5  ;;  %9190 = vst [vmem:[#allocation3 + $0x188] sm:$0xf] %v8897_v45  ;;  %v16650_v49 = vadd.f32 %v13187_v56, %v16598_v15  ;;  %v8935_v61 = vrot.slane %v8933_v28, 4  ;;  %v13194_v28 = vpop.f32.mrf.mxu0 }
 0x49f   : > { %v8907_v44 = vsel %vm14572_vm10, %v8902_v50, %v8906_v24  ;;  %v8936_v19 = vshll.u32 %v8737_v48, 16  ;;  %v8925_v18 = vor.u32 %v8924_v5, %v8920_v38  ;;  %v8942_v9 = vshll.u32 %v8738_v62, 16  ;;  %v16659_v1 = vpop.f32.mrf.mxu1 }
 0x4a0   : > { %9191 = vst [vmem:[#allocation3 + $0x1ac] sm:$0xf] %v8907_v44  ;;  %v8916_v42 = vrot.slane %v8915_v43, 4  ;;  %v8946_v52 = vshrl.u32 %v8738_v62, 16  ;;  %v8952_v46 = vshll.u32 %v8739_v4, 16  ;;  %v8957_v13 = vshrl.u32 %v8740_v23, 16 }
 0x4a1   : > { %v8938_v17 = vrot.slane %v8936_v19, 5  ;;  %v8960_v24 = vshll.u32 %v8740_v23, 16  ;;  %v8926_v8 = vrot.slane %v8925_v18, 4  ;;  %v8944_v48 = vrot.slane %v8942_v9, 5  ;;  %v8743_v23 = vld [vmem:[#allocation2 + $0xb4] sm:$0xf] }
 0x4a2   : > { %v14170_v12 = vld [vmem:[#allocation3 + $0x140] ss:$36 sps:$4 sm:$0xff]   ;;  %v8921_v15 = vsel %vm14572_vm10, %v8916_v42, %v8920_v38  ;;  %v16657_v22 = vadd.f32 %v13190_v25, %v16612_v20  ;;  %v8948_v6 = vrot.slane %v8946_v52, 4  ;;  %v8954_v62 = vrot.slane %v8952_v46, 5  ;;  %v8744_v44 = vld [vmem:[#allocation2 + $0xb8] sm:$0xf] }
 0x4a3   : > { %9192 = vst [vmem:[#allocation3 + $0x1d0] sm:$0xf] %v8921_v15  ;;  %v8939_v31 = vor.u32 %v8938_v17, %v8935_v61  ;;  %v8959_v56 = vrot.slane %v8957_v13, 4  ;;  %13544 = vmatprep.mubr.bf16.mxu1 %v14170_v12  ;;  %v8931_v50 = vsel %vm14572_vm10, %v8926_v8, %v8930_v16  ;;  %v8962_v45 = vrot.slane %v8960_v24, 5  ;;  %v13195_v61 = vpop.f32.mrf.mxu0  ;;  %v8745_v16 = vld [vmem:[#allocation2 + $0xbc] sm:$0x1] }
 0x4a4   : > { %v8966_v43 = vshll.u32 %v8741_v60, 16  ;;  %v8970_v38 = vshrl.u32 %v8741_v60, 16  ;;  %9193 = vst [vmem:[#allocation3 + $0x1f4] sm:$0xf] %v8931_v50  ;;  %v8949_v4 = vor.u32 %v8948_v6, %v8944_v48  ;;  %v8976_v20 = vshll.u32 %v8742_v10, 16 }
 0x4a5   : > { %v8940_v5 = vrot.slane %v8939_v31, 4  ;;  %v16665_v25 = vadd.f32 %v16630_v39, %v16616_v11  ;;  %v8963_v19 = vor.u32 %v8962_v45, %v8959_v56  ;;  %v13193_v9 = vadd.f32 %v13192_v26, %v16636_v63  ;;  %v13197_v11 = vpop.f32.mrf.mxu0  ;;  %v16673_v39 = vpop.f32.mrf.mxu1  ;;  %v8746_v26 = vld [vmem:[#allocation2 + $0xc4] sm:$0xf] }
 0x4a6   : > { %v8968_v42 = vrot.slane %v8966_v43, 5  ;;  %v8972_v18 = vrot.slane %v8970_v38, 4  ;;  %v8950_v17 = vrot.slane %v8949_v4, 4  ;;  %v8978_v46 = vrot.slane %v8976_v20, 5  ;;  %v8748_v4 = vld [vmem:[#allocation2 + $0xcc] sm:$0x1] }
 0x4a7   : > { %v14171_v52 = vld [vmem:[#allocation3 + $0x188] ss:$36 sps:$4 sm:$0xff]   ;;  %v8945_v60 = vsel %vm14572_vm10, %v8940_v5, %v8944_v48  ;;  %v16671_v10 = vadd.f32 %v13089_v59, %v16639_v27  ;;  %v8964_v13 = vrot.slane %v8963_v19, 4  ;;  %v16676_v12 = vadd.f32 %v13193_v9, %v16628_v34  ;;  %v13198_v59 = vpop.f32.mrf.mxu0  ;;  %v16680_v6 = vpop.f32.mrf.mxu1 }
 0x4a8   : > { %9194 = vst [vmem:[#allocation3 + $0x218] sm:$0xf] %v8945_v60  ;;  %v8973_v24 = vor.u32 %v8972_v18, %v8968_v42  ;;  %v8981_v63 = vshrl.u32 %v8743_v23, 16  ;;  %13545 = vmatmul.mubr.bf16.gmra.mxu1 %v14171_v52  ;;  %v8955_v15 = vsel %vm14572_vm10, %v8950_v17, %v8954_v62  ;;  %v8984_v8 = vshll.u32 %v8743_v23, 16  ;;  %v8747_v27 = vld [vmem:[#allocation2 + $0xc8] sm:$0xf] }
 0x4a9   : > { %v8990_v48 = vshll.u32 %v8744_v44, 16  ;;  %v8994_v31 = vshrl.u32 %v8744_v44, 16  ;;  %9195 = vst [vmem:[#allocation3 + $0x23c] sm:$0xf] %v8955_v15  ;;  %v8969_v56 = vsel %vm14572_vm10, %v8964_v13, %v8968_v42  ;;  %v9000_v45 = vshll.u32 %v8745_v16, 16  ;;  %v16684_v20 = vpop.f32.mrf.mxu1  ;;  %v16688_v17 = vpop.f32.mrf.mxu0 }
 0x4aa   : > { %v8974_v50 = vrot.slane %v8973_v24, 4  ;;  %v8983_v34 = vrot.slane %v8981_v63, 4  ;;  %9196 = vst [vmem:[#allocation3 + $0x260] sm:$0xf] %v8969_v56  ;;  %v8986_v43 = vrot.slane %v8984_v8, 5  ;;  %v9005_v62 = vshrl.u32 %v8746_v26, 16 }
 0x4ab   : > { %v8992_v38 = vrot.slane %v8990_v48, 5  ;;  %v8996_v5 = vrot.slane %v8994_v31, 4  ;;  %v14172_v23 = vld [vmem:[#allocation3 + $0x1d0] ss:$36 sps:$4 sm:$0xff]   ;;  %v9002_v19 = vrot.slane %v9000_v45, 5  ;;  %v9008_v18 = vshll.u32 %v8746_v26, 16  ;;  %v13201_v56 = vpop.f32.mrf.mxu0 }
 0x4ac   : > { %v8979_v44 = vsel %vm14572_vm10, %v8974_v50, %v8978_v46  ;;  %v13196_v9 = vadd.f32 %v13195_v61, %v13194_v28  ;;  %v8987_v42 = vor.u32 %v8986_v43, %v8983_v34  ;;  %v9007_v60 = vrot.slane %v9005_v62, 4  ;;  %v8749_v13 = vld [vmem:[#allocation2 + $0xd4] sm:$0xf]  ;;  %13548 = vmatprep.mubr.bf16.mxu1 %v14172_v23  ;;  %v8750_v48 = vld [vmem:[#allocation2 + $0xd8] sm:$0xf]  ;;  %v16693_v46 = vpop.f32.mrf.mxu1 }
 0x4ad   : > { %9197 = vst [vmem:[#allocation3 + $0x284] sm:$0xf] %v8979_v44  ;;  %v8997_v52 = vor.u32 %v8996_v5, %v8992_v38  ;;  %v9014_v16 = vshll.u32 %v8747_v27, 16  ;;  %v9010_v24 = vrot.slane %v9008_v18, 5  ;;  %v9018_v63 = vshrl.u32 %v8747_v27, 16 }
 0x4ae   : > { %v9024_v15 = vshll.u32 %v8748_v4, 16  ;;  %v16691_v8 = vadd.f32 %v13196_v9, %v16643_v21  ;;  %v8988_v26 = vrot.slane %v8987_v42, 4  ;;  %v16697_v31 = vadd.f32 %v16659_v1, %v16652_v36  ;;  %v8751_v27 = vld [vmem:[#allocation2 + $0xdc] sm:$0x1]  ;;  %v8752_v5 = vld [vmem:[#allocation2 + $0xe4] sm:$0xf]  ;;  %v13100_v42 = vpop.f32.mrf.mxu1 }
 0x4af   : > { %v8998_v28 = vrot.slane %v8997_v52, 4  ;;  %v9016_v61 = vrot.slane %v9014_v16, 5  ;;  %v9011_v50 = vor.u32 %v9010_v24, %v9007_v60  ;;  %v9020_v34 = vrot.slane %v9018_v63, 4  ;;  %v8754_v24 = vld [vmem:[#allocation2 + $0xec] sm:$0x1] }
 0x4b0   : > { %v9026_v45 = vrot.slane %v9024_v15, 5  ;;  %v13199_v43 = vadd.f32 %v13198_v59, %v13197_v11  ;;  %v14173_v4 = vld [vmem:[#allocation3 + $0x218] ss:$36 sps:$4 sm:$0xff]   ;;  %v8993_v21 = vsel %vm14572_vm10, %v8988_v26, %v8992_v38  ;;  %v9029_v23 = vshrl.u32 %v8749_v13, 16  ;;  %v8753_v11 = vld [vmem:[#allocation2 + $0xe8] sm:$0xf]  ;;  %v13203_v59 = vpop.f32.mrf.mxu0  ;;  %v13101_v26 = vpop.f32.mrf.mxu1 }
 0x4b1   : > { %v9003_v62 = vsel %vm14572_vm10, %v8998_v28, %v9002_v19  ;;  %v9032_v44 = vshll.u32 %v8749_v13, 16  ;;  %9198 = vst [vmem:[#allocation3 + $0x2a8] sm:$0xf] %v8993_v21  ;;  %v9012_v36 = vrot.slane %v9011_v50, 4  ;;  %v9021_v1 = vor.u32 %v9020_v34, %v9016_v61  ;;  %13549 = vmatmul.mubr.bf16.gmra.mxu1 %v14173_v4 }
 0x4b2   : > { %9199 = vst [vmem:[#allocation3 + $0x2cc] sm:$0xf] %v9003_v62  ;;  %v16704_v18 = vadd.f32 %v13199_v43, %v16665_v25  ;;  %v9038_v9 = vshll.u32 %v8750_v48, 16  ;;  %v9031_v52 = vrot.slane %v9029_v23, 4  ;;  %v9042_v38 = vshrl.u32 %v8750_v48, 16  ;;  %v16714_v62 = vpop.f32.mrf.mxu1 }
 0x4b3   : > { %v9034_v60 = vrot.slane %v9032_v44, 5  ;;  %v9048_v16 = vshll.u32 %v8751_v27, 16  ;;  %v9017_v13 = vsel %vm14572_vm10, %v9012_v36, %v9016_v61  ;;  %v9022_v63 = vrot.slane %v9021_v1, 4  ;;  %v13204_v61 = vpop.f32.mrf.mxu0  ;;  %v8755_v36 = vld [vmem:[#allocation2 + $0xf4] sm:$0xf] }
 0x4b4   : > { %v14174_v19 = vld [vmem:[#allocation3 + $0x260] ss:$36 sps:$4 sm:$0xff]   ;;  %v9040_v15 = vrot.slane %v9038_v9, 5  ;;  %v16710_v25 = vadd.f32 %v16680_v6, %v16673_v39  ;;  %9200 = vst [vmem:[#allocation3 + $0x2f0] sm:$0xf] %v9017_v13  ;;  %v9044_v50 = vrot.slane %v9042_v38, 4  ;;  %v13104_v13 = vpop.f32.mrf.mxu1 }
 0x4b5   : > { %v9035_v28 = vor.u32 %v9034_v60, %v9031_v52  ;;  %v9050_v34 = vrot.slane %v9048_v16, 5  ;;  %v9053_v43 = vshrl.u32 %v8752_v5, 16  ;;  %13552 = vmatprep.mubr.bf16.mxu1 %v14174_v19  ;;  %v9027_v48 = vsel %vm14572_vm10, %v9022_v63, %v9026_v45  ;;  %v8756_v38 = vld [vmem:[#allocation2 + $0xf8] sm:$0xf] }
 0x4b6   : > { %v9056_v27 = vshll.u32 %v8752_v5, 16  ;;  %v9062_v4 = vshll.u32 %v8753_v11, 16  ;;  %v9066_v21 = vshrl.u32 %v8753_v11, 16  ;;  %9201 = vst [vmem:[#allocation3 + $0x314] sm:$0xf] %v9027_v48  ;;  %v9045_v39 = vor.u32 %v9044_v50, %v9040_v15 }
 0x4b7   : > { %v9036_v23 = vrot.slane %v9035_v28, 4  ;;  %v9055_v6 = vrot.slane %v9053_v43, 4  ;;  %v9072_v44 = vshll.u32 %v8754_v24, 16  ;;  %v13202_v60 = vadd.f32 %v13201_v56, %v16688_v17  ;;  %v13206_v43 = vpop.f32.mrf.mxu0  ;;  %v8757_v17 = vld [vmem:[#allocation2 + $0xfc] sm:$0x1] }
 0x4b8   : > { %v9058_v1 = vrot.slane %v9056_v27, 5  ;;  %v9064_v9 = vrot.slane %v9062_v4, 5  ;;  %v9068_v52 = vrot.slane %v9066_v21, 4  ;;  %v16721_v5 = vadd.f32 %v16693_v46, %v16684_v20 }
 0x4b9   : > { %v14175_v16 = vld [vmem:[#allocation3 + $0x2a8] ss:$36 sps:$4 sm:$0xff]   ;;  %v9041_v45 = vsel %vm14572_vm10, %v9036_v23, %v9040_v15  ;;  %v13205_v11 = vadd.f32 %v13204_v61, %v13203_v59  ;;  %v16723_v19 = vadd.f32 %v13101_v26, %v13100_v42  ;;  %v9046_v24 = vrot.slane %v9045_v39, 4  ;;  %v8758_v59 = vld [vmem:[#allocation2 + $0x104] sm:$0xf]  ;;  %v13207_v21 = vpop.f32.mrf.mxu0 }
 0x4ba   : > { %9202 = vst [vmem:[#allocation3 + $0x338] sm:$0xf] %v9041_v45  ;;  %v9059_v63 = vor.u32 %v9058_v1, %v9055_v6  ;;  %v9069_v28 = vor.u32 %v9068_v52, %v9064_v9  ;;  %v9074_v50 = vrot.slane %v9072_v44, 5  ;;  %13553 = vmatmul.mubr.bf16.gmra.mxu1 %v14175_v16  ;;  %v16726_v56 = vadd.f32 %v13202_v60, %v16671_v10  ;;  %v8759_v42 = vld [vmem:[#allocation2 + $0x108] sm:$0xf]  ;;  %v13106_v44 = vpop.f32.mrf.mxu1 }
 0x4bb   : > { %v16729_v15 = vadd.f32 %v13205_v11, %v16697_v31  ;;  %v9077_v20 = vshrl.u32 %v8755_v36, 16  ;;  %v9080_v46 = vshll.u32 %v8755_v36, 16  ;;  %v9051_v26 = vsel %vm14572_vm10, %v9046_v24, %v9050_v34  ;;  %v8760_v6 = vld [vmem:[#allocation2 + $0x10c] sm:$0x1]  ;;  %v13209_v60 = vpop.f32.mrf.mxu0 }
 0x4bc   : > { %v9060_v48 = vrot.slane %v9059_v63, 4  ;;  %v9070_v27 = vrot.slane %v9069_v28, 4  ;;  %v9086_v4 = vshll.u32 %v8756_v38, 16  ;;  %9203 = vst [vmem:[#allocation3 + $0x35c] sm:$0xf] %v9051_v26  ;;  %v9090_v39 = vshrl.u32 %v8756_v38, 16  ;;  %v13107_v38 = vpop.f32.mrf.mxu1 }
 0x4bd   : > { %17397 = vst [vmem:[#allocation29_spill] sm:$0xff] %v16729_v15  ;;  %v9079_v61 = vrot.slane %v9077_v20, 4  ;;  %v9082_v23 = vrot.slane %v9080_v46, 5  ;;  %v9096_v10 = vshll.u32 %v8757_v17, 16  ;;  %v14176_v31 = vld [vmem:[#allocation3 + $0x2f0] ss:$36 sps:$4 sm:$0xff]   ;;  %v13210_v46 = vpop.f32.mrf.mxu0 }
 0x4be   : > { %v9065_v36 = vsel %vm14572_vm10, %v9060_v48, %v9064_v9  ;;  %v9075_v1 = vsel %vm14572_vm10, %v9070_v27, %v9074_v50  ;;  %v9088_v52 = vrot.slane %v9086_v4, 5  ;;  %v9101_v34 = vshrl.u32 %v8758_v59, 16  ;;  %13556 = vmatprep.mubr.bf16.mxu1 %v14176_v31  ;;  %v13109_v27 = vpop.f32.mrf.mxu1 }
 0x4bf   : > { %9204 = vst [vmem:[#allocation3 + $0x380] sm:$0xf] %v9065_v36  ;;  %9205 = vst [vmem:[#allocation3 + $0x3a4] sm:$0xf] %v9075_v1  ;;  %v9083_v16 = vor.u32 %v9082_v23, %v9079_v61  ;;  %v9092_v45 = vrot.slane %v9090_v39, 4  ;;  %v9098_v11 = vrot.slane %v9096_v10, 5  ;;  %v13208_v50 = vadd.f32 %v13207_v21, %v13206_v43  ;;  %v13212_v1 = vpop.f32.mrf.mxu0 }
 0x4c0   : > { %v9104_v24 = vshll.u32 %v8758_v59, 16  ;;  %v9103_v63 = vrot.slane %v9101_v34, 4  ;;  %v9110_v28 = vshll.u32 %v8759_v42, 16  ;;  %v9114_v17 = vshrl.u32 %v8759_v42, 16  ;;  %v13110_v42 = vpop.f32.mrf.mxu1 }
 0x4c1   : > { %v9120_v20 = vshll.u32 %v8760_v6, 16  ;;  %v9084_v9 = vrot.slane %v9083_v16, 4  ;;  %v9093_v26 = vor.u32 %v9092_v45, %v9088_v52  ;;  %v13105_v36 = vadd.f32 %v13104_v13, %v16714_v62 }
 0x4c2   : > { %v9106_v48 = vrot.slane %v9104_v24, 5  ;;  %v9112_v4 = vrot.slane %v9110_v28, 5  ;;  %v9116_v15 = vrot.slane %v9114_v17, 4  ;;  %v16741_v39 = vadd.f32 %v13208_v50, %v16710_v25  ;;  %v13213_v25 = vpop.f32.mrf.mxu0 }
 0x4c3   : > { %v9089_v61 = vsel %vm14572_vm10, %v9084_v9, %v9088_v52  ;;  %v9094_v59 = vrot.slane %v9093_v26, 4  ;;  %v14177_v10 = vld [vmem:[#allocation3 + $0x338] ss:$36 sps:$4 sm:$0xff]   ;;  %v13211_v31 = vadd.f32 %v13210_v46, %v13209_v60  ;;  %v13108_v43 = vadd.f32 %v13107_v38, %v13106_v44  ;;  %v13240_v26 = vpop.f32.mrf.mxu1 }
 0x4c4   : > { %v9107_v23 = vor.u32 %v9106_v48, %v9103_v63  ;;  %9206 = vst [vmem:[#allocation3 + $0x3c8] sm:$0xf] %v9089_v61  ;;  %v9117_v6 = vor.u32 %v9116_v15, %v9112_v4  ;;  %v13111_v21 = vadd.f32 %v13110_v42, %v13109_v27  ;;  %v9122_v13 = vrot.slane %v9120_v20, 5  ;;  %13557 = vmatmul.mubr.bf16.gmra.mxu1 %v14177_v10  ;;  %v13215_v44 = vpop.f32.mrf.mxu0 }
 0x4c5   : > { %v9099_v34 = vsel %vm14572_vm10, %v9094_v59, %v9098_v11  ;;  %v16746_v16 = vadd.f32 %v13211_v31, %v16721_v5  ;;  %v13214_v60 = vadd.f32 %v13213_v25, %v13212_v1  ;;  %v13241_v27 = vpop.f32.mrf.mxu1 }
 0x4c6   : > { %v9108_v62 = vrot.slane %v9107_v23, 4  ;;  %v14178_v52 = vld [vmem:[#allocation3 + $0x380] ss:$36 sps:$4 sm:$0xff]   ;;  %9207 = vst [vmem:[#allocation3 + $0x3ec] sm:$0xf] %v9099_v34  ;;  %v9118_v15 = vrot.slane %v9117_v6, 4  ;;  %v13216_v38 = vpop.f32.mrf.mxu0 }
 0x4c7   : > { %13560 = vmatprep.mubr.bf16.mxu1 %v14178_v52  ;;  %v16753_v24 = vadd.f32 %v13214_v60, %v16723_v19  ;;  %v13217_v63 = vadd.f32 %v13216_v38, %v13215_v44  ;;  %v13243_v59 = vpop.f32.mrf.mxu1 }
 0x4c8   : > { %v9113_v45 = vsel %vm14572_vm10, %v9108_v62, %v9112_v4  ;;  %v9123_v11 = vsel %vm14572_vm10, %v9118_v15, %v9122_v13  ;;  %v13218_v17 = vpop.f32.mrf.mxu0  ;;  %v13242_v4 = vadd.f32 %v13241_v27, %v13240_v26 }
 0x4c9   : > { %9208 = vst [vmem:[#allocation3 + $0x410] sm:$0xf] %v9113_v45  ;;  %9209 = vst [vmem:[#allocation3 + $0x434] sm:$0xf] %v9123_v11  ;;  %v16755_v28 = vadd.f32 %v13217_v63, %v13105_v36  ;;  %v13244_v42 = vpop.f32.mrf.mxu1 }
 0x4ca   : > { %v13219_v20 = vpop.f32.mrf.mxu0  ;;  %v16760_v23 = vadd.f32 %v13242_v4, %v16272_v3  ;;  %v13245_v10 = vadd.f32 %v13244_v42, %v13243_v59 }
 0x4cb   : > { %v13220_v46 = vadd.f32 %v13219_v20, %v13218_v17  ;;  %v13246_v31 = vpop.f32.mrf.mxu1 }
 0x4cc   : > { %v13221_v48 = vpop.f32.mrf.mxu0  ;;  %v16767_v1 = vadd.f32 %v13245_v10, %v16274_v54 }
 0x4cd   : > { %v14179_v5 = vld [vmem:[#allocation3 + $0x3c8] ss:$36 sps:$4 sm:$0xff]   ;;  %v16757_v50 = vadd.f32 %v13220_v46, %v13108_v43  ;;  %v13247_v34 = vpop.f32.mrf.mxu1 }
 0x4ce   : > { %13561 = vmatmul.mubr.bf16.gmra.mxu1 %v14179_v5  ;;  %v13222_v19 = vpop.f32.mrf.mxu0  ;;  %v13248_v62 = vadd.f32 %v13247_v34, %v13246_v31 }
 0x4cf   : > { %v13223_v61 = vadd.f32 %v13222_v19, %v13221_v48  ;;  %v13249_v52 = vpop.f32.mrf.mxu1 }
 0x4d0   : > { %v14180_v9 = vld [vmem:[#allocation3 + $0x410] ss:$36 sps:$4 sm:$0xff]   ;;  %v16764_v6 = vpop.f32.mrf.mxu0  ;;  %v16774_v3 = vadd.f32 %v13248_v62, %v16303_v29 }
 0x4d1   : > { %13564 = vmatprep.mubr.bf16.mxu1 %v14180_v9  ;;  %v16762_v36 = vadd.f32 %v13223_v61, %v13111_v21  ;;  %v13250_v25 = vpop.f32.mrf.mxu1 }
 0x4d2   : > { %v16769_v43 = vpop.f32.mrf.mxu0  ;;  %v13251_v45 = vadd.f32 %v13250_v25, %v13249_v52 }
 0x4d3   : > { %v13252_v15 = vpop.f32.mrf.mxu1 }
 0x4d4   : > { %v16771_v13 = vpop.f32.mrf.mxu0  ;;  %v16781_v54 = vadd.f32 %v13251_v45, %v16312_v55 }
 0x4d5   : > { %v13253_v44 = vpop.f32.mrf.mxu1 }
 0x4d6   : > { %13565 = vmatmul.mubr.bf16.gmra.mxu1 %v14181_v32  ;;  %v16776_v21 = vpop.f32.mrf.mxu0  ;;  %v13254_v38 = vadd.f32 %v13253_v44, %v13252_v15 }
 0x4d7   : > { %v13255_v63 = vpop.f32.mrf.mxu1 }
 0x4d8   : > { %v16778_v60 = vpop.f32.mrf.mxu0  ;;  %v16788_v29 = vadd.f32 %v13254_v38, %v16338_v35 }
 0x4d9   : > { %v13256_v17 = vpop.f32.mrf.mxu1 }
 0x4da   : > { %v16783_v11 = vpop.f32.mrf.mxu0  ;;  %v13257_v46 = vadd.f32 %v13256_v17, %v13255_v63 }
 0x4db   : > { %v13258_v9 = vpop.f32.mrf.mxu1 }
 0x4dc   : > { %v16785_v5 = vpop.f32.mrf.mxu0  ;;  %v16793_v26 = vadd.f32 %v13257_v46, %v16351_v33 }
 0x4dd   : > { %v13259_v48 = vpop.f32.mrf.mxu1 }
 0x4de   : > { %v16790_v20 = vpop.f32.mrf.mxu0  ;;  %v13260_v32 = vadd.f32 %v13259_v48, %v13258_v9 }
 0x4df   : > { %v13261_v19 = vpop.f32.mrf.mxu1 }
 0x4e0   : > { %v16795_v55 = vpop.f32.mrf.mxu0  ;;  %v16800_v4 = vadd.f32 %v13260_v32, %v16401_v7 }
 0x4e1   : > { %v13262_v61 = vpop.f32.mrf.mxu1 }
 0x4e2   : > { %v16797_v27 = vpop.f32.mrf.mxu0  ;;  %v13263_v59 = vadd.f32 %v13262_v61, %v13261_v19 }
 0x4e3   : > { %v13264_v10 = vpop.f32.mrf.mxu1 }
 0x4e4   : > { %v16802_v35 = vpop.f32.mrf.mxu0  ;;  %v16807_v33 = vadd.f32 %v13263_v59, %v16426_v14 }
 0x4e5   : > { %v13265_v34 = vpop.f32.mrf.mxu1 }
 0x4e6   : > { %v16804_v42 = vpop.f32.mrf.mxu0  ;;  %v13266_v62 = vadd.f32 %v13265_v34, %v13264_v10 }
 0x4e7   : > { %v13267_v25 = vpop.f32.mrf.mxu1 }
 0x4e8   : > { %v16809_v31 = vpop.f32.mrf.mxu0  ;;  %v16814_v7 = vadd.f32 %v13266_v62, %v16450_v40 }
 0x4e9   : > { %v13268_v15 = vpop.f32.mrf.mxu1 }
 0x4ea   : > { %v16811_v52 = vpop.f32.mrf.mxu0  ;;  %17398 = vst [vmem:[#allocation30_spill] sm:$0xff] %v16814_v7  ;;  %v13269_v44 = vadd.f32 %v13268_v15, %v13267_v25 }
 0x4ec   : > { %v16816_v45 = vpop.f32.mrf.mxu0  ;;  %v16821_v14 = vadd.f32 %v13269_v44, %v16475_v2 }
 0x4ed   : > { %v13270_v63 = vpop.f32.mrf.mxu1 }
 0x4ee   : > { %v16818_v38 = vpop.f32.mrf.mxu0  ;;  %17399 = vst [vmem:[#allocation32_spill] sm:$0xff] %v16821_v14 }
 0x4ef   : > { %v13271_v46 = vpop.f32.mrf.mxu1 }
 0x4f0   : > { %v16823_v17 = vpop.f32.mrf.mxu0  ;;  %v13272_v9 = vadd.f32 %v13271_v46, %v13270_v63 }
 0x4f1   : > { %v13273_v32 = vpop.f32.mrf.mxu1 }
 0x4f2   : > { %v16825_v48 = vpop.f32.mrf.mxu0  ;;  %v16828_v40 = vadd.f32 %v13272_v9, %v16497_v53 }
 0x4f3   : > { %v13274_v61 = vpop.f32.mrf.mxu1 }
 0x4f4   : > { %v16830_v19 = vpop.f32.mrf.mxu0  ;;  %v13275_v59 = vadd.f32 %v13274_v61, %v13273_v32 }
 0x4f5   : > { %v13276_v34 = vpop.f32.mrf.mxu1 }
 0x4f6   : > { %v16832_v10 = vpop.f32.mrf.mxu0  ;;  %v16835_v2 = vadd.f32 %v13275_v59, %v16499_v58 }
 0x4f7   : > { %17400 = vst [vmem:[#allocation33_spill] sm:$0xff] %v16832_v10  ;;  %v13277_v25 = vpop.f32.mrf.mxu1 }
 0x4f8   : > { %17401 = vst [vmem:[#allocation39_spill] sm:$0xff] %v16835_v2  ;;  %v13278_v15 = vadd.f32 %v13277_v25, %v13276_v34 }
 0x4f9   : > { %v13279_v63 = vpop.f32.mrf.mxu1 }
 0x4fa   : > { %v16837_v62 = vpop.f32.mrf.mxu0  ;;  %v16842_v53 = vadd.f32 %v13278_v15, %v16536_v0 }
 0x4fb   : > { %v13280_v9 = vpop.f32.mrf.mxu1 }
 0x4fc   : > { %v16839_v44 = vpop.f32.mrf.mxu0  ;;  %17402 = vst [vmem:[#allocation41_spill] sm:$0xff] %v16842_v53  ;;  %v13281_v32 = vadd.f32 %v13280_v9, %v13279_v63 }
 0x4fe   : > { %v16844_v46 = vpop.f32.mrf.mxu0  ;;  %v16849_v58 = vadd.f32 %v13281_v32, %v16545_v57 }
 0x500   : > { %v16846_v61 = vpop.f32.mrf.mxu0  ;;  %17403 = vst [vmem:[#allocation42_spill] sm:$0xff] %v16849_v58 }
 0x501   : > { %v13282_v14 = vpop.f32.mrf.mxu1 }
 0x502   : > { %v16851_v59 = vpop.f32.mrf.mxu0 }
 0x503   : > { %v13283_v2 = vpop.f32.mrf.mxu1 }
 0x504   : > { %v13284_v34 = vadd.f32 %v13283_v2, %v13282_v14  ;;  %v16853_v25 = vpop.f32.mrf.mxu0 }
 0x505   : > { %17404 = vst [vmem:[#allocation44_spill] sm:$0xff] %v16853_v25  ;;  %v13285_v7 = vpop.f32.mrf.mxu1 }
 0x506   : > { %v16856_v0 = vadd.f32 %v13284_v34, %v16583_v37  ;;  %v16858_v15 = vpop.f32.mrf.mxu0 }
 0x507   : > { %17406 = vst [vmem:[#allocation36_spill] sm:$0xff] %v16858_v15  ;;  %v13286_v53 = vpop.f32.mrf.mxu1 }
 0x508   : > { %17405 = vst [vmem:[#allocation46_spill] sm:$0xff] %v16856_v0  ;;  %v13287_v63 = vadd.f32 %v13286_v53, %v13285_v7  ;;  %v16860_v9 = vpop.f32.mrf.mxu0 }
 0x509   : > { %17407 = vst [vmem:[#allocation47_spill] sm:$0xff] %v16860_v9 }
 0x50a   : > { %v16863_v57 = vadd.f32 %v13287_v63, %v16586_v51 }
 0x50b   : > { %v13288_v10 = vpop.f32.mrf.mxu1 }
 0x50c   : > { %17408 = vst [vmem:[#allocation48_spill] sm:$0xff] %v16863_v57 }
 0x50d   : > { %v16865_v32 = vpop.f32.mrf.mxu0  ;;  %v13289_v58 = vpop.f32.mrf.mxu1 }
 0x50e   : > { %v13290_v14 = vadd.f32 %v13289_v58, %v13288_v10 }
 0x50f   : > { %v16867_v2 = vpop.f32.mrf.mxu0  ;;  %v13291_v25 = vpop.f32.mrf.mxu1 }
 0x510   : > { %v16870_v37 = vadd.f32 %v13290_v14, %v16607_v30 }
 0x511   : > { %v16872_v34 = vpop.f32.mrf.mxu0  ;;  %v13292_v15 = vpop.f32.mrf.mxu1 }
 0x512   : > { %17409 = vst [vmem:[#allocation38_spill] sm:$0xff] %v16870_v37  ;;  %v13293_v7 = vadd.f32 %v13292_v15, %v13291_v25 }
 0x513   : > { %v16874_v53 = vpop.f32.mrf.mxu0 }
 0x514   : > { %17410 = vst [vmem:[#allocation49_spill] sm:$0xff] %v16874_v53  ;;  %v16877_v9 = vadd.f32 %v13293_v7, %v16621_v41 }
 0x515   : > { %v13294_v51 = vpop.f32.mrf.mxu1 }
 0x516   : > { %17411 = vst [vmem:[#allocation50_spill] sm:$0xff] %v16877_v9 }
 0x517   : > { %v16879_v63 = vpop.f32.mrf.mxu0  ;;  %v13295_v57 = vpop.f32.mrf.mxu1 }
 0x518   : > { %17412 = vst [vmem:[#allocation51_spill] sm:$0xff] %v16879_v63  ;;  %v13296_v10 = vadd.f32 %v13295_v57, %v13294_v51 }
 0x519   : > { %v16881_v58 = vpop.f32.mrf.mxu0  ;;  %v13297_v0 = vpop.f32.mrf.mxu1 }
 0x51a   : > { %v16884_v30 = vadd.f32 %v13296_v10, %v16624_v47 }
 0x51b   : > { %v16886_v14 = vpop.f32.mrf.mxu0  ;;  %v13298_v37 = vpop.f32.mrf.mxu1 }
 0x51c   : > { %17413 = vst [vmem:[#allocation45_spill] sm:$0xff] %v16884_v30  ;;  %17414 = vst [vmem:[#allocation40_spill] sm:$0xff] %v16886_v14  ;;  %v13299_v25 = vadd.f32 %v13298_v37, %v13297_v0 }
 0x51d   : > { %v16888_v15 = vpop.f32.mrf.mxu0 }
 0x51e   : > { %17415 = vst [vmem:[#allocation43_spill] sm:$0xff] %v16888_v15  ;;  %v16891_v41 = vadd.f32 %v13299_v25, %v16650_v49 }
 0x51f   : > { %v13300_v53 = vpop.f32.mrf.mxu1 }
 0x520   : > { %17416 = vst [vmem:[#allocation16_spill] sm:$0xff] %v16891_v41 }
 0x521   : > { %v13301_v7 = vpop.f32.mrf.mxu1  ;;  %v16893_v63 = vpop.f32.mrf.mxu0 }
 0x522   : > { %v13302_v9 = vadd.f32 %v13301_v7, %v13300_v53 }
 0x523   : > { %v13303_v57 = vpop.f32.mrf.mxu1  ;;  %v16898_v30 = vpop.f32.mrf.mxu0 }
 0x524   : > { %v16896_v51 = vadd.f32 %v13302_v9, %v16657_v22 }
 0x525   : > { %v13304_v47 = vpop.f32.mrf.mxu1  ;;  %v16903_v49 = vpop.f32.mrf.mxu0 }
 0x526   : > { %17417 = vst [vmem:[#allocation17_spill] sm:$0xff] %v16896_v51  ;;  %v13305_v10 = vadd.f32 %v13304_v47, %v13303_v57 }
 0x527   : > { %v13306_v14 = vpop.f32.mrf.mxu1  ;;  %v16908_v22 = vpop.f32.mrf.mxu0 }
 0x528   : > { %v16901_v0 = vadd.f32 %v13305_v10, %v16676_v12  ;;  %17420 = vst [vmem:[#allocation14_spill] sm:$0xff] %v16908_v22 }
 0x529   : > { %v13307_v37 = vpop.f32.mrf.mxu1  ;;  %v16913_v12 = vpop.f32.mrf.mxu0 }
 0x52a   : > { %17418 = vst [vmem:[#allocation18_spill] sm:$0xff] %v16901_v0  ;;  %v13308_v15 = vadd.f32 %v13307_v37, %v13306_v14 }
 0x52b   : > { %v13309_v25 = vpop.f32.mrf.mxu1 }
 0x52c   : > { %v16906_v53 = vadd.f32 %v13308_v15, %v16691_v8  ;;  %v16918_v8 = vpop.f32.mrf.mxu0 }
 0x52d   : > { %v13310_v7 = vpop.f32.mrf.mxu1 }
 0x52e   : > { %17419 = vst [vmem:[#allocation19_spill] sm:$0xff] %v16906_v53  ;;  %v13311_v41 = vadd.f32 %v13310_v7, %v13309_v25  ;;  %v17423_v25 = vld [vmem:[#allocation29_spill] sm:$0xff] }
 0x52f   : > { %v13312_v9 = vpop.f32.mrf.mxu1 }
 0x530   : > { %v16911_v57 = vadd.f32 %v13311_v41, %v16704_v18  ;;  %v16923_v18 = vpop.f32.mrf.mxu0 }
 0x531   : > { %v13313_v47 = vpop.f32.mrf.mxu1 }
 0x532   : > { %17421 = vst [vmem:[#allocation15_spill] sm:$0xff] %v16911_v57  ;;  %v13314_v51 = vadd.f32 %v13313_v47, %v13312_v9 }
 0x533   : > { %v13315_v10 = vpop.f32.mrf.mxu1 }
 0x534   : > { %v16916_v14 = vadd.f32 %v13314_v51, %v16726_v56  ;;  %v16928_v56 = vpop.f32.mrf.mxu0 }
 0x535   : > { %v13316_v37 = vpop.f32.mrf.mxu1 }
 0x536   : > { %17422 = vst [vmem:[#allocation21_spill] sm:$0xff] %v16916_v14  ;;  %v13317_v0 = vadd.f32 %v13316_v37, %v13315_v10 }
 0x537   : > { %v13318_v15 = vpop.f32.mrf.mxu1 }
 0x538   : > { %v16921_v7 = vadd.f32 %v13317_v0, %v17423_v25  ;;  %v16933_v0 = vpop.f32.mrf.mxu0 }
 0x539   : > { %v13319_v53 = vpop.f32.mrf.mxu1 }
 0x53a   : > { %17424 = vst [vmem:[#allocation20_spill] sm:$0xff] %v16921_v7  ;;  %v13320_v22 = vadd.f32 %v13319_v53, %v13318_v15 }
 0x53b   : > { %v13321_v41 = vpop.f32.mrf.mxu1 }
 0x53c   : > { %v16926_v9 = vadd.f32 %v13320_v22, %v16741_v39  ;;  %v16938_v39 = vpop.f32.mrf.mxu0 }
 0x53d   : > { %v13322_v47 = vpop.f32.mrf.mxu1 }
 0x53e   : > { %v13323_v57 = vadd.f32 %v13322_v47, %v13321_v41 }
 0x53f   : > { %v13324_v51 = vpop.f32.mrf.mxu1 }
 0x540   : > { %v16931_v10 = vadd.f32 %v13323_v57, %v16746_v16  ;;  %v16943_v16 = vpop.f32.mrf.mxu0 }
 0x541   : > { %v13325_v37 = vpop.f32.mrf.mxu1 }
 0x542   : > { %v13326_v14 = vadd.f32 %v13325_v37, %v13324_v51  ;;  %v13360_v37 = vadd.f32 %v16783_v11, %v16778_v60  ;;  %v12513_v11 = vld [vmem:[%s14525_s19 + $0x8] sm:$0xff]  }
 0x543   : > { %v13327_v25 = vpop.f32.mrf.mxu1 }
 0x544   : > { %v16936_v53 = vadd.f32 %v13326_v14, %v16753_v24 }
 0x545   : > { %v13328_v15 = vpop.f32.mrf.mxu1 }
 0x546   : > { %17425 = vst [vmem:[#allocation22_spill] sm:$0xff] %v16936_v53  ;;  %v13329_v7 = vadd.f32 %v13328_v15, %v13327_v25  ;;  %v13354_v25 = vadd.f32 %v16769_v43, %v16764_v6  ;;  %v13363_v15 = vadd.f32 %v16790_v20, %v16785_v5  ;;  %v13357_v6 = vadd.f32 %v16776_v21, %v16771_v13 }
 0x547   : > { %v13372_v13 = vadd.f32 %v16811_v52, %v16809_v31 }
 0x548   : > { %v16941_v22 = vadd.f32 %v13329_v7, %v16755_v28  ;;  %v16952_v28 = vpop.f32.mrf.mxu0  ;;  %v11202_v5 = vadd.f32 %v13354_v25, %v16760_v23 }
 0x54a   : > { %17426 = vst [vmem:[#allocation26_spill] sm:$0xff] %v16941_v22  ;;  %v13330_v41 = vpop.f32.mrf.mxu1  ;;  %v16968_v43 = vpop.f32.mrf.mxu0 }
 0x54c   : > { %v13331_v47 = vpop.f32.mrf.mxu1 }
 0x54d   : > { %v13332_v57 = vadd.f32 %v13331_v47, %v13330_v41  ;;  %v11210_v47 = vadd.f32 %v13360_v37, %v16774_v3  ;;  %v16975_v3 = vld [vmem:[%s17253_s6] ss:$0 sm:$0xff]  ;;  %v12455_v37 = vunpack.c.l.bf16 %v12513_v11 }
 0x54e   : > { %v13333_v51 = vpop.f32.mrf.mxu1 }
 0x54f   : > { %v16948_v24 = vadd.f32 %v13332_v57, %v16757_v50  ;;  %v16963_v50 = vld [vmem:[%s17252_s5] ss:$0 sm:$0xff] }
 0x550   : > { %v13334_v14 = vpop.f32.mrf.mxu1 }
 0x551   : > { %v13335_v7 = vadd.f32 %v13334_v14, %v13333_v51 }
 0x553   : > { %v16957_v41 = vadd.f32 %v13335_v7, %v16762_v36  ;;  %v12450_v36 = vld [vmem:[%s14525_s19] sm:$0xff]   ;;  %v11213_v7 = vadd.f32 %v13363_v15, %v16781_v54  ;;  %v12456_v54 = vunpack.c.h.bf16 %v12513_v11  ;;  %v12515_v11 = vld [vmem:[%s14525_s19 + $0x18] sm:$0xff]  }
 0x554   : > { %v13538_v60 = vpop.f32.mrf.mxu1  ;;  %v12451_v21 = vunpack.c.l.bf16 %v12450_v36  ;;  %v12452_v53 = vunpack.c.h.bf16 %v12450_v36 }
 0x555   : > { %17427 = vst [vmem:[#allocation24_spill] sm:$0xff] %v16957_v41  ;;  %v11371_v57 = vadd.f32 %v13538_v60, %v11210_v47  ;;  %v16981_v60 = vpop.f32.mrf.mxu0  ;;  %v11205_v41 = vadd.f32 %v13357_v6, %v16767_v1 }
 0x556   : > { %v11362_v20 = vpop.f32.mrf.mxu1 }
 0x557   : > { %v11498_v51 = vmul.f32 %v16963_v50, %v11371_v57  ;;  %v11363_v14 = vadd.f32 %v11362_v20, %v11202_v5  ;;  %v13366_v57 = vadd.f32 %v16797_v27, %v16795_v55  ;;  %v16994_v1 = vpop.f32.mrf.mxu0 }
 0x558   : > { %v13539_v47 = vpop.f32.mrf.mxu1 }
 0x559   : > { %v11537_v23 = vadd.f32 %v16975_v3, %v11498_v51  ;;  %v11496_v25 = vmul.f32 %v16963_v50, %v11363_v14  ;;  %v11374_v22 = vadd.f32 %v13539_v47, %v11213_v7  ;;  %v13375_v51 = vadd.f32 %v16818_v38, %v16816_v45 }
 0x55a   : > { %v11365_v15 = vpop.f32.mrf.mxu1  ;;  %v11226_v14 = vadd.f32 %v13372_v13, %v16800_v4  ;;  %v12514_v13 = vld [vmem:[%s14525_s19 + $0x10] sm:$0xff]  }
 0x55b   : > { %v11633_v5 = vadd.f32 %v12455_v37, %v11537_v23  ;;  %v11535_v31 = vadd.f32 %v16975_v3, %v11496_v25  ;;  %v11499_v52 = vmul.f32 %v16963_v50, %v11374_v22  ;;  %v11366_v20 = vadd.f32 %v11365_v15, %v11205_v41 }
 0x55c   : > { %v13369_v22 = vadd.f32 %v16804_v42, %v16802_v35  ;;  %v11218_v37 = vadd.f32 %v13366_v57, %v16788_v29  ;;  %v11229_v23 = vadd.f32 %v13375_v51, %v16807_v33  ;;  %v17008_v35 = vpop.f32.mrf.mxu0  ;;  %v12459_v15 = vunpack.c.l.bf16 %v12514_v13 }
 0x55d   : > { %v11665_v6 = vmax.f32 %v11633_v5, 0.0  ;;  %v11631_v7 = vadd.f32 %v12451_v21, %v11535_v31  ;;  %v11538_v55 = vadd.f32 %v16975_v3, %v11499_v52  ;;  %v11497_v27 = vmul.f32 %v16963_v50, %v11366_v20  ;;  %v13542_v41 = vpop.f32.mrf.mxu1 }
 0x55e   : > { %v11387_v36 = vadd.f32 %v13542_v41, %v11226_v14  ;;  %v12463_v21 = vunpack.c.l.bf16 %v12515_v11  ;;  %v11221_v31 = vadd.f32 %v13369_v22, %v16793_v26  ;;  %v12464_v14 = vunpack.c.h.bf16 %v12515_v11 }
 0x55f   : > { %11697 = vst [vmem:[%s17002_s30 + $0x10] sm:$0xff] %v11665_v6  ;;  %v11663_v4 = vmax.f32 %v11631_v7, 0.0  ;;  %v11634_v45 = vadd.f32 %v12456_v54, %v11538_v55  ;;  %v11536_v38 = vadd.f32 %v16975_v3, %v11497_v27  ;;  %v11378_v47 = vpop.f32.mrf.mxu1  ;;  %v13384_v54 = vadd.f32 %v16839_v44, %v16837_v62  ;;  %v17020_v7 = vpop.f32.mrf.mxu0 }
 0x560   : > { %v11502_v25 = vmul.f32 %v16963_v50, %v11387_v36  ;;  %v11379_v57 = vadd.f32 %v11378_v47, %v11218_v37  ;;  %v13387_v27 = vadd.f32 %v16846_v61, %v16844_v46  ;;  %v12460_v22 = vunpack.c.h.bf16 %v12514_v13 }
 0x561   : > { %11695 = vst [vmem:[%s17002_s30] sm:$0xff] %v11663_v4  ;;  %v11666_v29 = vmax.f32 %v11634_v45, 0.0  ;;  %v11632_v42 = vadd.f32 %v12452_v53, %v11536_v38  ;;  %v13543_v5 = vpop.f32.mrf.mxu1  ;;  %v13378_v53 = vadd.f32 %v16825_v48, %v16823_v17  ;;  %v11242_v17 = vadd.f32 %v13384_v54, %v16828_v40  ;;  %v12517_v4 = vld [vmem:[%s14525_s19 + $0x28] sm:$0xff]   ;;  %v17428_v45 = vld [vmem:[#allocation33_spill] sm:$0xff] }
 0x562   : > { %v11541_v33 = vadd.f32 %v16975_v3, %v11502_v25  ;;  %v11500_v20 = vmul.f32 %v16963_v50, %v11379_v57  ;;  %v11390_v51 = vadd.f32 %v13543_v5, %v11229_v23  ;;  %v13381_v38 = vadd.f32 %v17428_v45, %v16830_v19  ;;  %v17034_v23 = vpop.f32.mrf.mxu0  ;;  %v17430_v57 = vld [vmem:[#allocation39_spill] sm:$0xff] }
 0x563   : > { %11698 = vst [vmem:[%s17002_s30 + $0x18] sm:$0xff] %v11666_v29  ;;  %v11664_v52 = vmax.f32 %v11632_v42, 0.0  ;;  %v11381_v6 = vpop.f32.mrf.mxu1  ;;  %v12516_v29 = vld [vmem:[%s14525_s19 + $0x20] sm:$0xff]   ;;  %v12471_v42 = vunpack.c.l.bf16 %v12517_v4  ;;  %v11245_v54 = vadd.f32 %v13387_v27, %v17430_v57  ;;  %v17437_v57 = vld [vmem:[#allocation41_spill] sm:$0xff] }
 0x564   : > { %v11637_v62 = vadd.f32 %v12463_v21, %v11541_v33  ;;  %v11539_v26 = vadd.f32 %v16975_v3, %v11500_v20  ;;  %v11503_v44 = vmul.f32 %v16963_v50, %v11390_v51  ;;  %v11382_v55 = vadd.f32 %v11381_v6, %v11221_v31  ;;  %v17429_v21 = vld [vmem:[#allocation30_spill] sm:$0xff]  ;;  %v17431_v51 = vld [vmem:[#allocation32_spill] sm:$0xff] }
 0x565   : > { %11696 = vst [vmem:[%s17002_s30 + $0x8] sm:$0xff] %v11664_v52  ;;  %v11234_v47 = vadd.f32 %v13378_v53, %v17429_v21  ;;  %v13396_v52 = vadd.f32 %v16867_v2, %v16865_v32  ;;  %v12467_v33 = vunpack.c.l.bf16 %v12516_v29  ;;  %v11237_v53 = vadd.f32 %v13381_v38, %v17431_v51  ;;  %v17434_v38 = vld [vmem:[#allocation46_spill] sm:$0xff] }
 0x566   : > { %v11669_v48 = vmax.f32 %v11637_v62, 0.0  ;;  %v11635_v11 = vadd.f32 %v12459_v15, %v11539_v26  ;;  %v11542_v41 = vadd.f32 %v16975_v3, %v11503_v44  ;;  %v11501_v37 = vmul.f32 %v16963_v50, %v11382_v55  ;;  %v17432_v55 = vld [vmem:[#allocation44_spill] sm:$0xff] }
 0x567   : > { %v13390_v27 = vadd.f32 %v17432_v55, %v16851_v59  ;;  %v12468_v45 = vunpack.c.h.bf16 %v12516_v29 }
 0x568   : > { %v13546_v36 = vpop.f32.mrf.mxu1  ;;  %11701 = vst [vmem:[%s17002_s30 + $0x30] sm:$0xff] %v11669_v48  ;;  %v11667_v46 = vmax.f32 %v11635_v11, 0.0  ;;  %v11638_v61 = vadd.f32 %v12464_v14, %v11542_v41  ;;  %v11540_v40 = vadd.f32 %v16975_v3, %v11501_v37  ;;  %v17045_v14 = vpop.f32.mrf.mxu0  ;;  %v17433_v41 = vld [vmem:[#allocation49_spill] sm:$0xff] }
 0x569   : > { %v11403_v13 = vadd.f32 %v13546_v36, %v11242_v17  ;;  %v13399_v37 = vadd.f32 %v17433_v41, %v16872_v34  ;;  %v11258_v36 = vadd.f32 %v13396_v52, %v17434_v38  ;;  %v11250_v34 = vadd.f32 %v13390_v27, %v17437_v57  ;;  %v17445_v57 = vld [vmem:[#allocation38_spill] sm:$0xff] }
 0x56a   : > { %v11394_v25 = vpop.f32.mrf.mxu1  ;;  %11699 = vst [vmem:[%s17002_s30 + $0x20] sm:$0xff] %v11667_v46  ;;  %v11670_v15 = vmax.f32 %v11638_v61, 0.0  ;;  %v11636_v19 = vadd.f32 %v12460_v22, %v11540_v40  ;;  %v12472_v22 = vunpack.c.h.bf16 %v12517_v4  ;;  %v17058_v21 = vpop.f32.mrf.mxu0  ;;  %v12519_v61 = vld [vmem:[%s14525_s19 + $0x38] sm:$0xff]   ;;  %v17435_v40 = vld [vmem:[#allocation36_spill] sm:$0xff]  ;;  %v13408_v27 = vadd.f32 %v16898_v30, %v16893_v63 }
 0x56b   : > { %v11506_v5 = vmul.f32 %v16963_v50, %v11403_v13  ;;  %v11395_v31 = vadd.f32 %v11394_v25, %v11234_v47  ;;  %v17436_v13 = vld [vmem:[#allocation47_spill] sm:$0xff] }
 0x56c   : > { %v13547_v20 = vpop.f32.mrf.mxu1  ;;  %11702 = vst [vmem:[%s17002_s30 + $0x38] sm:$0xff] %v11670_v15  ;;  %v11668_v6 = vmax.f32 %v11636_v19, 0.0  ;;  %v17070_v51 = vpop.f32.mrf.mxu0 }
 0x56d   : > { %v11545_v62 = vadd.f32 %v16975_v3, %v11506_v5  ;;  %v11504_v26 = vmul.f32 %v16963_v50, %v11395_v31  ;;  %v11406_v44 = vadd.f32 %v13547_v20, %v11245_v54  ;;  %v12518_v5 = vld [vmem:[%s14525_s19 + $0x30] sm:$0xff]   ;;  %v12479_v31 = vunpack.c.l.bf16 %v12519_v61 }
 0x56e   : > { %v11397_v17 = vpop.f32.mrf.mxu1  ;;  %11700 = vst [vmem:[%s17002_s30 + $0x28] sm:$0xff] %v11668_v6 }
 0x56f   : > { %v11641_v32 = vadd.f32 %v12471_v42, %v11545_v62  ;;  %v11543_v2 = vadd.f32 %v16975_v3, %v11504_v26  ;;  %v11507_v48 = vmul.f32 %v16963_v50, %v11406_v44  ;;  %v11398_v11 = vadd.f32 %v11397_v17, %v11237_v53  ;;  %v17439_v44 = vld [vmem:[#allocation51_spill] sm:$0xff] }
 0x570   : > { %v13393_v42 = vadd.f32 %v17436_v13, %v17435_v40  ;;  %v13402_v55 = vadd.f32 %v16881_v58, %v17439_v44  ;;  %v17084_v58 = vpop.f32.mrf.mxu0  ;;  %v17443_v40 = vld [vmem:[#allocation43_spill] sm:$0xff] }
 0x571   : > { %v11673_v59 = vmax.f32 %v11641_v32, 0.0  ;;  %v11639_v4 = vadd.f32 %v12467_v33, %v11543_v2  ;;  %v11546_v47 = vadd.f32 %v16975_v3, %v11507_v48  ;;  %v11505_v46 = vmul.f32 %v16963_v50, %v11398_v11  ;;  %v13550_v25 = vpop.f32.mrf.mxu1  ;;  %v17438_v33 = vld [vmem:[#allocation48_spill] sm:$0xff]  ;;  %v17440_v32 = vld [vmem:[#allocation42_spill] sm:$0xff] }
 0x572   : > { %v11419_v19 = vadd.f32 %v13550_v25, %v11258_v36  ;;  %v11261_v20 = vadd.f32 %v13399_v37, %v17438_v33  ;;  %v11253_v2 = vadd.f32 %v13393_v42, %v17440_v32  ;;  %v12480_v36 = vunpack.c.h.bf16 %v12519_v61  ;;  %v17444_v25 = vld [vmem:[#allocation45_spill] sm:$0xff] }
 0x573   : > { %11705 = vst [vmem:[%s17002_s30 + $0x50] sm:$0xff] %v11673_v59  ;;  %v11671_v29 = vmax.f32 %v11639_v4, 0.0  ;;  %v11642_v54 = vadd.f32 %v12472_v22, %v11546_v47  ;;  %v11544_v15 = vadd.f32 %v16975_v3, %v11505_v46  ;;  %v11410_v52 = vpop.f32.mrf.mxu1  ;;  %v12475_v22 = vunpack.c.l.bf16 %v12518_v5  ;;  %v17442_v46 = vld [vmem:[#allocation40_spill] sm:$0xff] }
 0x574   : > { %v11510_v62 = vmul.f32 %v16963_v50, %v11419_v19  ;;  %v11411_v26 = vadd.f32 %v11410_v52, %v11250_v34  ;;  %v13405_v13 = vadd.f32 %v17443_v40, %v17442_v46  ;;  %v12476_v42 = vunpack.c.h.bf16 %v12518_v5  ;;  %v12520_v52 = vld [vmem:[%s14525_s19 + $0x40] sm:$0xff]  }
 0x575   : > { %11703 = vst [vmem:[%s17002_s30 + $0x40] sm:$0xff] %v11671_v29  ;;  %v11674_v53 = vmax.f32 %v11642_v54, 0.0  ;;  %v11640_v6 = vadd.f32 %v12468_v45, %v11544_v15  ;;  %v13551_v17 = vpop.f32.mrf.mxu1  ;;  %v17441_v45 = vld [vmem:[#allocation14_spill] sm:$0xff]  ;;  %v11266_v34 = vadd.f32 %v13402_v55, %v17445_v57 }
 0x576   : > { %v11549_v11 = vadd.f32 %v16975_v3, %v11510_v62  ;;  %v11508_v41 = vmul.f32 %v16963_v50, %v11411_v26  ;;  %v11422_v37 = vadd.f32 %v13551_v17, %v11261_v20  ;;  %v13411_v38 = vadd.f32 %v17441_v45, %v16903_v49  ;;  %v17098_v62 = vpop.f32.mrf.mxu0 }
 0x577   : > { %11706 = vst [vmem:[%s17002_s30 + $0x58] sm:$0xff] %v11674_v53  ;;  %v11672_v48 = vmax.f32 %v11640_v6, 0.0  ;;  %v11413_v59 = vpop.f32.mrf.mxu1  ;;  %v11274_v49 = vadd.f32 %v13408_v27, %v17444_v25  ;;  %v17446_v53 = vld [vmem:[#allocation16_spill] sm:$0xff]  ;;  %v12483_v17 = vunpack.c.l.bf16 %v12520_v52 }
 0x578   : > { %v11645_v63 = vadd.f32 %v12479_v31, %v11549_v11  ;;  %v11547_v30 = vadd.f32 %v16975_v3, %v11508_v41  ;;  %v11511_v4 = vmul.f32 %v16963_v50, %v11422_v37  ;;  %v11414_v47 = vadd.f32 %v11413_v59, %v11253_v2  ;;  %v12521_v31 = vld [vmem:[%s14525_s19 + $0x48] sm:$0xff]   ;;  %v17447_v2 = vld [vmem:[#allocation50_spill] sm:$0xff] }
 0x579   : > { %11704 = vst [vmem:[%s17002_s30 + $0x48] sm:$0xff] %v11672_v48  ;;  %v11277_v6 = vadd.f32 %v13411_v38, %v17446_v53  ;;  %v11269_v48 = vadd.f32 %v13405_v13, %v17447_v2  ;;  %v13420_v38 = vadd.f32 %v16938_v39, %v16933_v0  ;;  %v12488_v59 = vunpack.c.h.bf16 %v12521_v31 }
 0x57a   : > { %v13554_v61 = vpop.f32.mrf.mxu1  ;;  %v11677_v29 = vmax.f32 %v11645_v63, 0.0  ;;  %v11643_v54 = vadd.f32 %v12475_v22, %v11547_v30  ;;  %v11550_v15 = vadd.f32 %v16975_v3, %v11511_v4  ;;  %v11509_v19 = vmul.f32 %v16963_v50, %v11414_v47  ;;  %v17109_v30 = vpop.f32.mrf.mxu0 }
 0x57b   : > { %v11435_v33 = vadd.f32 %v13554_v61, %v11274_v49  ;;  %v12487_v22 = vunpack.c.l.bf16 %v12521_v31  ;;  %v13414_v13 = vadd.f32 %v16918_v8, %v16913_v12  ;;  %v12484_v49 = vunpack.c.h.bf16 %v12520_v52  ;;  %v12523_v31 = vld [vmem:[%s14525_s19 + $0x58] sm:$0xff]  }
 0x57c   : > { %v11426_v20 = vpop.f32.mrf.mxu1  ;;  %11709 = vst [vmem:[%s17002_s30 + $0x70] sm:$0xff] %v11677_v29  ;;  %v11675_v5 = vmax.f32 %v11643_v54, 0.0  ;;  %v11646_v26 = vadd.f32 %v12480_v36, %v11550_v15  ;;  %v11548_v44 = vadd.f32 %v16975_v3, %v11509_v19  ;;  %v13423_v61 = vadd.f32 %v16952_v28, %v16943_v16  ;;  %v17122_v54 = vpop.f32.mrf.mxu0  ;;  %v12522_v16 = vld [vmem:[%s14525_s19 + $0x50] sm:$0xff]  }
 0x57d   : > { %v11427_v55 = vadd.f32 %v11426_v20, %v11266_v34  ;;  %v11514_v27 = vmul.f32 %v16963_v50, %v11435_v33  ;;  %v17448_v34 = vld [vmem:[#allocation19_spill] sm:$0xff]  ;;  %v13417_v33 = vadd.f32 %v16928_v56, %v16923_v18  ;;  %v17449_v20 = vld [vmem:[#allocation17_spill] sm:$0xff] }
 0x57e   : > { %v13555_v32 = vpop.f32.mrf.mxu1  ;;  %11707 = vst [vmem:[%s17002_s30 + $0x60] sm:$0xff] %v11675_v5  ;;  %v11678_v11 = vmax.f32 %v11646_v26, 0.0  ;;  %v11644_v41 = vadd.f32 %v12476_v42, %v11548_v44  ;;  %v11290_v29 = vadd.f32 %v13420_v38, %v17448_v34  ;;  %v11282_v53 = vadd.f32 %v13414_v13, %v17449_v20  ;;  %v13443_v18 = vpop.f32.mrf.mxu0  ;;  %v17452_v34 = vld [vmem:[#allocation21_spill] sm:$0xff] }
 0x57f   : > { %v11512_v37 = vmul.f32 %v16963_v50, %v11427_v55  ;;  %v11438_v45 = vadd.f32 %v13555_v32, %v11277_v6  ;;  %v11553_v36 = vadd.f32 %v16975_v3, %v11514_v27  ;;  %v12495_v44 = vunpack.c.l.bf16 %v12523_v31  ;;  %v17450_v27 = vld [vmem:[#allocation15_spill] sm:$0xff] }
 0x580   : > { %v11429_v63 = vpop.f32.mrf.mxu1  ;;  %11710 = vst [vmem:[%s17002_s30 + $0x78] sm:$0xff] %v11678_v11  ;;  %v11676_v4 = vmax.f32 %v11644_v41, 0.0  ;;  %v12491_v32 = vunpack.c.l.bf16 %v12522_v16  ;;  %v13426_v38 = vadd.f32 %v16981_v60, %v16968_v43 }
 0x581   : > { %v11551_v47 = vadd.f32 %v16975_v3, %v11512_v37  ;;  %v11515_v46 = vmul.f32 %v16963_v50, %v11438_v45  ;;  %v11430_v40 = vadd.f32 %v11429_v63, %v11269_v48  ;;  %v11649_v42 = vadd.f32 %v12487_v22, %v11553_v36  ;;  %v17451_v37 = vld [vmem:[#allocation18_spill] sm:$0xff] }
 0x582   : > { %11708 = vst [vmem:[%s17002_s30 + $0x68] sm:$0xff] %v11676_v4  ;;  %v11293_v22 = vadd.f32 %v13423_v61, %v17450_v27  ;;  %v11285_v45 = vadd.f32 %v13417_v33, %v17451_v37  ;;  %v12496_v36 = vunpack.c.h.bf16 %v12523_v31  ;;  %v13429_v61 = vadd.f32 %v17008_v35, %v16994_v1 }
 0x583   : > { %v11647_v0 = vadd.f32 %v12483_v17, %v11551_v47  ;;  %v11554_v39 = vadd.f32 %v16975_v3, %v11515_v46  ;;  %v11513_v25 = vmul.f32 %v16963_v50, %v11430_v40  ;;  %v11681_v57 = vmax.f32 %v11649_v42, 0.0  ;;  %v13445_v46 = vpop.f32.mrf.mxu0  ;;  %v12525_v42 = vld [vmem:[%s14525_s19 + $0x68] sm:$0xff]  }
 0x584   : > { %v13558_v19 = vpop.f32.mrf.mxu1  ;;  %v13432_v17 = vadd.f32 %v17034_v23, %v17020_v7  ;;  %v13435_v47 = vadd.f32 %v17058_v21, %v17045_v14  ;;  %v12492_v40 = vunpack.c.h.bf16 %v12522_v16  ;;  %v11298_v14 = vadd.f32 %v13426_v38, %v17452_v34 }
 0x585   : > { %v11679_v12 = vmax.f32 %v11647_v0, 0.0  ;;  %v11650_v8 = vadd.f32 %v12488_v59, %v11554_v39  ;;  %v11552_v15 = vadd.f32 %v16975_v3, %v11513_v25  ;;  %11713 = vst [vmem:[%s17002_s30 + $0x90] sm:$0xff] %v11681_v57  ;;  %v11451_v52 = vadd.f32 %v13558_v19, %v11290_v29 }
 0x586   : > { %v11442_v5 = vpop.f32.mrf.mxu1  ;;  %v11306_v13 = vadd.f32 %v13432_v17, %v16926_v9  ;;  %v13438_v1 = vadd.f32 %v17084_v58, %v17070_v51  ;;  %v13444_v35 = vadd.f32 %v13443_v18, %v17122_v54  ;;  %v12504_v27 = vunpack.c.h.bf16 %v12525_v42 }
 0x587   : > { %11711 = vst [vmem:[%s17002_s30 + $0x80] sm:$0xff] %v11679_v12  ;;  %v11682_v28 = vmax.f32 %v11650_v8, 0.0  ;;  %v11648_v6 = vadd.f32 %v12484_v49, %v11552_v15  ;;  %v11518_v26 = vmul.f32 %v16963_v50, %v11451_v52  ;;  %v11443_v55 = vadd.f32 %v11442_v5, %v11282_v53  ;;  %v12524_v49 = vld [vmem:[%s14525_s19 + $0x60] sm:$0xff]   ;;  %v13446_v15 = vpop.f32.mrf.mxu0 }
 0x588   : > { %v13559_v2 = vpop.f32.mrf.mxu1  ;;  %v12503_v12 = vunpack.c.l.bf16 %v12525_v42  ;;  %v12499_v33 = vunpack.c.l.bf16 %v12524_v49  ;;  %v11309_v52 = vadd.f32 %v13435_v47, %v16931_v10  ;;  %v13441_v18 = vadd.f32 %v17109_v30, %v17098_v62 }
 0x589   : > { %11714 = vst [vmem:[%s17002_s30 + $0x98] sm:$0xff] %v11682_v28  ;;  %v11680_v56 = vmax.f32 %v11648_v6, 0.0  ;;  %v11557_v48 = vadd.f32 %v16975_v3, %v11518_v26  ;;  %v11516_v11 = vmul.f32 %v16963_v50, %v11443_v55  ;;  %v11454_v41 = vadd.f32 %v13559_v2, %v11293_v22  ;;  %v17453_v26 = vld [vmem:[#allocation20_spill] sm:$0xff] }
 0x58a   : > { %v11445_v7 = vpop.f32.mrf.mxu1  ;;  %v13447_v55 = vadd.f32 %v13446_v15, %v13445_v46 }
 0x58b   : > { %11712 = vst [vmem:[%s17002_s30 + $0x88] sm:$0xff] %v11680_v56  ;;  %v11653_v23 = vadd.f32 %v12495_v44, %v11557_v48  ;;  %v11555_v59 = vadd.f32 %v16975_v3, %v11516_v11  ;;  %v11519_v63 = vmul.f32 %v16963_v50, %v11454_v41  ;;  %v11446_v4 = vadd.f32 %v11445_v7, %v11285_v45  ;;  %v17454_v48 = vld [vmem:[#allocation22_spill] sm:$0xff]  ;;  %v12526_v7 = vld [vmem:[%s14525_s19 + $0x70] sm:$0xff]  }
 0x58c   : > { %v11301_v44 = vadd.f32 %v13429_v61, %v17453_v26  ;;  %v12500_v56 = vunpack.c.h.bf16 %v12524_v49  ;;  %v11314_v11 = vadd.f32 %v13438_v1, %v17454_v48 }
 0x58d   : > { %v11685_v43 = vmax.f32 %v11653_v23, 0.0  ;;  %v11651_v60 = vadd.f32 %v12491_v32, %v11555_v59  ;;  %v11558_v0 = vadd.f32 %v16975_v3, %v11519_v63  ;;  %v11517_v39 = vmul.f32 %v16963_v50, %v11446_v4  ;;  %v17455_v63 = vld [vmem:[#allocation24_spill] sm:$0xff] }
 0x58e   : > { %v13562_v25 = vpop.f32.mrf.mxu1  ;;  %v11322_v32 = vadd.f32 %v13444_v35, %v16948_v24  ;;  %v11325_v62 = vadd.f32 %v13447_v55, %v17455_v63 }
 0x58f   : > { %v11467_v57 = vadd.f32 %v13562_v25, %v11306_v13  ;;  %11717 = vst [vmem:[%s17002_s30 + $0xb0] sm:$0xff] %v11685_v43  ;;  %v11683_v21 = vmax.f32 %v11651_v60, 0.0  ;;  %v11654_v29 = vadd.f32 %v12496_v36, %v11558_v0  ;;  %v11556_v9 = vadd.f32 %v16975_v3, %v11517_v39  ;;  %v12527_v36 = vld [vmem:[%s14525_s19 + $0x78] sm:$0xff]   ;;  %v17456_v43 = vld [vmem:[#allocation26_spill] sm:$0xff]  ;;  %s12448_s19 = sshll.u32 %s14406_s28, 12  ;;  %s14266_s28 = scalar_lea.vmem %s17202_s9, 4096 }
 0x590   : > { %v11458_v8 = vpop.f32.mrf.mxu1  ;;  %v12507_v13 = vunpack.c.l.bf16 %v12526_v7  ;;  %v11317_v60 = vadd.f32 %v13441_v18, %v17456_v43  ;;  %s17200_s10 = scalar_lea.hbm %s17254_s7, %s12448_s19  ;;  %p14267_p5 = scmp.ne.s32.totalorder %s17202_s9, %s14266_s28 }
 0x591   : > { %v11522_v19 = vmul.f32 %v16963_v50, %v11467_v57  ;;  %v11459_v31 = vadd.f32 %v11458_v8, %v11298_v14  ;;  %11715 = vst [vmem:[%s17002_s30 + $0xa0] sm:$0xff] %v11683_v21  ;;  %v11686_v20 = vmax.f32 %v11654_v29, 0.0  ;;  %v11652_v53 = vadd.f32 %v12492_v40, %v11556_v9  ;;  %p14274_p0 = scmp.lt.s32.totalorder %s14272_s14, %s14266_s28 }
 0x592   : > { %v13563_v16 = vpop.f32.mrf.mxu1  ;;  %v12511_v40 = vunpack.c.l.bf16 %v12527_v36  ;;  %v12512_v57 = vunpack.c.h.bf16 %v12527_v36  ;;  %p14268_p7 = pnand %p14267_p5, %p17457_p2 }
 0x593   : > { %v11561_v28 = vadd.f32 %v16975_v3, %v11522_v19  ;;  %v11520_v6 = vmul.f32 %v16963_v50, %v11459_v31  ;;  %v11470_v5 = vadd.f32 %v13563_v16, %v11309_v52  ;;  %11718 = vst [vmem:[%s17002_s30 + $0xb8] sm:$0xff] %v11686_v20  ;;  %v11684_v10 = vmax.f32 %v11652_v53, 0.0  ;;  %p14275_p10 = por %p14274_p0, %p14273_p13 }
 0x594   : > { %v11461_v51 = vpop.f32.mrf.mxu1  ;;  %v12508_v31 = vunpack.c.h.bf16 %v12526_v7  ;;  %p14269_p12 = pneg %p14268_p7 }
 0x595   : > { %v11657_v58 = vadd.f32 %v12503_v12, %v11561_v28  ;;  %v11559_v54 = vadd.f32 %v16975_v3, %v11520_v6  ;;  %v11523_v22 = vmul.f32 %v16963_v50, %v11470_v5  ;;  %v11462_v17 = vadd.f32 %v11461_v51, %v11301_v44  ;;  %11716 = vst [vmem:[%s17002_s30 + $0xa8] sm:$0xff] %v11684_v10 }
 0x596   : > { %v13566_v2 = vpop.f32.mrf.mxu1  ;;  %p14276_p3 = pnand %p14275_p10, %p14269_p12 }
 0x597   : > { %v11689_v41 = vmax.f32 %v11657_v58, 0.0  ;;  %v11655_v37 = vadd.f32 %v12499_v33, %v11559_v54  ;;  %v11562_v45 = vadd.f32 %v16975_v3, %v11523_v22  ;;  %v11521_v38 = vmul.f32 %v16963_v50, %v11462_v17 }
 0x598   : > { %v11483_v23 = vadd.f32 %v13566_v2, %v11322_v32  ;;  %v11474_v59 = vpop.f32.mrf.mxu1 }
 0x599   : > { %11721 = vst [vmem:[%s17002_s30 + $0xd0] sm:$0xff] %v11689_v41  ;;  %v11687_v30 = vmax.f32 %v11655_v37, 0.0  ;;  %v11658_v4 = vadd.f32 %v12504_v27, %v11562_v45  ;;  %v11560_v24 = vadd.f32 %v16975_v3, %v11521_v38  ;;  %v11475_v47 = vadd.f32 %v11474_v59, %v11314_v11 }
 0x59a   : > { %v11526_v46 = vmul.f32 %v16963_v50, %v11483_v23  ;;  %v13567_v42 = vpop.f32.mrf.mxu1 }
 0x59b   : > { %11719 = vst [vmem:[%s17002_s30 + $0xc0] sm:$0xff] %v11687_v30  ;;  %v11690_v0 = vmax.f32 %v11658_v4, 0.0  ;;  %v11656_v39 = vadd.f32 %v12500_v56, %v11560_v24  ;;  %v11524_v25 = vmul.f32 %v16963_v50, %v11475_v47  ;;  %v11486_v49 = vadd.f32 %v13567_v42, %v11325_v62 }
 0x59c   : > { %v11565_v61 = vadd.f32 %v16975_v3, %v11526_v46  ;;  %v11477_v34 = vpop.f32.mrf.mxu1 }
 0x59d   : > { %11722 = vst [vmem:[%s17002_s30 + $0xd8] sm:$0xff] %v11690_v0  ;;  %v11688_v14 = vmax.f32 %v11656_v39, 0.0  ;;  %v11563_v21 = vadd.f32 %v16975_v3, %v11524_v25  ;;  %v11527_v29 = vmul.f32 %v16963_v50, %v11486_v49  ;;  %v11478_v9 = vadd.f32 %v11477_v34, %v11317_v60 }
 0x59e   : > { %v11661_v12 = vadd.f32 %v12511_v40, %v11565_v61 }
 0x59f   : > { %11720 = vst [vmem:[%s17002_s30 + $0xc8] sm:$0xff] %v11688_v14  ;;  %v11659_v8 = vadd.f32 %v12507_v13, %v11563_v21  ;;  %v11566_v15 = vadd.f32 %v16975_v3, %v11527_v29  ;;  %v11525_v19 = vmul.f32 %v16963_v50, %v11478_v9 }
 0x5a0   : > { %v11693_v33 = vmax.f32 %v11661_v12, 0.0 }
 0x5a1   : > { %v11691_v52 = vmax.f32 %v11659_v8, 0.0  ;;  %v11662_v1 = vadd.f32 %v12512_v57, %v11566_v15  ;;  %v11564_v35 = vadd.f32 %v16975_v3, %v11525_v19 }
 0x5a2   : > { %11725 = vst [vmem:[%s17002_s30 + $0xf0] sm:$0xff] %v11693_v33 }
 0x5a3   : > { %11723 = vst [vmem:[%s17002_s30 + $0xe0] sm:$0xff] %v11691_v52  ;;  %v11694_v20 = vmax.f32 %v11662_v1, 0.0  ;;  %v11660_v53 = vadd.f32 %v12508_v31, %v11564_v35 }
 0x5a5   : > { %11726 = vst [vmem:[%s17002_s30 + $0xf8] sm:$0xff] %v11694_v20  ;;  %v11692_v50 = vmax.f32 %v11660_v53, 0.0 }
 0x5a7   : > { %11724 = vst [vmem:[%s17002_s30 + $0xe8] sm:$0xff] %v11692_v50 }
 0x5a8   : > { %14279 = shalt.err (!%p14276_p3)
}
 0x5a9   : > { %s14280_s16 = scalar_lea.hbm %s17200_s10, 4096  ;;  %s14284_s15 = scalar_lea.hbm %s17254_s7, 8192 }
 0x5aa   : > { %p14281_p11 = scmp.ne.s32.totalorder %s17200_s10, %s14280_s16  ;;  %p14285_p4 = scmp.lt.s32.totalorder %s17200_s10, %s17254_s7 }
 0x5ab   : > { %p14286_p6 = scmp.lt.s32.totalorder %s14284_s15, %s14280_s16 }
 0x5ac   : > { %p14282_p9 = pnand %p14281_p11, %p17457_p2 }
 0x5ad   : > { %p14287_p8 = por %p14286_p6, %p14285_p4 }
 0x5ae   : > { %p14283_p1 = pneg %p14282_p9 }
 0x5b0   : > { %p14288_p5 = pnand %p14287_p8, %p14283_p1 }
 0x5b2   : > { %14291 = shalt.err (!%p14288_p5)
}
 0x5b3   : > { %s14343_s20 = smov 128   ;;  %s14344_s22 = smov 8  }
 0x5b4   : > { %13578 = dma.vmem_to_hbm [thread:$0]  (%p17457_p2), %s17202_s9, 4096, %s17200_s10, %s11728_s29, %s14343_s20, %s14343_s20, %s14344_s22  }
 0x5b5 PF: > { %s11756_s28 = sand.u32 1, %s14322_s24   ;;  %p17458_p7 = scmp.ne.s32.totalorder %s17267_s8, 0 }
 0x5b6   : > { %p17459_p12 = scmp.ge.s32.totalorder %s14334_s27, 2  ;;  %s11757_s21 = scalar_lea.sflag [#allocation6], %s11756_s28 }
 0x5b8   : > { %p13592_p13 = pnand %p17459_p12, %p17458_p7 }
 0x5ba   : > { %p13593_p0 = pneg %p13592_p13 }
 0x5bc   : > { %14317 = dma.done.wait (%p13593_p0), %s11757_s21, 4096  }
 0x5bd   : > { %14319 = vsyncadd (%p13593_p0), %s11757_s21, 4294963200  ;;  %p21_p10 = scmp.ge.s32.totalorder %s14463_s23, 4   ;;  %s17460_s24 = smov %s14326_s25 }
 0x5be   : > { %s17461_s25 = smov %s14330_s26  ;;  %s17462_s26 = smov %s14479_s12 }
 0x5bf   : > { %s17463_s27 = smov %s14463_s23  ;;  %23 = sbr.rel (!%p21_p10) target bundleno = 8 (0x8), region = 104 }
 0x5c4   :  { %11762 = vsyncpa [#allocation5], 1 }
 0x5c5   :  { %11764 = vsyncpa [#allocation5 + $0x1], 1 }
 0x5c6   :  { %11765 = vsyncpa [#allocation8], 1 }
 0x5c7   :  { %11766 = vsyncpa [#allocation6], 1 }
 0x5c8   :  { %11768 = vsyncpa [#allocation6 + $0x1], 1 }

</bundles_post_ra>
